<compile_context>
chip_gen: v5e
topology: v5e:2x2
jax: 0.10.0
libtpu: 0.0.40
codegen_flags: <defaults>
</compile_context>

<pallas_src>
import functools

import jax
import jax.numpy as jnp
from jax.experimental import pallas as pl
from jax.experimental.pallas import tpu as pltpu

NUM_BINS = 128
SIGMA = 0.005          # bandwidth used by hist_region (diff_flag=True path)
EPS_PDF = 1e-10        # epsilon in marginal_pdf normalization
COS_EPS = 1e-8         # eps of F.cosine_similarity

LANE = 128
SUBLANE = 8
PIXELS_PER_STEP = 8192   # TR * TN target: exp intermediate = 8192*128*4B = 4 MB f32
PAD_VAL = 1e3            # sentinel for padded pixels/rows -> exp(-huge) == 0


def _round_up(x, m):
    return ((x + m - 1) // m) * m


def _compute_dtype():
    """bf16 Gaussian-kernel math on v6e/v7x (bf16 EUP/VPU); f32 on v5e & older."""
    try:
        kind = jax.devices()[0].device_kind.lower()
    except Exception:
        return jnp.float32
    if any(tag in kind for tag in ("v2", "v3", "v4", "v5")):
        return jnp.float32
    return jnp.bfloat16


# ----------------------------- Pallas kernel ------------------------------

def _kde_hist_kernel(vals_ref, pdf_ref, acc_ref, seg_ref, *,
                     tr, tn, n_valid, compute_dtype):
    k = pl.program_id(1)

    @pl.when(k == 0)
    def _():
        # Zero the accumulator and build the [TR, TR*TN] segment-sum selector
        # (S[r, p] = 1 iff flattened pixel-row p belongs to region row r).
        # Built once per region tile; reused for every pixel chunk.
        acc_ref[...] = jnp.zeros_like(acc_ref)
        p = tr * tn
        row = jax.lax.broadcasted_iota(jnp.int32, (tr, p), 0)
        col = jax.lax.broadcasted_iota(jnp.int32, (tr, p), 1)
        start = row * tn
        mask = jnp.logical_and(col >= start, col < start + tn)
        seg_ref[...] = jnp.where(mask, 1.0, 0.0).astype(compute_dtype)

    vals = vals_ref[...]                                        # [TR, TN] lane-dense
    # bins = linspace(0, 1, 128), generated in-kernel (no bins input / DMA).
    bins = (jax.lax.broadcasted_iota(jnp.int32, (1, 1, NUM_BINS), 2)
            .astype(jnp.float32) * (1.0 / (NUM_BINS - 1)))       # [1, 1, NB]
    d = vals[:, :, None] - bins                                  # [TR, TN, NB]
    arg = (d * d) * (-0.5 / (SIGMA * SIGMA))                     # folded constants
    kv = jnp.exp(arg.astype(compute_dtype))                      # EUP; bf16 on v6e/v7x
    kv2 = kv.reshape(tr * tn, NUM_BINS)                          # collapse leading dims

    # Pixel-axis reduction on the MXU: acc[r, b] += sum_p S[r, p] * kv[p, b]
    acc_ref[...] += jnp.dot(seg_ref[...], kv2,
                            preferred_element_type=jnp.float32)

    @pl.when(k == pl.num_programs(1) - 1)
    def _():
        pdf = acc_ref[...] * (1.0 / n_valid)       # mean over true pixel count
        norm = jnp.sum(pdf, axis=1, keepdims=True) + EPS_PDF
        pdf_ref[...] = pdf * pl.reciprocal(norm, approx=True)


def kde_histogram(vals):
    """Soft histogram (KDE) of each row of `vals`.

    vals: [R, N] float32 (R regions, N pixels per region)
    returns pdf: [R, NUM_BINS] float32, L1-normalized per row.
    """
    R, N = vals.shape
    compute_dtype = _compute_dtype()

    # pixel chunk: lane-dense multiple of 128, capped at 1024
    tn = min(1024, _round_up(N, LANE))
    # region tile: multiple of 8, sized so tr*tn ~ PIXELS_PER_STEP
    tr_cap = max(SUBLANE, (PIXELS_PER_STEP // tn) // SUBLANE * SUBLANE)
    tr = min(_round_up(R, SUBLANE), tr_cap)
    r_pad = _round_up(R, tr)
    n_pad = _round_up(N, tn)

    # Pad with a far-out-of-range sentinel: padded pixels/rows contribute
    # exp(-huge) == 0 to every bin (so the accumulated sums are exact).
    vals_p = jnp.full((r_pad, n_pad), PAD_VAL, jnp.float32).at[:R, :N].set(vals)

    kernel = functools.partial(_kde_hist_kernel, tr=tr, tn=tn,
                               n_valid=float(N), compute_dtype=compute_dtype)
    pdf = pl.pallas_call(
        kernel,
        out_shape=jax.ShapeDtypeStruct((r_pad, NUM_BINS), jnp.float32),
        grid=(r_pad // tr, n_pad // tn),
        in_specs=[pl.BlockSpec((tr, tn), lambda i, k: (i, k))],
        out_specs=pl.BlockSpec((tr, NUM_BINS), lambda i, k: (i, 0)),
        scratch_shapes=[
            pltpu.VMEM((tr, NUM_BINS), jnp.float32),    # f32 accumulator
            pltpu.VMEM((tr, tr * tn), compute_dtype),   # segment-sum selector
        ],
        compiler_params=pltpu.CompilerParams(
            dimension_semantics=("parallel", "arbitrary"),
            vmem_limit_bytes=32 * 1024 * 1024),
    )(vals_p)
    return pdf[:R]


# ------------------------------- JAX glue ---------------------------------

def gamma_jax(hdrs, EVs):
    # hdrs: [B, C, H, W]; EVs: per-sample exposure values (len B)
    evs = jnp.asarray(EVs, dtype=jnp.float32).reshape(-1, 1, 1, 1)
    hdr = hdrs * (2.0 ** evs)
    bpp = 12
    hdr_clip = jnp.clip(hdr, 1e-12, 2.0 ** bpp - 1)
    hdr_norm = hdr_clip / (2.0 ** bpp - 1)
    ldr = hdr_norm ** (1.0 / 2.2)
    return jnp.clip(ldr, 0.0, 1.0)


def rgb2gray(img):
    # img: [B, 3, H, W] -> [B, 1, H, W]
    g = 0.299 * img[:, 0] + 0.587 * img[:, 1] + 0.114 * img[:, 2]
    return g[:, None]


def region_values(gray2d, block, include_sky=False):
    """gray2d: [B, H, W] -> [B, Nreg, Npix] flattened block regions.

    Mirrors hist_region: hs = H // block, ws = W // block, and the top row of
    blocks (i == 0) is skipped when block > 1 and include_sky is False.
    """
    B, H, W = gray2d.shape
    hs, ws = H // block, W // block
    regs = []
    for i in range(block):
        if (not include_sky) and block > 1 and i == 0:
            continue
        for j in range(block):
            x = gray2d[:, i * hs:(i + 1) * hs, j * ws:(j + 1) * ws]
            regs.append(x.reshape(B, 1, hs * ws))
    return jnp.concatenate(regs, axis=1)


def cosine_to_uniform(pdf):
    # F.cosine_similarity(p, p_equal) with p_equal = ones(1,128)/128,
    # clamping each norm separately (matches x / max(||x||, eps)).
    u = jnp.full((NUM_BINS,), 1.0 / NUM_BINS, jnp.float32)
    num = pdf @ u
    n1 = jnp.maximum(jnp.sqrt(jnp.sum(pdf * pdf, axis=1)), COS_EPS)
    n2 = jnp.maximum(jnp.sqrt(jnp.sum(u * u)), COS_EPS)
    return num / (n1 * n2)


def hist_loss_forward(hdr, param, block_size=(1, 5), weights=(0.2, 0.8)):
    """Equivalent of hist_loss().forward(hdr, param, block_size, weights)."""
    B, C, H, W = hdr.shape
    ldrs = gamma_jax(hdr, param)               # [B, C, H, W]
    if C == 3:
        gray = rgb2gray(ldrs)                  # [B, 1, H, W]
    else:
        gray = ldrs
    gray2d = gray[:, 0]                        # ldr_loss/hist_region use channel 0

    per_sample = jnp.zeros((B,), jnp.float32)
    for w, block in zip(weights, block_size):
        regs = region_values(gray2d, block)    # [B, Nreg, Npix]
        _, nreg, npix = regs.shape
        pdf = kde_histogram(regs.reshape(B * nreg, npix))   # Pallas kernel
        cos = cosine_to_uniform(pdf)           # [B * Nreg]
        score = jnp.mean(cos.reshape(B, nreg), axis=1)      # sim_to_ref_hist
        per_sample = per_sample + w * score
    per_sample = per_sample / float(sum(weights))
    return jnp.mean(per_sample)


# --------------------------------- main ------------------------------------

if __name__ == "__main__":
    key = jax.random.PRNGKey(0)
    B, C, H, W = 2, 3, 20, 20                  # H, W divisible by block size 5
    hdr = jax.random.uniform(key, (B, C, H, W), jnp.float32, 0.0, 4096.0)
    param = [1, 2]                             # per-sample exposure values

    loss = hist_loss_forward(hdr, param, block_size=(1, 5), weights=(0.2, 0.8))
    loss = jax.block_until_ready(loss)
    assert loss.shape == () and jnp.isfinite(loss)
    print("KERNEL_OK")
</pallas_src>

<mosaic_0001>
module attributes {stable_mosaic.version = 11 : i64} {
  func.func @_kde_hist_kernel(%arg0: i32, %arg1: i32, %arg2: memref<8x512xf32, #tpu.memory_space<vmem>>, %arg3: memref<8x128xf32, #tpu.memory_space<vmem>>, %arg4: memref<8x128xf32, #tpu.memory_space<vmem>>, %arg5: memref<8x4096xbf16, #tpu.memory_space<vmem>>) attributes {dimension_semantics = [#tpu.dimension_semantics<parallel>, #tpu.dimension_semantics<arbitrary>], iteration_bounds = array<i64: 1, 1>, scalar_prefetch = 0 : i64, scratch_operands = 2 : i64, tpu.core_type = #tpu.core_type<tc>, window_params = [{transform_indices = @transform_0, window_bounds = array<i64: 8, 512>}, {transform_indices = @transform_1, window_bounds = array<i64: 8, 128>}]} {
    %c0_i32 = arith.constant 0 : i32
    %0 = arith.cmpi eq, %arg1, %c0_i32 : i32
    %1 = arith.extui %0 : i1 to i32
    %c0_i32_0 = arith.constant 0 : i32
    %2 = arith.cmpi ne, %1, %c0_i32_0 : i32
    scf.if %2 {
      %cst_12 = arith.constant 0.000000e+00 : f32
      %26 = vector.broadcast %cst_12 : f32 to vector<8x128xf32>
      %c0_13 = arith.constant 0 : index
      %c0_14 = arith.constant 0 : index
      %27 = vector.load %arg4[%c0_13, %c0_14] : memref<8x128xf32, #tpu.memory_space<vmem>>, vector<8x128xf32>
      tpu.vector_store %arg4[%c0_13, %c0_14], %26 {strides = array<i32>} : memref<8x128xf32, #tpu.memory_space<vmem>>, vector<8x128xf32>,
      %28 = tpu.iota {dimensions = array<i32: 0>} : vector<8x4096xi32>
      %29 = tpu.iota {dimensions = array<i32: 1>} : vector<8x4096xi32>
      %c512_i32 = arith.constant 512 : i32
      %30 = vector.broadcast %c512_i32 : i32 to vector<8x4096xi32>
      %31 = arith.muli %28, %30 : vector<8x4096xi32>
      %32 = arith.cmpi sge, %29, %31 : vector<8x4096xi32>
      %c512_i32_15 = arith.constant 512 : i32
      %33 = vector.broadcast %c512_i32_15 : i32 to vector<8x4096xi32>
      %34 = arith.addi %31, %33 : vector<8x4096xi32>
      %35 = arith.cmpi slt, %29, %34 : vector<8x4096xi32>
      %36 = arith.andi %32, %35 : vector<8x4096xi1>
      %cst_16 = arith.constant 1.000000e+00 : f32
      %cst_17 = arith.constant 0.000000e+00 : f32
      %37 = vector.broadcast %cst_16 : f32 to vector<8x4096xf32>
      %38 = vector.broadcast %cst_17 : f32 to vector<8x4096xf32>
      %39 = arith.select %36, %37, %38 : vector<8x4096xi1>, vector<8x4096xf32>
      %40 = arith.truncf %39 : vector<8x4096xf32> to vector<8x4096xbf16>
      %c0_18 = arith.constant 0 : index
      %c0_19 = arith.constant 0 : index
      %41 = vector.load %arg5[%c0_18, %c0_19] : memref<8x4096xbf16, #tpu.memory_space<vmem>>, vector<8x4096xbf16>
      tpu.vector_store %arg5[%c0_18, %c0_19], %40 {strides = array<i32>} : memref<8x4096xbf16, #tpu.memory_space<vmem>>, vector<8x4096xbf16>,
    } else {
    }
    %c0 = arith.constant 0 : index
    %c0_1 = arith.constant 0 : index
    %3 = vector.load %arg2[%c0, %c0_1] : memref<8x512xf32, #tpu.memory_space<vmem>>, vector<8x512xf32>
    %4 = tpu.iota {dimensions = array<i32: 2>} : vector<1x1x128xi32>
    %5 = arith.sitofp %4 : vector<1x1x128xi32> to vector<1x1x128xf32>
    %cst = arith.constant 0.00787401571 : f32
    %6 = vector.broadcast %cst : f32 to vector<1x1x128xf32>
    %7 = arith.mulf %5, %6 : vector<1x1x128xf32>
    %8 = vector.shape_cast %3 : vector<8x512xf32> to vector<8x512x1xf32>
    %9 = vector.broadcast %8 : vector<8x512x1xf32> to vector<8x512x128xf32>
    %10 = vector.broadcast %7 : vector<1x1x128xf32> to vector<8x512x128xf32>
    %11 = arith.subf %9, %10 : vector<8x512x128xf32>
    %12 = arith.mulf %11, %11 : vector<8x512x128xf32>
    %cst_2 = arith.constant -2.000000e+04 : f32
    %13 = vector.broadcast %cst_2 : f32 to vector<8x512x128xf32>
    %14 = arith.mulf %12, %13 : vector<8x512x128xf32>
    %15 = arith.truncf %14 : vector<8x512x128xf32> to vector<8x512x128xbf16>
    %16 = math.exp %15 : vector<8x512x128xbf16>
    %17 = vector.shape_cast %16 : vector<8x512x128xbf16> to vector<4096x128xbf16>
    %c0_3 = arith.constant 0 : index
    %c0_4 = arith.constant 0 : index
    %18 = vector.load %arg4[%c0_3, %c0_4] : memref<8x128xf32, #tpu.memory_space<vmem>>, vector<8x128xf32>
    %c0_5 = arith.constant 0 : index
    %c0_6 = arith.constant 0 : index
    %19 = vector.load %arg5[%c0_5, %c0_6] : memref<8x4096xbf16, #tpu.memory_space<vmem>>, vector<8x4096xbf16>
    %cst_7 = arith.constant dense<0.000000e+00> : vector<8x128xf32>
    %20 = tpu.matmul %19, %17, %cst_7 {dimension_numbers = #tpu.dot_dimension_numbers<[1], [0], [0], [1], [0, 0, 1, 1], [], []>} : vector<8x4096xbf16>, vector<4096x128xbf16>, vector<8x128xf32> -> vector<8x128xf32>
    %21 = arith.addf %18, %20 : vector<8x128xf32>
    %c0_8 = arith.constant 0 : index
    %c0_9 = arith.constant 0 : index
    %22 = vector.load %arg4[%c0_8, %c0_9] : memref<8x128xf32, #tpu.memory_space<vmem>>, vector<8x128xf32>
    tpu.vector_store %arg4[%c0_8, %c0_9], %21 {strides = array<i32>} : memref<8x128xf32, #tpu.memory_space<vmem>>, vector<8x128xf32>,
    %c0_i32_10 = arith.constant 0 : i32
    %23 = arith.cmpi eq, %arg1, %c0_i32_10 : i32
    %24 = arith.extui %23 : i1 to i32
    %c0_i32_11 = arith.constant 0 : i32
    %25 = arith.cmpi ne, %24, %c0_i32_11 : i32
    scf.if %25 {
      %c0_12 = arith.constant 0 : index
      %c0_13 = arith.constant 0 : index
      %26 = vector.load %arg4[%c0_12, %c0_13] : memref<8x128xf32, #tpu.memory_space<vmem>>, vector<8x128xf32>
      %cst_14 = arith.constant 2.500000e-03 : f32
      %27 = vector.broadcast %cst_14 : f32 to vector<8x128xf32>
      %28 = arith.mulf %26, %27 : vector<8x128xf32>
      %cst_15 = arith.constant dense<0.000000e+00> : vector<8xf32>
      %29 = vector.multi_reduction <add>, %28, %cst_15 [1] : vector<8x128xf32> to vector<8xf32>
      %30 = vector.shape_cast %29 : vector<8xf32> to vector<8x1xf32>
      %cst_16 = arith.constant 1.000000e-10 : f32
      %31 = vector.broadcast %cst_16 : f32 to vector<8x1xf32>
      %32 = arith.addf %30, %31 : vector<8x1xf32>
      %33 = tpu.reciprocal %32 {approx = true} : vector<8x1xf32> -> vector<8x1xf32>
      %34 = vector.broadcast %33 : vector<8x1xf32> to vector<8x128xf32>
      %35 = arith.mulf %28, %34 : vector<8x128xf32>
      %c0_17 = arith.constant 0 : index
      %c0_18 = arith.constant 0 : index
      %36 = vector.load %arg3[%c0_17, %c0_18] : memref<8x128xf32, #tpu.memory_space<vmem>>, vector<8x128xf32>
      tpu.vector_store %arg3[%c0_17, %c0_18], %35 {strides = array<i32>} : memref<8x128xf32, #tpu.memory_space<vmem>>, vector<8x128xf32>,
    } else {
    }
    return
  }
  func.func @transform_0(%arg0: i32, %arg1: i32) -> (i32, i32) {
    %c0_i32 = arith.constant 0 : i32
    return %arg0, %arg1 : i32, i32
  }
  func.func @transform_1(%arg0: i32, %arg1: i32) -> (i32, i32) {
    %c0_i32 = arith.constant 0 : i32
    %c0_i32_0 = arith.constant 0 : i32
    return %arg0, %c0_i32 : i32, i32
  }
}

</mosaic_0001>

<bundles_post_ra>
// kernel: tpu_custom_call.1
= control target key start
LH: loop header
LB: loop body
LE: loop exit
PB: predicated region body
PF: predicated region fallthrough
CT: control target
= control target key end

     0   :  { %6 = vsyncpa [#allocation5], 0  ;;  %s13835_s0 = inlined_call_operand.hbm [shape: f32[8,512], index: 0, kind: input, shape index: {}]   ;;  %s13836_s1 = inlined_call_operand.hbm [shape: f32[8,128], index: 1, kind: output, shape index: {}]  }
   0x1   :  { %7 = vsyncpa [#allocation6], 0  ;;  %s13_s8 = sshll.u32 %s13835_s0, 4  ;;  %s11047_s9 = smov [#allocation4]   ;;  %s14_s8 = int_to_ptr.hbm [resolvable:$true] %s13_s8 }
   0x2   :  { %s15_s10 = sshll.u32 %s11047_s9, 4  ;;  %s16_s10 = int_to_ptr.vmem [resolvable:$true] %s15_s10 }
   0x3   :  { %18 = dma.hbm_to_vmem [thread:$0]  %s14_s8, 512, %s16_s10, [#allocation5]  }
   0x4   :  { %11043 = dma.done.wait [#allocation5], 512  }
   0x5   :  { %11044 = vsyncadd [#allocation5], 4294966784  ;;  %v28_v0 = vlaneseq  ;;  %v11077_v5 = vld [vmem:[#allocation4] sm:$0xff]  ;;  %v11079_v6 = vld [vmem:[#allocation4 + $0x8] sm:$0xff]  ;;  %s11049_s0 = smov [#allocation7]   ;;  %s9534_s14 = sshll.u32 %s13836_s1, 4  ;;  %s9535_s14 = int_to_ptr.hbm [resolvable:$true] %s9534_s14 }
   0x6   :  { %v11083_v7 = vperm.slane %v11077_v5, 0  ;;  %v11086_v8 = vperm.slane %v11079_v6, 0  ;;  %v11101_v11 = vperm.slane %v11077_v5, 1  ;;  %v11107_v12 = vperm.slane %v11079_v6, 2  ;;  %v11114_v14 = vld [vmem:[#allocation4 + $0x10] sm:$0xff]  ;;  %v11149_v22 = vld [vmem:[#allocation4 + $0x18] sm:$0xff] }
   0x7   :  { %v11064_v1 = vshrl.u32 %v28_v0, 7  ;;  %v11118_v15 = vperm.slane %v11114_v14, 3  ;;  %v11133_v18 = vperm.slane %v11079_v6, 1  ;;  %v11139_v19 = vperm.slane %v11114_v14, 2  ;;  %s9532_s11 = sshll.u32 %s11049_s0, 4  ;;  %s9533_s11 = int_to_ptr.vmem [resolvable:$true] %s9532_s11 }
   0x8   :  { %v11153_v23 = vperm.slane %v11149_v22, 3  ;;  %v11159_v24 = vperm.slane %v11077_v5, 5  ;;  %v11197_v30 = vperm.slane %v11079_v6, 6  ;;  %v11217_v35 = vperm.slane %v11114_v14, 1 }
   0x9   :  { %13915 = vst [vmem:[#allocation10_spill] sm:$0xff] %v11064_v1  ;;  %v11067_v2 = vadd.s32 56, %v11064_v1  ;;  %v11070_v3 = vadd.s32 32, %v11064_v1  ;;  %v11073_v4 = vadd.s32 16, %v11064_v1  ;;  %v11092_v9 = vadd.s32 40, %v11064_v1 }
   0xa   :  { %v11095_v10 = vadd.s32 24, %v11064_v1  ;;  %v11110_v13 = vadd.s32 48, %v11064_v1  ;;  %13918 = vst [vmem:[#allocation13_spill] sm:$0xff] %v11118_v15  ;;  %v11124_v16 = vadd.s32 80, %v11064_v1  ;;  %v11127_v17 = vadd.s32 72, %v11064_v1 }
   0xb   :  { %13916 = vst [vmem:[#allocation11_spill] sm:$0xff] %v11070_v3  ;;  %9565 = vset.pattern.permute.xlu0 %v11067_v2  ;;  %9549 = vset.pattern.permute.xlu2 %v11070_v3  ;;  %v11142_v20 = vadd.s32 96, %v11064_v1  ;;  %v11145_v21 = vadd.s32 88, %v11064_v1  ;;  %v11162_v25 = vadd.s32 120, %v11064_v1  ;;  %v11165_v26 = vadd.s32 112, %v11064_v1 }
   0xc   :  { %9547 = vset.pattern.permute.xlu1 %v11073_v4  ;;  %13917 = vst [vmem:[#allocation12_spill] sm:$0xff] %v11110_v13  ;;  %v11171_v27 = vadd.s32 64, %v11064_v1  ;;  %v11177_v28 = vadd.s32 8, %v11064_v1  ;;  %v11229_v39 = vperm.slane %v11149_v22, 2  ;;  %v11241_v43 = vperm.slane %v11077_v5, 4 }
   0xd   :  { %13919 = vst [vmem:[#allocation14_spill] sm:$0xff] %v11124_v16  ;;  %v11244_v44 = vadd.s32 104, %v11064_v1  ;;  %v11249_v46 = vand.u32 127, %v28_v0  ;;  %v11257_v48 = vperm.slane %v11079_v6, 5  ;;  %v11271_v55 = vperm.slane %v11114_v14, 6 }
   0xe   :  { %13920 = vst [vmem:[#allocation15_spill] sm:$0xff] %v11127_v17  ;;  %v11281_v60 = vperm.slane %v11114_v14, 0 }
   0xf   :  { %13921 = vst [vmem:[#allocation16_spill] sm:$0xff] %v11139_v19  ;;  %v231_v49 = vcvt.s32.f32 %v11249_v46 }
  0x10   :  { %13922 = vst [vmem:[#allocation17_spill] sm:$0xff] %v11142_v20 }
  0x11   :  { %13923 = vst [vmem:[#allocation18_spill] sm:$0xff] %v11145_v21  ;;  %v11262_v52 = vmul.f32 0.007874016, %v231_v49 }
  0x12   :  { %13924 = vst [vmem:[#allocation19_spill] sm:$0xff] %v11153_v23 }
  0x13   :  { %377 = vperm.xlu0 %9565, %v11086_v8   ;;  %262 = vperm.xlu2 %9549, %v11083_v7   ;;  %13925 = vst [vmem:[#allocation20_spill] sm:$0xff] %v11159_v24 }
  0x14   :  { %250 = vperm.xlu1 %9547, %v11083_v7   ;;  %13926 = vst [vmem:[#allocation21_spill] sm:$0xff] %v11162_v25 }
  0x15   :  { %13927 = vst [vmem:[#allocation22_spill] sm:$0xff] %v11165_v26 }
  0x16   :  { %13928 = vst [vmem:[#allocation23_spill] sm:$0xff] %v11177_v28 }
  0x17   :  { %13929 = vst [vmem:[#allocation24_spill] sm:$0xff] %v11197_v30 }
  0x18   :  { %13934 = vst [vmem:[#allocation29_spill] sm:$0xff] %v11217_v35 }
  0x19   :  { %13938 = vst [vmem:[#allocation33_spill] sm:$0xff] %v11229_v39 }
  0x1a   :  { %13942 = vst [vmem:[#allocation37_spill] sm:$0xff] %v11241_v43 }
  0x1b   :  { %9602 = vset.pattern.permute.xlu0 %v11070_v3  ;;  %9550 = vset.pattern.permute.xlu2 %v11092_v9  ;;  %13943 = vst [vmem:[#allocation38_spill] sm:$0xff] %v11244_v44 }
  0x1c   :  { %9548 = vset.pattern.permute.xlu1 %v11095_v10  ;;  %13945 = vst [vmem:[#allocation40_spill] sm:$0xff] %v11249_v46 }
  0x1d   :  { %13947 = vst [vmem:[#allocation42_spill] sm:$0xff] %v11257_v48 }
  0x1e   :  { %13950 = vst [vmem:[#allocation45_spill] sm:$0xff] %v11271_v55 }
  0x1f   :  { %13953 = vst [vmem:[#allocation48_spill] sm:$0xff] %v11281_v60 }
  0x23   :  { %650 = vperm.xlu0 %9602, %v11101_v11   ;;  %268 = vperm.xlu2 %9550, %v11083_v7  }
  0x24   :  { %256 = vperm.xlu1 %9548, %v11083_v7  }
  0x2b   :  { %1135 = vperm.xlu0 %9602, %v11107_v12   ;;  %9552 = vset.pattern.permute.xlu2 %v11067_v2 }
  0x2c   :  { %9551 = vset.pattern.permute.xlu1 %v11110_v13 }
  0x33   :  { %1620 = vperm.xlu0 %9602, %v11118_v15   ;;  %280 = vperm.xlu2 %9552, %v11083_v7  }
  0x34   :  { %274 = vperm.xlu1 %9551, %v11083_v7  }
  0x3b   :  { %9731 = vset.pattern.permute.xlu0 %v11095_v10  ;;  %9554 = vset.pattern.permute.xlu2 %v11124_v16 }
  0x3c   :  { %9553 = vset.pattern.permute.xlu1 %v11127_v17 }
  0x43   :  { %741 = vperm.xlu0 %9731, %v11133_v18   ;;  %298 = vperm.xlu2 %9554, %v11083_v7  }
  0x44   :  { %292 = vperm.xlu1 %9553, %v11083_v7  }
  0x4b   :  { %1226 = vperm.xlu0 %9731, %v11139_v19   ;;  %9556 = vset.pattern.permute.xlu2 %v11142_v20 }
  0x4c   :  { %9555 = vset.pattern.permute.xlu1 %v11145_v21 }
  0x53   :  { %1711 = vperm.xlu0 %9731, %v11153_v23   ;;  %310 = vperm.xlu2 %9556, %v11083_v7  }
  0x54   :  { %304 = vperm.xlu1 %9555, %v11083_v7  }
  0x5b   :  { %2196 = vperm.xlu0 %9731, %v11159_v24   ;;  %9558 = vset.pattern.permute.xlu2 %v11162_v25 }
  0x5c   :  { %9557 = vset.pattern.permute.xlu1 %v11165_v26 }
  0x63   :  { %9808 = vset.pattern.permute.xlu0 %v11171_v27  ;;  %328 = vperm.xlu2 %9558, %v11083_v7  }
  0x64   :  { %322 = vperm.xlu1 %9557, %v11083_v7  }
  0x6b   :  { %286 = vperm.xlu0 %9808, %v11083_v7   ;;  %9560 = vset.pattern.permute.xlu2 %v11177_v28 }
  0x6c   :  { %9559 = vset.pattern.permute.xlu1 %v11064_v1 }
  0x6d   :  { %v11202_v31 = vpop.permute.xlu2 %262 }
  0x6e   :  { %13930 = vst [vmem:[#allocation25_spill] sm:$0xff] %v11202_v31 }
  0x73   :  { %771 = vperm.xlu0 %9808, %v11133_v18   ;;  %341 = vperm.xlu2 %9560, %v11086_v8  }
  0x74   :  { %335 = vperm.xlu1 %9559, %v11086_v8  }
  0x7b   :  { %1256 = vperm.xlu0 %9808, %v11139_v19   ;;  %9562 = vset.pattern.permute.xlu2 %v11070_v3 }
  0x7c   :  { %9561 = vset.pattern.permute.xlu1 %v11095_v10 }
  0x7d   :  { %v11209_v33 = vpop.permute.xlu2 %268 }
  0x7e   :  { %13932 = vst [vmem:[#allocation27_spill] sm:$0xff] %v11209_v33 }
  0x83   :  { %1741 = vperm.xlu0 %9808, %v11153_v23   ;;  %359 = vperm.xlu2 %9562, %v11086_v8  }
  0x84   :  { %353 = vperm.xlu1 %9561, %v11086_v8  }
  0x85   :  { %v11194_v29 = vpop.permute.xlu0 %377 }
  0x86   :  { %v11226_v38 = vpop.permute.xlu1 %250 }
  0x87   :  { %13937 = vst [vmem:[#allocation32_spill] sm:$0xff] %v11226_v38  ;;  %v11376_v38 = vperm.slane %v11149_v22, 6 }
  0x89   :  { %13968 = vst [vmem:[#allocation63_spill] sm:$0xff] %v11376_v38 }
  0x8b   :  { %2226 = vperm.xlu0 %9808, %v11159_v24   ;;  %9564 = vset.pattern.permute.xlu2 %v11110_v13 }
  0x8c   :  { %9563 = vset.pattern.permute.xlu1 %v11092_v9 }
  0x8d   :  { %v11219_v36 = vpop.permute.xlu2 %280 }
  0x8e   :  { %13935 = vst [vmem:[#allocation30_spill] sm:$0xff] %v11219_v36 }
  0x93   :  { %2711 = vperm.xlu0 %9808, %v11197_v30   ;;  %371 = vperm.xlu2 %9564, %v11086_v8  }
  0x94   :  { %365 = vperm.xlu1 %9563, %v11086_v8  }
  0x95   :  { %v11204_v32 = vpop.permute.xlu0 %650 }
  0x96   :  { %13931 = vst [vmem:[#allocation26_spill] sm:$0xff] %v11204_v32  ;;  %v11238_v42 = vpop.permute.xlu1 %256 }
  0x97   :  { %13941 = vst [vmem:[#allocation36_spill] sm:$0xff] %v11238_v42  ;;  %v11373_v42 = vperm.slane %v11149_v22, 0 }
  0x9b   :  { %9877 = vset.pattern.permute.xlu0 %v11073_v4  ;;  %9567 = vset.pattern.permute.xlu2 %v11127_v17 }
  0x9c   :  { %9566 = vset.pattern.permute.xlu1 %v11171_v27 }
  0x9d   :  { %v11211_v34 = vpop.permute.xlu0 %1135  ;;  %v11231_v40 = vpop.permute.xlu2 %298 }
  0x9e   :  { %13933 = vst [vmem:[#allocation28_spill] sm:$0xff] %v11211_v34  ;;  %v11349_v34 = vperm.slane %v11077_v5, 3 }
  0x9f   :  { %13939 = vst [vmem:[#allocation34_spill] sm:$0xff] %v11231_v40 }
  0xa0   :  { %13963 = vst [vmem:[#allocation58_spill] sm:$0xff] %v11349_v34 }
  0xa3   :  { %347 = vperm.xlu0 %9877, %v11086_v8   ;;  %389 = vperm.xlu2 %9567, %v11086_v8  }
  0xa4   :  { %383 = vperm.xlu1 %9566, %v11086_v8  }
  0xa5   :  { %v11223_v37 = vpop.permute.xlu0 %1620 }
  0xa6   :  { %13936 = vst [vmem:[#allocation31_spill] sm:$0xff] %v11223_v37  ;;  %v11254_v47 = vpop.permute.xlu1 %274 }
  0xa7   :  { %13946 = vst [vmem:[#allocation41_spill] sm:$0xff] %v11254_v47 }
  0xab   :  { %832 = vperm.xlu0 %9877, %v11217_v35   ;;  %9569 = vset.pattern.permute.xlu2 %v11145_v21 }
  0xac   :  { %9568 = vset.pattern.permute.xlu1 %v11124_v16 }
  0xad   :  { %v11246_v45 = vpop.permute.xlu2 %310 }
  0xae   :  { %13944 = vst [vmem:[#allocation39_spill] sm:$0xff] %v11246_v45  ;;  %v3360_v45 = vsub.f32 %v11194_v29, %v11262_v52 }
  0xb0   :  { %v3872_v33 = vmul.f32 %v3360_v45, %v3360_v45 }
  0xb3   :  { %1317 = vperm.xlu0 %9877, %v11229_v39   ;;  %401 = vperm.xlu2 %9569, %v11086_v8  }
  0xb4   :  { %395 = vperm.xlu1 %9568, %v11086_v8  }
  0xb5   :  { %v11236_v41 = vpop.permute.xlu0 %741 }
  0xb6   :  { %13940 = vst [vmem:[#allocation35_spill] sm:$0xff] %v11236_v41  ;;  %v11268_v54 = vpop.permute.xlu1 %292 }
  0xb7   :  { %13949 = vst [vmem:[#allocation44_spill] sm:$0xff] %v11268_v54 }
  0xbb   :  { %1802 = vperm.xlu0 %9877, %v11241_v43   ;;  %9571 = vset.pattern.permute.xlu2 %v11165_v26 }
  0xbc   :  { %9570 = vset.pattern.permute.xlu1 %v11244_v44 }
  0xbd   :  { %v11260_v50 = vpop.permute.xlu0 %1226  ;;  %v329_v51 = vpop.permute.xlu2 %328 }
  0xbe   :  { %13948 = vst [vmem:[#allocation43_spill] sm:$0xff] %v11260_v50  ;;  %v3352_v53 = vsub.f32 %v329_v51, %v11262_v52 }
  0xc0   :  { %v3864_v57 = vmul.f32 %v3352_v53, %v3352_v53 }
  0xc2   :  { %v4376_v58 = vmul.f32 -20000.0, %v3864_v57 }
  0xc3   :  { %2287 = vperm.xlu0 %9877, %v11257_v48   ;;  %419 = vperm.xlu2 %9571, %v11086_v8  }
  0xc4   :  { %413 = vperm.xlu1 %9570, %v11086_v8   ;;  %v4888_v61 = vpack.c.bf16 %v4376_v58, %v4376_v58 }
  0xc5   :  { %v11273_v56 = vpop.permute.xlu0 %1711 }
  0xc6   :  { %13951 = vst [vmem:[#allocation46_spill] sm:$0xff] %v11273_v56  ;;  %v11278_v59 = vpop.permute.xlu1 %304  ;;  %v5400_v63 = vunpack.c.l.bf16 %v4888_v61 }
  0xc7   :  { %13952 = vst [vmem:[#allocation47_spill] sm:$0xff] %v11278_v59 }
  0xc8   :  { %v5927_v51 = vmul.f32 1.442695, %v5400_v63 }
  0xca   :  { %9965 = vpow2.f32 %v5927_v51 }
  0xcb   :  { %2772 = vperm.xlu0 %9877, %v11271_v55   ;;  %9573 = vset.pattern.permute.xlu2 %v11064_v1 }
  0xcc   :  { %9572 = vset.pattern.permute.xlu1 %v11162_v25 }
  0xcd   :  { %v11285_v62 = vpop.permute.xlu0 %2196 }
  0xce   :  { %13954 = vst [vmem:[#allocation49_spill] sm:$0xff] %v11285_v62 }
  0xd0   :  { %v9966_v50 = vpop.eup %9965 }
  0xd3   :  { %9886 = vset.pattern.permute.xlu0 %v11142_v20  ;;  %432 = vperm.xlu2 %9573, %v11281_v60  }
  0xd4   :  { %425 = vperm.xlu1 %9572, %v11086_v8  }
  0xd6   :  { %v323_v0 = vpop.permute.xlu1 %322 }
  0xd7   :  { %v3351_v49 = vsub.f32 %v323_v0, %v11262_v52 }
  0xd9   :  { %v3863_v53 = vmul.f32 %v3351_v49, %v3351_v49 }
  0xdb   :  { %v4375_v57 = vmul.f32 -20000.0, %v3863_v53  ;;  %407 = vperm.xlu0 %9886, %v11086_v8   ;;  %9575 = vset.pattern.permute.xlu2 %v11095_v10  ;;  %v6936_v8 = vpack.c.bf16 %v9966_v50, %v9966_v50 }
  0xdc   :  { %9574 = vset.pattern.permute.xlu1 %v11073_v4 }
  0xdd   :  { %v4887_v58 = vpack.c.bf16 %v4375_v57, %v4375_v57  ;;  %v11292_v56 = vpop.permute.xlu0 %286  ;;  %v8089_v49 = vunpack.c.l.b16 %v6936_v8  ;;  %v11317_v57 = vpop.permute.xlu2 %341 }
  0xde   :  { %13955 = vst [vmem:[#allocation50_spill] sm:$0xff] %v11292_v56 }
  0xdf   :  { %v5399_v62 = vunpack.c.l.bf16 %v4887_v58 }
  0xe1   :  { %v5925_v37 = vmul.f32 1.442695, %v5399_v62 }
  0xe3   :  { %892 = vperm.xlu0 %9886, %v11217_v35   ;;  %450 = vperm.xlu2 %9575, %v11281_v60   ;;  %9967 = vpow2.f32 %v5925_v37 }
  0xe4   :  { %444 = vperm.xlu1 %9574, %v11281_v60  }
  0xe5   :  { %v11297_v61 = vpop.permute.xlu0 %771  ;;  %v11324_v8 = vpop.permute.xlu2 %359 }
  0xe6   :  { %13956 = vst [vmem:[#allocation51_spill] sm:$0xff] %v11297_v61 }
  0xe9   :  { %v9968_v63 = vpop.eup %9967 }
  0xea   :  { %v6935_v0 = vpack.c.bf16 %v9968_v63, %v9968_v63  ;;  %v11326_v63 = vpop.permute.xlu1 %335 }
  0xeb   :  { %1377 = vperm.xlu0 %9886, %v11229_v39   ;;  %9577 = vset.pattern.permute.xlu2 %v11092_v9  ;;  %v11363_v39 = vperm.slane %v11114_v14, 5 }
  0xec   :  { %9576 = vset.pattern.permute.xlu1 %v11070_v3  ;;  %v8088_v62 = vunpack.c.l.b16 %v6935_v0 }
  0xed   :  { %v11302_v51 = vpop.permute.xlu0 %1256  ;;  %13966 = vst [vmem:[#allocation61_spill] sm:$0xff] %v11363_v39 }
  0xee   :  { %13957 = vst [vmem:[#allocation52_spill] sm:$0xff] %v11302_v51  ;;  %v8593_v53 = vpack.c.b16 %v8089_v49, %v8088_v62  ;;  %v372_v49 = vpop.permute.xlu2 %371 }
  0xef   :  { %v3359_v29 = vsub.f32 %v372_v49, %v11262_v52 }
  0xf0   :  { %9098 = vmatpush.bf16.msra.mxu0 %v8593_v53 }
  0xf1   :  { %v3871_v19 = vmul.f32 %v3359_v29, %v3359_v29 }
  0xf3   :  { %1862 = vperm.xlu0 %9886, %v11241_v43   ;;  %462 = vperm.xlu2 %9577, %v11281_v60  }
  0xf4   :  { %456 = vperm.xlu1 %9576, %v11281_v60  }
  0xf5   :  { %v11307_v37 = vpop.permute.xlu0 %1741 }
  0xf6   :  { %13958 = vst [vmem:[#allocation53_spill] sm:$0xff] %v11307_v37  ;;  %v11333_v62 = vpop.permute.xlu1 %353 }
  0xfb   :  { %2347 = vperm.xlu0 %9886, %v11257_v48   ;;  %9579 = vset.pattern.permute.xlu2 %v11171_v27 }
  0xfc   :  { %9578 = vset.pattern.permute.xlu1 %v11067_v2 }
  0xfd   :  { %v11312_v50 = vpop.permute.xlu0 %2226  ;;  %v390_v37 = vpop.permute.xlu2 %389 }
  0xfe   :  { %13959 = vst [vmem:[#allocation54_spill] sm:$0xff] %v11312_v50  ;;  %v3362_v59 = vsub.f32 %v390_v37, %v11262_v52 }
 0x100   :  { %v3874_v31 = vmul.f32 %v3362_v59, %v3362_v59 }
 0x103   :  { %2832 = vperm.xlu0 %9886, %v11271_v55   ;;  %480 = vperm.xlu2 %9579, %v11281_v60   ;;  %v11355_v55 = vperm.slane %v11079_v6, 4 }
 0x104   :  { %474 = vperm.xlu1 %9578, %v11281_v60  }
 0x105   :  { %v11321_v58 = vpop.permute.xlu0 %2711  ;;  %13964 = vst [vmem:[#allocation59_spill] sm:$0xff] %v11355_v55 }
 0x106   :  { %13960 = vst [vmem:[#allocation55_spill] sm:$0xff] %v11321_v58  ;;  %v11341_v58 = vperm.slane %v11149_v22, 1  ;;  %v366_v50 = vpop.permute.xlu1 %365 }
 0x107   :  { %v3358_v45 = vsub.f32 %v366_v50, %v11262_v52 }
 0x10b   :  { %9895 = vset.pattern.permute.xlu0 %v11177_v28  ;;  %9581 = vset.pattern.permute.xlu2 %v11124_v16 }
 0x10c   :  { %9580 = vset.pattern.permute.xlu1 %v11127_v17 }
 0x113   :  { %244 = vperm.xlu0 %9895, %v11083_v7   ;;  %492 = vperm.xlu2 %9581, %v11281_v60  }
 0x114   :  { %486 = vperm.xlu1 %9580, %v11281_v60  }
 0x115   :  { %v11331_v0 = vpop.permute.xlu0 %347 }
 0x116   :  { %v384_v46 = vpop.permute.xlu1 %383 }
 0x11b   :  { %438 = vperm.xlu0 %9895, %v11281_v60   ;;  %9583 = vset.pattern.permute.xlu2 %v11244_v44 }
 0x11c   :  { %9582 = vset.pattern.permute.xlu1 %v11142_v20 }
 0x11d   :  { %v11338_v53 = vpop.permute.xlu0 %832 }
 0x11e   :  { %13961 = vst [vmem:[#allocation56_spill] sm:$0xff] %v11338_v53  ;;  %v402_v53 = vpop.permute.xlu2 %401 }
 0x123   :  { %923 = vperm.xlu0 %9895, %v11341_v58   ;;  %510 = vperm.xlu2 %9583, %v11281_v60  }
 0x124   :  { %504 = vperm.xlu1 %9582, %v11281_v60  }
 0x125   :  { %v11346_v51 = vpop.permute.xlu0 %1317 }
 0x126   :  { %13962 = vst [vmem:[#allocation57_spill] sm:$0xff] %v11346_v51  ;;  %v396_v43 = vpop.permute.xlu1 %395  ;;  %v420_v51 = vpop.permute.xlu2 %419 }
 0x127   :  { %v3367_v32 = vsub.f32 %v420_v51, %v11262_v52  ;;  %v3364_v51 = vsub.f32 %v402_v53, %v11262_v52 }
 0x129   :  { %v3876_v40 = vmul.f32 %v3364_v51, %v3364_v51  ;;  %v4384_v51 = vmul.f32 -20000.0, %v3872_v33  ;;  %v3357_v33 = vsub.f32 %v11324_v8, %v11262_v52  ;;  %v3354_v8 = vsub.f32 %v11317_v57, %v11262_v52 }
 0x12b   :  { %1408 = vperm.xlu0 %9895, %v11349_v34   ;;  %9585 = vset.pattern.permute.xlu2 %v11162_v25  ;;  %v4388_v30 = vmul.f32 -20000.0, %v3876_v40  ;;  %v3869_v29 = vmul.f32 %v3357_v33, %v3357_v33 }
 0x12c   :  { %9584 = vset.pattern.permute.xlu1 %v11165_v26 }
 0x12d   :  { %v11357_v48 = vpop.permute.xlu0 %1802 }
 0x12e   :  { %13965 = vst [vmem:[#allocation60_spill] sm:$0xff] %v11357_v48  ;;  %v3879_v48 = vmul.f32 %v3367_v32, %v3367_v32 }
 0x130   :  { %v4391_v54 = vmul.f32 -20000.0, %v3879_v48  ;;  %v3361_v48 = vsub.f32 %v384_v46, %v11262_v52  ;;  %v4386_v46 = vmul.f32 -20000.0, %v3874_v31 }
 0x132   :  { %v4903_v32 = vpack.c.bf16 %v4391_v54, %v4391_v54  ;;  %v3873_v24 = vmul.f32 %v3361_v48, %v3361_v48  ;;  %v4383_v48 = vmul.f32 -20000.0, %v3871_v19  ;;  %v4898_v50 = vpack.c.bf16 %v4386_v46, %v4386_v46 }
 0x133   :  { %1893 = vperm.xlu0 %9895, %v11355_v55   ;;  %522 = vperm.xlu2 %9585, %v11281_v60   ;;  %v3353_v19 = vsub.f32 %v11326_v63, %v11262_v52 }
 0x134   :  { %516 = vperm.xlu1 %9584, %v11281_v60   ;;  %v5415_v54 = vunpack.c.l.bf16 %v4903_v32  ;;  %v4385_v59 = vmul.f32 -20000.0, %v3873_v24  ;;  %v4896_v32 = vpack.c.bf16 %v4384_v51, %v4384_v51  ;;  %v3355_v24 = vsub.f32 %v11331_v0, %v11262_v52 }
 0x135   :  { %v11366_v61 = vpop.permute.xlu0 %2287  ;;  %v4895_v51 = vpack.c.bf16 %v4383_v48, %v4383_v48  ;;  %v5410_v0 = vunpack.c.l.bf16 %v4898_v50  ;;  %v4381_v48 = vmul.f32 -20000.0, %v3869_v29 }
 0x136   :  { %13967 = vst [vmem:[#allocation62_spill] sm:$0xff] %v11366_v61  ;;  %v414_v41 = vpop.permute.xlu1 %413  ;;  %v3363_v61 = vsub.f32 %v396_v43, %v11262_v52  ;;  %v5957_v35 = vmul.f32 1.442695, %v5415_v54 }
 0x137   :  { %v3366_v56 = vsub.f32 %v414_v41, %v11262_v52  ;;  %v5947_v50 = vmul.f32 1.442695, %v5410_v0 }
 0x138   :  { %v3875_v53 = vmul.f32 %v3363_v61, %v3363_v61  ;;  %9969 = vpow2.f32 %v5957_v35  ;;  %v3356_v35 = vsub.f32 %v11333_v62, %v11262_v52  ;;  %v3866_v62 = vmul.f32 %v3354_v8, %v3354_v8 }
 0x139   :  { %v3878_v47 = vmul.f32 %v3366_v56, %v3366_v56 }
 0x13b   :  { %2378 = vperm.xlu0 %9895, %v11363_v39   ;;  %9587 = vset.pattern.permute.xlu2 %v11073_v4  ;;  %v4390_v43 = vmul.f32 -20000.0, %v3878_v47  ;;  %v4900_v47 = vpack.c.bf16 %v4388_v30, %v4388_v30 }
 0x13c   :  { %9586 = vset.pattern.permute.xlu1 %v11177_v28 }
 0x13d   :  { %v11384_v41 = vpop.permute.xlu0 %2772  ;;  %v4902_v37 = vpack.c.bf16 %v4390_v43, %v4390_v43  ;;  %v3870_v43 = vmul.f32 %v3358_v45, %v3358_v45  ;;  %v5412_v31 = vunpack.c.l.bf16 %v4900_v47 }
 0x13e   :  { %13969 = vst [vmem:[#allocation64_spill] sm:$0xff] %v11384_v41  ;;  %v4387_v41 = vmul.f32 -20000.0, %v3875_v53  ;;  %v9970_v57 = vpop.eup %9969 }
 0x13f   :  { %v5951_v45 = vmul.f32 1.442695, %v5412_v31  ;;  %v4382_v47 = vmul.f32 -20000.0, %v3870_v43 }
 0x140   :  { %v4899_v40 = vpack.c.bf16 %v4387_v41, %v4387_v41  ;;  %v4897_v41 = vpack.c.bf16 %v4385_v59, %v4385_v59  ;;  %v3867_v59 = vmul.f32 %v3355_v24, %v3355_v24 }
 0x142   :  { %v4379_v43 = vmul.f32 -20000.0, %v3867_v59  ;;  %v11416_v59 = vpop.permute.xlu2 %432 }
 0x143   :  { %2863 = vperm.xlu0 %9895, %v11376_v38   ;;  %541 = vperm.xlu2 %9587, %v11373_v42   ;;  %13972 = vst [vmem:[#allocation67_spill] sm:$0xff] %v11416_v59 }
 0x144   :  { %535 = vperm.xlu1 %9586, %v11373_v42  }
 0x146   :  { %v426_v56 = vpop.permute.xlu1 %425 }
 0x147   :  { %v3368_v36 = vsub.f32 %v426_v56, %v11262_v52 }
 0x149   :  { %v3880_v23 = vmul.f32 %v3368_v36, %v3368_v36  ;;  %v5414_v36 = vunpack.c.l.bf16 %v4902_v37 }
 0x14b   :  { %v4392_v15 = vmul.f32 -20000.0, %v3880_v23  ;;  %9900 = vset.pattern.permute.xlu0 %v11145_v21  ;;  %9589 = vset.pattern.permute.xlu2 %v11070_v3  ;;  %v5955_v54 = vmul.f32 1.442695, %v5414_v36  ;;  %v3865_v36 = vmul.f32 %v3353_v19, %v3353_v19 }
 0x14c   :  { %9588 = vset.pattern.permute.xlu1 %v11095_v10 }
 0x14d   :  { %v4904_v61 = vpack.c.bf16 %v4392_v15, %v4392_v15  ;;  %v408_v49 = vpop.permute.xlu0 %407  ;;  %v5411_v15 = vunpack.c.l.bf16 %v4899_v40  ;;  %v5409_v40 = vunpack.c.l.bf16 %v4897_v41  ;;  %v4377_v0 = vmul.f32 -20000.0, %v3865_v36 }
 0x14e   :  { %v3365_v23 = vsub.f32 %v408_v49, %v11262_v52  ;;  %v5408_v49 = vunpack.c.l.bf16 %v4896_v32  ;;  %v4378_v32 = vmul.f32 -20000.0, %v3866_v62 }
 0x14f   :  { %v5416_v53 = vunpack.c.l.bf16 %v4904_v61  ;;  %v5949_v61 = vmul.f32 1.442695, %v5411_v15  ;;  %v5945_v24 = vmul.f32 1.442695, %v5409_v40 }
 0x150   :  { %v3877_v30 = vmul.f32 %v3365_v23, %v3365_v23  ;;  %v3868_v23 = vmul.f32 %v3356_v35, %v3356_v35  ;;  %v5943_v15 = vmul.f32 1.442695, %v5408_v49 }
 0x151   :  { %v5959_v56 = vmul.f32 1.442695, %v5416_v53  ;;  %v5407_v53 = vunpack.c.l.bf16 %v4895_v51 }
 0x152   :  { %v4389_v37 = vmul.f32 -20000.0, %v3877_v30  ;;  %v6951_v30 = vpack.c.bf16 %v9970_v57, %v9970_v57  ;;  %v4380_v8 = vmul.f32 -20000.0, %v3868_v23 }
 0x153   :  { %498 = vperm.xlu0 %9900, %v11281_v60   ;;  %553 = vperm.xlu2 %9589, %v11373_v42   ;;  %9971 = vpow2.f32 %v5959_v56  ;;  %v5941_v19 = vmul.f32 1.442695, %v5407_v53  ;;  %v4889_v53 = vpack.c.bf16 %v4377_v0, %v4377_v0 }
 0x154   :  { %v4901_v46 = vpack.c.bf16 %v4389_v37, %v4389_v37  ;;  %547 = vperm.xlu1 %9588, %v11373_v42   ;;  %9973 = vpow2.f32 %v5955_v54  ;;  %v4894_v37 = vpack.c.bf16 %v4382_v47, %v4382_v47  ;;  %v4893_v54 = vpack.c.bf16 %v4381_v48, %v4381_v48 }
 0x155   :  { %v11409_v63 = vpop.permute.xlu0 %892  ;;  %9975 = vpow2.f32 %v5951_v45  ;;  %v8104_v35 = vunpack.c.l.b16 %v6951_v30  ;;  %v4892_v49 = vpack.c.bf16 %v4380_v8, %v4380_v8  ;;  %v4890_v48 = vpack.c.bf16 %v4378_v32, %v4378_v32 }
 0x156   :  { %13970 = vst [vmem:[#allocation65_spill] sm:$0xff] %v11409_v63  ;;  %v5413_v33 = vunpack.c.l.bf16 %v4901_v46  ;;  %9977 = vpow2.f32 %v5949_v61  ;;  %v5406_v45 = vunpack.c.l.bf16 %v4894_v37  ;;  %v4891_v46 = vpack.c.bf16 %v4379_v43, %v4379_v43 }
 0x157   :  { %v5405_v62 = vunpack.c.l.bf16 %v4893_v54  ;;  %v5402_v54 = vunpack.c.l.bf16 %v4890_v48 }
 0x158   :  { %v5953_v31 = vmul.f32 1.442695, %v5413_v33  ;;  %v5939_v36 = vmul.f32 1.442695, %v5406_v45 }
 0x159   :  { %v9972_v56 = vpop.eup %9971 }
 0x15a   :  { %9979 = vpow2.f32 %v5953_v31  ;;  %v6952_v41 = vpack.c.bf16 %v9972_v56, %v9972_v56  ;;  %v9974_v29 = vpop.eup %9973 }
 0x15b   :  { %983 = vperm.xlu0 %9900, %v11341_v58   ;;  %9591 = vset.pattern.permute.xlu2 %v11067_v2  ;;  %9981 = vpow2.f32 %v5947_v50  ;;  %v9976_v47 = vpop.eup %9975  ;;  %v6950_v33 = vpack.c.bf16 %v9974_v29, %v9974_v29  ;;  %v5403_v50 = vunpack.c.l.bf16 %v4891_v46  ;;  %v5401_v29 = vunpack.c.l.bf16 %v4889_v53 }
 0x15c   :  { %9590 = vset.pattern.permute.xlu1 %v11110_v13  ;;  %v8105_v51 = vunpack.c.l.b16 %v6952_v41  ;;  %9983 = vpow2.f32 %v5945_v24  ;;  %v9978_v61 = vpop.eup %9977  ;;  %v6948_v37 = vpack.c.bf16 %v9976_v47, %v9976_v47  ;;  %v5404_v24 = vunpack.c.l.bf16 %v4892_v49 }
 0x15d   :  { %v11414_v57 = vpop.permute.xlu0 %1377  ;;  %9985 = vpow2.f32 %v5943_v15  ;;  %v6947_v56 = vpack.c.bf16 %v9978_v61, %v9978_v61  ;;  %v5937_v41 = vmul.f32 1.442695, %v5405_v62  ;;  %v8103_v8 = vunpack.c.l.b16 %v6950_v33  ;;  %v11423_v62 = vpop.permute.xlu2 %450 }
 0x15e   :  { %13971 = vst [vmem:[#allocation66_spill] sm:$0xff] %v11414_v57  ;;  %v8601_v40 = vpack.c.b16 %v8105_v51, %v8104_v35  ;;  %9987 = vpow2.f32 %v5941_v19  ;;  %v5933_v19 = vmul.f32 1.442695, %v5403_v50  ;;  %v8101_v45 = vunpack.c.l.b16 %v6948_v37 }
 0x15f   :  { %9989 = vpow2.f32 %v5939_v36  ;;  %v8100_v0 = vunpack.c.l.b16 %v6947_v56  ;;  %v5931_v49 = vmul.f32 1.442695, %v5402_v54  ;;  %13974 = vst [vmem:[#allocation69_spill] sm:$0xff] %v11423_v62  ;;  %v5929_v33 = vmul.f32 1.442695, %v5401_v29 }
 0x160   :  { %v9980_v23 = vpop.eup %9979  ;;  %9111 = vmatpush.bf16.msra.mxu1 %v8601_v40  ;;  %v5935_v40 = vmul.f32 1.442695, %v5404_v24  ;;  %9991 = vpow2.f32 %v5937_v41 }
 0x161   :  { %v6949_v31 = vpack.c.bf16 %v9980_v23, %v9980_v23  ;;  %v9982_v30 = vpop.eup %9981  ;;  %9993 = vpow2.f32 %v5933_v19  ;;  %v8599_v48 = vpack.c.b16 %v8101_v45, %v8100_v0 }
 0x162   :  { %v9984_v43 = vpop.eup %9983  ;;  %v6946_v47 = vpack.c.bf16 %v9982_v30, %v9982_v30  ;;  %9995 = vpow2.f32 %v5935_v40 }
 0x163   :  { %1468 = vperm.xlu0 %9900, %v11349_v34   ;;  %571 = vperm.xlu2 %9591, %v11373_v42   ;;  %v8102_v15 = vunpack.c.l.b16 %v6949_v31  ;;  %v9986_v32 = vpop.eup %9985  ;;  %v6945_v46 = vpack.c.bf16 %v9984_v43, %v9984_v43  ;;  %9997 = vpow2.f32 %v5931_v49 }
 0x164   :  { %565 = vperm.xlu1 %9590, %v11373_v42   ;;  %v9988_v51 = vpop.eup %9987  ;;  %v8099_v36 = vunpack.c.l.b16 %v6946_v47  ;;  %v6944_v50 = vpack.c.bf16 %v9986_v32, %v9986_v32  ;;  %9999 = vpow2.f32 %v5929_v33  ;;  %v11435_v47 = vpop.permute.xlu1 %444 }
 0x165   :  { %v8600_v35 = vpack.c.b16 %v8103_v8, %v8102_v15  ;;  %v11421_v61 = vpop.permute.xlu0 %1862  ;;  %v6943_v23 = vpack.c.bf16 %v9988_v51, %v9988_v51  ;;  %v8098_v53 = vunpack.c.l.b16 %v6945_v46  ;;  %v9990_v31 = vpop.eup %9989  ;;  %13977 = vst [vmem:[#allocation72_spill] sm:$0xff] %v11435_v47 }
 0x166   :  { %13973 = vst [vmem:[#allocation68_spill] sm:$0xff] %v11421_v61  ;;  %v9992_v30 = vpop.eup %9991  ;;  %v8097_v43 = vunpack.c.l.b16 %v6944_v50  ;;  %v6942_v24 = vpack.c.bf16 %v9990_v31, %v9990_v31  ;;  %v11428_v15 = vpop.permute.xlu2 %462 }
 0x167   :  { %9112 = vmatpush.bf16.msra.mxu1 %v8600_v35  ;;  %v8598_v56 = vpack.c.b16 %v8099_v36, %v8098_v53  ;;  %v8096_v37 = vunpack.c.l.b16 %v6943_v23  ;;  %v9994_v41 = vpop.eup %9993  ;;  %13975 = vst [vmem:[#allocation70_spill] sm:$0xff] %v11428_v15  ;;  %v6941_v8 = vpack.c.bf16 %v9992_v30, %v9992_v30 }
 0x168   :  { %v9996_v54 = vpop.eup %9995  ;;  %v8095_v35 = vunpack.c.l.b16 %v6942_v24  ;;  %v6939_v51 = vpack.c.bf16 %v9994_v41, %v9994_v41 }
 0x169   :  { %v9998_v29 = vpop.eup %9997  ;;  %v8597_v19 = vpack.c.b16 %v8097_v43, %v8096_v37  ;;  %v8094_v45 = vunpack.c.l.b16 %v6941_v8  ;;  %v6940_v46 = vpack.c.bf16 %v9996_v54, %v9996_v54 }
 0x16a   :  { %v10000_v0 = vpop.eup %9999  ;;  %v8092_v49 = vunpack.c.l.b16 %v6939_v51  ;;  %v6938_v23 = vpack.c.bf16 %v9998_v29, %v9998_v29 }
 0x16b   :  { %1953 = vperm.xlu0 %9900, %v11355_v55   ;;  %9593 = vset.pattern.permute.xlu2 %v11127_v17  ;;  %v8596_v40 = vpack.c.b16 %v8095_v35, %v8094_v45  ;;  %v6937_v33 = vpack.c.bf16 %v10000_v0, %v10000_v0  ;;  %v11467_v45 = vperm.slane %v11077_v5, 2 }
 0x16c   :  { %9592 = vset.pattern.permute.xlu1 %v11171_v27  ;;  %9113 = vmatpush.bf16.msra.mxu1 %v8599_v48  ;;  %v8093_v48 = vunpack.c.l.b16 %v6940_v46  ;;  %v8091_v31 = vunpack.c.l.b16 %v6938_v23 }
 0x16d   :  { %v11430_v32 = vpop.permute.xlu0 %2347  ;;  %v8090_v50 = vunpack.c.l.b16 %v6937_v33  ;;  %13983 = vst [vmem:[#allocation78_spill] sm:$0xff] %v11467_v45 }
 0x16e   :  { %13976 = vst [vmem:[#allocation71_spill] sm:$0xff] %v11430_v32  ;;  %v11437_v53 = vpop.permute.xlu2 %480  ;;  %v8595_v36 = vpack.c.b16 %v8093_v48, %v8092_v49 }
 0x16f   :  { %v8594_v37 = vpack.c.b16 %v8091_v31, %v8090_v50  ;;  %v11477_v50 = vperm.slane %v11079_v6, 3 }
 0x170   :  { %9114 = vmatpush.bf16.msra.mxu1 %v8598_v56  ;;  %v11444_v56 = vpop.permute.xlu1 %456 }
 0x171   :  { %13979 = vst [vmem:[#allocation74_spill] sm:$0xff] %v11444_v56 }
 0x172   :  { %13985 = vst [vmem:[#allocation80_spill] sm:$0xff] %v11477_v50 }
 0x173   :  { %2438 = vperm.xlu0 %9900, %v11363_v39   ;;  %583 = vperm.xlu2 %9593, %v11373_v42  }
 0x174   :  { %577 = vperm.xlu1 %9592, %v11373_v42   ;;  %9115 = vmatpush.bf16.msra.mxu1 %v8597_v19 }
 0x175   :  { %v11441_v30 = vpop.permute.xlu0 %2832 }
 0x176   :  { %13978 = vst [vmem:[#allocation73_spill] sm:$0xff] %v11441_v30  ;;  %v11446_v43 = vpop.permute.xlu2 %492 }
 0x178   :  { %9116 = vmatpush.bf16.msra.mxu1 %v8596_v40  ;;  %v11453_v41 = vpop.permute.xlu1 %474 }
 0x179   :  { %13980 = vst [vmem:[#allocation75_spill] sm:$0xff] %v11453_v41  ;;  %v10994_v41 = vld [vmem:[#allocation4 + $0x8] sm:$0xff] }
 0x17a   :  { %v11642_v56 = vperm.slane %v10994_v41, 7 }
 0x17b   :  { %2923 = vperm.xlu0 %9900, %v11376_v38   ;;  %9595 = vset.pattern.permute.xlu2 %v11142_v20 }
 0x17c   :  { %9594 = vset.pattern.permute.xlu1 %v11145_v21  ;;  %9117 = vmatpush.bf16.msra.mxu1 %v8595_v36  ;;  %14023 = vst [vmem:[#allocation117_spill] sm:$0xff] %v11642_v56 }
 0x17e   :  { %v511_v8 = vpop.permute.xlu2 %510 }
 0x17f   :  { %v3382_v46 = vsub.f32 %v511_v8, %v11262_v52 }
 0x180   :  { %9118 = vmatpush.bf16.msra.mxu1 %v8594_v37 }
 0x181   :  { %v3894_v33 = vmul.f32 %v3382_v46, %v3382_v46 }
 0x183   :  { %9909 = vset.pattern.permute.xlu0 %v11064_v1  ;;  %601 = vperm.xlu2 %9595, %v11373_v42   ;;  %v4406_v31 = vmul.f32 -20000.0, %v3894_v33 }
 0x184   :  { %595 = vperm.xlu1 %9594, %v11373_v42  }
 0x185   :  { %v11451_v24 = vpop.permute.xlu0 %244 }
 0x186   :  { %v487_v29 = vpop.permute.xlu1 %486 }
 0x18b   :  { %238 = vperm.xlu0 %9909, %v11083_v7   ;;  %9597 = vset.pattern.permute.xlu2 %v11165_v26 }
 0x18c   :  { %9596 = vset.pattern.permute.xlu1 %v11244_v44 }
 0x18d   :  { %v11458_v54 = vpop.permute.xlu0 %438  ;;  %v523_v19 = vpop.permute.xlu2 %522 }
 0x18e   :  { %13981 = vst [vmem:[#allocation76_spill] sm:$0xff] %v11458_v54  ;;  %v3384_v51 = vsub.f32 %v523_v19, %v11262_v52  ;;  %v4918_v19 = vpack.c.bf16 %v4406_v31, %v4406_v31 }
 0x190   :  { %v3896_v49 = vmul.f32 %v3384_v51, %v3384_v51  ;;  %v5430_v33 = vunpack.c.l.bf16 %v4918_v19 }
 0x192   :  { %v4408_v36 = vmul.f32 -20000.0, %v3896_v49  ;;  %v5987_v31 = vmul.f32 1.442695, %v5430_v33  ;;  %v11502_v33 = vperm.slane %v11077_v5, 7 }
 0x193   :  { %529 = vperm.xlu0 %9909, %v11373_v42   ;;  %613 = vperm.xlu2 %9597, %v11373_v42  }
 0x194   :  { %607 = vperm.xlu1 %9596, %v11373_v42   ;;  %v4920_v8 = vpack.c.bf16 %v4408_v36, %v4408_v36  ;;  %13990 = vst [vmem:[#allocation85_spill] sm:$0xff] %v11502_v33 }
 0x195   :  { %v11463_v35 = vpop.permute.xlu0 %923 }
 0x196   :  { %13982 = vst [vmem:[#allocation77_spill] sm:$0xff] %v11463_v35  ;;  %v505_v0 = vpop.permute.xlu1 %504  ;;  %v10993_v35 = vld [vmem:[#allocation4] sm:$0xff] }
 0x197   :  { %v3381_v40 = vsub.f32 %v505_v0, %v11262_v52  ;;  %v5432_v0 = vunpack.c.l.bf16 %v4920_v8 }
 0x199   :  { %v3893_v23 = vmul.f32 %v3381_v40, %v3381_v40  ;;  %v11483_v40 = vperm.slane %v11114_v14, 4  ;;  %v5991_v36 = vmul.f32 1.442695, %v5432_v0  ;;  %v11492_v14 = vperm.slane %v11149_v22, 5 }
 0x19b   :  { %1014 = vperm.xlu0 %9909, %v11467_v45   ;;  %9599 = vset.pattern.permute.xlu2 %v11177_v28  ;;  %v4405_v37 = vmul.f32 -20000.0, %v3893_v23  ;;  %13986 = vst [vmem:[#allocation81_spill] sm:$0xff] %v11483_v40  ;;  %10001 = vpow2.f32 %v5991_v36  ;;  %v3378_v36 = vsub.f32 %v487_v29, %v11262_v52 }
 0x19c   :  { %9598 = vset.pattern.permute.xlu1 %v11064_v1  ;;  %13988 = vst [vmem:[#allocation83_spill] sm:$0xff] %v11492_v14  ;;  %10003 = vpow2.f32 %v5987_v31 }
 0x19d   :  { %v11474_v48 = vpop.permute.xlu0 %1408  ;;  %v4917_v51 = vpack.c.bf16 %v4405_v37, %v4405_v37 }
 0x19e   :  { %13984 = vst [vmem:[#allocation79_spill] sm:$0xff] %v11474_v48 }
 0x19f   :  { %v5429_v23 = vunpack.c.l.bf16 %v4917_v51 }
 0x1a1   :  { %v5985_v37 = vmul.f32 1.442695, %v5429_v23 }
 0x1a3   :  { %1499 = vperm.xlu0 %9909, %v11477_v50   ;;  %632 = vperm.xlu2 %9599, %v11101_v11   ;;  %10005 = vpow2.f32 %v5985_v37 }
 0x1a4   :  { %626 = vperm.xlu1 %9598, %v11101_v11  }
 0x1a5   :  { %v11486_v6 = vpop.permute.xlu0 %1893 }
 0x1a6   :  { %v517_v46 = vpop.permute.xlu1 %516  ;;  %13987 = vst [vmem:[#allocation82_spill] sm:$0xff] %v11486_v6 }
 0x1a7   :  { %v3383_v49 = vsub.f32 %v517_v46, %v11262_v52 }
 0x1a9   :  { %v3895_v30 = vmul.f32 %v3383_v49, %v3383_v49 }
 0x1ab   :  { %v4407_v32 = vmul.f32 -20000.0, %v3895_v30  ;;  %1984 = vperm.xlu0 %9909, %v11483_v40   ;;  %9601 = vset.pattern.permute.xlu2 %v11095_v10  ;;  %v10002_v30 = vpop.eup %10001 }
 0x1ac   :  { %9600 = vset.pattern.permute.xlu1 %v11073_v4  ;;  %v10004_v0 = vpop.eup %10003  ;;  %v6968_v22 = vpack.c.bf16 %v10002_v30, %v10002_v30  ;;  %v3890_v30 = vmul.f32 %v3378_v36, %v3378_v36 }
 0x1ad   :  { %v4919_v8 = vpack.c.bf16 %v4407_v32, %v4407_v32  ;;  %v11494_v51 = vpop.permute.xlu0 %2378  ;;  %v3379_v32 = vsub.f32 %v11446_v43, %v11262_v52  ;;  %v10006_v49 = vpop.eup %10005 }
 0x1ae   :  { %13989 = vst [vmem:[#allocation84_spill] sm:$0xff] %v11494_v51  ;;  %v6966_v51 = vpack.c.bf16 %v10004_v0, %v10004_v0  ;;  %v4402_v0 = vmul.f32 -20000.0, %v3890_v30 }
 0x1af   :  { %v5431_v46 = vunpack.c.l.bf16 %v4919_v8  ;;  %v3891_v31 = vmul.f32 %v3379_v32, %v3379_v32  ;;  %v8121_v8 = vunpack.c.l.b16 %v6968_v22 }
 0x1b1   :  { %v5989_v19 = vmul.f32 1.442695, %v5431_v46  ;;  %v6965_v46 = vpack.c.bf16 %v10006_v49, %v10006_v49  ;;  %v4403_v6 = vmul.f32 -20000.0, %v3891_v31 }
 0x1b3   :  { %2469 = vperm.xlu0 %9909, %v11492_v14   ;;  %644 = vperm.xlu2 %9601, %v11101_v11   ;;  %10007 = vpow2.f32 %v5989_v19  ;;  %v3377_v19 = vsub.f32 %v11437_v53, %v11262_v52  ;;  %v8118_v32 = vunpack.c.l.b16 %v6965_v46  ;;  %v4915_v49 = vpack.c.bf16 %v4403_v6, %v4403_v6 }
 0x1b4   :  { %638 = vperm.xlu1 %9600, %v11101_v11  }
 0x1b5   :  { %v11509_v43 = vpop.permute.xlu0 %2863  ;;  %v3889_v22 = vmul.f32 %v3377_v19, %v3377_v19  ;;  %v5427_v36 = vunpack.c.l.bf16 %v4915_v49 }
 0x1b6   :  { %13991 = vst [vmem:[#allocation86_spill] sm:$0xff] %v11509_v43  ;;  %v4914_v43 = vpack.c.bf16 %v4402_v0, %v4402_v0 }
 0x1b7   :  { %v4401_v53 = vmul.f32 -20000.0, %v3889_v22  ;;  %v5981_v19 = vmul.f32 1.442695, %v5427_v36 }
 0x1b8   :  { %v5426_v46 = vunpack.c.l.bf16 %v4914_v43 }
 0x1b9   :  { %v10008_v23 = vpop.eup %10007  ;;  %10009 = vpow2.f32 %v5981_v19 }
 0x1ba   :  { %v6967_v37 = vpack.c.bf16 %v10008_v23, %v10008_v23  ;;  %v8119_v23 = vunpack.c.l.b16 %v6966_v51 }
 0x1bb   :  { %2954 = vperm.xlu0 %9909, %v11502_v33   ;;  %9604 = vset.pattern.permute.xlu2 %v11110_v13 }
 0x1bc   :  { %9603 = vset.pattern.permute.xlu1 %v11092_v9  ;;  %v8120_v5 = vunpack.c.l.b16 %v6967_v37  ;;  %v8608_v61 = vpack.c.b16 %v8119_v23, %v8118_v32 }
 0x1be   :  { %v8609_v29 = vpack.c.b16 %v8121_v8, %v8120_v5  ;;  %v4913_v8 = vpack.c.bf16 %v4401_v53, %v4401_v53 }
 0x1bf   :  { %v10010_v43 = vpop.eup %10009 }
 0x1c0   :  { %9124 = vmatpush.bf16.msra.mxu2 %v8609_v29  ;;  %v5425_v6 = vunpack.c.l.bf16 %v4913_v8  ;;  %v5979_v29 = vmul.f32 1.442695, %v5426_v46  ;;  %v6963_v53 = vpack.c.bf16 %v10010_v43, %v10010_v43 }
 0x1c2   :  { %v5977_v23 = vmul.f32 1.442695, %v5425_v6  ;;  %10011 = vpow2.f32 %v5979_v29 }
 0x1c3   :  { %9914 = vset.pattern.permute.xlu0 %v11092_v9  ;;  %662 = vperm.xlu2 %9604, %v11101_v11  }
 0x1c4   :  { %656 = vperm.xlu1 %9603, %v11101_v11   ;;  %9125 = vmatpush.bf16.msra.mxu2 %v8608_v61 }
 0x1c5   :  { %v499_v37 = vpop.permute.xlu0 %498 }
 0x1c6   :  { %v3380_v31 = vsub.f32 %v499_v37, %v11262_v52 }
 0x1c8   :  { %v3892_v51 = vmul.f32 %v3380_v31, %v3380_v31  ;;  %v10012_v49 = vpop.eup %10011 }
 0x1c9   :  { %v6962_v8 = vpack.c.bf16 %v10012_v49, %v10012_v49 }
 0x1ca   :  { %v4404_v5 = vmul.f32 -20000.0, %v3892_v51  ;;  %v8116_v51 = vunpack.c.l.b16 %v6963_v53 }
 0x1cb   :  { %559 = vperm.xlu0 %9914, %v11373_v42   ;;  %9606 = vset.pattern.permute.xlu2 %v11171_v27  ;;  %v8115_v6 = vunpack.c.l.b16 %v6962_v8 }
 0x1cc   :  { %v4916_v30 = vpack.c.bf16 %v4404_v5, %v4404_v5  ;;  %9605 = vset.pattern.permute.xlu1 %v11067_v2 }
 0x1cd   :  { %v11519_v61 = vpop.permute.xlu0 %983 }
 0x1ce   :  { %13992 = vst [vmem:[#allocation87_spill] sm:$0xff] %v11519_v61  ;;  %v5428_v32 = vunpack.c.l.bf16 %v4916_v30  ;;  %v11632_v61 = vperm.slane %v10993_v35, 6 }
 0x1d0   :  { %v5983_v22 = vmul.f32 1.442695, %v5428_v32  ;;  %14020 = vst [vmem:[#allocation114_spill] sm:$0xff] %v11632_v61 }
 0x1d2   :  { %10013 = vpow2.f32 %v5983_v22 }
 0x1d3   :  { %10015 = vpow2.f32 %v5977_v23  ;;  %1044 = vperm.xlu0 %9914, %v11467_v45   ;;  %674 = vperm.xlu2 %9606, %v11101_v11  }
 0x1d4   :  { %668 = vperm.xlu1 %9605, %v11101_v11  }
 0x1d5   :  { %v11524_v0 = vpop.permute.xlu0 %1468 }
 0x1d6   :  { %13993 = vst [vmem:[#allocation88_spill] sm:$0xff] %v11524_v0  ;;  %v11618_v0 = vld [vmem:[#allocation4 + $0x18] sm:$0xff] }
 0x1d7   :  { %v11621_v57 = vperm.slane %v11618_v0, 4 }
 0x1d8   :  { %v10014_v37 = vpop.eup %10013 }
 0x1d9   :  { %v10016_v36 = vpop.eup %10015  ;;  %v6964_v31 = vpack.c.bf16 %v10014_v37, %v10014_v37  ;;  %14016 = vst [vmem:[#allocation110_spill] sm:$0xff] %v11621_v57 }
 0x1da   :  { %v6961_v19 = vpack.c.bf16 %v10016_v36, %v10016_v36 }
 0x1db   :  { %1529 = vperm.xlu0 %9914, %v11477_v50   ;;  %9608 = vset.pattern.permute.xlu2 %v11145_v21  ;;  %v8117_v46 = vunpack.c.l.b16 %v6964_v31  ;;  %v11572_v31 = vpop.permute.xlu2 %541 }
 0x1dc   :  { %9607 = vset.pattern.permute.xlu1 %v11124_v16  ;;  %v8114_v29 = vunpack.c.l.b16 %v6961_v19  ;;  %14001 = vst [vmem:[#allocation96_spill] sm:$0xff] %v11572_v31 }
 0x1dd   :  { %v8607_v5 = vpack.c.b16 %v8117_v46, %v8116_v51  ;;  %v11529_v30 = vpop.permute.xlu0 %1953  ;;  %v10991_v51 = vld [vmem:[#allocation4 + $0x10] sm:$0xff] }
 0x1de   :  { %13994 = vst [vmem:[#allocation89_spill] sm:$0xff] %v11529_v30  ;;  %v8606_v32 = vpack.c.b16 %v8115_v6, %v8114_v29  ;;  %v11579_v46 = vperm.slane %v10991_v51, 7 }
 0x1df   :  { %9126 = vmatpush.bf16.msra.mxu2 %v8607_v5 }
 0x1e0   :  { %14003 = vst [vmem:[#allocation98_spill] sm:$0xff] %v11579_v46 }
 0x1e3   :  { %2014 = vperm.xlu0 %9914, %v11483_v40   ;;  %692 = vperm.xlu2 %9608, %v11101_v11   ;;  %v11581_v19 = vpop.permute.xlu2 %553 }
 0x1e4   :  { %686 = vperm.xlu1 %9607, %v11101_v11   ;;  %9127 = vmatpush.bf16.msra.mxu2 %v8606_v32  ;;  %14004 = vst [vmem:[#allocation99_spill] sm:$0xff] %v11581_v19  ;;  %v11595_v32 = vpop.permute.xlu1 %535 }
 0x1e5   :  { %v11534_v23 = vpop.permute.xlu0 %2438  ;;  %14008 = vst [vmem:[#allocation103_spill] sm:$0xff] %v11595_v32  ;;  %v14045_v32 = vld [vmem:[#allocation27_spill] sm:$0xff] }
 0x1e6   :  { %13995 = vst [vmem:[#allocation90_spill] sm:$0xff] %v11534_v23 }
 0x1eb   :  { %2499 = vperm.xlu0 %9914, %v11492_v14   ;;  %9610 = vset.pattern.permute.xlu2 %v11244_v44  ;;  %v11588_v6 = vpop.permute.xlu2 %571 }
 0x1ec   :  { %9609 = vset.pattern.permute.xlu1 %v11142_v20  ;;  %14006 = vst [vmem:[#allocation101_spill] sm:$0xff] %v11588_v6 }
 0x1ed   :  { %v11541_v22 = vpop.permute.xlu0 %2923 }
 0x1ee   :  { %13996 = vst [vmem:[#allocation91_spill] sm:$0xff] %v11541_v22  ;;  %v11604_v22 = vpop.permute.xlu1 %547 }
 0x1ef   :  { %14011 = vst [vmem:[#allocation106_spill] sm:$0xff] %v11604_v22 }
 0x1f3   :  { %2984 = vperm.xlu0 %9914, %v11502_v33   ;;  %704 = vperm.xlu2 %9610, %v11101_v11   ;;  %v11597_v51 = vpop.permute.xlu2 %583 }
 0x1f4   :  { %698 = vperm.xlu1 %9609, %v11101_v11   ;;  %14009 = vst [vmem:[#allocation104_spill] sm:$0xff] %v11597_v51 }
 0x1fb   :  { %9919 = vset.pattern.permute.xlu0 %v11162_v25  ;;  %9612 = vset.pattern.permute.xlu2 %v11064_v1 }
 0x1fc   :  { %9611 = vset.pattern.permute.xlu1 %v11162_v25 }
 0x1fd   :  { %v11547_v43 = vpop.permute.xlu0 %238 }
 0x203   :  { %619 = vperm.xlu0 %9919, %v11373_v42   ;;  %723 = vperm.xlu2 %9612, %v11133_v18  }
 0x204   :  { %716 = vperm.xlu1 %9611, %v11101_v11  }
 0x205   :  { %v11552_v49 = vpop.permute.xlu0 %529 }
 0x206   :  { %13997 = vst [vmem:[#allocation92_spill] sm:$0xff] %v11552_v49  ;;  %v3342_v49 = vsub.f32 %v14045_v32, %v11262_v52 }
 0x20b   :  { %1104 = vperm.xlu0 %9919, %v11467_v45   ;;  %9614 = vset.pattern.permute.xlu2 %v11073_v4 }
 0x20c   :  { %9613 = vset.pattern.permute.xlu1 %v11177_v28 }
 0x20d   :  { %v11557_v53 = vpop.permute.xlu0 %1014 }
 0x20e   :  { %13998 = vst [vmem:[#allocation93_spill] sm:$0xff] %v11557_v53 }
 0x213   :  { %1589 = vperm.xlu0 %9919, %v11477_v50   ;;  %735 = vperm.xlu2 %9614, %v11133_v18  }
 0x214   :  { %729 = vperm.xlu1 %9613, %v11133_v18  }
 0x215   :  { %v11562_v37 = vpop.permute.xlu0 %1499 }
 0x216   :  { %13999 = vst [vmem:[#allocation94_spill] sm:$0xff] %v11562_v37  ;;  %v14014_v37 = vld [vmem:[#allocation13_spill] sm:$0xff] }
 0x21b   :  { %2074 = vperm.xlu0 %9919, %v11483_v40   ;;  %9616 = vset.pattern.permute.xlu2 %v11092_v9 }
 0x21c   :  { %9615 = vset.pattern.permute.xlu1 %v11070_v3 }
 0x21d   :  { %v11567_v36 = vpop.permute.xlu0 %1984 }
 0x21e   :  { %14000 = vst [vmem:[#allocation95_spill] sm:$0xff] %v11567_v36  ;;  %v11611_v36 = vpop.permute.xlu1 %565 }
 0x21f   :  { %14013 = vst [vmem:[#allocation108_spill] sm:$0xff] %v11611_v36  ;;  %v14050_v36 = vld [vmem:[#allocation41_spill] sm:$0xff] }
 0x220   :  { %v3343_v6 = vsub.f32 %v14050_v36, %v11262_v52 }
 0x223   :  { %2559 = vperm.xlu0 %9919, %v11492_v14   ;;  %753 = vperm.xlu2 %9616, %v11133_v18  }
 0x224   :  { %747 = vperm.xlu1 %9615, %v11133_v18  }
 0x225   :  { %v11574_v8 = vpop.permute.xlu0 %2469 }
 0x226   :  { %14002 = vst [vmem:[#allocation97_spill] sm:$0xff] %v11574_v8  ;;  %v602_v8 = vpop.permute.xlu2 %601  ;;  %v11616_v48 = vpop.permute.xlu1 %577 }
 0x227   :  { %14015 = vst [vmem:[#allocation109_spill] sm:$0xff] %v11616_v48  ;;  %v3397_v15 = vsub.f32 %v602_v8, %v11262_v52 }
 0x22b   :  { %3044 = vperm.xlu0 %9919, %v11502_v33   ;;  %9618 = vset.pattern.permute.xlu2 %v11067_v2 }
 0x22c   :  { %9617 = vset.pattern.permute.xlu1 %v11110_v13 }
 0x22d   :  { %v11585_v5 = vpop.permute.xlu0 %2954 }
 0x22e   :  { %14005 = vst [vmem:[#allocation100_spill] sm:$0xff] %v11585_v5  ;;  %v614_v30 = vpop.permute.xlu2 %613 }
 0x22f   :  { %v3399_v59 = vsub.f32 %v614_v30, %v11262_v52 }
 0x231   :  { %v3911_v35 = vmul.f32 %v3399_v59, %v3399_v59 }
 0x233   :  { %3238 = vperm.xlu0 %9919, %v11579_v46   ;;  %765 = vperm.xlu2 %9618, %v11133_v18   ;;  %v4423_v30 = vmul.f32 -20000.0, %v3911_v35 }
 0x234   :  { %759 = vperm.xlu1 %9617, %v11133_v18  }
 0x235   :  { %v4935_v38 = vpack.c.bf16 %v4423_v30, %v4423_v30 }
 0x23b   :  { %9932 = vset.pattern.permute.xlu0 %v11165_v26  ;;  %9620 = vset.pattern.permute.xlu2 %v11124_v16 }
 0x23c   :  { %9619 = vset.pattern.permute.xlu1 %v11127_v17 }
 0x23d   :  { %v11593_v29 = vpop.permute.xlu0 %559 }
 0x23e   :  { %14007 = vst [vmem:[#allocation102_spill] sm:$0xff] %v11593_v29 }
 0x243   :  { %710 = vperm.xlu0 %9932, %v11101_v11   ;;  %783 = vperm.xlu2 %9620, %v11133_v18  }
 0x244   :  { %777 = vperm.xlu1 %9619, %v11133_v18  }
 0x245   :  { %v11602_v5 = vpop.permute.xlu0 %1044 }
 0x246   :  { %14010 = vst [vmem:[#allocation105_spill] sm:$0xff] %v11602_v5  ;;  %v11630_v5 = vpop.permute.xlu1 %595 }
 0x247   :  { %14019 = vst [vmem:[#allocation113_spill] sm:$0xff] %v11630_v5 }
 0x24b   :  { %1195 = vperm.xlu0 %9932, %v11107_v12   ;;  %9622 = vset.pattern.permute.xlu2 %v11142_v20 }
 0x24c   :  { %9621 = vset.pattern.permute.xlu1 %v11145_v21 }
 0x24d   :  { %v11609_v23 = vpop.permute.xlu0 %1529 }
 0x24e   :  { %14012 = vst [vmem:[#allocation107_spill] sm:$0xff] %v11609_v23  ;;  %v11627_v23 = vpop.permute.xlu2 %632  ;;  %v608_v63 = vpop.permute.xlu1 %607 }
 0x24f   :  { %14018 = vst [vmem:[#allocation112_spill] sm:$0xff] %v11627_v23  ;;  %v3398_v47 = vsub.f32 %v608_v63, %v11262_v52  ;;  %v14026_v63 = vld [vmem:[#allocation29_spill] sm:$0xff] }
 0x251   :  { %v3910_v23 = vmul.f32 %v3398_v47, %v3398_v47 }
 0x253   :  { %1680 = vperm.xlu0 %9932, %v14014_v37   ;;  %795 = vperm.xlu2 %9622, %v11133_v18   ;;  %v4422_v41 = vmul.f32 -20000.0, %v3910_v23 }
 0x254   :  { %789 = vperm.xlu1 %9621, %v11133_v18  }
 0x255   :  { %v11623_v53 = vpop.permute.xlu0 %2014  ;;  %v4934_v8 = vpack.c.bf16 %v4422_v41, %v4422_v41 }
 0x256   :  { %14017 = vst [vmem:[#allocation111_spill] sm:$0xff] %v11623_v53  ;;  %v11638_v53 = vpop.permute.xlu2 %644 }
 0x257   :  { %14022 = vst [vmem:[#allocation116_spill] sm:$0xff] %v11638_v53  ;;  %v3909_v53 = vmul.f32 %v3397_v15, %v3397_v15  ;;  %v5446_v23 = vunpack.c.l.bf16 %v4934_v8 }
 0x259   :  { %v4421_v39 = vmul.f32 -20000.0, %v3909_v53  ;;  %v6019_v41 = vmul.f32 1.442695, %v5446_v23 }
 0x25b   :  { %2165 = vperm.xlu0 %9932, %v11621_v57   ;;  %9624 = vset.pattern.permute.xlu2 %v11162_v25  ;;  %v4933_v35 = vpack.c.bf16 %v4421_v39, %v4421_v39 }
 0x25c   :  { %9623 = vset.pattern.permute.xlu1 %v11165_v26 }
 0x25d   :  { %v11634_v54 = vpop.permute.xlu0 %2499  ;;  %v5445_v55 = vunpack.c.l.bf16 %v4933_v35 }
 0x25e   :  { %14021 = vst [vmem:[#allocation115_spill] sm:$0xff] %v11634_v54  ;;  %v11650_v62 = vpop.permute.xlu2 %662 }
 0x25f   :  { %14025 = vst [vmem:[#allocation119_spill] sm:$0xff] %v11650_v62  ;;  %v11658_v62 = vpop.permute.xlu1 %626 }
 0x260   :  { %14028 = vst [vmem:[#allocation120_spill] sm:$0xff] %v11658_v62 }
 0x263   :  { %2650 = vperm.xlu0 %9932, %v11632_v61   ;;  %813 = vperm.xlu2 %9624, %v11133_v18  }
 0x264   :  { %807 = vperm.xlu1 %9623, %v11133_v18  }
 0x265   :  { %v11648_v54 = vpop.permute.xlu0 %2984 }
 0x266   :  { %14024 = vst [vmem:[#allocation118_spill] sm:$0xff] %v11648_v54  ;;  %v11655_v59 = vpop.permute.xlu2 %674 }
 0x267   :  { %14027 = vst [vmem:[#allocation29_spill] sm:$0xff] %v11655_v59 }
 0x26b   :  { %3135 = vperm.xlu0 %9932, %v11642_v56   ;;  %9626 = vset.pattern.permute.xlu2 %v11177_v28  ;;  %v5447_v56 = vunpack.c.l.bf16 %v4935_v38  ;;  %v11666_v38 = vpop.permute.xlu1 %638 }
 0x26c   :  { %9625 = vset.pattern.permute.xlu1 %v11064_v1  ;;  %14030 = vst [vmem:[#allocation122_spill] sm:$0xff] %v11666_v38 }
 0x26d   :  { %v6021_v30 = vmul.f32 1.442695, %v5447_v56 }
 0x26e   :  { %v11668_v62 = vpop.permute.xlu2 %692 }
 0x26f   :  { %10017 = vpow2.f32 %v6021_v30 }
 0x270   :  { %10019 = vpow2.f32 %v6019_v41  ;;  %v14033_v41 = vld [vmem:[#allocation16_spill] sm:$0xff] }
 0x273   :  { %9935 = vset.pattern.permute.xlu0 %v11244_v44  ;;  %826 = vperm.xlu2 %9626, %v14026_v63  }
 0x274   :  { %820 = vperm.xlu1 %9625, %v14026_v63  }
 0x275   :  { %v620_v54 = vpop.permute.xlu0 %619 }
 0x276   :  { %v3400_v47 = vsub.f32 %v620_v54, %v11262_v52  ;;  %v6017_v54 = vmul.f32 1.442695, %v5445_v55  ;;  %v11677_v35 = vpop.permute.xlu2 %704 }
 0x278   :  { %v3912_v15 = vmul.f32 %v3400_v47, %v3400_v47  ;;  %v11675_v47 = vpop.permute.xlu1 %656 }
 0x279   :  { %14032 = vst [vmem:[#allocation124_spill] sm:$0xff] %v11675_v47  ;;  %v14036_v47 = vld [vmem:[#allocation19_spill] sm:$0xff] }
 0x27a   :  { %v4424_v53 = vmul.f32 -20000.0, %v3912_v15 }
 0x27b   :  { %316 = vperm.xlu0 %9935, %v11083_v7   ;;  %9628 = vset.pattern.permute.xlu2 %v11070_v3  ;;  %v10018_v7 = vpop.eup %10017 }
 0x27c   :  { %v4936_v59 = vpack.c.bf16 %v4424_v53, %v4424_v53  ;;  %9627 = vset.pattern.permute.xlu1 %v11095_v10  ;;  %v6983_v15 = vpack.c.bf16 %v10018_v7, %v10018_v7 }
 0x27d   :  { %v11664_v34 = vpop.permute.xlu0 %1104 }
 0x27e   :  { %14029 = vst [vmem:[#allocation121_spill] sm:$0xff] %v11664_v34  ;;  %v5448_v39 = vunpack.c.l.bf16 %v4936_v59  ;;  %v10020_v59 = vpop.eup %10019  ;;  %v11686_v38 = vpop.permute.xlu2 %723 }
 0x27f   :  { %v6982_v53 = vpack.c.bf16 %v10020_v59, %v10020_v59 }
 0x280   :  { %v6023_v56 = vmul.f32 1.442695, %v5448_v39  ;;  %v11684_v34 = vpop.permute.xlu1 %668 }
 0x281   :  { %14035 = vst [vmem:[#allocation126_spill] sm:$0xff] %v11684_v34  ;;  %v8135_v7 = vunpack.c.l.b16 %v6982_v53  ;;  %v14044_v34 = vld [vmem:[#allocation30_spill] sm:$0xff] }
 0x282   :  { %10021 = vpow2.f32 %v6023_v56  ;;  %v3344_v28 = vsub.f32 %v14044_v34, %v11262_v52 }
 0x283   :  { %10023 = vpow2.f32 %v6017_v54  ;;  %801 = vperm.xlu0 %9935, %v11133_v18   ;;  %844 = vperm.xlu2 %9628, %v14026_v63   ;;  %v8136_v18 = vunpack.c.l.b16 %v6983_v15 }
 0x284   :  { %838 = vperm.xlu1 %9627, %v14026_v63  }
 0x285   :  { %v11673_v8 = vpop.permute.xlu0 %1589 }
 0x286   :  { %14031 = vst [vmem:[#allocation123_spill] sm:$0xff] %v11673_v8 }
 0x288   :  { %v10022_v55 = vpop.eup %10021  ;;  %v11691_v15 = vpop.permute.xlu1 %686 }
 0x289   :  { %v10024_v23 = vpop.eup %10023  ;;  %v6984_v30 = vpack.c.bf16 %v10022_v55, %v10022_v55 }
 0x28a   :  { %v6981_v54 = vpack.c.bf16 %v10024_v23, %v10024_v23  ;;  %v11693_v23 = vpop.permute.xlu2 %735 }
 0x28b   :  { %1286 = vperm.xlu0 %9935, %v14033_v41   ;;  %9630 = vset.pattern.permute.xlu2 %v11110_v13  ;;  %v8137_v39 = vunpack.c.l.b16 %v6984_v30  ;;  %v14048_v13 = vld [vmem:[#allocation47_spill] sm:$0xff] }
 0x28c   :  { %9629 = vset.pattern.permute.xlu1 %v11092_v9  ;;  %v8134_v55 = vunpack.c.l.b16 %v6981_v54  ;;  %v3348_v32 = vsub.f32 %v14048_v13, %v11262_v52 }
 0x28d   :  { %v8617_v56 = vpack.c.b16 %v8137_v39, %v8136_v18  ;;  %v11682_v8 = vpop.permute.xlu0 %2074  ;;  %v14038_v18 = vld [vmem:[#allocation20_spill] sm:$0xff] }
 0x28e   :  { %14034 = vst [vmem:[#allocation125_spill] sm:$0xff] %v11682_v8  ;;  %v8616_v59 = vpack.c.b16 %v8135_v7, %v8134_v55  ;;  %v11712_v55 = vperm.slane %v11618_v0, 7  ;;  %v3860_v13 = vmul.f32 %v3348_v32, %v3348_v32 }
 0x28f   :  { %9137 = vmatpush.bf16.msra.mxu3 %v8617_v56  ;;  %v14040_v56 = vld [vmem:[#allocation24_spill] sm:$0xff] }
 0x290   :  { %v11700_v53 = vpop.permute.xlu1 %698 }
 0x292   :  { %v11702_v39 = vpop.permute.xlu2 %753 }
 0x293   :  { %1771 = vperm.xlu0 %9935, %v14036_v47   ;;  %856 = vperm.xlu2 %9630, %v14026_v63  }
 0x294   :  { %850 = vperm.xlu1 %9629, %v14026_v63   ;;  %9138 = vmatpush.bf16.msra.mxu3 %v8616_v59 }
 0x295   :  { %v11695_v30 = vpop.permute.xlu0 %2559 }
 0x296   :  { %14037 = vst [vmem:[#allocation127_spill] sm:$0xff] %v11695_v30 }
 0x298   :  { %v11709_v7 = vpop.permute.xlu1 %716 }
 0x29a   :  { %v11714_v59 = vpop.permute.xlu2 %765 }
 0x29b   :  { %2256 = vperm.xlu0 %9935, %v14038_v18   ;;  %9632 = vset.pattern.permute.xlu2 %v11127_v17 }
 0x29c   :  { %9631 = vset.pattern.permute.xlu1 %v11171_v27 }
 0x29d   :  { %v11704_v54 = vpop.permute.xlu0 %3044 }
 0x29e   :  { %14039 = vst [vmem:[#allocation128_spill] sm:$0xff] %v11704_v54 }
 0x2a0   :  { %v11721_v54 = vpop.permute.xlu1 %729 }
 0x2a2   :  { %v11723_v18 = vpop.permute.xlu2 %783 }
 0x2a3   :  { %2741 = vperm.xlu0 %9935, %v14040_v56   ;;  %874 = vperm.xlu2 %9632, %v14026_v63  }
 0x2a4   :  { %868 = vperm.xlu1 %9631, %v14026_v63  }
 0x2a5   :  { %v11718_v30 = vpop.permute.xlu0 %3238 }
 0x2a6   :  { %14041 = vst [vmem:[#allocation129_spill] sm:$0xff] %v11718_v30  ;;  %v14042_v30 = vld [vmem:[#allocation25_spill] sm:$0xff] }
 0x2a7   :  { %v3341_v41 = vsub.f32 %v14042_v30, %v11262_v52 }
 0x2a8   :  { %v11730_v8 = vpop.permute.xlu1 %747 }
 0x2a9   :  { %v3853_v60 = vmul.f32 %v3341_v41, %v3341_v41  ;;  %v3854_v41 = vmul.f32 %v3342_v49, %v3342_v49  ;;  %v14052_v49 = vld [vmem:[#allocation32_spill] sm:$0xff] }
 0x2ab   :  { %3323 = vperm.xlu0 %9935, %v11712_v55   ;;  %9634 = vset.pattern.permute.xlu2 %v11145_v21  ;;  %v4365_v30 = vmul.f32 -20000.0, %v3853_v60  ;;  %v14051_v60 = vld [vmem:[#allocation44_spill] sm:$0xff]  ;;  %v4366_v51 = vmul.f32 -20000.0, %v3854_v41  ;;  %v4372_v41 = vmul.f32 -20000.0, %v3860_v13 }
 0x2ac   :  { %9633 = vset.pattern.permute.xlu1 %v11124_v16  ;;  %v3346_v46 = vsub.f32 %v14051_v60, %v11262_v52 }
 0x2ad   :  { %v11732_v47 = vpop.permute.xlu2 %795  ;;  %v4884_v57 = vpack.c.bf16 %v4372_v41, %v4372_v41 }
 0x2b0   :  { %v11741_v21 = vpop.permute.xlu1 %759 }
 0x2b3   :  { %9939 = vset.pattern.permute.xlu0 %v11124_v16  ;;  %886 = vperm.xlu2 %9634, %v14026_v63  }
 0x2b4   :  { %880 = vperm.xlu1 %9633, %v14026_v63  }
 0x2b5   :  { %v11728_v0 = vpop.permute.xlu0 %710 }
 0x2b8   :  { %v11757_v19 = vpop.permute.xlu1 %777 }
 0x2bb   :  { %589 = vperm.xlu0 %9939, %v11373_v42   ;;  %9636 = vset.pattern.permute.xlu2 %v11165_v26  ;;  %v3856_v42 = vmul.f32 %v3344_v28, %v3344_v28  ;;  %v14046_v26 = vld [vmem:[#allocation34_spill] sm:$0xff] }
 0x2bc   :  { %9635 = vset.pattern.permute.xlu1 %v11244_v44  ;;  %v3347_v22 = vsub.f32 %v14046_v26, %v11262_v52  ;;  %v14049_v26 = vld [vmem:[#allocation39_spill] sm:$0xff]  ;;  %v14053_v44 = vld [vmem:[#allocation36_spill] sm:$0xff] }
 0x2bd   :  { %v11739_v56 = vpop.permute.xlu0 %1195  ;;  %v814_v31 = vpop.permute.xlu2 %813  ;;  %v4368_v28 = vmul.f32 -20000.0, %v3856_v42 }
 0x2be   :  { %14043 = vst [vmem:[#allocation25_spill] sm:$0xff] %v11739_v56  ;;  %v3432_v34 = vsub.f32 %v814_v31, %v11262_v52  ;;  %v3859_v29 = vmul.f32 %v3347_v22, %v3347_v22  ;;  %v3339_v31 = vsub.f32 %v14052_v49, %v11262_v52  ;;  %v3855_v22 = vmul.f32 %v3343_v6, %v3343_v6 }
 0x2bf   :  { %v4880_v5 = vpack.c.bf16 %v4368_v28, %v4368_v28  ;;  %v3340_v49 = vsub.f32 %v14053_v44, %v11262_v52 }
 0x2c0   :  { %v3944_v48 = vmul.f32 %v3432_v34, %v3432_v34  ;;  %v4371_v20 = vmul.f32 -20000.0, %v3859_v29  ;;  %v4878_v34 = vpack.c.bf16 %v4366_v51, %v4366_v51 }
 0x2c1   :  { %v5392_v29 = vunpack.c.l.bf16 %v4880_v5  ;;  %v3852_v61 = vmul.f32 %v3340_v49, %v3340_v49  ;;  %v5396_v49 = vunpack.c.l.bf16 %v4884_v57 }
 0x2c2   :  { %v4456_v60 = vmul.f32 -20000.0, %v3944_v48  ;;  %v5390_v51 = vunpack.c.l.bf16 %v4878_v34 }
 0x2c3   :  { %1074 = vperm.xlu0 %9939, %v11467_v45   ;;  %904 = vperm.xlu2 %9636, %v14026_v63   ;;  %v3349_v45 = vsub.f32 %v14049_v26, %v11262_v52  ;;  %v3858_v26 = vmul.f32 %v3346_v46, %v3346_v46  ;;  %v14055_v46 = vld [vmem:[#allocation50_spill] sm:$0xff]  ;;  %v5911_v44 = vmul.f32 1.442695, %v5392_v29  ;;  %v4364_v34 = vmul.f32 -20000.0, %v3852_v61 }
 0x2c4   :  { %898 = vperm.xlu1 %9635, %v14026_v63   ;;  %v4968_v48 = vpack.c.bf16 %v4456_v60, %v4456_v60 }
 0x2c5   :  { %v11752_v56 = vpop.permute.xlu0 %1680  ;;  %v3861_v42 = vmul.f32 %v3349_v45, %v3349_v45  ;;  %v4883_v45 = vpack.c.bf16 %v4371_v20, %v4371_v20  ;;  %v4370_v6 = vmul.f32 -20000.0, %v3858_v26 }
 0x2c6   :  { %14047 = vst [vmem:[#allocation30_spill] sm:$0xff] %v11752_v56  ;;  %v4877_v56 = vpack.c.bf16 %v4365_v30, %v4365_v30  ;;  %v3851_v30 = vmul.f32 %v3339_v31, %v3339_v31  ;;  %v11772_v32 = vpop.permute.xlu1 %789 }
 0x2c7   :  { %v4373_v28 = vmul.f32 -20000.0, %v3861_v42  ;;  %v5395_v13 = vunpack.c.l.bf16 %v4883_v45  ;;  %v4882_v5 = vpack.c.bf16 %v4370_v6, %v4370_v6  ;;  %v14056_v42 = vld [vmem:[#allocation35_spill] sm:$0xff] }
 0x2c8   :  { %v5389_v36 = vunpack.c.l.bf16 %v4877_v56  ;;  %v4363_v31 = vmul.f32 -20000.0, %v3851_v30  ;;  %v5907_v30 = vmul.f32 1.442695, %v5390_v51  ;;  %v4876_v51 = vpack.c.bf16 %v4364_v34, %v4364_v34 }
 0x2c9   :  { %v4885_v16 = vpack.c.bf16 %v4373_v28, %v4373_v28  ;;  %v5917_v29 = vmul.f32 1.442695, %v5395_v13  ;;  %v5394_v6 = vunpack.c.l.bf16 %v4882_v5 }
 0x2ca   :  { %v5905_v56 = vmul.f32 1.442695, %v5389_v36  ;;  %v5480_v36 = vunpack.c.l.bf16 %v4968_v48  ;;  %v4875_v60 = vpack.c.bf16 %v4363_v31, %v4363_v31 }
 0x2cb   :  { %1559 = vperm.xlu0 %9939, %v11477_v50   ;;  %9638 = vset.pattern.permute.xlu2 %v11064_v1  ;;  %v4367_v1 = vmul.f32 -20000.0, %v3855_v22  ;;  %v3420_v22 = vsub.f32 %v14056_v42, %v11262_v52  ;;  %v5397_v45 = vunpack.c.l.bf16 %v4885_v16  ;;  %v5919_v16 = vmul.f32 1.442695, %v5396_v49 }
 0x2cc   :  { %9637 = vset.pattern.permute.xlu1 %v11162_v25  ;;  %v3345_v25 = vsub.f32 %v14055_v46, %v11262_v52  ;;  %10025 = vpow2.f32 %v5905_v56  ;;  %v3338_v56 = vsub.f32 %v11451_v24, %v11262_v52  ;;  %v6087_v48 = vmul.f32 1.442695, %v5480_v36 }
 0x2cd   :  { %v11774_v50 = vpop.permute.xlu0 %2165  ;;  %v4879_v20 = vpack.c.bf16 %v4367_v1, %v4367_v1  ;;  %10027 = vpow2.f32 %v5911_v44  ;;  %v3932_v46 = vmul.f32 %v3420_v22, %v3420_v22  ;;  %v5387_v57 = vunpack.c.l.bf16 %v4875_v60 }
 0x2ce   :  { %14054 = vst [vmem:[#allocation27_spill] sm:$0xff] %v11774_v50  ;;  %v3857_v26 = vmul.f32 %v3345_v25, %v3345_v25  ;;  %v14057_v25 = vld [vmem:[#allocation51_spill] sm:$0xff]  ;;  %10029 = vpow2.f32 %v5907_v30  ;;  %v5921_v13 = vmul.f32 1.442695, %v5397_v45  ;;  %v5915_v22 = vmul.f32 1.442695, %v5394_v6 }
 0x2cf   :  { %v5391_v1 = vunpack.c.l.bf16 %v4879_v20  ;;  %v3425_v42 = vsub.f32 %v14057_v25, %v11262_v52  ;;  %10031 = vpow2.f32 %v5917_v29  ;;  %v3337_v20 = vsub.f32 %v11547_v43, %v11262_v52 }
 0x2d0   :  { %v4369_v50 = vmul.f32 -20000.0, %v3857_v26  ;;  %v4444_v26 = vmul.f32 -20000.0, %v3932_v46  ;;  %v3850_v34 = vmul.f32 %v3338_v56, %v3338_v56  ;;  %10033 = vpow2.f32 %v6087_v48 }
 0x2d1   :  { %v5909_v24 = vmul.f32 1.442695, %v5391_v1  ;;  %v3937_v30 = vmul.f32 %v3425_v42, %v3425_v42  ;;  %10035 = vpow2.f32 %v5919_v16  ;;  %v3849_v43 = vmul.f32 %v3337_v20, %v3337_v20 }
 0x2d2   :  { %v10026_v44 = vpop.eup %10025  ;;  %v4881_v36 = vpack.c.bf16 %v4369_v50, %v4369_v50  ;;  %10037 = vpow2.f32 %v5921_v13  ;;  %v5901_v25 = vmul.f32 1.442695, %v5387_v57  ;;  %v4956_v1 = vpack.c.bf16 %v4444_v26, %v4444_v26 }
 0x2d3   :  { %2044 = vperm.xlu0 %9939, %v11483_v40   ;;  %917 = vperm.xlu2 %9638, %v11341_v58   ;;  %v10028_v60 = vpop.eup %10027  ;;  %v6925_v45 = vpack.c.bf16 %v10026_v44, %v10026_v44  ;;  %10039 = vpow2.f32 %v5915_v22  ;;  %v4449_v46 = vmul.f32 -20000.0, %v3937_v30 }
 0x2d4   :  { %910 = vperm.xlu1 %9637, %v14026_v63   ;;  %v5393_v6 = vunpack.c.l.bf16 %v4881_v36  ;;  %10041 = vpow2.f32 %v5909_v24  ;;  %v6928_v48 = vpack.c.bf16 %v10028_v60, %v10028_v60  ;;  %v5468_v44 = vunpack.c.l.bf16 %v4956_v1 }
 0x2d5   :  { %v11788_v61 = vpop.permute.xlu0 %2650  ;;  %v11802_v24 = vunpack.c.l.b16 %v6925_v45  ;;  %v4961_v26 = vpack.c.bf16 %v4449_v46, %v4449_v46  ;;  %v3412_v45 = vsub.f32 %v11668_v62, %v11262_v52 }
 0x2d6   :  { %v808_v41 = vpop.permute.xlu1 %807  ;;  %14058 = vst [vmem:[#allocation34_spill] sm:$0xff] %v11788_v61  ;;  %v5913_v13 = vmul.f32 1.442695, %v5393_v6  ;;  %v6063_v6 = vmul.f32 1.442695, %v5468_v44 }
 0x2d7   :  { %v3431_v28 = vsub.f32 %v808_v41, %v11262_v52  ;;  %v5388_v41 = vunpack.c.l.bf16 %v4876_v51  ;;  %v4361_v51 = vmul.f32 -20000.0, %v3849_v43  ;;  %v3924_v44 = vmul.f32 %v3412_v45, %v3412_v45 }
 0x2d9   :  { %v3943_v31 = vmul.f32 %v3431_v28, %v3431_v28  ;;  %v11795_v28 = vpop.eup %10029  ;;  %v5903_v56 = vmul.f32 1.442695, %v5388_v41  ;;  %v11808_v41 = vunpack.c.l.b16 %v6928_v48 }
 0x2da   :  { %v10032_v50 = vpop.eup %10031 }
 0x2db   :  { %v4455_v5 = vmul.f32 -20000.0, %v3943_v31  ;;  %2529 = vperm.xlu0 %9939, %v11492_v14   ;;  %9640 = vset.pattern.permute.xlu2 %v11095_v10  ;;  %v4362_v31 = vmul.f32 -20000.0, %v3850_v34  ;;  %v6931_v20 = vpack.c.bf16 %v10032_v50, %v10032_v50  ;;  %v3429_v34 = vsub.f32 %v11732_v47, %v11262_v52 }
 0x2dc   :  { %9639 = vset.pattern.permute.xlu1 %v11073_v4  ;;  %v5473_v47 = vunpack.c.l.bf16 %v4961_v26 }
 0x2dd   :  { %v4967_v49 = vpack.c.bf16 %v4455_v5, %v4455_v5  ;;  %v10034_v5 = vpop.eup %10033  ;;  %v11799_v16 = vpop.permute.xlu0 %3135  ;;  %v4874_v36 = vpack.c.bf16 %v4362_v31, %v4362_v31  ;;  %v11816_v46 = vunpack.c.l.b16 %v6931_v20 }
 0x2de   :  { %14059 = vst [vmem:[#allocation47_spill] sm:$0xff] %v11799_v16  ;;  %v10036_v57 = vpop.eup %10035  ;;  %v11842_v16 = vmul.f32 -20000.0, %v3924_v44 }
 0x2df   :  { %v5479_v29 = vunpack.c.l.bf16 %v4967_v49  ;;  %v10038_v22 = vpop.eup %10037  ;;  %v7016_v49 = vpack.c.bf16 %v10034_v5, %v10034_v5  ;;  %v6932_v1 = vpack.c.bf16 %v10036_v57, %v10036_v57  ;;  %v3941_v5 = vmul.f32 %v3429_v34, %v3429_v34 }
 0x2e0   :  { %v10040_v30 = vpop.eup %10039  ;;  %v6933_v50 = vpack.c.bf16 %v10038_v22, %v10038_v22 }
 0x2e1   :  { %v6085_v42 = vmul.f32 1.442695, %v5479_v29  ;;  %v11810_v43 = vpop.eup %10041  ;;  %v4873_v29 = vpack.c.bf16 %v4361_v51, %v4361_v51  ;;  %v6930_v48 = vpack.c.bf16 %v10040_v30, %v10040_v30  ;;  %v8169_v60 = vunpack.c.l.b16 %v7016_v49 }
 0x2e2   :  { %v11826_v20 = vunpack.c.l.b16 %v6932_v1  ;;  %v6073_v30 = vmul.f32 1.442695, %v5473_v47  ;;  %v3426_v1 = vsub.f32 %v11757_v19, %v11262_v52  ;;  %v3423_v19 = vsub.f32 %v11741_v21, %v11262_v52 }
 0x2e3   :  { %10043 = vpow2.f32 %v6085_v42  ;;  %3014 = vperm.xlu0 %9939, %v11502_v33   ;;  %935 = vperm.xlu2 %9640, %v11341_v58   ;;  %v5386_v42 = vunpack.c.l.bf16 %v4874_v36  ;;  %v5385_v57 = vunpack.c.l.bf16 %v4873_v29  ;;  %v11833_v36 = vunpack.c.l.b16 %v6933_v50 }
 0x2e4   :  { %929 = vperm.xlu1 %9639, %v11341_v58   ;;  %10045 = vpow2.f32 %v5901_v25  ;;  %v3414_v25 = vsub.f32 %v11677_v35, %v11262_v52  ;;  %v11835_v45 = vunpack.c.l.b16 %v6930_v48  ;;  %v3938_v44 = vmul.f32 %v3426_v1, %v3426_v1 }
 0x2e5   :  { %10047 = vpow2.f32 %v5903_v56  ;;  %v3428_v56 = vsub.f32 %v11772_v32, %v11262_v52  ;;  %v3427_v32 = vsub.f32 %v11723_v18, %v11262_v52  ;;  %v5899_v34 = vmul.f32 1.442695, %v5386_v42 }
 0x2e6   :  { %10049 = vpow2.f32 %v5913_v13  ;;  %v3926_v13 = vmul.f32 %v3414_v25, %v3414_v25  ;;  %v5897_v62 = vmul.f32 1.442695, %v5385_v57  ;;  %v3411_v42 = vsub.f32 %v11691_v15, %v11262_v52 }
 0x2e7   :  { %10051 = vpow2.f32 %v6063_v6  ;;  %v3940_v49 = vmul.f32 %v3428_v56, %v3428_v56  ;;  %v4453_v6 = vmul.f32 -20000.0, %v3941_v5  ;;  %v3424_v56 = vsub.f32 %v11714_v59, %v11262_v52 }
 0x2e8   :  { %v4438_v50 = vmul.f32 -20000.0, %v3926_v13  ;;  %v3939_v48 = vmul.f32 %v3427_v32, %v3427_v32  ;;  %10053 = vpow2.f32 %v6073_v30  ;;  %v11862_v21 = vmul.f32 %v3411_v42, %v3411_v42 }
 0x2e9   :  { %v10044_v31 = vpop.eup %10043  ;;  %10055 = vpow2.f32 %v5899_v34  ;;  %v4965_v13 = vpack.c.bf16 %v4453_v6, %v4453_v6  ;;  %v3936_v30 = vmul.f32 %v3424_v56, %v3424_v56  ;;  %v3415_v1 = vsub.f32 %v11728_v0, %v11262_v52 }
 0x2ea   :  { %v7015_v51 = vpack.c.bf16 %v10044_v31, %v10044_v31  ;;  %v11822_v35 = vpop.eup %10045  ;;  %10057 = vpow2.f32 %v5897_v62  ;;  %v4950_v32 = vpack.c.bf16 %v4438_v50, %v4438_v50  ;;  %v3421_v62 = vsub.f32 %v11730_v8, %v11262_v52 }
 0x2eb   :  { %3305 = vperm.xlu0 %9939, %v11712_v55   ;;  %9642 = vset.pattern.permute.xlu2 %v11092_v9  ;;  %v11828_v22 = vpop.eup %10047  ;;  %v3413_v56 = vsub.f32 %v11700_v53, %v11262_v52  ;;  %v3419_v8 = vsub.f32 %v11693_v23, %v11262_v52  ;;  %v3927_v59 = vmul.f32 %v3415_v1, %v3415_v1 }
 0x2ec   :  { %9641 = vset.pattern.permute.xlu1 %v11070_v3  ;;  %v8168_v26 = vunpack.c.l.b16 %v7015_v51  ;;  %v11837_v25 = vpop.eup %10049  ;;  %v5462_v61 = vunpack.c.l.bf16 %v4950_v32 }
 0x2ed   :  { %v317_v29 = vpop.permute.xlu0 %316  ;;  %v11854_v57 = vpop.eup %10051  ;;  %v3925_v14 = vmul.f32 %v3413_v56, %v3413_v56 }
 0x2ee   :  { %v3350_v31 = vsub.f32 %v317_v29, %v11262_v52  ;;  %v8633_v18 = vpack.c.b16 %v8169_v60, %v8168_v26  ;;  %v4452_v60 = vmul.f32 -20000.0, %v3940_v49  ;;  %v3422_v26 = vsub.f32 %v11702_v39, %v11262_v52 }
 0x2ef   :  { %v4451_v49 = vmul.f32 -20000.0, %v3939_v48  ;;  %v3935_v29 = vmul.f32 %v3423_v19, %v3423_v19  ;;  %v3416_v48 = vsub.f32 %v11709_v7, %v11262_v52  ;;  %v4437_v56 = vmul.f32 -20000.0, %v3925_v14 }
 0x2f0   :  { %v3862_v51 = vmul.f32 %v3350_v31, %v3350_v31  ;;  %9163 = vmatpush.bf16.msrb.mxu1 %v8633_v18  ;;  %v4964_v6 = vpack.c.bf16 %v4452_v60, %v4452_v60  ;;  %v4450_v31 = vmul.f32 -20000.0, %v3938_v44  ;;  %v5477_v18 = vunpack.c.l.bf16 %v4965_v13 }
 0x2f1   :  { %v3934_v19 = vmul.f32 %v3422_v26, %v3422_v26  ;;  %v4448_v60 = vmul.f32 -20000.0, %v3936_v30  ;;  %v4963_v44 = vpack.c.bf16 %v4451_v49, %v4451_v49  ;;  %v4447_v47 = vmul.f32 -20000.0, %v3935_v29 }
 0x2f2   :  { %v4374_v15 = vmul.f32 -20000.0, %v3862_v51  ;;  %v11870_v51 = vpop.eup %10053  ;;  %v5476_v5 = vunpack.c.l.bf16 %v4964_v6  ;;  %v4962_v53 = vpack.c.bf16 %v4450_v31, %v4450_v31  ;;  %v6081_v33 = vmul.f32 1.442695, %v5477_v18 }
 0x2f3   :  { %9944 = vset.pattern.permute.xlu0 %v11127_v17  ;;  %947 = vperm.xlu2 %9642, %v11341_v58   ;;  %v11878_v0 = vpop.eup %10055  ;;  %v3928_v23 = vmul.f32 %v3416_v48, %v3416_v48  ;;  %v3931_v26 = vmul.f32 %v3419_v8, %v3419_v8  ;;  %v3418_v30 = vsub.f32 %v11721_v54, %v11262_v52  ;;  %v4446_v49 = vmul.f32 -20000.0, %v3934_v19 }
 0x2f4   :  { %v4886_v34 = vpack.c.bf16 %v4374_v15, %v4374_v15  ;;  %941 = vperm.xlu1 %9641, %v11341_v58   ;;  %v4960_v6 = vpack.c.bf16 %v4448_v60, %v4448_v60  ;;  %v4959_v31 = vpack.c.bf16 %v4447_v47, %v4447_v47  ;;  %v6079_v18 = vmul.f32 1.442695, %v5476_v5 }
 0x2f5   :  { %v802_v39 = vpop.permute.xlu0 %801  ;;  %v4440_v48 = vmul.f32 -20000.0, %v3928_v23  ;;  %v3417_v54 = vsub.f32 %v11686_v38, %v11262_v52  ;;  %v4443_v8 = vmul.f32 -20000.0, %v3931_v26  ;;  %v4435_v14 = vmul.f32 -20000.0, %v11862_v21 }
 0x2f6   :  { %v5398_v50 = vunpack.c.l.bf16 %v4886_v34  ;;  %v3430_v42 = vsub.f32 %v802_v39, %v11262_v52  ;;  %v11880_v34 = vpop.eup %10057  ;;  %v3933_v39 = vmul.f32 %v3421_v62, %v3421_v62  ;;  %v5475_v62 = vunpack.c.l.bf16 %v4963_v44 }
 0x2f7   :  { %v3930_v44 = vmul.f32 %v3418_v30, %v3418_v30  ;;  %v5472_v47 = vunpack.c.l.bf16 %v4960_v6  ;;  %v4949_v23 = vpack.c.bf16 %v4437_v56, %v4437_v56  ;;  %v4952_v30 = vpack.c.bf16 %v4440_v48, %v4440_v48 }
 0x2f8   :  { %v5923_v13 = vmul.f32 1.442695, %v5398_v50  ;;  %v3942_v15 = vmul.f32 %v3430_v42, %v3430_v42  ;;  %v4445_v1 = vmul.f32 -20000.0, %v3933_v39  ;;  %v4439_v50 = vmul.f32 -20000.0, %v3927_v59 }
 0x2f9   :  { %v5474_v42 = vunpack.c.l.bf16 %v4962_v53  ;;  %v6071_v6 = vmul.f32 1.442695, %v5472_v47  ;;  %v14062_v56 = vpack.c.bf16 %v11837_v25, %v11837_v25 }
 0x2fa   :  { %10059 = vpow2.f32 %v5923_v13  ;;  %v4454_v7 = vmul.f32 -20000.0, %v3942_v15  ;;  %v4958_v13 = vpack.c.bf16 %v4446_v49, %v4446_v49  ;;  %v6077_v15 = vmul.f32 1.442695, %v5475_v62 }
 0x2fb   :  { %680 = vperm.xlu0 %9944, %v11101_v11   ;;  %9644 = vset.pattern.permute.xlu2 %v11171_v27  ;;  %10061 = vpow2.f32 %v6081_v33  ;;  %v4957_v60 = vpack.c.bf16 %v4445_v1, %v4445_v1  ;;  %v4951_v59 = vpack.c.bf16 %v4439_v50, %v4439_v50  ;;  %v6075_v53 = vmul.f32 1.442695, %v5474_v42 }
 0x2fc   :  { %v4966_v29 = vpack.c.bf16 %v4454_v7, %v4454_v7  ;;  %9643 = vset.pattern.permute.xlu1 %v11067_v2  ;;  %10063 = vpow2.f32 %v6079_v18  ;;  %v5471_v7 = vunpack.c.l.bf16 %v4959_v31  ;;  %v6051_v33 = vmul.f32 1.442695, %v5462_v61 }
 0x2fd   :  { %v11887_v32 = vpop.permute.xlu0 %1286  ;;  %v3929_v49 = vmul.f32 %v3417_v54, %v3417_v54  ;;  %v5470_v62 = vunpack.c.l.bf16 %v4958_v13  ;;  %v5469_v1 = vunpack.c.l.bf16 %v4957_v60  ;;  %v4442_v61 = vmul.f32 -20000.0, %v3930_v44 }
 0x2fe   :  { %14060 = vst [vmem:[#allocation39_spill] sm:$0xff] %v11887_v32  ;;  %v5478_v11 = vunpack.c.l.bf16 %v4966_v29  ;;  %v4955_v29 = vpack.c.bf16 %v4443_v8, %v4443_v8  ;;  %v6069_v18 = vmul.f32 1.442695, %v5471_v7  ;;  %v5463_v50 = vunpack.c.l.bf16 %v4951_v59 }
 0x2ff   :  { %v8082_v48 = vunpack.c.l.b16 %v14062_v56  ;;  %v5464_v13 = vunpack.c.l.bf16 %v4952_v30  ;;  %v6065_v60 = vmul.f32 1.442695, %v5469_v1  ;;  %v4954_v59 = vpack.c.bf16 %v4442_v61, %v4442_v61 }
 0x300   :  { %v10060_v19 = vpop.eup %10059  ;;  %v6083_v39 = vmul.f32 1.442695, %v5478_v11  ;;  %v5461_v11 = vunpack.c.l.bf16 %v4949_v23 }
 0x301   :  { %v6934_v5 = vpack.c.bf16 %v10060_v19, %v10060_v19  ;;  %v10062_v26 = vpop.eup %10061  ;;  %v4947_v19 = vpack.c.bf16 %v4435_v14, %v4435_v14  ;;  %v5466_v61 = vunpack.c.l.bf16 %v4954_v59 }
 0x302   :  { %10065 = vpow2.f32 %v6083_v39  ;;  %v10064_v42 = vpop.eup %10063  ;;  %v7013_v54 = vpack.c.bf16 %v10062_v26, %v10062_v26  ;;  %v5467_v39 = vunpack.c.l.bf16 %v4955_v29  ;;  %v6049_v25 = vmul.f32 1.442695, %v5461_v11 }
 0x303   :  { %1165 = vperm.xlu0 %9944, %v11107_v12   ;;  %965 = vperm.xlu2 %9644, %v11341_v58   ;;  %v8087_v38 = vunpack.c.l.b16 %v6934_v5  ;;  %10067 = vpow2.f32 %v6077_v15  ;;  %v4441_v15 = vmul.f32 -20000.0, %v3929_v49  ;;  %v14063_v5 = vpack.c.bf16 %v11842_v16, %v11842_v16 }
 0x304   :  { %959 = vperm.xlu1 %9643, %v11341_v58   ;;  %10069 = vpow2.f32 %v6075_v53  ;;  %v6053_v53 = vmul.f32 1.442695, %v5463_v50  ;;  %v8166_v14 = vunpack.c.l.b16 %v7013_v54  ;;  %v5459_v30 = vunpack.c.l.bf16 %v4947_v19 }
 0x305   :  { %v8592_v31 = vpack.c.b16 %v8087_v38, %v11833_v36  ;;  %v11896_v21 = vpop.permute.xlu0 %1771  ;;  %10071 = vpow2.f32 %v6051_v33  ;;  %v6067_v36 = vmul.f32 1.442695, %v5470_v62  ;;  %v5460_v7 = vunpack.c.l.bf16 %v14063_v5  ;;  %v14064_v33 = vld [vmem:[#allocation14_spill] sm:$0xff] }
 0x306   :  { %14061 = vst [vmem:[#allocation41_spill] sm:$0xff] %v11896_v21  ;;  %10073 = vpow2.f32 %v6071_v6  ;;  %v7012_v38 = vpack.c.bf16 %v10064_v42, %v10064_v42  ;;  %v6055_v49 = vmul.f32 1.442695, %v5464_v13  ;;  %v4953_v62 = vpack.c.bf16 %v4441_v15, %v4441_v15 }
 0x307   :  { %9099 = vmatpush.bf16.msra.mxu0 %v8592_v31  ;;  %10075 = vpow2.f32 %v6069_v18  ;;  %v14065_v16 = vpack.c.b16 %v11826_v20, %v11816_v46  ;;  %v6061_v1 = vmul.f32 1.442695, %v5467_v39  ;;  %v8590_v18 = vpack.c.b16 %v11835_v45, %v8082_v48 }
 0x308   :  { %v10066_v8 = vpop.eup %10065  ;;  %10077 = vpow2.f32 %v6067_v36  ;;  %v14066_v50 = vpack.c.bf16 %v11810_v43, %v11810_v43  ;;  %v8165_v56 = vunpack.c.l.b16 %v7012_v38  ;;  %v7009_v20 = vpack.c.bf16 %v11870_v51, %v11870_v51 }
 0x309   :  { %v7014_v44 = vpack.c.bf16 %v10066_v8, %v10066_v8  ;;  %v10068_v47 = vpop.eup %10067  ;;  %10079 = vpow2.f32 %v6065_v60  ;;  %v6047_v19 = vmul.f32 1.442695, %v5460_v7  ;;  %v5465_v13 = vunpack.c.l.bf16 %v4953_v62  ;;  %v14069_v7 = vld [vmem:[#allocation110_spill] sm:$0xff] }
 0x30a   :  { %v10070_v26 = vpop.eup %10069  ;;  %v7011_v31 = vpack.c.bf16 %v10068_v47, %v10068_v47  ;;  %10081 = vpow2.f32 %v6053_v53  ;;  %v8080_v42 = vunpack.c.l.b16 %v14066_v50  ;;  %v14068_v45 = vpack.c.bf16 %v11795_v28, %v11795_v28 }
 0x30b   :  { %1650 = vperm.xlu0 %9944, %v14014_v37   ;;  %9646 = vset.pattern.permute.xlu2 %v14064_v33  ;;  %v8167_v23 = vunpack.c.l.b16 %v7014_v44  ;;  %v11910_v29 = vpop.eup %10071  ;;  %10083 = vpow2.f32 %v6049_v25  ;;  %v7010_v54 = vpack.c.bf16 %v10070_v26, %v10070_v26  ;;  %v6045_v48 = vmul.f32 1.442695, %v5459_v30 }
 0x30c   :  { %9645 = vset.pattern.permute.xlu1 %v11127_v17  ;;  %9100 = vmatpush.bf16.msra.mxu0 %v14065_v16  ;;  %v10074_v11 = vpop.eup %10073  ;;  %10085 = vpow2.f32 %v6055_v49  ;;  %v8079_v43 = vunpack.c.l.b16 %v14068_v45  ;;  %v8164_v15 = vunpack.c.l.b16 %v7011_v31  ;;  %v6924_v36 = vpack.c.bf16 %v11828_v22, %v11828_v22  ;;  %v14072_v45 = vld [vmem:[#allocation38_spill] sm:$0xff] }
 0x30d   :  { %v8632_v6 = vpack.c.b16 %v8167_v23, %v8166_v14  ;;  %v11916_v46 = vpop.permute.xlu0 %2256  ;;  %v10076_v8 = vpop.eup %10075  ;;  %10087 = vpow2.f32 %v6061_v1  ;;  %v6059_v60 = vmul.f32 1.442695, %v5466_v61  ;;  %v8589_v51 = vpack.c.b16 %v11808_v41, %v8080_v42 }
 0x30e   :  { %14067 = vst [vmem:[#allocation44_spill] sm:$0xff] %v11916_v46  ;;  %v10078_v39 = vpop.eup %10077  ;;  %v6923_v44 = vpack.c.bf16 %v11822_v35, %v11822_v35  ;;  %v7008_v47 = vpack.c.bf16 %v10074_v11, %v10074_v11  ;;  %v8631_v28 = vpack.c.b16 %v8165_v56, %v8164_v15  ;;  %v8162_v59 = vunpack.c.l.b16 %v7009_v20 }
 0x30f   :  { %9164 = vmatpush.bf16.msrb.mxu1 %v8632_v6  ;;  %v10080_v5 = vpop.eup %10079  ;;  %v8163_v53 = vunpack.c.l.b16 %v7010_v54  ;;  %v7007_v25 = vpack.c.bf16 %v10076_v8, %v10076_v8  ;;  %10089 = vpow2.f32 %v6047_v19  ;;  %v6057_v22 = vmul.f32 1.442695, %v5465_v13  ;;  %v14071_v13 = vld [vmem:[#allocation114_spill] sm:$0xff] }
 0x310   :  { %9101 = vmatpush.bf16.msra.mxu0 %v8590_v18  ;;  %v10082_v14 = vpop.eup %10081  ;;  %v6921_v41 = vpack.c.bf16 %v11880_v34, %v11880_v34  ;;  %v6922_v35 = vpack.c.bf16 %v11878_v0, %v11878_v0  ;;  %10091 = vpow2.f32 %v6045_v48  ;;  %v8588_v38 = vpack.c.b16 %v8079_v43, %v11802_v24 }
 0x311   :  { %v10084_v23 = vpop.eup %10083  ;;  %v8077_v26 = vunpack.c.l.b16 %v6924_v36  ;;  %10093 = vpow2.f32 %v6059_v60  ;;  %v8076_v49 = vunpack.c.l.b16 %v6923_v44  ;;  %v8161_v62 = vunpack.c.l.b16 %v7008_v47  ;;  %v14073_v60 = vld [vmem:[#allocation17_spill] sm:$0xff] }
 0x312   :  { %v10086_v30 = vpop.eup %10085  ;;  %v7006_v16 = vpack.c.bf16 %v10078_v39, %v10078_v39  ;;  %v8630_v6 = vpack.c.b16 %v8163_v53, %v8162_v59  ;;  %v8160_v31 = vunpack.c.l.b16 %v7007_v25  ;;  %v7005_v61 = vpack.c.bf16 %v10080_v5, %v10080_v5 }
 0x313   :  { %2135 = vperm.xlu0 %9944, %v14069_v7   ;;  %977 = vperm.xlu2 %9646, %v11341_v58   ;;  %v10088_v1 = vpop.eup %10087  ;;  %v6999_v18 = vpack.c.bf16 %v10082_v14, %v10082_v14  ;;  %10095 = vpow2.f32 %v6057_v22  ;;  %v8074_v34 = vunpack.c.l.b16 %v6921_v41  ;;  %v8075_v0 = vunpack.c.l.b16 %v6922_v35 }
 0x314   :  { %971 = vperm.xlu1 %9645, %v11341_v58   ;;  %9102 = vmatpush.bf16.msra.mxu0 %v8589_v51  ;;  %v8587_v50 = vpack.c.b16 %v8077_v26, %v8076_v49  ;;  %v7000_v24 = vpack.c.bf16 %v10086_v30, %v10086_v30  ;;  %v7003_v56 = vpack.c.bf16 %v10088_v1, %v10088_v1  ;;  %v8158_v48 = vunpack.c.l.b16 %v7005_v61  ;;  %v14076_v26 = vld [vmem:[#allocation109_spill] sm:$0xff]  ;;  %v14077_v1 = vld [vmem:[#allocation98_spill] sm:$0xff] }
 0x315   :  { %9165 = vmatpush.bf16.msrb.mxu1 %v8631_v28  ;;  %v11936_v42 = vpop.permute.xlu0 %2741  ;;  %v10090_v11 = vpop.eup %10089  ;;  %v7004_v20 = vpack.c.bf16 %v11854_v57, %v11854_v57  ;;  %v6997_v54 = vpack.c.bf16 %v10084_v23, %v10084_v23  ;;  %v6998_v8 = vpack.c.bf16 %v11910_v29, %v11910_v29  ;;  %v8629_v43 = vpack.c.b16 %v8161_v62, %v8160_v31  ;;  %v14074_v57 = vld [vmem:[#allocation113_spill] sm:$0xff]  ;;  %v14075_v23 = vld [vmem:[#allocation104_spill] sm:$0xff] }
 0x316   :  { %14070 = vst [vmem:[#allocation32_spill] sm:$0xff] %v11936_v42  ;;  %v10092_v19 = vpop.eup %10091  ;;  %v8159_v15 = vunpack.c.l.b16 %v7006_v16  ;;  %v8152_v36 = vunpack.c.l.b16 %v6999_v18  ;;  %v8586_v51 = vpack.c.b16 %v8075_v0, %v8074_v34  ;;  %v3396_v44 = vsub.f32 %v14074_v57, %v11262_v52  ;;  %v14079_v0 = vld [vmem:[#allocation101_spill] sm:$0xff] }
 0x317   :  { %v10094_v39 = vpop.eup %10093  ;;  %v8153_v47 = vunpack.c.l.b16 %v7000_v24  ;;  %v6996_v29 = vpack.c.bf16 %v10090_v11, %v10090_v11  ;;  %v8156_v28 = vunpack.c.l.b16 %v7003_v56  ;;  %v8150_v59 = vunpack.c.l.b16 %v6997_v54  ;;  %v14080_v11 = vld [vmem:[#allocation108_spill] sm:$0xff] }
 0x318   :  { %9103 = vmatpush.bf16.msra.mxu0 %v8588_v38  ;;  %v8151_v53 = vunpack.c.l.b16 %v6998_v8  ;;  %v6995_v25 = vpack.c.bf16 %v10092_v19, %v10092_v19  ;;  %v8628_v14 = vpack.c.b16 %v8159_v15, %v8158_v48  ;;  %v8157_v41 = vunpack.c.l.b16 %v7004_v20 }
 0x319   :  { %9166 = vmatpush.bf16.msrb.mxu1 %v8630_v6  ;;  %v10096_v5 = vpop.eup %10095  ;;  %v8625_v22 = vpack.c.b16 %v8153_v47, %v8152_v36  ;;  %v7002_v35 = vpack.c.bf16 %v10094_v39, %v10094_v39  ;;  %v3394_v38 = vsub.f32 %v14075_v23, %v11262_v52  ;;  %v3393_v30 = vsub.f32 %v14076_v26, %v11262_v52  ;;  %v14082_v47 = vld [vmem:[#allocation99_spill] sm:$0xff] }
 0x31a   :  { %v7001_v49 = vpack.c.bf16 %v10096_v5, %v10096_v5  ;;  %v3908_v62 = vmul.f32 %v3396_v44, %v3396_v44  ;;  %v8149_v16 = vunpack.c.l.b16 %v6996_v29  ;;  %v8627_v6 = vpack.c.b16 %v8157_v41, %v8156_v28  ;;  %v14083_v5 = vld [vmem:[#allocation12_spill] sm:$0xff]  ;;  %v14084_v28 = vld [vmem:[#allocation21_spill] sm:$0xff]  ;;  %v14087_v41 = vld [vmem:[#allocation22_spill] sm:$0xff] }
 0x31b   :  { %2620 = vperm.xlu0 %9944, %v14071_v13   ;;  %9648 = vset.pattern.permute.xlu2 %v14072_v45  ;;  %v8624_v31 = vpack.c.b16 %v8151_v53, %v8150_v59  ;;  %v8155_v18 = vunpack.c.l.b16 %v7002_v35  ;;  %v8148_v34 = vunpack.c.l.b16 %v6995_v25  ;;  %v3906_v24 = vmul.f32 %v3394_v38, %v3394_v38  ;;  %v14085_v59 = vld [vmem:[#allocation106_spill] sm:$0xff] }
 0x31c   :  { %9647 = vset.pattern.permute.xlu1 %v14073_v60  ;;  %9104 = vmatpush.bf16.msra.mxu0 %v8587_v50  ;;  %v3392_v50 = vsub.f32 %v14079_v0, %v11262_v52  ;;  %v3391_v56 = vsub.f32 %v14080_v11, %v11262_v52  ;;  %v3905_v20 = vmul.f32 %v3393_v30, %v3393_v30  ;;  %v8154_v54 = vunpack.c.l.b16 %v7001_v49  ;;  %v14088_v30 = vld [vmem:[#allocation96_spill] sm:$0xff] }
 0x31d   :  { %9167 = vmatpush.bf16.msrb.mxu1 %v8629_v43  ;;  %v11953_v61 = vpop.permute.xlu0 %3323  ;;  %v4420_v8 = vmul.f32 -20000.0, %v3908_v62  ;;  %v8623_v43 = vpack.c.b16 %v8149_v16, %v8148_v34  ;;  %v4418_v15 = vmul.f32 -20000.0, %v3906_v24  ;;  %v3389_v29 = vsub.f32 %v14082_v47, %v11262_v52  ;;  %v14089_v11 = vld [vmem:[#allocation92_spill] sm:$0xff] }
 0x31e   :  { %14078 = vst [vmem:[#allocation36_spill] sm:$0xff] %v11953_v61  ;;  %v8626_v19 = vpack.c.b16 %v8155_v18, %v8154_v54  ;;  %v3904_v48 = vmul.f32 %v3392_v50, %v3392_v50  ;;  %v3903_v36 = vmul.f32 %v3391_v56, %v3391_v56  ;;  %v4417_v39 = vmul.f32 -20000.0, %v3905_v20  ;;  %v14113_v61 = vld [vmem:[#allocation122_spill] sm:$0xff] }
 0x31f   :  { %v4932_v44 = vpack.c.bf16 %v4420_v8, %v4420_v8  ;;  %v3388_v53 = vsub.f32 %v14085_v59, %v11262_v52  ;;  %v3387_v49 = vsub.f32 %v14088_v30, %v11262_v52  ;;  %v3385_v56 = vsub.f32 %v14089_v11, %v11262_v52  ;;  %v14094_v11 = vld [vmem:[#allocation23_spill] sm:$0xff] }
 0x320   :  { %9105 = vmatpush.bf16.msra.mxu0 %v8586_v51  ;;  %v14081_v51 = vld [vmem:[#allocation102_spill] sm:$0xff]  ;;  %v4416_v25 = vmul.f32 -20000.0, %v3904_v48  ;;  %v4415_v35 = vmul.f32 -20000.0, %v3903_v36  ;;  %v4929_v23 = vpack.c.bf16 %v4417_v39, %v4417_v39  ;;  %v14091_v36 = vld [vmem:[#allocation48_spill] sm:$0xff] }
 0x321   :  { %9168 = vmatpush.bf16.msrb.mxu1 %v8628_v14  ;;  %v3390_v57 = vsub.f32 %v14081_v51, %v11262_v52  ;;  %v4930_v14 = vpack.c.bf16 %v4418_v15, %v4418_v15  ;;  %v5444_v62 = vunpack.c.l.bf16 %v4932_v44  ;;  %v3899_v54 = vmul.f32 %v3387_v49, %v3387_v49 }
 0x322   :  { %v4928_v18 = vpack.c.bf16 %v4416_v25, %v4416_v25  ;;  %v4927_v50 = vpack.c.bf16 %v4415_v35, %v4415_v35  ;;  %v5441_v24 = vunpack.c.l.bf16 %v4929_v23 }
 0x323   :  { %3202 = vperm.xlu0 %9944, %v14077_v1   ;;  %995 = vperm.xlu2 %9648, %v11341_v58   ;;  %v3902_v38 = vmul.f32 %v3390_v57, %v3390_v57  ;;  %v5442_v34 = vunpack.c.l.bf16 %v4930_v14  ;;  %v6015_v8 = vmul.f32 1.442695, %v5444_v62  ;;  %v4411_v35 = vmul.f32 -20000.0, %v3899_v54 }
 0x324   :  { %9150 = vmatpush.bf16.msrb.mxu0 %v8625_v22  ;;  %989 = vperm.xlu1 %9647, %v11341_v58   ;;  %v11968_v22 = vpop.permute.xlu2 %826  ;;  %v5440_v51 = vunpack.c.l.bf16 %v4928_v18  ;;  %v6009_v59 = vmul.f32 1.442695, %v5441_v24 }
 0x325   :  { %9169 = vmatpush.bf16.msrb.mxu1 %v8627_v6  ;;  %14086 = vst [vmem:[#allocation50_spill] sm:$0xff] %v11968_v22  ;;  %v3901_v6 = vmul.f32 %v3389_v29, %v3389_v29  ;;  %v4414_v20 = vmul.f32 -20000.0, %v3902_v38  ;;  %v6011_v57 = vmul.f32 1.442695, %v5442_v34  ;;  %v5439_v29 = vunpack.c.l.bf16 %v4927_v50 }
 0x326   :  { %10097 = vpow2.f32 %v6015_v8  ;;  %v6007_v49 = vmul.f32 1.442695, %v5440_v51  ;;  %v4923_v18 = vpack.c.bf16 %v4411_v35, %v4411_v35 }
 0x327   :  { %v4413_v15 = vmul.f32 -20000.0, %v3901_v6  ;;  %v4926_v25 = vpack.c.bf16 %v4414_v20, %v4414_v20  ;;  %10099 = vpow2.f32 %v6011_v57 }
 0x328   :  { %9151 = vmatpush.bf16.msrb.mxu0 %v8624_v31  ;;  %v3900_v31 = vmul.f32 %v3388_v53, %v3388_v53  ;;  %v3897_v53 = vmul.f32 %v3385_v56, %v3385_v56  ;;  %10101 = vpow2.f32 %v6009_v59 }
 0x329   :  { %9170 = vmatpush.bf16.msrb.mxu1 %v8626_v19 }
 0x32a   :  { %v4412_v39 = vmul.f32 -20000.0, %v3900_v31  ;;  %v4409_v6 = vmul.f32 -20000.0, %v3897_v53  ;;  %v5438_v31 = vunpack.c.l.bf16 %v4926_v25 }
 0x32b   :  { %9948 = vset.pattern.permute.xlu0 %v14083_v5  ;;  %9650 = vset.pattern.permute.xlu2 %v14084_v28 }
 0x32c   :  { %9152 = vmatpush.bf16.msrb.mxu0 %v8623_v43  ;;  %9649 = vset.pattern.permute.xlu1 %v14087_v41  ;;  %v14090_v43 = vld [vmem:[#allocation103_spill] sm:$0xff]  ;;  %v11980_v44 = vpop.permute.xlu2 %844  ;;  %v4924_v30 = vpack.c.bf16 %v4412_v39, %v4412_v39  ;;  %v10098_v50 = vpop.eup %10097  ;;  %v4921_v20 = vpack.c.bf16 %v4409_v6, %v4409_v6  ;;  %v6003_v54 = vmul.f32 1.442695, %v5438_v31 }
 0x32d   :  { %v590_v26 = vpop.permute.xlu0 %589  ;;  %v3386_v48 = vsub.f32 %v14090_v43, %v11262_v52  ;;  %14092 = vst [vmem:[#allocation35_spill] sm:$0xff] %v11980_v44  ;;  %v5435_v43 = vunpack.c.l.bf16 %v4923_v18  ;;  %v6980_v39 = vpack.c.bf16 %v10098_v50, %v10098_v50 }
 0x32e   :  { %v3395_v16 = vsub.f32 %v590_v26, %v11262_v52  ;;  %v4925_v26 = vpack.c.bf16 %v4413_v15, %v4413_v15  ;;  %v5436_v56 = vunpack.c.l.bf16 %v4924_v30  ;;  %v14098_v30 = vld [vmem:[#allocation78_spill] sm:$0xff] }
 0x32f   :  { %v3898_v38 = vmul.f32 %v3386_v48, %v3386_v48  ;;  %v11992_v48 = vpop.permute.xlu1 %820  ;;  %v5997_v53 = vmul.f32 1.442695, %v5435_v43 }
 0x330   :  { %v3907_v0 = vmul.f32 %v3395_v16, %v3395_v16  ;;  %v6005_v16 = vmul.f32 1.442695, %v5439_v29  ;;  %14096 = vst [vmem:[#allocation38_spill] sm:$0xff] %v11992_v48  ;;  %v5999_v57 = vmul.f32 1.442695, %v5436_v56 }
 0x331   :  { %v4410_v34 = vmul.f32 -20000.0, %v3898_v38 }
 0x332   :  { %v4419_v19 = vmul.f32 -20000.0, %v3907_v0  ;;  %v5437_v0 = vunpack.c.l.bf16 %v4925_v26  ;;  %v14097_v26 = vld [vmem:[#allocation58_spill] sm:$0xff] }
 0x333   :  { %468 = vperm.xlu0 %9948, %v14091_v36   ;;  %1007 = vperm.xlu2 %9650, %v11341_v58  }
 0x334   :  { %v4931_v47 = vpack.c.bf16 %v4419_v19, %v4419_v19  ;;  %1001 = vperm.xlu1 %9649, %v11341_v58   ;;  %v11987_v24 = vpop.permute.xlu2 %856  ;;  %v10100_v19 = vpop.eup %10099  ;;  %v6001_v36 = vmul.f32 1.442695, %v5437_v0 }
 0x335   :  { %v11983_v14 = vpop.permute.xlu0 %1074  ;;  %v10102_v15 = vpop.eup %10101  ;;  %v6978_v35 = vpack.c.bf16 %v10100_v19, %v10100_v19 }
 0x336   :  { %14093 = vst [vmem:[#allocation51_spill] sm:$0xff] %v11983_v14  ;;  %v5443_v23 = vunpack.c.l.bf16 %v4931_v47  ;;  %v5433_v47 = vunpack.c.l.bf16 %v4921_v20  ;;  %v6977_v25 = vpack.c.bf16 %v10102_v15, %v10102_v15 }
 0x337   :  { %v11999_v18 = vpop.permute.xlu1 %838  ;;  %v8131_v50 = vunpack.c.l.b16 %v6978_v35 }
 0x338   :  { %v6013_v62 = vmul.f32 1.442695, %v5443_v23  ;;  %14100 = vst [vmem:[#allocation104_spill] sm:$0xff] %v11999_v18  ;;  %v8130_v0 = vunpack.c.l.b16 %v6977_v25 }
 0x33a   :  { %10103 = vpow2.f32 %v6013_v62  ;;  %v8133_v62 = vunpack.c.l.b16 %v6980_v39  ;;  %v8614_v15 = vpack.c.b16 %v8131_v50, %v8130_v0 }
 0x33b   :  { %953 = vperm.xlu0 %9948, %v11341_v58   ;;  %9652 = vset.pattern.permute.xlu2 %v11073_v4  ;;  %10105 = vpow2.f32 %v6007_v49  ;;  %v4922_v58 = vpack.c.bf16 %v4410_v34, %v4410_v34 }
 0x33c   :  { %9651 = vset.pattern.permute.xlu1 %v14094_v11  ;;  %10107 = vpow2.f32 %v6005_v16  ;;  %v5993_v16 = vmul.f32 1.442695, %v5433_v47  ;;  %v12001_v34 = vpop.permute.xlu2 %874 }
 0x33d   :  { %v11990_v8 = vpop.permute.xlu0 %1559  ;;  %10109 = vpow2.f32 %v6003_v54  ;;  %v5434_v38 = vunpack.c.l.bf16 %v4922_v58 }
 0x33e   :  { %14095 = vst [vmem:[#allocation114_spill] sm:$0xff] %v11990_v8  ;;  %10111 = vpow2.f32 %v6001_v36 }
 0x33f   :  { %10113 = vpow2.f32 %v5999_v57  ;;  %v5995_v19 = vmul.f32 1.442695, %v5434_v38  ;;  %v14101_v57 = vld [vmem:[#allocation59_spill] sm:$0xff] }
 0x340   :  { %v10104_v51 = vpop.eup %10103  ;;  %10115 = vpow2.f32 %v5997_v53 }
 0x341   :  { %v6979_v29 = vpack.c.bf16 %v10104_v51, %v10104_v51  ;;  %v10106_v59 = vpop.eup %10105  ;;  %10117 = vpow2.f32 %v5993_v16 }
 0x342   :  { %v10108_v23 = vpop.eup %10107  ;;  %v6976_v20 = vpack.c.bf16 %v10106_v59, %v10106_v59  ;;  %10119 = vpow2.f32 %v5995_v19  ;;  %v12006_v59 = vpop.permute.xlu1 %850 }
 0x343   :  { %1438 = vperm.xlu0 %9948, %v14097_v26   ;;  %1026 = vperm.xlu2 %9652, %v14098_v30   ;;  %v8132_v49 = vunpack.c.l.b16 %v6979_v29  ;;  %v6975_v56 = vpack.c.bf16 %v10108_v23, %v10108_v23  ;;  %v10110_v54 = vpop.eup %10109 }
 0x344   :  { %1020 = vperm.xlu1 %9651, %v14098_v30   ;;  %v10112_v43 = vpop.eup %10111  ;;  %v8129_v36 = vunpack.c.l.b16 %v6976_v20  ;;  %v6974_v39 = vpack.c.bf16 %v10110_v54, %v10110_v54  ;;  %v12008_v53 = vpop.permute.xlu2 %886  ;;  %v14103_v20 = vld [vmem:[#allocation61_spill] sm:$0xff] }
 0x345   :  { %v8615_v6 = vpack.c.b16 %v8133_v62, %v8132_v49  ;;  %v11997_v31 = vpop.permute.xlu0 %2044  ;;  %v8128_v58 = vunpack.c.l.b16 %v6975_v56  ;;  %v10114_v51 = vpop.eup %10113  ;;  %v6973_v47 = vpack.c.bf16 %v10112_v43, %v10112_v43 }
 0x346   :  { %14099 = vst [vmem:[#allocation113_spill] sm:$0xff] %v11997_v31  ;;  %v10116_v29 = vpop.eup %10115  ;;  %v8127_v35 = vunpack.c.l.b16 %v6974_v39  ;;  %v6972_v23 = vpack.c.bf16 %v10114_v51, %v10114_v51 }
 0x347   :  { %9139 = vmatpush.bf16.msra.mxu3 %v8615_v6  ;;  %v8613_v25 = vpack.c.b16 %v8129_v36, %v8128_v58  ;;  %v10118_v38 = vpop.eup %10117  ;;  %v8126_v62 = vunpack.c.l.b16 %v6973_v47  ;;  %v6971_v16 = vpack.c.bf16 %v10116_v29, %v10116_v29  ;;  %v14105_v29 = vld [vmem:[#allocation63_spill] sm:$0xff] }
 0x348   :  { %v10120_v6 = vpop.eup %10119  ;;  %v8125_v50 = vunpack.c.l.b16 %v6972_v23  ;;  %v6969_v56 = vpack.c.bf16 %v10118_v38, %v10118_v38  ;;  %v14107_v23 = vld [vmem:[#allocation29_spill] sm:$0xff] }
 0x349   :  { %v8612_v0 = vpack.c.b16 %v8127_v35, %v8126_v62  ;;  %v8124_v54 = vunpack.c.l.b16 %v6971_v16  ;;  %v6970_v19 = vpack.c.bf16 %v10120_v6, %v10120_v6  ;;  %v3409_v38 = vsub.f32 %v14107_v23, %v11262_v52  ;;  %v14108_v6 = vld [vmem:[#allocation126_spill] sm:$0xff] }
 0x34a   :  { %v12015_v43 = vpop.permute.xlu1 %868  ;;  %v8122_v36 = vunpack.c.l.b16 %v6969_v56  ;;  %v14109_v56 = vld [vmem:[#allocation119_spill] sm:$0xff] }
 0x34b   :  { %1923 = vperm.xlu0 %9948, %v14101_v57   ;;  %9654 = vset.pattern.permute.xlu2 %v11070_v3  ;;  %v8611_v58 = vpack.c.b16 %v8125_v50, %v8124_v54  ;;  %v8123_v39 = vunpack.c.l.b16 %v6970_v19  ;;  %v3407_v54 = vsub.f32 %v14109_v56, %v11262_v52  ;;  %v3921_v19 = vmul.f32 %v3409_v38, %v3409_v38  ;;  %v14112_v56 = vld [vmem:[#allocation116_spill] sm:$0xff] }
 0x34c   :  { %9653 = vset.pattern.permute.xlu1 %v11095_v10  ;;  %9140 = vmatpush.bf16.msra.mxu3 %v8614_v15  ;;  %v12017_v15 = vpop.permute.xlu2 %904  ;;  %v3404_v38 = vsub.f32 %v14112_v56, %v11262_v52 }
 0x34d   :  { %v12010_v49 = vpop.permute.xlu0 %2529  ;;  %v8610_v47 = vpack.c.b16 %v8123_v39, %v8122_v36  ;;  %v14111_v36 = vld [vmem:[#allocation124_spill] sm:$0xff]  ;;  %v3919_v23 = vmul.f32 %v3407_v54, %v3407_v54 }
 0x34e   :  { %14102 = vst [vmem:[#allocation109_spill] sm:$0xff] %v12010_v49  ;;  %v3406_v39 = vsub.f32 %v14111_v36, %v11262_v52  ;;  %v14114_v49 = vld [vmem:[#allocation112_spill] sm:$0xff] }
 0x34f   :  { %v4431_v36 = vmul.f32 -20000.0, %v3919_v23  ;;  %v14115_v54 = vld [vmem:[#allocation120_spill] sm:$0xff] }
 0x350   :  { %9141 = vmatpush.bf16.msra.mxu3 %v8613_v25  ;;  %v14106_v25 = vld [vmem:[#allocation26_spill] sm:$0xff] }
 0x351   :  { %v3405_v35 = vsub.f32 %v14106_v25, %v11262_v52 }
 0x352   :  { %v12028_v62 = vpop.permute.xlu1 %880 }
 0x353   :  { %2408 = vperm.xlu0 %9948, %v14103_v20   ;;  %1038 = vperm.xlu2 %9654, %v14098_v30   ;;  %v3917_v50 = vmul.f32 %v3405_v35, %v3405_v35  ;;  %v3916_v20 = vmul.f32 %v3404_v38, %v3404_v38 }
 0x354   :  { %1032 = vperm.xlu1 %9653, %v14098_v30   ;;  %9142 = vmatpush.bf16.msra.mxu3 %v8612_v0  ;;  %v12030_v16 = vpop.permute.xlu2 %917  ;;  %v3408_v0 = vsub.f32 %v14108_v6, %v11262_v52  ;;  %v4433_v6 = vmul.f32 -20000.0, %v3921_v19  ;;  %v3401_v19 = vsub.f32 %v14115_v54, %v11262_v52 }
 0x355   :  { %v12019_v51 = vpop.permute.xlu0 %3014  ;;  %v4429_v25 = vmul.f32 -20000.0, %v3917_v50  ;;  %v3402_v50 = vsub.f32 %v14114_v49, %v11262_v52  ;;  %v4428_v57 = vmul.f32 -20000.0, %v3916_v20 }
 0x356   :  { %14104 = vst [vmem:[#allocation101_spill] sm:$0xff] %v12019_v51  ;;  %v3403_v51 = vsub.f32 %v14113_v61, %v11262_v52  ;;  %v3913_v40 = vmul.f32 %v3401_v19, %v3401_v19 }
 0x357   :  { %v4941_v42 = vpack.c.bf16 %v4429_v25, %v4429_v25  ;;  %v14116_v25 = vld [vmem:[#allocation69_spill] sm:$0xff]  ;;  %v3914_v54 = vmul.f32 %v3402_v50, %v3402_v50 }
 0x358   :  { %9143 = vmatpush.bf16.msra.mxu3 %v8611_v58  ;;  %v3915_v56 = vmul.f32 %v3403_v51, %v3403_v51  ;;  %v3372_v23 = vsub.f32 %v14116_v25, %v11262_v52  ;;  %v14117_v25 = vld [vmem:[#allocation70_spill] sm:$0xff]  ;;  %v4425_v14 = vmul.f32 -20000.0, %v3913_v40 }
 0x35a   :  { %v12043_v35 = vpop.permute.xlu1 %898  ;;  %v4427_v21 = vmul.f32 -20000.0, %v3915_v56  ;;  %v3884_v37 = vmul.f32 %v3372_v23, %v3372_v23 }
 0x35b   :  { %2893 = vperm.xlu0 %9948, %v14105_v29   ;;  %9656 = vset.pattern.permute.xlu2 %v11067_v2 }
 0x35c   :  { %9655 = vset.pattern.permute.xlu1 %v14083_v5  ;;  %9144 = vmatpush.bf16.msra.mxu3 %v8610_v47  ;;  %v3920_v47 = vmul.f32 %v3408_v0, %v3408_v0  ;;  %v4945_v0 = vpack.c.bf16 %v4433_v6, %v4433_v6  ;;  %v4943_v6 = vpack.c.bf16 %v4431_v36, %v4431_v36 }
 0x35d   :  { %v12038_v58 = vpop.permute.xlu0 %3305  ;;  %v3374_v36 = vsub.f32 %v14117_v25, %v11262_v52  ;;  %v4939_v20 = vpack.c.bf16 %v4427_v21, %v4427_v21  ;;  %v14122_v25 = vld [vmem:[#allocation67_spill] sm:$0xff] }
 0x35e   :  { %14110 = vst [vmem:[#allocation108_spill] sm:$0xff] %v12038_v58  ;;  %v4432_v29 = vmul.f32 -20000.0, %v3920_v47  ;;  %v12049_v58 = vpop.permute.xlu2 %935  ;;  %v5453_v47 = vunpack.c.l.bf16 %v4941_v42  ;;  %v5457_v49 = vunpack.c.l.bf16 %v4945_v0  ;;  %v5455_v26 = vunpack.c.l.bf16 %v4943_v6 }
 0x360   :  { %v6033_v42 = vmul.f32 1.442695, %v5453_v47  ;;  %v6041_v0 = vmul.f32 1.442695, %v5457_v49  ;;  %v6037_v47 = vmul.f32 1.442695, %v5455_v26 }
 0x362   :  { %v12060_v31 = vpop.permute.xlu1 %910  ;;  %10121 = vpow2.f32 %v6033_v42 }
 0x363   :  { %3184 = vperm.xlu0 %9948, %v14077_v1   ;;  %1056 = vperm.xlu2 %9656, %v14098_v30   ;;  %v3918_v1 = vmul.f32 %v3406_v39, %v3406_v39  ;;  %v4944_v39 = vpack.c.bf16 %v4432_v29, %v4432_v29  ;;  %10123 = vpow2.f32 %v6041_v0 }
 0x364   :  { %1050 = vperm.xlu1 %9655, %v14098_v30  }
 0x365   :  { %v4430_v61 = vmul.f32 -20000.0, %v3918_v1  ;;  %v5456_v1 = vunpack.c.l.bf16 %v4944_v39  ;;  %v3886_v39 = vmul.f32 %v3374_v36, %v3374_v36  ;;  %v3369_v36 = vsub.f32 %v14122_v25, %v11262_v52 }
 0x366   :  { %v12063_v29 = vpop.permute.xlu2 %947 }
 0x367   :  { %v4942_v51 = vpack.c.bf16 %v4430_v61, %v4430_v61  ;;  %v6039_v19 = vmul.f32 1.442695, %v5456_v1  ;;  %v4396_v61 = vmul.f32 -20000.0, %v3884_v37 }
 0x369   :  { %v5454_v50 = vunpack.c.l.bf16 %v4942_v51  ;;  %v5451_v51 = vunpack.c.l.bf16 %v4939_v20  ;;  %10125 = vpow2.f32 %v6039_v19  ;;  %v4908_v0 = vpack.c.bf16 %v4396_v61, %v4396_v61  ;;  %v14124_v19 = vld [vmem:[#allocation33_spill] sm:$0xff]  ;;  %v14125_v61 = vld [vmem:[#allocation18_spill] sm:$0xff] }
 0x36a   :  { %v12076_v6 = vpop.permute.xlu1 %929  ;;  %10127 = vpow2.f32 %v6037_v47 }
 0x36b   :  { %9951 = vset.pattern.permute.xlu0 %v11067_v2  ;;  %9658 = vset.pattern.permute.xlu2 %v11127_v17  ;;  %v4426_v17 = vmul.f32 -20000.0, %v3914_v54  ;;  %v4937_v54 = vpack.c.bf16 %v4425_v14, %v4425_v14  ;;  %v6035_v26 = vmul.f32 1.442695, %v5454_v50  ;;  %v6029_v47 = vmul.f32 1.442695, %v5451_v51 }
 0x36c   :  { %9657 = vset.pattern.permute.xlu1 %v11171_v27 }
 0x36d   :  { %v681_v46 = vpop.permute.xlu0 %680  ;;  %v5449_v25 = vunpack.c.l.bf16 %v4937_v54 }
 0x36e   :  { %v3410_v38 = vsub.f32 %v681_v46, %v11262_v52  ;;  %v4940_v46 = vpack.c.bf16 %v4428_v57, %v4428_v57  ;;  %v14120_v57 = vld [vmem:[#allocation74_spill] sm:$0xff]  ;;  %v12080_v42 = vpop.permute.xlu2 %965 }
 0x370   :  { %v3922_v8 = vmul.f32 %v3410_v38, %v3410_v38  ;;  %v4938_v38 = vpack.c.bf16 %v4426_v17, %v4426_v17  ;;  %v5452_v37 = vunpack.c.l.bf16 %v4940_v46  ;;  %v14123_v17 = vld [vmem:[#allocation65_spill] sm:$0xff]  ;;  %v4398_v46 = vmul.f32 -20000.0, %v3886_v39 }
 0x371   :  { %v3445_v14 = vsub.f32 %v14123_v17, %v11262_v52 }
 0x372   :  { %v4434_v32 = vmul.f32 -20000.0, %v3922_v8  ;;  %v14119_v8 = vld [vmem:[#allocation72_spill] sm:$0xff]  ;;  %v5450_v20 = vunpack.c.l.bf16 %v4938_v38  ;;  %v6031_v50 = vmul.f32 1.442695, %v5452_v37  ;;  %v12093_v38 = vpop.permute.xlu1 %941  ;;  %v4910_v28 = vpack.c.bf16 %v4398_v46, %v4398_v46 }
 0x373   :  { %862 = vperm.xlu0 %9951, %v14026_v63   ;;  %1068 = vperm.xlu2 %9658, %v14098_v30   ;;  %v3371_v40 = vsub.f32 %v14119_v8, %v11262_v52  ;;  %v3373_v63 = vsub.f32 %v14120_v57, %v11262_v52  ;;  %v3957_v54 = vmul.f32 %v3445_v14, %v3445_v14 }
 0x374   :  { %v4946_v56 = vpack.c.bf16 %v4434_v32, %v4434_v32  ;;  %1062 = vperm.xlu1 %9657, %v14098_v30   ;;  %v14121_v32 = vld [vmem:[#allocation75_spill] sm:$0xff] }
 0x375   :  { %v12070_v23 = vpop.permute.xlu0 %1165  ;;  %v3376_v49 = vsub.f32 %v14121_v32, %v11262_v52  ;;  %v3883_v8 = vmul.f32 %v3371_v40, %v3371_v40  ;;  %v3885_v57 = vmul.f32 %v3373_v63, %v3373_v63  ;;  %v4469_v14 = vmul.f32 -20000.0, %v3957_v54 }
 0x376   :  { %14118 = vst [vmem:[#allocation102_spill] sm:$0xff] %v12070_v23  ;;  %v5458_v21 = vunpack.c.l.bf16 %v4946_v56  ;;  %v12084_v56 = vpop.eup %10121  ;;  %v5420_v23 = vunpack.c.l.bf16 %v4908_v0  ;;  %v12095_v48 = vpop.permute.xlu2 %977 }
 0x377   :  { %v3888_v32 = vmul.f32 %v3376_v49, %v3376_v49  ;;  %v4395_v17 = vmul.f32 -20000.0, %v3883_v8  ;;  %v4397_v39 = vmul.f32 -20000.0, %v3885_v57 }
 0x378   :  { %v6043_v1 = vmul.f32 1.442695, %v5458_v21  ;;  %v10124_v21 = vpop.eup %10123  ;;  %v5967_v8 = vmul.f32 1.442695, %v5420_v23  ;;  %v6989_v23 = vpack.c.bf16 %v12084_v56, %v12084_v56 }
 0x379   :  { %v10126_v63 = vpop.eup %10125  ;;  %v4400_v51 = vmul.f32 -20000.0, %v3888_v32  ;;  %v4907_v57 = vpack.c.bf16 %v4395_v17, %v4395_v17  ;;  %v4909_v33 = vpack.c.bf16 %v4397_v39, %v4397_v39  ;;  %v5422_v32 = vunpack.c.l.bf16 %v4910_v28 }
 0x37a   :  { %10129 = vpow2.f32 %v6043_v1  ;;  %v3881_v1 = vmul.f32 %v3369_v36, %v3369_v36  ;;  %v10128_v37 = vpop.eup %10127  ;;  %v6992_v22 = vpack.c.bf16 %v10126_v63, %v10126_v63 }
 0x37b   :  { %9660 = vset.pattern.permute.xlu2 %v14073_v60  ;;  %1347 = vperm.xlu0 %9951, %v14124_v19   ;;  %10131 = vpow2.f32 %v6035_v26  ;;  %v6027_v60 = vmul.f32 1.442695, %v5450_v20  ;;  %v6993_v19 = vpack.c.bf16 %v10124_v21, %v10124_v21  ;;  %v6025_v26 = vmul.f32 1.442695, %v5449_v25  ;;  %v14127_v21 = vld [vmem:[#allocation37_spill] sm:$0xff] }
 0x37c   :  { %9659 = vset.pattern.permute.xlu1 %v14125_v61  ;;  %10133 = vpow2.f32 %v6031_v50  ;;  %v4393_v0 = vmul.f32 -20000.0, %v3881_v1  ;;  %v6991_v50 = vpack.c.bf16 %v10128_v37, %v10128_v37  ;;  %v4912_v25 = vpack.c.bf16 %v4400_v51, %v4400_v51  ;;  %v12104_v37 = vpop.permute.xlu1 %959 }
 0x37d   :  { %v12091_v40 = vpop.permute.xlu0 %1650  ;;  %10135 = vpow2.f32 %v6029_v47  ;;  %v8146_v46 = vunpack.c.l.b16 %v6993_v19  ;;  %v8145_v1 = vunpack.c.l.b16 %v6992_v22  ;;  %v5419_v39 = vunpack.c.l.bf16 %v4907_v57  ;;  %v14128_v19 = vld [vmem:[#allocation76_spill] sm:$0xff] }
 0x37e   :  { %14126 = vst [vmem:[#allocation99_spill] sm:$0xff] %v12091_v40  ;;  %10137 = vpow2.f32 %v6027_v60  ;;  %v5421_v28 = vunpack.c.l.bf16 %v4909_v33  ;;  %v8144_v54 = vunpack.c.l.b16 %v6991_v50  ;;  %v5971_v22 = vmul.f32 1.442695, %v5422_v32  ;;  %v12110_v33 = vpop.permute.xlu2 %995 }
 0x37f   :  { %10139 = vpow2.f32 %v6025_v26  ;;  %v4981_v26 = vpack.c.bf16 %v4469_v14, %v4469_v14  ;;  %v3444_v14 = vsub.f32 %v12008_v53, %v11262_v52 }
 0x380   :  { %v10130_v49 = vpop.eup %10129  ;;  %10141 = vpow2.f32 %v5967_v8 }
 0x381   :  { %v6994_v40 = vpack.c.bf16 %v10130_v49, %v10130_v49  ;;  %v10132_v36 = vpop.eup %10131  ;;  %v4905_v49 = vpack.c.bf16 %v4393_v0, %v4393_v0  ;;  %v14130_v0 = vld [vmem:[#allocation87_spill] sm:$0xff]  ;;  %v5493_v32 = vunpack.c.l.bf16 %v4981_v26  ;;  %10143 = vpow2.f32 %v5971_v22 }
 0x382   :  { %v10134_v47 = vpop.eup %10133  ;;  %v6990_v60 = vpack.c.bf16 %v10132_v36, %v10132_v36  ;;  %v8621_v36 = vpack.c.b16 %v8145_v1, %v8144_v54  ;;  %v3460_v8 = vsub.f32 %v14130_v0, %v11262_v52  ;;  %v14131_v1 = vld [vmem:[#allocation42_spill] sm:$0xff]  ;;  %v3956_v54 = vmul.f32 %v3444_v14, %v3444_v14 }
 0x383   :  { %1086 = vperm.xlu2 %9660, %v14098_v30   ;;  %v8147_v20 = vunpack.c.l.b16 %v6994_v40  ;;  %1832 = vperm.xlu0 %9951, %v14127_v21   ;;  %v10136_v17 = vpop.eup %10135  ;;  %v3370_v40 = vsub.f32 %v14128_v19, %v11262_v52  ;;  %v8142_v21 = vunpack.c.l.b16 %v6989_v23  ;;  %v5965_v19 = vmul.f32 1.442695, %v5419_v39 }
 0x384   :  { %1080 = vperm.xlu1 %9659, %v14098_v30   ;;  %v10138_v56 = vpop.eup %10137  ;;  %v8143_v57 = vunpack.c.l.b16 %v6990_v60  ;;  %v6987_v61 = vpack.c.bf16 %v10136_v17, %v10136_v17  ;;  %v5417_v50 = vunpack.c.l.bf16 %v4905_v49  ;;  %v3447_v26 = vsub.f32 %v12017_v15, %v11262_v52 }
 0x385   :  { %v8622_v63 = vpack.c.b16 %v8147_v20, %v8146_v46  ;;  %v12106_v51 = vpop.permute.xlu0 %2135  ;;  %v5424_v46 = vunpack.c.l.bf16 %v4912_v25  ;;  %v6988_v20 = vpack.c.bf16 %v10134_v47, %v10134_v47  ;;  %v10140_v18 = vpop.eup %10139  ;;  %v3882_v44 = vmul.f32 %v3370_v40, %v3370_v40 }
 0x386   :  { %14129 = vst [vmem:[#allocation12_spill] sm:$0xff] %v12106_v51  ;;  %v6986_v47 = vpack.c.bf16 %v10138_v56, %v10138_v56  ;;  %v10142_v23 = vpop.eup %10141  ;;  %v8620_v60 = vpack.c.b16 %v8143_v57, %v8142_v21  ;;  %v8140_v17 = vunpack.c.l.b16 %v6987_v61  ;;  %v6985_v40 = vpack.c.bf16 %v10140_v18, %v10140_v18  ;;  %v12117_v53 = vpop.permute.xlu1 %971 }
 0x387   :  { %9153 = vmatpush.bf16.msrb.mxu0 %v8622_v63  ;;  %v5969_v63 = vmul.f32 1.442695, %v5421_v28  ;;  %v5975_v25 = vmul.f32 1.442695, %v5424_v46  ;;  %v8141_v39 = vunpack.c.l.b16 %v6988_v20  ;;  %10145 = vpow2.f32 %v5965_v19 }
 0x388   :  { %v4394_v49 = vmul.f32 -20000.0, %v3882_v44  ;;  %v3972_v28 = vmul.f32 %v3460_v8, %v3460_v8  ;;  %v5961_v22 = vmul.f32 1.442695, %v5417_v50  ;;  %v3443_v46 = vsub.f32 %v12028_v62, %v11262_v52  ;;  %v14133_v50 = vld [vmem:[#allocation45_spill] sm:$0xff] }
 0x389   :  { %10147 = vpow2.f32 %v5969_v63  ;;  %v6956_v21 = vpack.c.bf16 %v10142_v23, %v10142_v23  ;;  %v6113_v61 = vmul.f32 1.442695, %v5493_v32  ;;  %v8619_v20 = vpack.c.b16 %v8141_v39, %v8140_v17  ;;  %v14134_v17 = vld [vmem:[#allocation77_spill] sm:$0xff] }
 0x38a   :  { %10149 = vpow2.f32 %v5975_v25  ;;  %v8138_v44 = vunpack.c.l.b16 %v6985_v40  ;;  %v8139_v56 = vunpack.c.l.b16 %v6986_v47  ;;  %v4906_v57 = vpack.c.bf16 %v4394_v49, %v4394_v49 }
 0x38b   :  { %9662 = vset.pattern.permute.xlu2 %v14087_v41  ;;  %9154 = vmatpush.bf16.msrb.mxu0 %v8621_v36  ;;  %v10144_v36 = vpop.eup %10143  ;;  %v4484_v19 = vmul.f32 -20000.0, %v3972_v28  ;;  %v4468_v8 = vmul.f32 -20000.0, %v3956_v54  ;;  %v3959_v63 = vmul.f32 %v3447_v26, %v3447_v26  ;;  %10151 = vpow2.f32 %v5961_v22 }
 0x38c   :  { %9661 = vset.pattern.permute.xlu1 %v14072_v45  ;;  %2317 = vperm.xlu0 %9951, %v14131_v1   ;;  %v3955_v62 = vmul.f32 %v3443_v46, %v3443_v46  ;;  %10153 = vpow2.f32 %v6113_v61  ;;  %v8618_v32 = vpack.c.b16 %v8139_v56, %v8138_v44  ;;  %v12131_v47 = vunpack.c.l.b16 %v6956_v21 }
 0x38d   :  { %v12123_v18 = vpop.permute.xlu0 %2620  ;;  %v1008_v0 = vpop.permute.xlu2 %1007  ;;  %v3450_v39 = vsub.f32 %v14134_v17, %v11262_v52  ;;  %v4996_v40 = vpack.c.bf16 %v4484_v19, %v4484_v19  ;;  %v3442_v49 = vsub.f32 %v12001_v34, %v11262_v52  ;;  %v4980_v54 = vpack.c.bf16 %v4468_v8, %v4468_v8 }
 0x38e   :  { %14132 = vst [vmem:[#allocation106_spill] sm:$0xff] %v12123_v18  ;;  %v12126_v15 = vpop.eup %10145  ;;  %v3464_v25 = vsub.f32 %v1008_v0, %v11262_v52  ;;  %v3446_v26 = vsub.f32 %v12043_v35, %v11262_v52  ;;  %v4471_v22 = vmul.f32 -20000.0, %v3959_v63  ;;  %v4467_v46 = vmul.f32 -20000.0, %v3955_v62 }
 0x38f   :  { %9155 = vmatpush.bf16.msrb.mxu0 %v8620_v60  ;;  %v10148_v14 = vpop.eup %10147  ;;  %v5418_v60 = vunpack.c.l.bf16 %v4906_v57  ;;  %v3462_v21 = vsub.f32 %v12110_v33, %v11262_v52  ;;  %v6958_v61 = vpack.c.bf16 %v10144_v36, %v10144_v36  ;;  %v3962_v0 = vmul.f32 %v3450_v39, %v3450_v39  ;;  %v14137_v39 = vld [vmem:[#allocation117_spill] sm:$0xff] }
 0x390   :  { %v10150_v23 = vpop.eup %10149  ;;  %v3976_v44 = vmul.f32 %v3464_v25, %v3464_v25  ;;  %v6957_v57 = vpack.c.bf16 %v10148_v14, %v10148_v14  ;;  %v5508_v35 = vunpack.c.l.bf16 %v4996_v40  ;;  %v3954_v8 = vmul.f32 %v3442_v49, %v3442_v49 }
 0x391   :  { %v6960_v56 = vpack.c.bf16 %v10150_v23, %v10150_v23  ;;  %v5963_v19 = vmul.f32 1.442695, %v5418_v60  ;;  %v3958_v33 = vmul.f32 %v3446_v26, %v3446_v26  ;;  %v4983_v36 = vpack.c.bf16 %v4471_v22, %v4471_v22  ;;  %v14136_v23 = vld [vmem:[#allocation10_spill] sm:$0xff] }
 0x392   :  { %v3459_v14 = vsub.f32 %v12095_v48, %v11262_v52  ;;  %v3974_v25 = vmul.f32 %v3462_v21, %v3462_v21  ;;  %v12156_v60 = vunpack.c.l.b16 %v6958_v61  ;;  %v4488_v49 = vmul.f32 -20000.0, %v3976_v44 }
 0x393   :  { %1098 = vperm.xlu2 %9662, %v14098_v30   ;;  %9156 = vmatpush.bf16.msrb.mxu0 %v8619_v20  ;;  %v12163_v26 = vmul.f32 -20000.0, %v3962_v0  ;;  %v6143_v22 = vmul.f32 1.442695, %v5508_v35  ;;  %v3448_v48 = vsub.f32 %v12060_v31, %v11262_v52  ;;  %10155 = vpow2.f32 %v5963_v19 }
 0x394   :  { %1092 = vperm.xlu1 %9661, %v14098_v30   ;;  %2802 = vperm.xlu0 %9951, %v14133_v50   ;;  %v3441_v30 = vsub.f32 %v12015_v43, %v11262_v52  ;;  %v12146_v43 = vpop.eup %10151  ;;  %v4470_v20 = vmul.f32 -20000.0, %v3958_v33  ;;  %v3971_v44 = vmul.f32 %v3459_v14, %v3459_v14  ;;  %v3458_v0 = vsub.f32 %v12117_v53, %v11262_v52 }
 0x395   :  { %v12148_v63 = vpop.eup %10153  ;;  %v12151_v17 = vpop.permute.xlu0 %3202  ;;  %10157 = vpow2.f32 %v6143_v22  ;;  %v3456_v31 = vsub.f32 %v12104_v37, %v11262_v52 }
 0x396   :  { %v990_v28 = vpop.permute.xlu1 %989  ;;  %v3953_v62 = vmul.f32 %v3441_v30, %v3441_v30  ;;  %14135 = vst [vmem:[#allocation96_spill] sm:$0xff] %v12151_v17  ;;  %v12159_v30 = vunpack.c.l.b16 %v6960_v56  ;;  %v4486_v56 = vmul.f32 -20000.0, %v3974_v25  ;;  %v4982_v33 = vpack.c.bf16 %v4470_v20, %v4470_v20 }
 0x397   :  { %9157 = vmatpush.bf16.msrb.mxu0 %v8618_v32  ;;  %v3461_v34 = vsub.f32 %v990_v28, %v11262_v52  ;;  %v5492_v32 = vunpack.c.l.bf16 %v4980_v54  ;;  %v4979_v28 = vpack.c.bf16 %v4467_v46, %v4467_v46  ;;  %v12161_v54 = vunpack.c.l.b16 %v6957_v57 }
 0x398   :  { %v12165_v46 = vmul.f32 -20000.0, %v3954_v8  ;;  %v12169_v21 = vmul.f32 -20000.0, %v3953_v62  ;;  %v3449_v57 = vsub.f32 %v12030_v16, %v11262_v52  ;;  %v5000_v8 = vpack.c.bf16 %v4488_v49, %v4488_v49 }
 0x399   :  { %v3973_v40 = vmul.f32 %v3461_v34, %v3461_v34  ;;  %v6111_v61 = vmul.f32 1.442695, %v5492_v32  ;;  %v5491_v17 = vunpack.c.l.bf16 %v4979_v28  ;;  %v5495_v34 = vunpack.c.l.bf16 %v4983_v36  ;;  %v12190_v25 = vpop.eup %10155 }
 0x39a   :  { %v3960_v62 = vmul.f32 %v3448_v48, %v3448_v48  ;;  %v3457_v16 = vsub.f32 %v12080_v42, %v11262_v52  ;;  %v4483_v28 = vmul.f32 -20000.0, %v3971_v44  ;;  %v4998_v14 = vpack.c.bf16 %v4486_v56, %v4486_v56 }
 0x39b   :  { %9664 = vset.pattern.permute.xlu2 %v14094_v11  ;;  %v4485_v35 = vmul.f32 -20000.0, %v3973_v40  ;;  %10159 = vpow2.f32 %v6111_v61  ;;  %v12184_v53 = vmul.f32 1.442695, %v5491_v17  ;;  %v12186_v36 = vmul.f32 1.442695, %v5495_v34 }
 0x39c   :  { %9663 = vset.pattern.permute.xlu1 %v14136_v23  ;;  %3093 = vperm.xlu0 %9951, %v14137_v39   ;;  %v12192_v40 = vmul.f32 %v3449_v57, %v3449_v57  ;;  %v3970_v20 = vmul.f32 %v3458_v0, %v3458_v0  ;;  %v5512_v42 = vunpack.c.l.bf16 %v5000_v8  ;;  %v4472_v48 = vmul.f32 -20000.0, %v3960_v62 }
 0x39d   :  { %v4997_v49 = vpack.c.bf16 %v4485_v35, %v4485_v35  ;;  %v3452_v17 = vsub.f32 %v12049_v58, %v11262_v52  ;;  %v3454_v61 = vsub.f32 %v12063_v29, %v11262_v52  ;;  %v5494_v56 = vunpack.c.l.bf16 %v4982_v33  ;;  %v12202_v35 = vpop.eup %10157 }
 0x39e   :  { %v3969_v57 = vmul.f32 %v3457_v16, %v3457_v16  ;;  %v3453_v8 = vsub.f32 %v12093_v38, %v11262_v52  ;;  %v4995_v62 = vpack.c.bf16 %v4483_v28, %v4483_v28  ;;  %v5510_v58 = vunpack.c.l.bf16 %v4998_v14 }
 0x39f   :  { %v4482_v29 = vmul.f32 -20000.0, %v3970_v20  ;;  %v6151_v50 = vmul.f32 1.442695, %v5512_v42  ;;  %v4984_v18 = vpack.c.bf16 %v4472_v48, %v4472_v48  ;;  %v3964_v1 = vmul.f32 %v3452_v17, %v3452_v17 }
 0x3a0   :  { %v3966_v37 = vmul.f32 %v3454_v61, %v3454_v61  ;;  %v3968_v51 = vmul.f32 %v3456_v31, %v3456_v31  ;;  %v4481_v41 = vmul.f32 -20000.0, %v3969_v57  ;;  %v3965_v38 = vmul.f32 %v3453_v8, %v3453_v8 }
 0x3a1   :  { %v12206_v19 = vpop.eup %10159  ;;  %v5507_v28 = vunpack.c.l.bf16 %v4995_v62  ;;  %v6147_v14 = vmul.f32 1.442695, %v5510_v58  ;;  %v4994_v20 = vpack.c.bf16 %v4482_v29, %v4482_v29  ;;  %10161 = vpow2.f32 %v6151_v50 }
 0x3a2   :  { %v5496_v48 = vunpack.c.l.bf16 %v4984_v18  ;;  %v4480_v57 = vmul.f32 -20000.0, %v3968_v51  ;;  %v6115_v50 = vmul.f32 1.442695, %v5494_v56 }
 0x3a3   :  { %1117 = vperm.xlu2 %9664, %v11107_v12   ;;  %v6141_v62 = vmul.f32 1.442695, %v5507_v28  ;;  %10163 = vpow2.f32 %v6147_v14 }
 0x3a4   :  { %1111 = vperm.xlu1 %9663, %v11107_v12   ;;  %9954 = vset.pattern.permute.xlu0 %v11070_v3 }
 0x3a5   :  { %v469_v22 = vpop.permute.xlu0 %468 }
 0x3a6   :  { %v3375_v34 = vsub.f32 %v469_v22, %v11262_v52  ;;  %v1002_v44 = vpop.permute.xlu1 %1001  ;;  %v5509_v22 = vunpack.c.l.bf16 %v4997_v49 }
 0x3a7   :  { %v3463_v0 = vsub.f32 %v1002_v44, %v11262_v52  ;;  %v3451_v44 = vsub.f32 %v12076_v6, %v11262_v52  ;;  %v4478_v6 = vmul.f32 -20000.0, %v3966_v37  ;;  %v6119_v37 = vmul.f32 1.442695, %v5496_v48 }
 0x3a8   :  { %v3887_v32 = vmul.f32 %v3375_v34, %v3375_v34  ;;  %v6145_v49 = vmul.f32 1.442695, %v5509_v22  ;;  %v10162_v22 = vpop.eup %10161 }
 0x3a9   :  { %v3975_v33 = vmul.f32 %v3463_v0, %v3463_v0  ;;  %v3963_v61 = vmul.f32 %v3451_v44, %v3451_v44  ;;  %v4993_v0 = vpack.c.bf16 %v4481_v41, %v4481_v41  ;;  %v4990_v51 = vpack.c.bf16 %v4478_v6, %v4478_v6 }
 0x3aa   :  { %v4399_v16 = vmul.f32 -20000.0, %v3887_v32  ;;  %10165 = vpow2.f32 %v6145_v49  ;;  %v14139_v49 = vpack.c.bf16 %v12169_v21, %v12169_v21  ;;  %v7048_v6 = vpack.c.bf16 %v10162_v22, %v10162_v22 }
 0x3ab   :  { %v4487_v3 = vmul.f32 -20000.0, %v3975_v33  ;;  %9666 = vset.pattern.permute.xlu2 %v11095_v10  ;;  %v4475_v41 = vmul.f32 -20000.0, %v3963_v61 }
 0x3ac   :  { %v4911_v34 = vpack.c.bf16 %v4399_v16, %v4399_v16  ;;  %9665 = vset.pattern.permute.xlu1 %v11073_v4  ;;  %2105 = vperm.xlu0 %9954, %v14069_v7   ;;  %v4477_v16 = vmul.f32 -20000.0, %v3965_v38  ;;  %v5506_v7 = vunpack.c.l.bf16 %v4994_v20  ;;  %v10164_v20 = vpop.eup %10163 }
 0x3ad   :  { %v4999_v32 = vpack.c.bf16 %v4487_v3, %v4487_v3  ;;  %v954_v42 = vpop.permute.xlu0 %953  ;;  %v4476_v3 = vmul.f32 -20000.0, %v3964_v1  ;;  %v14138_v1 = vpack.c.bf16 %v12165_v46, %v12165_v46  ;;  %v4473_v46 = vmul.f32 -20000.0, %v12192_v40 }
 0x3ae   :  { %v5423_v31 = vunpack.c.l.bf16 %v4911_v34  ;;  %v3455_v17 = vsub.f32 %v954_v42, %v11262_v52  ;;  %v4992_v34 = vpack.c.bf16 %v4480_v57, %v4480_v57  ;;  %v5505_v42 = vunpack.c.l.bf16 %v4993_v0 }
 0x3af   :  { %v5511_v8 = vunpack.c.l.bf16 %v4999_v32  ;;  %v5490_v56 = vunpack.c.l.bf16 %v14138_v1  ;;  %v4989_v38 = vpack.c.bf16 %v4477_v16, %v4477_v16  ;;  %v6139_v28 = vmul.f32 1.442695, %v5506_v7 }
 0x3b0   :  { %v5973_v58 = vmul.f32 1.442695, %v5423_v31  ;;  %v3967_v33 = vmul.f32 %v3455_v17, %v3455_v17  ;;  %v5489_v32 = vunpack.c.l.bf16 %v14139_v49  ;;  %v10166_v31 = vpop.eup %10165  ;;  %v5504_v17 = vunpack.c.l.bf16 %v4992_v34 }
 0x3b1   :  { %v6149_v29 = vmul.f32 1.442695, %v5511_v8  ;;  %v6137_v61 = vmul.f32 1.442695, %v5505_v42  ;;  %v4988_v7 = vpack.c.bf16 %v4476_v3, %v4476_v3  ;;  %v4987_v57 = vpack.c.bf16 %v4475_v41, %v4475_v41 }
 0x3b2   :  { %10167 = vpow2.f32 %v5973_v58  ;;  %v4479_v18 = vmul.f32 -20000.0, %v3967_v33  ;;  %v5502_v0 = vunpack.c.l.bf16 %v4990_v51  ;;  %v8201_v16 = vunpack.c.l.b16 %v7048_v6 }
 0x3b3   :  { %10169 = vpow2.f32 %v6149_v29  ;;  %1129 = vperm.xlu2 %9666, %v11107_v12   ;;  %v7045_v29 = vpack.c.bf16 %v10166_v31, %v10166_v31  ;;  %v4985_v40 = vpack.c.bf16 %v4473_v46, %v4473_v46  ;;  %v6135_v22 = vmul.f32 1.442695, %v5504_v17 }
 0x3b4   :  { %10171 = vpow2.f32 %v6141_v62  ;;  %v4991_v44 = vpack.c.bf16 %v4479_v18, %v4479_v18  ;;  %1123 = vperm.xlu1 %9665, %v11107_v12   ;;  %2590 = vperm.xlu0 %9954, %v14071_v13   ;;  %v5501_v62 = vunpack.c.l.bf16 %v4989_v38  ;;  %v7046_v18 = vpack.c.bf16 %v10164_v20, %v10164_v20 }
 0x3b5   :  { %10173 = vpow2.f32 %v12186_v36  ;;  %v12221_v14 = vpop.permute.xlu0 %1438  ;;  %v5500_v34 = vunpack.c.l.bf16 %v4988_v7  ;;  %v5499_v42 = vunpack.c.l.bf16 %v4987_v57  ;;  %v6131_v41 = vmul.f32 1.442695, %v5502_v0 }
 0x3b6   :  { %10175 = vpow2.f32 %v12184_v53  ;;  %v5503_v48 = vunpack.c.l.bf16 %v4991_v44  ;;  %v6129_v1 = vmul.f32 1.442695, %v5501_v62  ;;  %v8198_v6 = vunpack.c.l.b16 %v7045_v29 }
 0x3b7   :  { %10177 = vpow2.f32 %v6115_v50  ;;  %v8199_v31 = vunpack.c.l.b16 %v7046_v18  ;;  %v7044_v46 = vpack.c.bf16 %v12202_v35, %v12202_v35  ;;  %v14141_v57 = vpack.c.bf16 %v12163_v26, %v12163_v26 }
 0x3b8   :  { %v10168_v36 = vpop.eup %10167  ;;  %10179 = vpow2.f32 %v6119_v37  ;;  %v6133_v21 = vmul.f32 1.442695, %v5503_v48  ;;  %v6127_v62 = vmul.f32 1.442695, %v5500_v34  ;;  %v6953_v26 = vpack.c.bf16 %v12146_v43, %v12146_v43 }
 0x3b9   :  { %v10170_v8 = vpop.eup %10169  ;;  %10181 = vpow2.f32 %v6139_v28  ;;  %v6959_v58 = vpack.c.bf16 %v10168_v36, %v10168_v36  ;;  %v8604_v36 = vpack.c.b16 %v12156_v60, %v12161_v54  ;;  %v5498_v0 = vunpack.c.l.bf16 %v14141_v57 }
 0x3ba   :  { %v10172_v33 = vpop.eup %10171  ;;  %v7047_v53 = vpack.c.bf16 %v10170_v8, %v10170_v8  ;;  %10183 = vpow2.f32 %v6137_v61  ;;  %v6107_v61 = vmul.f32 1.442695, %v5490_v56  ;;  %v5497_v8 = vunpack.c.l.bf16 %v4985_v40 }
 0x3bb   :  { %v12228_v50 = vpop.eup %10173  ;;  %9668 = vset.pattern.permute.xlu2 %v14083_v5  ;;  %v8112_v3 = vunpack.c.l.b16 %v6959_v58  ;;  %10185 = vpow2.f32 %v6133_v21  ;;  %v7043_v20 = vpack.c.bf16 %v10172_v33, %v10172_v33  ;;  %v6105_v21 = vmul.f32 1.442695, %v5489_v32  ;;  %v12250_v58 = vpop.permute.xlu2 %1026 }
 0x3bc   :  { %v12231_v37 = vpop.eup %10175  ;;  %9667 = vset.pattern.permute.xlu1 %v11092_v9  ;;  %v8200_v51 = vunpack.c.l.b16 %v7047_v53  ;;  %3075 = vperm.xlu0 %9954, %v14137_v39   ;;  %10187 = vpow2.f32 %v6135_v22  ;;  %v6125_v56 = vmul.f32 1.442695, %v5499_v42  ;;  %v6954_v60 = vpack.c.bf16 %v12190_v25, %v12190_v25 }
 0x3bd   :  { %v12235_v44 = vpop.eup %10177  ;;  %v8605_v38 = vpack.c.b16 %v12159_v30, %v8112_v3  ;;  %v12238_v28 = vpop.permute.xlu0 %1923  ;;  %v14140_v30 = vpack.c.bf16 %v12126_v15, %v12126_v15  ;;  %10189 = vpow2.f32 %v6131_v41  ;;  %v8648_v54 = vpack.c.b16 %v8199_v31, %v8198_v6 }
 0x3be   :  { %v10180_v49 = vpop.eup %10179  ;;  %v8649_v48 = vpack.c.b16 %v8201_v16, %v8200_v51  ;;  %10191 = vpow2.f32 %v6129_v1  ;;  %v8196_v15 = vunpack.c.l.b16 %v7043_v20  ;;  %v8197_v33 = vunpack.c.l.b16 %v7044_v46 }
 0x3bf   :  { %v10182_v17 = vpop.eup %10181  ;;  %9128 = vmatpush.bf16.msra.mxu2 %v8605_v38  ;;  %v8108_v7 = vunpack.c.l.b16 %v14140_v30  ;;  %10193 = vpow2.f32 %v6107_v61  ;;  %v7032_v32 = vpack.c.bf16 %v10180_v49, %v10180_v49  ;;  %v6121_v29 = vmul.f32 1.442695, %v5497_v8 }
 0x3c0   :  { %9189 = vmatpush.bf16.msrb.mxu3 %v8649_v48  ;;  %v10184_v35 = vpop.eup %10183  ;;  %v7042_v53 = vpack.c.bf16 %v10182_v17, %v10182_v17  ;;  %10195 = vpow2.f32 %v6127_v62  ;;  %v6123_v22 = vmul.f32 1.442695, %v5498_v0  ;;  %v8107_v3 = vunpack.c.l.b16 %v6954_v60 }
 0x3c1   :  { %v10186_v16 = vpop.eup %10185  ;;  %v8603_v25 = vpack.c.b16 %v12131_v47, %v8108_v7  ;;  %v7041_v18 = vpack.c.bf16 %v10184_v35, %v10184_v35  ;;  %10197 = vpow2.f32 %v6125_v56  ;;  %v7031_v34 = vpack.c.bf16 %v12228_v50, %v12228_v50 }
 0x3c2   :  { %v10188_v40 = vpop.eup %10187  ;;  %10199 = vpow2.f32 %v6105_v21  ;;  %v8647_v43 = vpack.c.b16 %v8197_v33, %v8196_v15  ;;  %v8195_v41 = vunpack.c.l.b16 %v7042_v53  ;;  %v7039_v51 = vpack.c.bf16 %v10186_v16, %v10186_v16  ;;  %v14142_v15 = vld [vmem:[#allocation24_spill] sm:$0xff] }
 0x3c3   :  { %1147 = vperm.xlu2 %9668, %v11107_v12   ;;  %9129 = vmatpush.bf16.msra.mxu2 %v8604_v36  ;;  %v10190_v42 = vpop.eup %10189  ;;  %v8106_v38 = vunpack.c.l.b16 %v6953_v26  ;;  %v8185_v20 = vunpack.c.l.b16 %v7032_v32  ;;  %v7029_v49 = vpack.c.bf16 %v12148_v63, %v12148_v63  ;;  %v7030_v48 = vpack.c.bf16 %v12235_v44, %v12235_v44  ;;  %v12268_v61 = vpop.permute.xlu2 %1038 }
 0x3c4   :  { %1141 = vperm.xlu1 %9667, %v11107_v12   ;;  %9190 = vmatpush.bf16.msrb.mxu3 %v8648_v54  ;;  %v10192_v1 = vpop.eup %10191  ;;  %10201 = vpow2.f32 %v6121_v29  ;;  %v8194_v50 = vunpack.c.l.b16 %v7041_v18  ;;  %v7040_v6 = vpack.c.bf16 %v10188_v40, %v10188_v40  ;;  %v8184_v17 = vunpack.c.l.b16 %v7031_v34 }
 0x3c5   :  { %9957 = vset.pattern.permute.xlu0 %v11095_v10  ;;  %v12262_v47 = vpop.permute.xlu0 %2408  ;;  %v10194_v31 = vpop.eup %10193  ;;  %10203 = vpow2.f32 %v6123_v22  ;;  %v8602_v46 = vpack.c.b16 %v8107_v3, %v8106_v38  ;;  %v7028_v36 = vpack.c.bf16 %v12206_v19, %v12206_v19  ;;  %v8192_v57 = vunpack.c.l.b16 %v7039_v51 }
 0x3c6   :  { %v10196_v30 = vpop.eup %10195  ;;  %v8646_v7 = vpack.c.b16 %v8195_v41, %v8194_v50  ;;  %v7037_v63 = vpack.c.bf16 %v10192_v1, %v10192_v1  ;;  %v7038_v0 = vpack.c.bf16 %v10190_v42, %v10190_v42  ;;  %v8641_v44 = vpack.c.b16 %v8185_v20, %v8184_v17 }
 0x3c7   :  { %9130 = vmatpush.bf16.msra.mxu2 %v8603_v25  ;;  %v10198_v8 = vpop.eup %10197  ;;  %v8182_v62 = vunpack.c.l.b16 %v7029_v49  ;;  %v8183_v35 = vunpack.c.l.b16 %v7030_v48  ;;  %v7027_v21 = vpack.c.bf16 %v12231_v37, %v12231_v37  ;;  %v8193_v19 = vunpack.c.l.b16 %v7040_v6  ;;  %v14143_v49 = vld [vmem:[#allocation56_spill] sm:$0xff]  ;;  %v12288_v6 = vpop.permute.xlu1 %1020 }
 0x3c8   :  { %9191 = vmatpush.bf16.msrb.mxu3 %v8647_v43  ;;  %v10200_v56 = vpop.eup %10199  ;;  %v7036_v60 = vpack.c.bf16 %v10196_v30, %v10196_v30  ;;  %v7026_v54 = vpack.c.bf16 %v10194_v31, %v10194_v31  ;;  %v8190_v16 = vunpack.c.l.b16 %v7037_v63  ;;  %v8191_v26 = vunpack.c.l.b16 %v7038_v0  ;;  %v14145_v0 = vld [vmem:[#allocation35_spill] sm:$0xff] }
 0x3c9   :  { %v8645_v53 = vpack.c.b16 %v8193_v19, %v8192_v57  ;;  %v7035_v32 = vpack.c.bf16 %v10198_v8, %v10198_v8  ;;  %v8640_v25 = vpack.c.b16 %v8183_v35, %v8182_v62  ;;  %v8180_v18 = vunpack.c.l.b16 %v7027_v21  ;;  %v14146_v62 = vld [vmem:[#allocation104_spill] sm:$0xff] }
 0x3ca   :  { %v10202_v33 = vpop.eup %10201  ;;  %v8181_v40 = vunpack.c.l.b16 %v7028_v36  ;;  %v7025_v37 = vpack.c.bf16 %v10200_v56, %v10200_v56  ;;  %v8644_v34 = vpack.c.b16 %v8191_v26, %v8190_v16  ;;  %v8189_v43 = vunpack.c.l.b16 %v7036_v60  ;;  %v14147_v56 = vld [vmem:[#allocation18_spill] sm:$0xff] }
 0x3cb   :  { %9670 = vset.pattern.permute.xlu2 %v11171_v27  ;;  %9131 = vmatpush.bf16.msra.mxu2 %v8602_v46  ;;  %v10204_v29 = vpop.eup %10203  ;;  %v7033_v3 = vpack.c.bf16 %v10202_v33, %v10202_v33  ;;  %v8188_v42 = vunpack.c.l.b16 %v7035_v32  ;;  %v12280_v1 = vpop.permute.xlu2 %1056  ;;  %v8179_v20 = vunpack.c.l.b16 %v7026_v54  ;;  %v3435_v48 = vsub.f32 %v14143_v49, %v11262_v52  ;;  %v14148_v54 = vld [vmem:[#allocation14_spill] sm:$0xff] }
 0x3cc   :  { %9669 = vset.pattern.permute.xlu1 %v11067_v2  ;;  %9192 = vmatpush.bf16.msrb.mxu3 %v8646_v7  ;;  %v7034_v41 = vpack.c.bf16 %v10204_v29, %v10204_v29  ;;  %v8639_v51 = vpack.c.b16 %v8181_v40, %v8180_v18  ;;  %v8178_v38 = vunpack.c.l.b16 %v7025_v37  ;;  %v3439_v50 = vsub.f32 %v11987_v24, %v11262_v52  ;;  %v14144_v7 = vld [vmem:[#allocation121_spill] sm:$0xff]  ;;  %v14150_v26 = vld [vmem:[#allocation38_spill] sm:$0xff] }
 0x3cd   :  { %2681 = vperm.xlu0 %9957, %v14142_v15   ;;  %v12277_v22 = vpop.permute.xlu0 %2893  ;;  %v8643_v31 = vpack.c.b16 %v8189_v43, %v8188_v42  ;;  %v8186_v46 = vunpack.c.l.b16 %v7033_v3  ;;  %v3438_v36 = vsub.f32 %v12006_v59, %v11262_v52  ;;  %v3480_v57 = vsub.f32 %v14144_v7, %v11262_v52 }
 0x3ce   :  { %v8187_v17 = vunpack.c.l.b16 %v7034_v41  ;;  %v8638_v30 = vpack.c.b16 %v8179_v20, %v8178_v38  ;;  %v3947_v63 = vmul.f32 %v3435_v48, %v3435_v48  ;;  %v3437_v8 = vsub.f32 %v14145_v0, %v11262_v52 }
 0x3cf   :  { %9176 = vmatpush.bf16.msrb.mxu2 %v8641_v44  ;;  %v3951_v44 = vmul.f32 %v3439_v50, %v3439_v50  ;;  %v3436_v35 = vsub.f32 %v14146_v62, %v11262_v52  ;;  %v3950_v21 = vmul.f32 %v3438_v36, %v3438_v36  ;;  %v3992_v60 = vmul.f32 %v3480_v57, %v3480_v57  ;;  %v12309_v18 = vpop.permute.xlu1 %1032 }
 0x3d0   :  { %9193 = vmatpush.bf16.msrb.mxu3 %v8645_v53  ;;  %v8642_v24 = vpack.c.b16 %v8187_v17, %v8186_v46  ;;  %v4459_v33 = vmul.f32 -20000.0, %v3947_v63  ;;  %v14149_v53 = vld [vmem:[#allocation50_spill] sm:$0xff]  ;;  %v3433_v32 = vsub.f32 %v14150_v26, %v11262_v52  ;;  %v3949_v29 = vmul.f32 %v3437_v8, %v3437_v8 }
 0x3d1   :  { %v3434_v16 = vsub.f32 %v14149_v53, %v11262_v52  ;;  %v3948_v40 = vmul.f32 %v3436_v35, %v3436_v35  ;;  %v4462_v37 = vmul.f32 -20000.0, %v3950_v21  ;;  %v4504_v3 = vmul.f32 -20000.0, %v3992_v60 }
 0x3d2   :  { %v3945_v43 = vmul.f32 %v3433_v32, %v3433_v32  ;;  %v4461_v41 = vmul.f32 -20000.0, %v3949_v29  ;;  %v14151_v29 = vld [vmem:[#allocation17_spill] sm:$0xff] }
 0x3d3   :  { %9177 = vmatpush.bf16.msrb.mxu2 %v8640_v25  ;;  %1159 = vperm.xlu2 %9670, %v11107_v12   ;;  %v12301_v59 = vpop.permute.xlu2 %1068  ;;  %v4463_v25 = vmul.f32 -20000.0, %v3951_v44  ;;  %v3946_v42 = vmul.f32 %v3434_v16, %v3434_v16  ;;  %v4460_v38 = vmul.f32 -20000.0, %v3948_v40  ;;  %v4974_v20 = vpack.c.bf16 %v4462_v37, %v4462_v37 }
 0x3d4   :  { %1153 = vperm.xlu1 %9669, %v11107_v12   ;;  %9194 = vmatpush.bf16.msrb.mxu3 %v8644_v34  ;;  %v4971_v34 = vpack.c.bf16 %v4459_v33, %v4459_v33  ;;  %v5016_v48 = vpack.c.bf16 %v4504_v3, %v4504_v3  ;;  %v4457_v46 = vmul.f32 -20000.0, %v3945_v43  ;;  %v4973_v17 = vpack.c.bf16 %v4461_v41, %v4461_v41 }
 0x3d5   :  { %3263 = vperm.xlu0 %9957, %v11712_v55   ;;  %v12299_v19 = vpop.permute.xlu0 %3184  ;;  %v4972_v63 = vpack.c.bf16 %v4460_v38, %v4460_v38  ;;  %v5486_v0 = vunpack.c.l.bf16 %v4974_v20 }
 0x3d6   :  { %v5483_v50 = vunpack.c.l.bf16 %v4971_v34  ;;  %v5528_v8 = vunpack.c.l.bf16 %v5016_v48  ;;  %v4969_v35 = vpack.c.bf16 %v4457_v46, %v4457_v46  ;;  %v5485_v21 = vunpack.c.l.bf16 %v4973_v17  ;;  %v14152_v34 = vld [vmem:[#allocation21_spill] sm:$0xff]  ;;  %v14153_v17 = vld [vmem:[#allocation40_spill] sm:$0xff] }
 0x3d7   :  { %9178 = vmatpush.bf16.msrb.mxu2 %v8639_v51  ;;  %v4975_v51 = vpack.c.bf16 %v4463_v25, %v4463_v25  ;;  %v12316_v7 = vpop.permute.xlu1 %1050  ;;  %v5484_v53 = vunpack.c.l.bf16 %v4972_v63  ;;  %v6099_v16 = vmul.f32 1.442695, %v5486_v0  ;;  %v12326_v48 = vmul.u32 512, %v14136_v23 }
 0x3d8   :  { %9195 = vmatpush.bf16.msrb.mxu3 %v8643_v31  ;;  %v4458_v31 = vmul.f32 -20000.0, %v3946_v42  ;;  %v6183_v26 = vmul.f32 1.442695, %v5528_v8  ;;  %v5481_v40 = vunpack.c.l.bf16 %v4969_v35  ;;  %v6097_v37 = vmul.f32 1.442695, %v5485_v21 }
 0x3d9   :  { %vm64_vm0 = vcmp.ge.s32.totalorder %v14153_v17, %v12326_v48 }
 0x3da   :  { %v4970_v62 = vpack.c.bf16 %v4458_v31, %v4458_v31  ;;  %v6089_v31 = vmul.f32 1.442695, %v5481_v40 }
 0x3db   :  { %9179 = vmatpush.bf16.msrb.mxu2 %v8638_v30  ;;  %9672 = vset.pattern.permute.xlu2 %v14147_v56  ;;  %v5487_v30 = vunpack.c.l.bf16 %v4975_v51  ;;  %v6095_v51 = vmul.f32 1.442695, %v5484_v53 }
 0x3dc   :  { %9671 = vset.pattern.permute.xlu1 %v14148_v54  ;;  %9196 = vmatpush.bf16.msrb.mxu3 %v8642_v24  ;;  %v6093_v24 = vmul.f32 1.442695, %v5483_v50  ;;  %v5482_v25 = vunpack.c.l.bf16 %v4970_v62 }
 0x3dd   :  { %9963 = vset.pattern.permute.xlu0 %v14094_v11  ;;  %v12312_v49 = vpop.permute.xlu2 %1086  ;;  %v6101_v60 = vmul.f32 1.442695, %v5487_v30  ;;  %v12330_v30 = vadd.s32 512, %v12326_v48 }
 0x3de   :  { %10205 = vpow2.f32 %v6093_v24  ;;  %v6091_v50 = vmul.f32 1.442695, %v5482_v25  ;;  %v14154_v24 = vld [vmem:[#allocation51_spill] sm:$0xff] }
 0x3df   :  { %10207 = vpow2.f32 %v6101_v60  ;;  %vm97_vm2 = vcmp.lt.s32.totalorder %v14153_v17, %v12330_v30  ;;  %v3475_v62 = vsub.f32 %v14154_v24, %v11262_v52  ;;  %v13913_v60 = vmov 0.0  }
 0x3e0   :  { %10209 = vpow2.f32 %v6099_v16  ;;  %vm129_vm4 = vmand %vm64_vm0, %vm97_vm2  ;;  %v3477_v16 = vsub.f32 %v12312_v49, %v11262_v52  ;;  %v3474_v24 = vsub.f32 %v12301_v59, %v11262_v52 }
 0x3e1   :  { %10211 = vpow2.f32 %v6183_v26 }
 0x3e2   :  { %10213 = vpow2.f32 %v6097_v37  ;;  %v3989_v49 = vmul.f32 %v3477_v16, %v3477_v16 }
 0x3e3   :  { %1177 = vperm.xlu2 %9672, %v11107_v12  }
 0x3e4   :  { %1171 = vperm.xlu1 %9671, %v11107_v12  }
 0x3e5   :  { %v863_v36 = vpop.permute.xlu0 %862  ;;  %3251 = vperm.xlu0 %9963, %v11712_v55  }
 0x3e6   :  { %v3440_v57 = vsub.f32 %v863_v36, %v11262_v52  ;;  %v12322_v43 = vpop.permute.xlu1 %1062  ;;  %v32_v36 = vadd.s32 128, %v14153_v17 }
 0x3e8   :  { %v3952_v44 = vmul.f32 %v3440_v57, %v3440_v57  ;;  %v10206_v57 = vpop.eup %10205  ;;  %vm65_vm1 = vcmp.ge.s32.totalorder %v32_v36, %v12326_v48  ;;  %vm98_vm3 = vcmp.lt.s32.totalorder %v32_v36, %v12330_v30 }
 0x3e9   :  { %v10208_v63 = vpop.eup %10207  ;;  %vm130_vm5 = vmand %vm65_vm1, %vm98_vm3 }
 0x3ea   :  { %v4464_v33 = vmul.f32 -20000.0, %v3952_v44  ;;  %v10210_v8 = vpop.eup %10209  ;;  %v7023_v26 = vpack.c.bf16 %v10208_v63, %v10208_v63 }
 0x3eb   :  { %9674 = vset.pattern.permute.xlu2 %v14072_v45  ;;  %v10212_v44 = vpop.eup %10211  ;;  %v7022_v37 = vpack.c.bf16 %v10210_v8, %v10210_v8 }
 0x3ec   :  { %v4976_v32 = vpack.c.bf16 %v4464_v33, %v4464_v33  ;;  %9673 = vset.pattern.permute.xlu1 %v14151_v29  ;;  %v161_v33 = vsel %vm129_vm4, 1.0, %v13913_v60  ;;  %v10214_v53 = vpop.eup %10213  ;;  %v8176_v36 = vunpack.c.l.b16 %v7023_v26  ;;  %v4501_v26 = vmul.f32 -20000.0, %v3989_v49 }
 0x3ed   :  { %v1099_v3 = vpop.permute.xlu2 %1098  ;;  %9964 = vset.pattern.permute.xlu0 %v14152_v34 }
 0x3ee   :  { %v5488_v42 = vunpack.c.l.bf16 %v4976_v32  ;;  %v3479_v41 = vsub.f32 %v1099_v3, %v11262_v52  ;;  %v162_v32 = vsel %vm130_vm5, 1.0, %v13913_v60 }
 0x3ef   :  { %v12346_v3 = vpack.c.bf16 %v162_v32, %v161_v33 }
 0x3f0   :  { %v6103_v38 = vmul.f32 1.442695, %v5488_v42  ;;  %v3991_v20 = vmul.f32 %v3479_v41, %v3479_v41  ;;  %v7064_v41 = vpack.c.bf16 %v10212_v44, %v10212_v44  ;;  %v8175_v44 = vunpack.c.l.b16 %v7022_v37 }
 0x3f1   :  { %v3472_v37 = vsub.f32 %v12280_v1, %v11262_v52 }
 0x3f2   :  { %10215 = vpow2.f32 %v6103_v38  ;;  %v4503_v46 = vmul.f32 -20000.0, %v3991_v20  ;;  %v3987_v20 = vmul.f32 %v3475_v62, %v3475_v62  ;;  %v8217_v16 = vunpack.c.l.b16 %v7064_v41 }
 0x3f3   :  { %10217 = vpow2.f32 %v6095_v51  ;;  %1189 = vperm.xlu2 %9674, %v11107_v12  }
 0x3f4   :  { %1183 = vperm.xlu1 %9673, %v11107_v12   ;;  %v5015_v0 = vpack.c.bf16 %v4503_v46, %v4503_v46  ;;  %10219 = vpow2.f32 %v6091_v50  ;;  %v7021_v50 = vpack.c.bf16 %v10214_v53, %v10214_v53  ;;  %v4499_v32 = vmul.f32 -20000.0, %v3987_v20 }
 0x3f5   :  { %10221 = vpow2.f32 %v6089_v31  ;;  %v7466_v31 = vunpack.c.l.b16 %v12346_v3 }
 0x3f6   :  { %v1081_v35 = vpop.permute.xlu1 %1080  ;;  %v5527_v21 = vunpack.c.l.bf16 %v5015_v0  ;;  %v7019_v0 = vpack.c.bf16 %v10206_v57, %v10206_v57 }
 0x3f7   :  { %v3476_v51 = vsub.f32 %v1081_v35, %v11262_v52  ;;  %v7498_v62 = vpack.c.b16 %v7466_v31, %v7466_v31 }
 0x3f8   :  { %v10216_v25 = vpop.eup %10215  ;;  %v6181_v40 = vmul.f32 1.442695, %v5527_v21  ;;  %v3473_v21 = vsub.f32 %v12322_v43, %v11262_v52  ;;  %v8172_v57 = vunpack.c.l.b16 %v7019_v0  ;;  %v3471_v43 = vsub.f32 %v12316_v7, %v11262_v52 }
 0x3f9   :  { %v10218_v42 = vpop.eup %10217  ;;  %v7024_v38 = vpack.c.bf16 %v10216_v25, %v10216_v25  ;;  %v3988_v33 = vmul.f32 %v3476_v51, %v3476_v51  ;;  %v8174_v25 = vunpack.c.l.b16 %v7021_v50  ;;  %9106 = vmatmul.bf16.vlgmr.msra.gmra.mxu0 %v7498_v62  ;;  %v14155_v50 = vld [vmem:[#allocation105_spill] sm:$0xff] }
 0x3fa   :  { %10223 = vpow2.f32 %v6181_v40  ;;  %v10220_v46 = vpop.eup %10219  ;;  %v7020_v35 = vpack.c.bf16 %v10218_v42, %v10218_v42  ;;  %v3986_v42 = vmul.f32 %v3474_v24, %v3474_v24  ;;  %v3985_v51 = vmul.f32 %v3473_v21, %v3473_v21 }
 0x3fb   :  { %9676 = vset.pattern.permute.xlu2 %v14136_v23  ;;  %v8177_v63 = vunpack.c.l.b16 %v7024_v38  ;;  %v10222_v8 = vpop.eup %10221  ;;  %v7018_v38 = vpack.c.bf16 %v10220_v46, %v10220_v46  ;;  %v8636_v31 = vpack.c.b16 %v8175_v44, %v8174_v25  ;;  %v4500_v41 = vmul.f32 -20000.0, %v3988_v33 }
 0x3fc   :  { %9675 = vset.pattern.permute.xlu1 %v14152_v34  ;;  %v7017_v40 = vpack.c.bf16 %v10222_v8, %v10222_v8  ;;  %v8173_v60 = vunpack.c.l.b16 %v7020_v35  ;;  %v3470_v49 = vsub.f32 %v14155_v50, %v11262_v52  ;;  %v3469_v46 = vsub.f32 %v12268_v61, %v11262_v52  ;;  %v14156_v8 = vld [vmem:[#allocation16_spill] sm:$0xff] }
 0x3fd   :  { %v8637_v53 = vpack.c.b16 %v8177_v63, %v8176_v36  ;;  %v5011_v36 = vpack.c.bf16 %v4499_v32, %v4499_v32  ;;  %v5013_v63 = vpack.c.bf16 %v4501_v26, %v4501_v26  ;;  %v8171_v1 = vunpack.c.l.b16 %v7018_v38 }
 0x3fe   :  { %v3984_v24 = vmul.f32 %v3472_v37, %v3472_v37  ;;  %v4498_v44 = vmul.f32 -20000.0, %v3986_v42  ;;  %v8635_v7 = vpack.c.b16 %v8173_v60, %v8172_v57  ;;  %v8170_v35 = vunpack.c.l.b16 %v7017_v40 }
 0x3ff   :  { %9180 = vmatpush.bf16.msrb.mxu2 %v8637_v53  ;;  %v3983_v62 = vmul.f32 %v3471_v43, %v3471_v43  ;;  %v4497_v21 = vmul.f32 -20000.0, %v3985_v51  ;;  %v5012_v33 = vpack.c.bf16 %v4500_v41, %v4500_v41  ;;  %v3982_v32 = vmul.f32 %v3470_v49, %v3470_v49 }
 0x400   :  { %v10224_v59 = vpop.eup %10223  ;;  %v5523_v25 = vunpack.c.l.bf16 %v5011_v36  ;;  %v3981_v61 = vmul.f32 %v3469_v46, %v3469_v46  ;;  %v5525_v26 = vunpack.c.l.bf16 %v5013_v63  ;;  %v3468_v38 = vsub.f32 %v12309_v18, %v11262_v52 }
 0x401   :  { %v7063_v20 = vpack.c.bf16 %v10224_v59, %v10224_v59  ;;  %v4496_v37 = vmul.f32 -20000.0, %v3984_v24  ;;  %v8634_v60 = vpack.c.b16 %v8171_v1, %v8170_v35  ;;  %v4495_v57 = vmul.f32 -20000.0, %v3983_v62 }
 0x402   :  { %v5009_v40 = vpack.c.bf16 %v4497_v21, %v4497_v21  ;;  %v5524_v42 = vunpack.c.l.bf16 %v5012_v33  ;;  %v4494_v51 = vmul.f32 -20000.0, %v3982_v32  ;;  %v6173_v41 = vmul.f32 1.442695, %v5523_v25 }
 0x403   :  { %v8216_v0 = vunpack.c.l.b16 %v7063_v20  ;;  %1208 = vperm.xlu2 %9676, %v14156_v8   ;;  %9181 = vmatpush.bf16.msrb.mxu2 %v8636_v31  ;;  %v3467_v50 = vsub.f32 %v12250_v58, %v11262_v52  ;;  %v4493_v49 = vmul.f32 -20000.0, %v3981_v61  ;;  %v6177_v36 = vmul.f32 1.442695, %v5525_v26 }
 0x404   :  { %1201 = vperm.xlu1 %9675, %v11107_v12   ;;  %v5010_v12 = vpack.c.bf16 %v4498_v44, %v4498_v44  ;;  %v3466_v18 = vsub.f32 %v12288_v6, %v11262_v52  ;;  %v3980_v63 = vmul.f32 %v3468_v38, %v3468_v38  ;;  %v5007_v24 = vpack.c.bf16 %v4495_v57, %v4495_v57 }
 0x405   :  { %v8657_v53 = vpack.c.b16 %v8217_v16, %v8216_v0  ;;  %v14157_v16 = vld [vmem:[#allocation93_spill] sm:$0xff]  ;;  %v5008_v0 = vpack.c.bf16 %v4496_v37, %v4496_v37  ;;  %v5521_v44 = vunpack.c.l.bf16 %v5009_v40  ;;  %v5006_v58 = vpack.c.bf16 %v4494_v51, %v4494_v51 }
 0x406   :  { %v1093_v59 = vpop.permute.xlu1 %1092  ;;  %v3465_v43 = vsub.f32 %v14157_v16, %v11262_v52  ;;  %v5522_v1 = vunpack.c.l.bf16 %v5010_v12  ;;  %10225 = vpow2.f32 %v6173_v41  ;;  %v3979_v21 = vmul.f32 %v3467_v50, %v3467_v50 }
 0x407   :  { %v3478_v20 = vsub.f32 %v1093_v59, %v11262_v52  ;;  %9182 = vmatpush.bf16.msrb.mxu2 %v8635_v7  ;;  %9202 = vmatpush.bf16.msra.mxu0 %v8657_v53  ;;  %v6175_v7 = vmul.f32 1.442695, %v5524_v42  ;;  %v5005_v33 = vpack.c.bf16 %v4493_v49, %v4493_v49  ;;  %10227 = vpow2.f32 %v6177_v36 }
 0x408   :  { %v3977_v62 = vmul.f32 %v3465_v43, %v3465_v43  ;;  %v3978_v32 = vmul.f32 %v3466_v18, %v3466_v18  ;;  %v4492_v25 = vmul.f32 -20000.0, %v3980_v63  ;;  %v5520_v59 = vunpack.c.l.bf16 %v5008_v0 }
 0x409   :  { %v3990_v31 = vmul.f32 %v3478_v20, %v3478_v20  ;;  %v6171_v6 = vmul.f32 1.442695, %v5522_v1  ;;  %v5519_v61 = vunpack.c.l.bf16 %v5007_v24  ;;  %v6169_v26 = vmul.f32 1.442695, %v5521_v44 }
 0x40a   :  { %10229 = vpow2.f32 %v6175_v7  ;;  %v4489_v38 = vmul.f32 -20000.0, %v3977_v62  ;;  %v4491_v37 = vmul.f32 -20000.0, %v3979_v21  ;;  %v5517_v57 = vunpack.c.l.bf16 %v5005_v33  ;;  %v14158_v21 = vld [vmem:[#allocation11_spill] sm:$0xff] }
 0x40b   :  { %v4502_v46 = vmul.f32 -20000.0, %v3990_v31  ;;  %9678 = vset.pattern.permute.xlu2 %v11073_v4  ;;  %9183 = vmatpush.bf16.msrb.mxu2 %v8634_v60  ;;  %v5518_v60 = vunpack.c.l.bf16 %v5006_v58  ;;  %v6167_v40 = vmul.f32 1.442695, %v5520_v59  ;;  %v4490_v31 = vmul.f32 -20000.0, %v3978_v32 }
 0x40c   :  { %9677 = vset.pattern.permute.xlu1 %v14094_v11  ;;  %v10226_v12 = vpop.eup %10225  ;;  %v5004_v16 = vpack.c.bf16 %v4492_v25, %v4492_v25  ;;  %v6165_v43 = vmul.f32 1.442695, %v5519_v61  ;;  %v5001_v41 = vpack.c.bf16 %v4489_v38, %v4489_v38  ;;  %v5003_v50 = vpack.c.bf16 %v4491_v37, %v4491_v37 }
 0x40d   :  { %v5014_v35 = vpack.c.bf16 %v4502_v46, %v4502_v46  ;;  %v10228_v42 = vpop.eup %10227  ;;  %v6163_v49 = vmul.f32 1.442695, %v5518_v60  ;;  %v6161_v36 = vmul.f32 1.442695, %v5517_v57  ;;  %v7059_v63 = vpack.c.bf16 %v10226_v12, %v10226_v12 }
 0x40e   :  { %v7061_v46 = vpack.c.bf16 %v10228_v42, %v10228_v42  ;;  %v5002_v0 = vpack.c.bf16 %v4490_v31, %v4490_v31  ;;  %v5516_v1 = vunpack.c.l.bf16 %v5004_v16  ;;  %v5515_v62 = vunpack.c.l.bf16 %v5003_v50 }
 0x40f   :  { %v5526_v53 = vunpack.c.l.bf16 %v5014_v35  ;;  %v5513_v58 = vunpack.c.l.bf16 %v5001_v41  ;;  %v8212_v32 = vunpack.c.l.b16 %v7059_v63 }
 0x410   :  { %v10230_v51 = vpop.eup %10229  ;;  %v8214_v33 = vunpack.c.l.b16 %v7061_v46  ;;  %v5514_v25 = vunpack.c.l.bf16 %v5002_v0  ;;  %v6159_v59 = vmul.f32 1.442695, %v5516_v1  ;;  %v6157_v12 = vmul.f32 1.442695, %v5515_v62 }
 0x411   :  { %v6179_v20 = vmul.f32 1.442695, %v5526_v53  ;;  %v7060_v7 = vpack.c.bf16 %v10230_v51, %v10230_v51  ;;  %v6153_v60 = vmul.f32 1.442695, %v5513_v58 }
 0x412   :  { %v6155_v57 = vmul.f32 1.442695, %v5514_v25 }
 0x413   :  { %10231 = vpow2.f32 %v6179_v20  ;;  %1220 = vperm.xlu2 %9678, %v14156_v8  }
 0x414   :  { %10233 = vpow2.f32 %v6171_v6  ;;  %1214 = vperm.xlu1 %9677, %v14156_v8  }
 0x415   :  { %10235 = vpow2.f32 %v6169_v26  ;;  %v8213_v26 = vunpack.c.l.b16 %v7060_v7 }
 0x416   :  { %10237 = vpow2.f32 %v6167_v40 }
 0x417   :  { %10239 = vpow2.f32 %v6165_v43  ;;  %v8655_v31 = vpack.c.b16 %v8213_v26, %v8212_v32 }
 0x418   :  { %10241 = vpow2.f32 %v6161_v36 }
 0x419   :  { %v10232_v18 = vpop.eup %10231  ;;  %10243 = vpow2.f32 %v6163_v49 }
 0x41a   :  { %v10234_v24 = vpop.eup %10233  ;;  %v7062_v44 = vpack.c.bf16 %v10232_v18, %v10232_v18  ;;  %10245 = vpow2.f32 %v6159_v59 }
 0x41b   :  { %v10236_v35 = vpop.eup %10235  ;;  %9680 = vset.pattern.permute.xlu2 %v11092_v9  ;;  %v7058_v38 = vpack.c.bf16 %v10234_v24, %v10234_v24  ;;  %10247 = vpow2.f32 %v6157_v12  ;;  %v12391_v12 = vpop.permute.xlu1 %1111 }
 0x41c   :  { %9679 = vset.pattern.permute.xlu1 %v14158_v21  ;;  %v8215_v53 = vunpack.c.l.b16 %v7062_v44  ;;  %v10238_v6 = vpop.eup %10237  ;;  %v7057_v20 = vpack.c.bf16 %v10236_v35, %v10236_v35  ;;  %10249 = vpow2.f32 %v6153_v60 }
 0x41d   :  { %v10240_v37 = vpop.eup %10239  ;;  %v7056_v40 = vpack.c.bf16 %v10238_v6, %v10238_v6  ;;  %v8211_v43 = vunpack.c.l.b16 %v7058_v38  ;;  %10251 = vpow2.f32 %v6155_v57  ;;  %v12387_v38 = vpop.permute.xlu2 %1117 }
 0x41e   :  { %v8656_v61 = vpack.c.b16 %v8215_v53, %v8214_v33  ;;  %v10242_v42 = vpop.eup %10241  ;;  %v8210_v16 = vunpack.c.l.b16 %v7057_v20  ;;  %v7055_v51 = vpack.c.bf16 %v10240_v37, %v10240_v37  ;;  %v14159_v37 = vld [vmem:[#allocation15_spill] sm:$0xff] }
 0x41f   :  { %v10244_v41 = vpop.eup %10243  ;;  %v7053_v50 = vpack.c.bf16 %v10242_v42, %v10242_v42  ;;  %v8209_v46 = vunpack.c.l.b16 %v7056_v40 }
 0x420   :  { %9203 = vmatpush.bf16.msra.mxu0 %v8656_v61  ;;  %v8654_v49 = vpack.c.b16 %v8211_v43, %v8210_v16  ;;  %v8208_v36 = vunpack.c.l.b16 %v7055_v51  ;;  %v7054_v18 = vpack.c.bf16 %v10244_v41, %v10244_v41  ;;  %v10246_v63 = vpop.eup %10245  ;;  %v14160_v43 = vld [vmem:[#allocation22_spill] sm:$0xff] }
 0x421   :  { %v10248_v0 = vpop.eup %10247  ;;  %v8206_v44 = vunpack.c.l.b16 %v7053_v50  ;;  %v7052_v35 = vpack.c.bf16 %v10246_v63, %v10246_v63  ;;  %v14161_v50 = vld [vmem:[#allocation25_spill] sm:$0xff] }
 0x422   :  { %v10250_v1 = vpop.eup %10249  ;;  %v8653_v24 = vpack.c.b16 %v8209_v46, %v8208_v36  ;;  %v8207_v7 = vunpack.c.l.b16 %v7054_v18  ;;  %v7051_v58 = vpack.c.bf16 %v10248_v0, %v10248_v0 }
 0x423   :  { %1238 = vperm.xlu2 %9680, %v14156_v8   ;;  %v10252_v62 = vpop.eup %10251  ;;  %v8205_v53 = vunpack.c.l.b16 %v7052_v35  ;;  %v7049_v32 = vpack.c.bf16 %v10250_v1, %v10250_v1 }
 0x424   :  { %1232 = vperm.xlu1 %9679, %v14156_v8   ;;  %9204 = vmatpush.bf16.msra.mxu0 %v8655_v31  ;;  %v8652_v33 = vpack.c.b16 %v8207_v7, %v8206_v44  ;;  %v7050_v25 = vpack.c.bf16 %v10252_v62, %v10252_v62  ;;  %v8204_v59 = vunpack.c.l.b16 %v7051_v58  ;;  %v14162_v62 = vld [vmem:[#allocation102_spill] sm:$0xff] }
 0x425   :  { %v8202_v61 = vunpack.c.l.b16 %v7049_v32  ;;  %v12393_v60 = vpop.permute.xlu2 %1129  ;;  %v3490_v58 = vsub.f32 %v14162_v62, %v11262_v52 }
 0x426   :  { %v8651_v6 = vpack.c.b16 %v8205_v53, %v8204_v59  ;;  %v8203_v26 = vunpack.c.l.b16 %v7050_v25  ;;  %v12397_v57 = vpop.permute.xlu1 %1123 }
 0x428   :  { %9205 = vmatpush.bf16.msra.mxu0 %v8654_v49  ;;  %v8650_v20 = vpack.c.b16 %v8203_v26, %v8202_v61  ;;  %v3495_v49 = vsub.f32 %v14161_v50, %v11262_v52  ;;  %v4002_v26 = vmul.f32 %v3490_v58, %v3490_v58 }
 0x42a   :  { %v4007_v18 = vmul.f32 %v3495_v49, %v3495_v49 }
 0x42b   :  { %9682 = vset.pattern.permute.xlu2 %v11067_v2 }
 0x42c   :  { %9681 = vset.pattern.permute.xlu1 %v14083_v5  ;;  %9206 = vmatpush.bf16.msra.mxu0 %v8653_v24  ;;  %v4519_v1 = vmul.f32 -20000.0, %v4007_v18 }
 0x42d   :  { %v1148_v40 = vpop.permute.xlu2 %1147 }
 0x430   :  { %9207 = vmatpush.bf16.msra.mxu0 %v8652_v33  ;;  %v5031_v33 = vpack.c.bf16 %v4519_v1, %v4519_v1 }
 0x433   :  { %1250 = vperm.xlu2 %9682, %v14156_v8  }
 0x434   :  { %1244 = vperm.xlu1 %9681, %v14156_v8   ;;  %9208 = vmatpush.bf16.msra.mxu0 %v8651_v6 }
 0x435   :  { %v1160_v31 = vpop.permute.xlu2 %1159 }
 0x436   :  { %v1142_v42 = vpop.permute.xlu1 %1141  ;;  %v3489_v32 = vsub.f32 %v1160_v31, %v11262_v52  ;;  %v14164_v31 = vld [vmem:[#allocation28_spill] sm:$0xff] }
 0x437   :  { %v3485_v18 = vsub.f32 %v14164_v31, %v11262_v52  ;;  %v3482_v31 = vsub.f32 %v12387_v38, %v11262_v52 }
 0x438   :  { %9209 = vmatpush.bf16.msra.mxu0 %v8650_v20  ;;  %v5543_v20 = vunpack.c.l.bf16 %v5031_v33 }
 0x43a   :  { %v6213_v1 = vmul.f32 1.442695, %v5543_v20 }
 0x43b   :  { %9684 = vset.pattern.permute.xlu2 %v14148_v54 }
 0x43c   :  { %9683 = vset.pattern.permute.xlu1 %v14159_v37  ;;  %10253 = vpow2.f32 %v6213_v1 }
 0x43d   :  { %v1178_v51 = vpop.permute.xlu2 %1177 }
 0x43e   :  { %v3492_v24 = vsub.f32 %v1178_v51, %v11262_v52  ;;  %v14163_v51 = vld [vmem:[#allocation33_spill] sm:$0xff] }
 0x440   :  { %v4004_v25 = vmul.f32 %v3492_v24, %v3492_v24  ;;  %v3487_v24 = vsub.f32 %v1148_v40, %v11262_v52  ;;  %v3483_v40 = vsub.f32 %v12397_v57, %v11262_v52 }
 0x442   :  { %v4516_v50 = vmul.f32 -20000.0, %v4004_v25 }
 0x443   :  { %1268 = vperm.xlu2 %9684, %v14156_v8  }
 0x444   :  { %1262 = vperm.xlu1 %9683, %v14156_v8  }
 0x446   :  { %v1154_v16 = vpop.permute.xlu1 %1153 }
 0x44b   :  { %9686 = vset.pattern.permute.xlu2 %v14151_v29 }
 0x44c   :  { %9685 = vset.pattern.permute.xlu1 %v14147_v56 }
 0x44d   :  { %v1190_v36 = vpop.permute.xlu2 %1189 }
 0x44e   :  { %v3494_v63 = vsub.f32 %v1190_v36, %v11262_v52 }
 0x450   :  { %v4006_v44 = vmul.f32 %v3494_v63, %v3494_v63  ;;  %v4514_v63 = vmul.f32 -20000.0, %v4002_v26 }
 0x452   :  { %v4518_v59 = vmul.f32 -20000.0, %v4006_v44  ;;  %v5026_v25 = vpack.c.bf16 %v4514_v63, %v4514_v63  ;;  %v3995_v63 = vmul.f32 %v3483_v40, %v3483_v40 }
 0x453   :  { %1280 = vperm.xlu2 %9686, %v14156_v8  }
 0x454   :  { %1274 = vperm.xlu1 %9685, %v14156_v8   ;;  %v5030_v49 = vpack.c.bf16 %v4518_v59, %v4518_v59  ;;  %v3484_v59 = vsub.f32 %v12393_v60, %v11262_v52  ;;  %v5538_v60 = vunpack.c.l.bf16 %v5026_v25  ;;  %v4507_v25 = vmul.f32 -20000.0, %v3995_v63 }
 0x456   :  { %v1172_v41 = vpop.permute.xlu1 %1171  ;;  %v5542_v62 = vunpack.c.l.bf16 %v5030_v49  ;;  %v3996_v57 = vmul.f32 %v3484_v59, %v3484_v59 }
 0x457   :  { %v3491_v7 = vsub.f32 %v1172_v41, %v11262_v52  ;;  %v4001_v41 = vmul.f32 %v3489_v32, %v3489_v32  ;;  %v3997_v32 = vmul.f32 %v3485_v18, %v3485_v18  ;;  %v3481_v18 = vsub.f32 %v12391_v12, %v11262_v52 }
 0x459   :  { %v4003_v6 = vmul.f32 %v3491_v7, %v3491_v7  ;;  %v3486_v7 = vsub.f32 %v1142_v42, %v11262_v52  ;;  %v3993_v12 = vmul.f32 %v3481_v18, %v3481_v18 }
 0x45b   :  { %9688 = vset.pattern.permute.xlu2 %v14152_v34  ;;  %v4515_v36 = vmul.f32 -20000.0, %v4003_v6  ;;  %v3999_v6 = vmul.f32 %v3487_v24, %v3487_v24  ;;  %v3998_v42 = vmul.f32 %v3486_v7, %v3486_v7 }
 0x45c   :  { %9687 = vset.pattern.permute.xlu1 %v14160_v43 }
 0x45d   :  { %v5027_v33 = vpack.c.bf16 %v4515_v36, %v4515_v36  ;;  %v4510_v24 = vmul.f32 -20000.0, %v3998_v42 }
 0x45f   :  { %v5539_v49 = vunpack.c.l.bf16 %v5027_v33  ;;  %v5022_v59 = vpack.c.bf16 %v4510_v24, %v4510_v24 }
 0x463   :  { %1298 = vperm.xlu2 %9688, %v14156_v8  }
 0x464   :  { %1292 = vperm.xlu1 %9687, %v14156_v8   ;;  %v7467_v8 = vunpack.c.h.b16 %v12346_v3  ;;  %v3488_v3 = vsub.f32 %v1154_v16, %v11262_v52 }
 0x466   :  { %v1184_v46 = vpop.permute.xlu1 %1183  ;;  %v7499_v53 = vpack.c.b16 %v7467_v8, %v7467_v8  ;;  %v5028_v8 = vpack.c.bf16 %v4516_v50, %v4516_v50  ;;  %v4000_v58 = vmul.f32 %v3488_v3, %v3488_v3 }
 0x467   :  { %v3493_v0 = vsub.f32 %v1184_v46, %v11262_v52 }
 0x468   :  { %9119 = vmatmul.bf16.vlgmr.msra.gmra.mxu1 %v7499_v53  ;;  %v5540_v20 = vunpack.c.l.bf16 %v5028_v8  ;;  %v4512_v50 = vmul.f32 -20000.0, %v4000_v58 }
 0x469   :  { %v4005_v35 = vmul.f32 %v3493_v0, %v3493_v0 }
 0x46a   :  { %v6207_v7 = vmul.f32 1.442695, %v5540_v20  ;;  %v5024_v8 = vpack.c.bf16 %v4512_v50, %v4512_v50 }
 0x46b   :  { %9690 = vset.pattern.permute.xlu2 %v14094_v11  ;;  %v4517_v61 = vmul.f32 -20000.0, %v4005_v35  ;;  %v4513_v35 = vmul.f32 -20000.0, %v4001_v41  ;;  %v6211_v41 = vmul.f32 1.442695, %v5542_v62  ;;  %v6205_v62 = vmul.f32 1.442695, %v5539_v49 }
 0x46c   :  { %9689 = vset.pattern.permute.xlu1 %v14136_v23  ;;  %v5536_v40 = vunpack.c.l.bf16 %v5024_v8  ;;  %v4505_v49 = vmul.f32 -20000.0, %v3993_v12  ;;  %v12441_v12 = vpop.permute.xlu2 %1208 }
 0x46d   :  { %v5029_v46 = vpack.c.bf16 %v4517_v61, %v4517_v61  ;;  %v5025_v26 = vpack.c.bf16 %v4513_v35, %v4513_v35  ;;  %10255 = vpow2.f32 %v6211_v41  ;;  %v10254_v35 = vpop.eup %10253 }
 0x46e   :  { %v7079_v42 = vpack.c.bf16 %v10254_v35, %v10254_v35  ;;  %v5017_v8 = vpack.c.bf16 %v4505_v49, %v4505_v49 }
 0x46f   :  { %v5541_v16 = vunpack.c.l.bf16 %v5029_v46  ;;  %v4509_v46 = vmul.f32 -20000.0, %v3997_v32  ;;  %v4508_v32 = vmul.f32 -20000.0, %v3996_v57 }
 0x470   :  { %v8232_v18 = vunpack.c.l.b16 %v7079_v42 }
 0x471   :  { %v6209_v3 = vmul.f32 1.442695, %v5541_v16  ;;  %v5021_v33 = vpack.c.bf16 %v4509_v46, %v4509_v46  ;;  %v6203_v16 = vmul.f32 1.442695, %v5538_v60  ;;  %v5019_v46 = vpack.c.bf16 %v4507_v25, %v4507_v25 }
 0x472   :  { %v5534_v60 = vunpack.c.l.bf16 %v5022_v59 }
 0x473   :  { %1311 = vperm.xlu2 %9690, %v14163_v51   ;;  %10257 = vpow2.f32 %v6209_v3  ;;  %v5533_v20 = vunpack.c.l.bf16 %v5021_v33  ;;  %v5020_v3 = vpack.c.bf16 %v4508_v32, %v4508_v32  ;;  %v5531_v33 = vunpack.c.l.bf16 %v5019_v46 }
 0x474   :  { %1305 = vperm.xlu1 %9689, %v14163_v51  }
 0x476   :  { %v1202_v0 = vpop.permute.xlu1 %1201 }
 0x477   :  { %v3496_v44 = vsub.f32 %v1202_v0, %v11262_v52  ;;  %v4511_v0 = vmul.f32 -20000.0, %v3999_v6 }
 0x479   :  { %v4008_v53 = vmul.f32 %v3496_v44, %v3496_v44  ;;  %v5537_v44 = vunpack.c.l.bf16 %v5025_v26  ;;  %v5023_v38 = vpack.c.bf16 %v4511_v0, %v4511_v0 }
 0x47b   :  { %v4520_v61 = vmul.f32 -20000.0, %v4008_v53  ;;  %9692 = vset.pattern.permute.xlu2 %v14158_v21  ;;  %v3994_v53 = vmul.f32 %v3482_v31, %v3482_v31  ;;  %v6201_v6 = vmul.f32 1.442695, %v5537_v44  ;;  %v5535_v41 = vunpack.c.l.bf16 %v5023_v38 }
 0x47c   :  { %9691 = vset.pattern.permute.xlu1 %v11095_v10  ;;  %v6199_v31 = vmul.f32 1.442695, %v5536_v40  ;;  %v6193_v44 = vmul.f32 1.442695, %v5533_v20  ;;  %v5529_v20 = vunpack.c.l.bf16 %v5017_v8 }
 0x47d   :  { %v5032_v36 = vpack.c.bf16 %v4520_v61, %v4520_v61  ;;  %v10256_v61 = vpop.eup %10255  ;;  %v4506_v50 = vmul.f32 -20000.0, %v3994_v53 }
 0x47e   :  { %v10258_v26 = vpop.eup %10257 }
 0x47f   :  { %v5544_v1 = vunpack.c.l.bf16 %v5032_v36  ;;  %v7077_v0 = vpack.c.bf16 %v10258_v26, %v10258_v26  ;;  %v5018_v35 = vpack.c.bf16 %v4506_v50, %v4506_v50 }
 0x481   :  { %v6215_v58 = vmul.f32 1.442695, %v5544_v1  ;;  %v7078_v1 = vpack.c.bf16 %v10256_v61, %v10256_v61  ;;  %v8230_v25 = vunpack.c.l.b16 %v7077_v0  ;;  %v5530_v61 = vunpack.c.l.bf16 %v5018_v35  ;;  %v12445_v0 = vpop.permute.xlu2 %1220 }
 0x483   :  { %10259 = vpow2.f32 %v6215_v58  ;;  %1329 = vperm.xlu2 %9692, %v14163_v51   ;;  %v8231_v59 = vunpack.c.l.b16 %v7078_v1 }
 0x484   :  { %10261 = vpow2.f32 %v6207_v7  ;;  %1323 = vperm.xlu1 %9691, %v14163_v51   ;;  %v6197_v7 = vmul.f32 1.442695, %v5535_v41  ;;  %v6189_v41 = vmul.f32 1.442695, %v5531_v33 }
 0x485   :  { %10263 = vpow2.f32 %v6205_v62  ;;  %v5532_v62 = vunpack.c.l.bf16 %v5020_v3  ;;  %v8664_v50 = vpack.c.b16 %v8231_v59, %v8230_v25 }
 0x486   :  { %10265 = vpow2.f32 %v6203_v16  ;;  %v6195_v16 = vmul.f32 1.442695, %v5534_v60  ;;  %v6187_v60 = vmul.f32 1.442695, %v5530_v61 }
 0x487   :  { %10267 = vpow2.f32 %v6201_v6  ;;  %v6191_v42 = vmul.f32 1.442695, %v5532_v62 }
 0x488   :  { %10269 = vpow2.f32 %v6199_v31 }
 0x489   :  { %v10260_v36 = vpop.eup %10259  ;;  %10271 = vpow2.f32 %v6197_v7 }
 0x48a   :  { %v10262_v57 = vpop.eup %10261  ;;  %v7080_v63 = vpack.c.bf16 %v10260_v36, %v10260_v36  ;;  %10273 = vpow2.f32 %v6193_v44 }
 0x48b   :  { %v10264_v24 = vpop.eup %10263  ;;  %9694 = vset.pattern.permute.xlu2 %v14083_v5  ;;  %v7076_v53 = vpack.c.bf16 %v10262_v57, %v10262_v57  ;;  %10275 = vpow2.f32 %v6195_v16  ;;  %v6185_v57 = vmul.f32 1.442695, %v5529_v20 }
 0x48c   :  { %v8233_v58 = vunpack.c.l.b16 %v7080_v63  ;;  %9693 = vset.pattern.permute.xlu1 %v11092_v9  ;;  %v10266_v38 = vpop.eup %10265  ;;  %v7075_v40 = vpack.c.bf16 %v10264_v24, %v10264_v24  ;;  %10277 = vpow2.f32 %v6191_v42 }
 0x48d   :  { %v10268_v6 = vpop.eup %10267  ;;  %v7074_v26 = vpack.c.bf16 %v10266_v38, %v10266_v38  ;;  %v8229_v3 = vunpack.c.l.b16 %v7076_v53  ;;  %10279 = vpow2.f32 %v6189_v41 }
 0x48e   :  { %v8665_v32 = vpack.c.b16 %v8233_v58, %v8232_v18  ;;  %v8228_v49 = vunpack.c.l.b16 %v7075_v40  ;;  %v7073_v36 = vpack.c.bf16 %v10268_v6, %v10268_v6  ;;  %v10270_v46 = vpop.eup %10269  ;;  %10281 = vpow2.f32 %v6187_v60 }
 0x48f   :  { %v10272_v31 = vpop.eup %10271  ;;  %v8227_v63 = vunpack.c.l.b16 %v7074_v26  ;;  %v7072_v44 = vpack.c.bf16 %v10270_v46, %v10270_v46  ;;  %10283 = vpow2.f32 %v6185_v57  ;;  %v12449_v26 = vpop.permute.xlu2 %1238 }
 0x490   :  { %9215 = vmatpush.bf16.msra.mxu1 %v8665_v32  ;;  %v10274_v18 = vpop.eup %10273  ;;  %v8663_v1 = vpack.c.b16 %v8229_v3, %v8228_v49  ;;  %v8226_v24 = vunpack.c.l.b16 %v7073_v36  ;;  %v7071_v35 = vpack.c.bf16 %v10272_v31, %v10272_v31  ;;  %v12453_v57 = vpop.permute.xlu1 %1214 }
 0x491   :  { %v10276_v7 = vpop.eup %10275  ;;  %v8225_v58 = vunpack.c.l.b16 %v7072_v44  ;;  %v7069_v33 = vpack.c.bf16 %v10274_v18, %v10274_v18 }
 0x492   :  { %v10278_v8 = vpop.eup %10277  ;;  %v8662_v62 = vpack.c.b16 %v8227_v63, %v8226_v24  ;;  %v7070_v16 = vpack.c.bf16 %v10276_v7, %v10276_v7  ;;  %v8224_v38 = vunpack.c.l.b16 %v7071_v35 }
 0x493   :  { %1341 = vperm.xlu2 %9694, %v14163_v51   ;;  %v10280_v53 = vpop.eup %10279  ;;  %v7068_v32 = vpack.c.bf16 %v10278_v8, %v10278_v8  ;;  %v8222_v40 = vunpack.c.l.b16 %v7069_v33  ;;  %v33_v33 = vadd.s32 256, %v14153_v17 }
 0x494   :  { %1335 = vperm.xlu1 %9693, %v14163_v51   ;;  %9216 = vmatpush.bf16.msra.mxu1 %v8664_v50  ;;  %v10282_v25 = vpop.eup %10281  ;;  %v8661_v59 = vpack.c.b16 %v8225_v58, %v8224_v38  ;;  %v8223_v6 = vunpack.c.l.b16 %v7070_v16  ;;  %v7067_v61 = vpack.c.bf16 %v10280_v53, %v10280_v53  ;;  %v34_v16 = vadd.s32 384, %v14153_v17 }
 0x495   :  { %v10284_v42 = vpop.eup %10283  ;;  %v7066_v20 = vpack.c.bf16 %v10282_v25, %v10282_v25  ;;  %v8221_v49 = vunpack.c.l.b16 %v7068_v32  ;;  %vm66_vm6 = vcmp.ge.s32.totalorder %v33_v33, %v12326_v48  ;;  %vm99_vm8 = vcmp.lt.s32.totalorder %v33_v33, %v12330_v30 }
 0x496   :  { %v8660_v41 = vpack.c.b16 %v8223_v6, %v8222_v40  ;;  %v8220_v50 = vunpack.c.l.b16 %v7067_v61  ;;  %v7065_v3 = vpack.c.bf16 %v10284_v42, %v10284_v42  ;;  %vm67_vm7 = vcmp.ge.s32.totalorder %v34_v16, %v12326_v48  ;;  %vm131_vm10 = vmand %vm66_vm6, %vm99_vm8 }
 0x497   :  { %v8219_v60 = vunpack.c.l.b16 %v7066_v20  ;;  %v1251_v31 = vpop.permute.xlu2 %1250  ;;  %vm100_vm9 = vcmp.lt.s32.totalorder %v34_v16, %v12330_v30  ;;  %v14168_v16 = vld [vmem:[#allocation58_spill] sm:$0xff] }
 0x498   :  { %9217 = vmatpush.bf16.msra.mxu1 %v8663_v1  ;;  %v8659_v36 = vpack.c.b16 %v8221_v49, %v8220_v50  ;;  %v8218_v46 = vunpack.c.l.b16 %v7065_v3  ;;  %v1233_v1 = vpop.permute.xlu1 %1232  ;;  %vm132_vm11 = vmand %vm67_vm7, %vm100_vm9  ;;  %v14167_v50 = vld [vmem:[#allocation52_spill] sm:$0xff] }
 0x499   :  { %v3505_v49 = vsub.f32 %v14167_v50, %v11262_v52 }
 0x49a   :  { %v8658_v18 = vpack.c.b16 %v8219_v60, %v8218_v46 }
 0x49b   :  { %9696 = vset.pattern.permute.xlu2 %v14159_v37 }
 0x49c   :  { %9695 = vset.pattern.permute.xlu1 %v11171_v27  ;;  %9218 = vmatpush.bf16.msra.mxu1 %v8662_v62  ;;  %v14165_v62 = vld [vmem:[#allocation39_spill] sm:$0xff] }
 0x49d   :  { %v3510_v58 = vsub.f32 %v14165_v62, %v11262_v52  ;;  %v4017_v62 = vmul.f32 %v3505_v49, %v3505_v49  ;;  %v3501_v49 = vsub.f32 %v1233_v1, %v11262_v52 }
 0x49f   :  { %v1269_v63 = vpop.permute.xlu2 %1268  ;;  %v4022_v32 = vmul.f32 %v3510_v58, %v3510_v58  ;;  %v4013_v1 = vmul.f32 %v3501_v49, %v3501_v49 }
 0x4a0   :  { %9219 = vmatpush.bf16.msra.mxu1 %v8661_v59  ;;  %v14166_v59 = vmov 0.0   ;;  %v3507_v46 = vsub.f32 %v1269_v63, %v11262_v52 }
 0x4a1   :  { %v163_v40 = vsel %vm131_vm10, 1.0, %v14166_v59  ;;  %v164_v6 = vsel %vm132_vm11, 1.0, %v14166_v59  ;;  %v4534_v3 = vmul.f32 -20000.0, %v4022_v32  ;;  %v4525_v49 = vmul.f32 -20000.0, %v4013_v1 }
 0x4a2   :  { %v12477_v42 = vpack.c.bf16 %v164_v6, %v163_v40  ;;  %v4019_v33 = vmul.f32 %v3507_v46, %v3507_v46  ;;  %v4529_v6 = vmul.f32 -20000.0, %v4017_v62 }
 0x4a3   :  { %1359 = vperm.xlu2 %9696, %v14163_v51   ;;  %v5046_v58 = vpack.c.bf16 %v4534_v3, %v4534_v3 }
 0x4a4   :  { %1353 = vperm.xlu1 %9695, %v14163_v51   ;;  %9220 = vmatpush.bf16.msra.mxu1 %v8660_v41 }
 0x4a6   :  { %v1245_v44 = vpop.permute.xlu1 %1244 }
 0x4a8   :  { %9221 = vmatpush.bf16.msra.mxu1 %v8659_v36  ;;  %v7468_v36 = vunpack.c.l.b16 %v12477_v42 }
 0x4ab   :  { %9698 = vset.pattern.permute.xlu2 %v14147_v56 }
 0x4ac   :  { %9697 = vset.pattern.permute.xlu1 %v14148_v54  ;;  %9222 = vmatpush.bf16.msra.mxu1 %v8658_v18  ;;  %v7500_v18 = vpack.c.b16 %v7468_v36, %v7468_v36 }
 0x4ad   :  { %v1281_v24 = vpop.permute.xlu2 %1280 }
 0x4ae   :  { %v3509_v53 = vsub.f32 %v1281_v24, %v11262_v52  ;;  %9132 = vmatmul.bf16.vlgmr.msra.gmra.mxu2 %v7500_v18  ;;  %v14169_v18 = vld [vmem:[#allocation43_spill] sm:$0xff] }
 0x4b0   :  { %v4021_v61 = vmul.f32 %v3509_v53, %v3509_v53  ;;  %v3504_v53 = vsub.f32 %v1251_v31, %v11262_v52 }
 0x4b2   :  { %v4533_v60 = vmul.f32 -20000.0, %v4021_v61  ;;  %v4016_v31 = vmul.f32 %v3504_v53, %v3504_v53 }
 0x4b3   :  { %1371 = vperm.xlu2 %9698, %v14163_v51  }
 0x4b4   :  { %1365 = vperm.xlu1 %9697, %v14163_v51   ;;  %v5045_v32 = vpack.c.bf16 %v4533_v60, %v4533_v60  ;;  %v4528_v53 = vmul.f32 -20000.0, %v4016_v31 }
 0x4b6   :  { %v1263_v7 = vpop.permute.xlu1 %1262  ;;  %v5040_v31 = vpack.c.bf16 %v4528_v53, %v4528_v53 }
 0x4b7   :  { %v3506_v24 = vsub.f32 %v1263_v7, %v11262_v52  ;;  %v5558_v7 = vunpack.c.l.bf16 %v5046_v58 }
 0x4b9   :  { %v4018_v63 = vmul.f32 %v3506_v24, %v3506_v24  ;;  %v3500_v24 = vsub.f32 %v14169_v18, %v11262_v52 }
 0x4bb   :  { %9700 = vset.pattern.permute.xlu2 %v14160_v43  ;;  %v4530_v36 = vmul.f32 -20000.0, %v4018_v63 }
 0x4bc   :  { %9699 = vset.pattern.permute.xlu1 %v14072_v45 }
 0x4bd   :  { %v1299_v35 = vpop.permute.xlu2 %1298  ;;  %v5042_v63 = vpack.c.bf16 %v4530_v36, %v4530_v36 }
 0x4be   :  { %v3512_v8 = vsub.f32 %v1299_v35, %v11262_v52 }
 0x4c0   :  { %v4024_v38 = vmul.f32 %v3512_v8, %v3512_v8 }
 0x4c2   :  { %v4536_v41 = vmul.f32 -20000.0, %v4024_v38  ;;  %v3503_v38 = vsub.f32 %v1245_v44, %v11262_v52  ;;  %v5557_v44 = vunpack.c.l.bf16 %v5045_v32 }
 0x4c3   :  { %1389 = vperm.xlu2 %9700, %v14163_v51  }
 0x4c4   :  { %1383 = vperm.xlu1 %9699, %v14163_v51   ;;  %v5048_v8 = vpack.c.bf16 %v4536_v41, %v4536_v41  ;;  %v4531_v41 = vmul.f32 -20000.0, %v4019_v33  ;;  %v4015_v3 = vmul.f32 %v3503_v38, %v3503_v38  ;;  %v6241_v32 = vmul.f32 1.442695, %v5557_v44 }
 0x4c5   :  { %v5554_v44 = vunpack.c.l.bf16 %v5042_v63 }
 0x4c6   :  { %v1275_v25 = vpop.permute.xlu1 %1274  ;;  %v5560_v40 = vunpack.c.l.bf16 %v5048_v8  ;;  %v6243_v8 = vmul.f32 1.442695, %v5558_v7  ;;  %v5043_v58 = vpack.c.bf16 %v4531_v41, %v4531_v41  ;;  %v4527_v38 = vmul.f32 -20000.0, %v4015_v3 }
 0x4c7   :  { %v3508_v20 = vsub.f32 %v1275_v25, %v11262_v52  ;;  %v6235_v53 = vmul.f32 1.442695, %v5554_v44 }
 0x4c8   :  { %v5039_v3 = vpack.c.bf16 %v4527_v38, %v4527_v38 }
 0x4c9   :  { %v4020_v35 = vmul.f32 %v3508_v20, %v3508_v20  ;;  %v3502_v20 = vsub.f32 %v12449_v26, %v11262_v52  ;;  %v3499_v26 = vsub.f32 %v12445_v0, %v11262_v52 }
 0x4ca   :  { %v5551_v1 = vunpack.c.l.bf16 %v5039_v3 }
 0x4cb   :  { %9702 = vset.pattern.permute.xlu2 %v14136_v23  ;;  %v4532_v25 = vmul.f32 -20000.0, %v4020_v35  ;;  %v5041_v35 = vpack.c.bf16 %v4529_v6, %v4529_v6  ;;  %v4014_v62 = vmul.f32 %v3502_v20, %v3502_v20  ;;  %v4012_v6 = vmul.f32 %v3500_v24, %v3500_v24 }
 0x4cc   :  { %9701 = vset.pattern.permute.xlu1 %v14152_v34  ;;  %v5555_v20 = vunpack.c.l.bf16 %v5043_v58  ;;  %v3497_v24 = vsub.f32 %v12441_v12, %v11262_v52  ;;  %v5552_v58 = vunpack.c.l.bf16 %v5040_v31 }
 0x4cd   :  { %v5044_v46 = vpack.c.bf16 %v4532_v25, %v4532_v25  ;;  %v5553_v7 = vunpack.c.l.bf16 %v5041_v35  ;;  %v4526_v0 = vmul.f32 -20000.0, %v4014_v62 }
 0x4ce   :  { %v6237_v35 = vmul.f32 1.442695, %v5555_v20 }
 0x4cf   :  { %v5556_v25 = vunpack.c.l.bf16 %v5044_v46  ;;  %v4524_v46 = vmul.f32 -20000.0, %v4012_v6  ;;  %v6233_v18 = vmul.f32 1.442695, %v5553_v7  ;;  %v5038_v62 = vpack.c.bf16 %v4526_v0, %v4526_v0 }
 0x4d0   :  { %v6231_v6 = vmul.f32 1.442695, %v5552_v58  ;;  %v6229_v0 = vmul.f32 1.442695, %v5551_v1 }
 0x4d1   :  { %v5036_v63 = vpack.c.bf16 %v4524_v46, %v4524_v46 }
 0x4d3   :  { %1402 = vperm.xlu2 %9702, %v14168_v16  }
 0x4d4   :  { %1395 = vperm.xlu1 %9701, %v14163_v51   ;;  %v6247_v51 = vmul.f32 1.442695, %v5560_v40 }
 0x4d6   :  { %v1293_v61 = vpop.permute.xlu1 %1292  ;;  %10285 = vpow2.f32 %v6247_v51 }
 0x4d7   :  { %v3511_v50 = vsub.f32 %v1293_v61, %v11262_v52  ;;  %10287 = vpow2.f32 %v6243_v8  ;;  %v4011_v61 = vmul.f32 %v3499_v26, %v3499_v26 }
 0x4d8   :  { %10289 = vpow2.f32 %v6241_v32 }
 0x4d9   :  { %v4023_v60 = vmul.f32 %v3511_v50, %v3511_v50  ;;  %v3498_v50 = vsub.f32 %v12453_v57, %v11262_v52  ;;  %v4523_v57 = vmul.f32 -20000.0, %v4011_v61 }
 0x4db   :  { %v4535_v33 = vmul.f32 -20000.0, %v4023_v60  ;;  %9704 = vset.pattern.permute.xlu2 %v11095_v10  ;;  %v6239_v60 = vmul.f32 1.442695, %v5556_v25  ;;  %v4010_v26 = vmul.f32 %v3498_v50, %v3498_v50  ;;  %v4009_v25 = vmul.f32 %v3497_v24, %v3497_v24 }
 0x4dc   :  { %9703 = vset.pattern.permute.xlu1 %v11073_v4  ;;  %v10286_v51 = vpop.eup %10285  ;;  %v5035_v12 = vpack.c.bf16 %v4523_v57, %v4523_v57 }
 0x4dd   :  { %v5047_v40 = vpack.c.bf16 %v4535_v33, %v4535_v33  ;;  %v10288_v8 = vpop.eup %10287  ;;  %v5037_v33 = vpack.c.bf16 %v4525_v49, %v4525_v49  ;;  %v7096_v38 = vpack.c.bf16 %v10286_v51, %v10286_v51  ;;  %v4522_v20 = vmul.f32 -20000.0, %v4010_v26 }
 0x4de   :  { %v10290_v32 = vpop.eup %10289  ;;  %v4521_v44 = vmul.f32 -20000.0, %v4009_v25 }
 0x4df   :  { %v5559_v41 = vunpack.c.l.bf16 %v5047_v40  ;;  %v5550_v40 = vunpack.c.l.bf16 %v5038_v62  ;;  %v5549_v61 = vunpack.c.l.bf16 %v5037_v33  ;;  %v8249_v50 = vunpack.c.l.b16 %v7096_v38 }
 0x4e0   :  { %v7093_v31 = vpack.c.bf16 %v10290_v32, %v10290_v32  ;;  %v5034_v24 = vpack.c.bf16 %v4522_v20, %v4522_v20  ;;  %v5033_v1 = vpack.c.bf16 %v4521_v44, %v4521_v44 }
 0x4e1   :  { %v6245_v36 = vmul.f32 1.442695, %v5559_v41  ;;  %v7094_v41 = vpack.c.bf16 %v10288_v8, %v10288_v8 }
 0x4e2   :  { %v8246_v62 = vunpack.c.l.b16 %v7093_v31  ;;  %v5546_v25 = vunpack.c.l.bf16 %v5034_v24 }
 0x4e3   :  { %10291 = vpow2.f32 %v6245_v36  ;;  %1420 = vperm.xlu2 %9704, %v14168_v16   ;;  %v6227_v36 = vmul.f32 1.442695, %v5550_v40  ;;  %v8247_v8 = vunpack.c.l.b16 %v7094_v41 }
 0x4e4   :  { %1414 = vperm.xlu1 %9703, %v14168_v16   ;;  %10293 = vpow2.f32 %v6239_v60  ;;  %v5547_v60 = vunpack.c.l.bf16 %v5035_v12  ;;  %v6219_v41 = vmul.f32 1.442695, %v5546_v25 }
 0x4e5   :  { %10295 = vpow2.f32 %v6237_v35  ;;  %v6225_v35 = vmul.f32 1.442695, %v5549_v61  ;;  %v8672_v40 = vpack.c.b16 %v8247_v8, %v8246_v62  ;;  %v5545_v61 = vunpack.c.l.bf16 %v5033_v1 }
 0x4e6   :  { %10297 = vpow2.f32 %v6233_v18  ;;  %v5548_v18 = vunpack.c.l.bf16 %v5036_v63 }
 0x4e7   :  { %10299 = vpow2.f32 %v6235_v53  ;;  %v6221_v53 = vmul.f32 1.442695, %v5547_v60 }
 0x4e8   :  { %10301 = vpow2.f32 %v6231_v6  ;;  %v6223_v32 = vmul.f32 1.442695, %v5548_v18 }
 0x4e9   :  { %v10292_v7 = vpop.eup %10291  ;;  %10303 = vpow2.f32 %v6229_v0 }
 0x4ea   :  { %v7095_v49 = vpack.c.bf16 %v10292_v7, %v10292_v7  ;;  %v10294_v3 = vpop.eup %10293  ;;  %10305 = vpow2.f32 %v6227_v36 }
 0x4eb   :  { %9706 = vset.pattern.permute.xlu2 %v11092_v9  ;;  %v10296_v51 = vpop.eup %10295  ;;  %v7092_v58 = vpack.c.bf16 %v10294_v3, %v10294_v3  ;;  %10307 = vpow2.f32 %v6225_v35 }
 0x4ec   :  { %v8248_v46 = vunpack.c.l.b16 %v7095_v49  ;;  %9705 = vset.pattern.permute.xlu1 %v14158_v21  ;;  %v10298_v26 = vpop.eup %10297  ;;  %v7091_v38 = vpack.c.bf16 %v10296_v51, %v10296_v51  ;;  %10309 = vpow2.f32 %v6221_v53 }
 0x4ed   :  { %v10300_v33 = vpop.eup %10299  ;;  %v8245_v63 = vunpack.c.l.b16 %v7092_v58  ;;  %v7089_v6 = vpack.c.bf16 %v10298_v26, %v10298_v26  ;;  %10311 = vpow2.f32 %v6223_v32 }
 0x4ee   :  { %v8673_v57 = vpack.c.b16 %v8249_v50, %v8248_v46  ;;  %v10302_v12 = vpop.eup %10301  ;;  %v7090_v7 = vpack.c.bf16 %v10300_v33, %v10300_v33  ;;  %v8244_v0 = vunpack.c.l.b16 %v7091_v38  ;;  %v6217_v46 = vmul.f32 1.442695, %v5545_v61 }
 0x4ef   :  { %v10304_v20 = vpop.eup %10303  ;;  %v7088_v50 = vpack.c.bf16 %v10302_v12, %v10302_v12  ;;  %v8242_v3 = vunpack.c.l.b16 %v7089_v6  ;;  %10313 = vpow2.f32 %v6219_v41 }
 0x4f0   :  { %9228 = vmatpush.bf16.msra.mxu2 %v8673_v57  ;;  %v10306_v49 = vpop.eup %10305  ;;  %v8671_v31 = vpack.c.b16 %v8245_v63, %v8244_v0  ;;  %v8243_v44 = vunpack.c.l.b16 %v7090_v7  ;;  %v7087_v60 = vpack.c.bf16 %v10304_v20, %v10304_v20  ;;  %10315 = vpow2.f32 %v6217_v46  ;;  %v12513_v0 = vpop.permute.xlu2 %1311 }
 0x4f1   :  { %v10308_v36 = vpop.eup %10307  ;;  %v7086_v51 = vpack.c.bf16 %v10306_v49, %v10306_v49  ;;  %v8241_v26 = vunpack.c.l.b16 %v7088_v50  ;;  %v12517_v50 = vpop.permute.xlu1 %1305 }
 0x4f2   :  { %v10310_v18 = vpop.eup %10309  ;;  %v8670_v24 = vpack.c.b16 %v8243_v44, %v8242_v3  ;;  %v8240_v35 = vunpack.c.l.b16 %v7087_v60  ;;  %v7085_v8 = vpack.c.bf16 %v10308_v36, %v10308_v36 }
 0x4f3   :  { %1432 = vperm.xlu2 %9706, %v14168_v16   ;;  %v10312_v57 = vpop.eup %10311  ;;  %v7083_v62 = vpack.c.bf16 %v10310_v18, %v10310_v18  ;;  %v8239_v1 = vunpack.c.l.b16 %v7086_v51 }
 0x4f4   :  { %1426 = vperm.xlu1 %9705, %v14168_v16   ;;  %9229 = vmatpush.bf16.msra.mxu2 %v8672_v40  ;;  %v8669_v58 = vpack.c.b16 %v8241_v26, %v8240_v35  ;;  %v8238_v33 = vunpack.c.l.b16 %v7085_v8  ;;  %v7084_v53 = vpack.c.bf16 %v10312_v57, %v10312_v57 }
 0x4f5   :  { %v10314_v38 = vpop.eup %10313  ;;  %v8236_v12 = vunpack.c.l.b16 %v7083_v62 }
 0x4f6   :  { %v10316_v32 = vpop.eup %10315  ;;  %v8668_v25 = vpack.c.b16 %v8239_v1, %v8238_v33  ;;  %v8237_v40 = vunpack.c.l.b16 %v7084_v53  ;;  %v7082_v63 = vpack.c.bf16 %v10314_v38, %v10314_v38  ;;  %v7469_v53 = vunpack.c.h.b16 %v12477_v42 }
 0x4f7   :  { %v7081_v6 = vpack.c.bf16 %v10316_v32, %v10316_v32 }
 0x4f8   :  { %9230 = vmatpush.bf16.msra.mxu2 %v8671_v31  ;;  %v8667_v7 = vpack.c.b16 %v8237_v40, %v8236_v12  ;;  %v8235_v20 = vunpack.c.l.b16 %v7082_v63  ;;  %v12519_v49 = vpop.permute.xlu2 %1329  ;;  %v1348_v12 = vpop.permute.xlu0 %1347 }
 0x4f9   :  { %v8234_v61 = vunpack.c.l.b16 %v7081_v6  ;;  %v12523_v31 = vpop.permute.xlu1 %1323 }
 0x4fb   :  { %9708 = vset.pattern.permute.xlu2 %v11171_v27  ;;  %v8666_v41 = vpack.c.b16 %v8235_v20, %v8234_v61 }
 0x4fc   :  { %9707 = vset.pattern.permute.xlu1 %v11067_v2  ;;  %9231 = vmatpush.bf16.msra.mxu2 %v8670_v24  ;;  %v14170_v24 = vld [vmem:[#allocation66_spill] sm:$0xff] }
 0x4fd   :  { %v3525_v35 = vsub.f32 %v14170_v24, %v11262_v52 }
 0x4ff   :  { %v4037_v62 = vmul.f32 %v3525_v35, %v3525_v35 }
 0x500   :  { %9232 = vmatpush.bf16.msra.mxu2 %v8669_v58  ;;  %v1342_v3 = vpop.permute.xlu2 %1341 }
 0x501   :  { %v4549_v38 = vmul.f32 -20000.0, %v4037_v62 }
 0x503   :  { %1450 = vperm.xlu2 %9708, %v14168_v16   ;;  %v5061_v61 = vpack.c.bf16 %v4549_v38, %v4549_v38 }
 0x504   :  { %1444 = vperm.xlu1 %9707, %v14168_v16   ;;  %9233 = vmatpush.bf16.msra.mxu2 %v8668_v25  ;;  %v7501_v25 = vpack.c.b16 %v7469_v53, %v7469_v53 }
 0x506   :  { %v1336_v44 = vpop.permute.xlu1 %1335  ;;  %9145 = vmatmul.bf16.vlgmr.msra.gmra.mxu3 %v7501_v25 }
 0x508   :  { %9234 = vmatpush.bf16.msra.mxu2 %v8667_v7  ;;  %v1360_v60 = vpop.permute.xlu2 %1359 }
 0x509   :  { %v3522_v40 = vsub.f32 %v1360_v60, %v11262_v52 }
 0x50b   :  { %9710 = vset.pattern.permute.xlu2 %v14148_v54  ;;  %v4034_v42 = vmul.f32 %v3522_v40, %v3522_v40 }
 0x50c   :  { %9709 = vset.pattern.permute.xlu1 %v14159_v37  ;;  %9235 = vmatpush.bf16.msra.mxu2 %v8666_v41  ;;  %v3519_v41 = vsub.f32 %v1342_v3, %v11262_v52 }
 0x50d   :  { %v4546_v53 = vmul.f32 -20000.0, %v4034_v42 }
 0x50f   :  { %v5058_v42 = vpack.c.bf16 %v4546_v53, %v4546_v53 }
 0x510   :  { %v1372_v46 = vpop.permute.xlu2 %1371 }
 0x511   :  { %v3524_v33 = vsub.f32 %v1372_v46, %v11262_v52  ;;  %v3520_v46 = vsub.f32 %v1348_v12, %v11262_v52 }
 0x513   :  { %1462 = vperm.xlu2 %9710, %v14168_v16   ;;  %v4036_v63 = vmul.f32 %v3524_v33, %v3524_v33  ;;  %v4032_v33 = vmul.f32 %v3520_v46, %v3520_v46 }
 0x514   :  { %1456 = vperm.xlu1 %9709, %v14168_v16  }
 0x515   :  { %v4548_v24 = vmul.f32 -20000.0, %v4036_v63 }
 0x516   :  { %v1354_v36 = vpop.permute.xlu1 %1353 }
 0x517   :  { %v3521_v6 = vsub.f32 %v1354_v36, %v11262_v52  ;;  %v14172_v36 = vld [vmem:[#allocation57_spill] sm:$0xff]  ;;  %v5060_v38 = vpack.c.bf16 %v4548_v24, %v4548_v24 }
 0x519   :  { %v4033_v35 = vmul.f32 %v3521_v6, %v3521_v6  ;;  %v5572_v24 = vunpack.c.l.bf16 %v5060_v38 }
 0x51b   :  { %9712 = vset.pattern.permute.xlu2 %v14072_v45 }
 0x51c   :  { %9711 = vset.pattern.permute.xlu1 %v14151_v29 }
 0x51d   :  { %v1390_v18 = vpop.permute.xlu2 %1389 }
 0x51e   :  { %v3527_v8 = vsub.f32 %v1390_v18, %v11262_v52  ;;  %v14171_v18 = vld [vmem:[#allocation80_spill] sm:$0xff] }
 0x520   :  { %v4039_v58 = vmul.f32 %v3527_v8, %v3527_v8  ;;  %v3515_v8 = vsub.f32 %v14172_v36, %v11262_v52 }
 0x522   :  { %v4551_v32 = vmul.f32 -20000.0, %v4039_v58  ;;  %v4031_v58 = vmul.f32 %v3519_v41, %v3519_v41  ;;  %v4027_v63 = vmul.f32 %v3515_v8, %v3515_v8  ;;  %v3513_v8 = vsub.f32 %v12517_v50, %v11262_v52 }
 0x523   :  { %1480 = vperm.xlu2 %9712, %v14168_v16  }
 0x524   :  { %1474 = vperm.xlu1 %9711, %v14168_v16  }
 0x526   :  { %v1366_v51 = vpop.permute.xlu1 %1365 }
 0x527   :  { %v3523_v1 = vsub.f32 %v1366_v51, %v11262_v52  ;;  %v5063_v51 = vpack.c.bf16 %v4551_v32, %v4551_v32  ;;  %v4545_v32 = vmul.f32 -20000.0, %v4033_v35 }
 0x529   :  { %v4035_v7 = vmul.f32 %v3523_v1, %v3523_v1  ;;  %v5575_v3 = vunpack.c.l.bf16 %v5063_v51  ;;  %v5057_v35 = vpack.c.bf16 %v4545_v32, %v4545_v32 }
 0x52b   :  { %9714 = vset.pattern.permute.xlu2 %v14152_v34  ;;  %v4547_v60 = vmul.f32 -20000.0, %v4035_v7  ;;  %v3517_v7 = vsub.f32 %v12519_v49, %v11262_v52  ;;  %v6277_v41 = vmul.f32 1.442695, %v5575_v3  ;;  %v3514_v49 = vsub.f32 %v12513_v0, %v11262_v52 }
 0x52c   :  { %9713 = vset.pattern.permute.xlu1 %v14160_v43  ;;  %v5569_v53 = vunpack.c.l.bf16 %v5057_v35 }
 0x52d   :  { %v5059_v25 = vpack.c.bf16 %v4547_v60, %v4547_v60 }
 0x52f   :  { %v5571_v60 = vunpack.c.l.bf16 %v5059_v25  ;;  %v4539_v25 = vmul.f32 -20000.0, %v4027_v63 }
 0x531   :  { %v6269_v38 = vmul.f32 1.442695, %v5571_v60  ;;  %v5051_v63 = vpack.c.bf16 %v4539_v25, %v4539_v25 }
 0x533   :  { %1492 = vperm.xlu2 %9714, %v14168_v16  }
 0x534   :  { %1486 = vperm.xlu1 %9713, %v14168_v16  }
 0x536   :  { %v1384_v26 = vpop.permute.xlu1 %1383 }
 0x537   :  { %v3526_v57 = vsub.f32 %v1384_v26, %v11262_v52 }
 0x539   :  { %v4038_v16 = vmul.f32 %v3526_v57, %v3526_v57  ;;  %v5573_v57 = vunpack.c.l.bf16 %v5061_v61  ;;  %v4544_v61 = vmul.f32 -20000.0, %v4032_v33 }
 0x53b   :  { %9716 = vset.pattern.permute.xlu2 %v11073_v4  ;;  %v4550_v20 = vmul.f32 -20000.0, %v4038_v16  ;;  %v3518_v16 = vsub.f32 %v1336_v44, %v11262_v52  ;;  %v6273_v6 = vmul.f32 1.442695, %v5573_v57  ;;  %v3516_v44 = vsub.f32 %v12523_v31, %v11262_v52 }
 0x53c   :  { %9715 = vset.pattern.permute.xlu1 %v14094_v11  ;;  %v4029_v57 = vmul.f32 %v3517_v7, %v3517_v7 }
 0x53d   :  { %v5062_v26 = vpack.c.bf16 %v4550_v20, %v4550_v20  ;;  %v4543_v20 = vmul.f32 -20000.0, %v4031_v58  ;;  %v4030_v51 = vmul.f32 %v3518_v16, %v3518_v16  ;;  %10317 = vpow2.f32 %v6273_v6 }
 0x53e   :  { %v5056_v58 = vpack.c.bf16 %v4544_v61, %v4544_v61  ;;  %10319 = vpow2.f32 %v6277_v41  ;;  %v4028_v33 = vmul.f32 %v3516_v44, %v3516_v44  ;;  %v6271_v16 = vmul.f32 1.442695, %v5572_v24 }
 0x53f   :  { %v5574_v12 = vunpack.c.l.bf16 %v5062_v26  ;;  %v4542_v3 = vmul.f32 -20000.0, %v4030_v51  ;;  %v4541_v0 = vmul.f32 -20000.0, %v4029_v57  ;;  %v6265_v44 = vmul.f32 1.442695, %v5569_v53 }
 0x540   :  { %v5568_v7 = vunpack.c.l.bf16 %v5056_v58  ;;  %v4540_v41 = vmul.f32 -20000.0, %v4028_v33 }
 0x541   :  { %v6275_v26 = vmul.f32 1.442695, %v5574_v12  ;;  %v4026_v12 = vmul.f32 %v3514_v49, %v3514_v49  ;;  %v5053_v24 = vpack.c.bf16 %v4541_v0, %v4541_v0 }
 0x542   :  { %v5052_v49 = vpack.c.bf16 %v4540_v41, %v4540_v41  ;;  %v6263_v57 = vmul.f32 1.442695, %v5568_v7  ;;  %v12566_v7 = vpop.permute.xlu2 %1402 }
 0x543   :  { %1511 = vperm.xlu2 %9716, %v14171_v18   ;;  %10321 = vpow2.f32 %v6275_v26  ;;  %v10318_v50 = vpop.eup %10317  ;;  %v5565_v53 = vunpack.c.l.bf16 %v5053_v24 }
 0x544   :  { %1505 = vperm.xlu1 %9715, %v14171_v18   ;;  %v10320_v61 = vpop.eup %10319 }
 0x545   :  { %v7111_v26 = vpack.c.bf16 %v10320_v61, %v10320_v61 }
 0x546   :  { %v1396_v62 = vpop.permute.xlu1 %1395 }
 0x547   :  { %v3528_v1 = vsub.f32 %v1396_v62, %v11262_v52  ;;  %v5055_v62 = vpack.c.bf16 %v4543_v20, %v4543_v20 }
 0x549   :  { %v4040_v40 = vmul.f32 %v3528_v1, %v3528_v1  ;;  %v5570_v1 = vunpack.c.l.bf16 %v5058_v42  ;;  %v5567_v6 = vunpack.c.l.bf16 %v5055_v62  ;;  %v10322_v51 = vpop.eup %10321  ;;  %v4538_v42 = vmul.f32 -20000.0, %v4026_v12 }
 0x54a   :  { %v7110_v33 = vpack.c.bf16 %v10322_v51, %v10322_v51  ;;  %v5564_v12 = vunpack.c.l.bf16 %v5052_v49 }
 0x54b   :  { %v4552_v46 = vmul.f32 -20000.0, %v4040_v40  ;;  %9718 = vset.pattern.permute.xlu2 %v14158_v21  ;;  %v4025_v40 = vmul.f32 %v3513_v8, %v3513_v8  ;;  %v6267_v20 = vmul.f32 1.442695, %v5570_v1  ;;  %v6261_v60 = vmul.f32 1.442695, %v5567_v6 }
 0x54c   :  { %9717 = vset.pattern.permute.xlu1 %v11095_v10  ;;  %v5563_v1 = vunpack.c.l.bf16 %v5051_v63  ;;  %v8263_v61 = vunpack.c.l.b16 %v7110_v33  ;;  %v6255_v24 = vmul.f32 1.442695, %v5564_v12 }
 0x54d   :  { %v5064_v36 = vpack.c.bf16 %v4552_v46, %v4552_v46  ;;  %v5054_v46 = vpack.c.bf16 %v4542_v3, %v4542_v3  ;;  %v4537_v35 = vmul.f32 -20000.0, %v4025_v40 }
 0x54e   :  { %v6253_v51 = vmul.f32 1.442695, %v5563_v1 }
 0x54f   :  { %v5576_v31 = vunpack.c.l.bf16 %v5064_v36  ;;  %v5566_v8 = vunpack.c.l.bf16 %v5054_v46 }
 0x551   :  { %v6279_v32 = vmul.f32 1.442695, %v5576_v31  ;;  %v7109_v31 = vpack.c.bf16 %v10318_v50, %v10318_v50  ;;  %v6259_v40 = vmul.f32 1.442695, %v5566_v8 }
 0x553   :  { %10323 = vpow2.f32 %v6279_v32  ;;  %1523 = vperm.xlu2 %9718, %v14171_v18   ;;  %v8264_v32 = vunpack.c.l.b16 %v7111_v26 }
 0x554   :  { %10325 = vpow2.f32 %v6271_v16  ;;  %1517 = vperm.xlu1 %9717, %v14171_v18   ;;  %v5050_v16 = vpack.c.bf16 %v4538_v42, %v4538_v42 }
 0x555   :  { %10327 = vpow2.f32 %v6269_v38  ;;  %v5049_v38 = vpack.c.bf16 %v4537_v35, %v4537_v35 }
 0x556   :  { %10329 = vpow2.f32 %v6267_v20  ;;  %v8262_v20 = vunpack.c.l.b16 %v7109_v31  ;;  %v5562_v63 = vunpack.c.l.bf16 %v5050_v16 }
 0x557   :  { %10331 = vpow2.f32 %v6265_v44  ;;  %v6257_v44 = vmul.f32 1.442695, %v5565_v53  ;;  %v5561_v42 = vunpack.c.l.bf16 %v5049_v38  ;;  %v12570_v38 = vpop.permute.xlu2 %1420 }
 0x558   :  { %10333 = vpow2.f32 %v6261_v60  ;;  %v8680_v26 = vpack.c.b16 %v8263_v61, %v8262_v20 }
 0x559   :  { %v10324_v36 = vpop.eup %10323  ;;  %10335 = vpow2.f32 %v6263_v57 }
 0x55a   :  { %v10326_v62 = vpop.eup %10325  ;;  %v7112_v58 = vpack.c.bf16 %v10324_v36, %v10324_v36  ;;  %10337 = vpow2.f32 %v6259_v40 }
 0x55b   :  { %v10328_v3 = vpop.eup %10327  ;;  %9720 = vset.pattern.permute.xlu2 %v11067_v2  ;;  %v7108_v0 = vpack.c.bf16 %v10326_v62, %v10326_v62  ;;  %10339 = vpow2.f32 %v6257_v44  ;;  %v6251_v62 = vmul.f32 1.442695, %v5562_v63 }
 0x55c   :  { %v8265_v25 = vunpack.c.l.b16 %v7112_v58  ;;  %9719 = vset.pattern.permute.xlu1 %v14083_v5  ;;  %v10330_v6 = vpop.eup %10329  ;;  %v7107_v41 = vpack.c.bf16 %v10328_v3, %v10328_v3  ;;  %10341 = vpow2.f32 %v6253_v51  ;;  %v6249_v58 = vmul.f32 1.442695, %v5561_v42 }
 0x55d   :  { %v10332_v46 = vpop.eup %10331  ;;  %v7106_v35 = vpack.c.bf16 %v10330_v6, %v10330_v6  ;;  %v8261_v49 = vunpack.c.l.b16 %v7108_v0  ;;  %10343 = vpow2.f32 %v6255_v24 }
 0x55e   :  { %v8681_v50 = vpack.c.b16 %v8265_v25, %v8264_v32  ;;  %v10334_v60 = vpop.eup %10333  ;;  %v8260_v36 = vunpack.c.l.b16 %v7107_v41  ;;  %v7105_v8 = vpack.c.bf16 %v10332_v46, %v10332_v46  ;;  %10345 = vpow2.f32 %v6251_v62 }
 0x55f   :  { %v10336_v57 = vpop.eup %10335  ;;  %v7103_v31 = vpack.c.bf16 %v10334_v60, %v10334_v60  ;;  %v8259_v16 = vunpack.c.l.b16 %v7106_v35  ;;  %10347 = vpow2.f32 %v6249_v58  ;;  %v12574_v42 = vpop.permute.xlu2 %1432 }
 0x560   :  { %9241 = vmatpush.bf16.msra.mxu3 %v8681_v50  ;;  %v7104_v33 = vpack.c.bf16 %v10336_v57, %v10336_v57  ;;  %v8679_v3 = vpack.c.b16 %v8261_v49, %v8260_v36  ;;  %v8258_v1 = vunpack.c.l.b16 %v7105_v8  ;;  %v10338_v53 = vpop.eup %10337  ;;  %v12578_v8 = vpop.permute.xlu1 %1414 }
 0x561   :  { %v10340_v32 = vpop.eup %10339  ;;  %v8256_v0 = vunpack.c.l.b16 %v7103_v31  ;;  %v7102_v6 = vpack.c.bf16 %v10338_v53, %v10338_v53 }
 0x562   :  { %v10342_v25 = vpop.eup %10341  ;;  %v8257_v12 = vunpack.c.l.b16 %v7104_v33  ;;  %v8678_v40 = vpack.c.b16 %v8259_v16, %v8258_v1  ;;  %v7101_v20 = vpack.c.bf16 %v10340_v32, %v10340_v32 }
 0x563   :  { %1541 = vperm.xlu2 %9720, %v14171_v18   ;;  %v10344_v50 = vpop.eup %10343  ;;  %v8255_v46 = vunpack.c.l.b16 %v7102_v6  ;;  %v7099_v44 = vpack.c.bf16 %v10342_v25, %v10342_v25  ;;  %v36_v6 = vadd.s32 640, %v14153_v17 }
 0x564   :  { %1535 = vperm.xlu1 %9719, %v14171_v18   ;;  %9242 = vmatpush.bf16.msra.mxu3 %v8680_v26  ;;  %v10346_v61 = vpop.eup %10345  ;;  %v8677_v41 = vpack.c.b16 %v8257_v12, %v8256_v0  ;;  %v7100_v51 = vpack.c.bf16 %v10344_v50, %v10344_v50  ;;  %v8254_v24 = vunpack.c.l.b16 %v7101_v20  ;;  %v35_v0 = vadd.s32 512, %v14153_v17 }
 0x565   :  { %v10348_v63 = vpop.eup %10347  ;;  %v7098_v35 = vpack.c.bf16 %v10346_v61, %v10346_v61  ;;  %v8252_v26 = vunpack.c.l.b16 %v7099_v44  ;;  %vm69_vm13 = vcmp.ge.s32.totalorder %v36_v6, %v12326_v48  ;;  %vm102_vm15 = vcmp.lt.s32.totalorder %v36_v6, %v12330_v30 }
 0x566   :  { %v8676_v60 = vpack.c.b16 %v8255_v46, %v8254_v24  ;;  %v8253_v36 = vunpack.c.l.b16 %v7100_v51  ;;  %v7097_v49 = vpack.c.bf16 %v10348_v63, %v10348_v63  ;;  %vm68_vm12 = vcmp.ge.s32.totalorder %v35_v0, %v12326_v48  ;;  %vm134_vm1 = vmand %vm69_vm13, %vm102_vm15 }
 0x567   :  { %v8251_v58 = vunpack.c.l.b16 %v7098_v35  ;;  %v1451_v31 = vpop.permute.xlu2 %1450  ;;  %vm101_vm14 = vcmp.lt.s32.totalorder %v35_v0, %v12330_v30  ;;  %v166_v44 = vsel %vm134_vm1, 1.0, %v14166_v59  ;;  %v14174_v0 = vld [vmem:[#allocation13_spill] sm:$0xff] }
 0x568   :  { %9243 = vmatpush.bf16.msra.mxu3 %v8679_v3  ;;  %v8675_v57 = vpack.c.b16 %v8253_v36, %v8252_v26  ;;  %v8250_v62 = vunpack.c.l.b16 %v7097_v49  ;;  %v1427_v3 = vpop.permute.xlu1 %1426  ;;  %vm133_vm0 = vmand %vm68_vm12, %vm101_vm14  ;;  %v3535_v36 = vsub.f32 %v12221_v14, %v11262_v52 }
 0x569   :  { %v165_v46 = vsel %vm133_vm0, 1.0, %v14166_v59 }
 0x56a   :  { %v8674_v33 = vpack.c.b16 %v8251_v58, %v8250_v62  ;;  %v12604_v24 = vpack.c.bf16 %v166_v44, %v165_v46  ;;  %v3534_v44 = vsub.f32 %v12574_v42, %v11262_v52  ;;  %v3531_v42 = vsub.f32 %v12578_v8, %v11262_v52 }
 0x56b   :  { %9722 = vset.pattern.permute.xlu2 %v14159_v37 }
 0x56c   :  { %9721 = vset.pattern.permute.xlu1 %v11171_v27  ;;  %9244 = vmatpush.bf16.msra.mxu3 %v8678_v40  ;;  %v7470_v49 = vunpack.c.l.b16 %v12604_v24 }
 0x56e   :  { %v7502_v58 = vpack.c.b16 %v7470_v49, %v7470_v49 }
 0x56f   :  { %v1463_v1 = vpop.permute.xlu2 %1462 }
 0x570   :  { %9245 = vmatpush.bf16.msra.mxu3 %v8677_v41  ;;  %v3539_v51 = vsub.f32 %v1463_v1, %v11262_v52  ;;  %9158 = vmatmul.bf16.vlgmr.msrb.gmra.mxu0 %v7502_v58 }
 0x573   :  { %1553 = vperm.xlu2 %9722, %v14171_v18  }
 0x574   :  { %1547 = vperm.xlu1 %9721, %v14171_v18   ;;  %9246 = vmatpush.bf16.msra.mxu3 %v8676_v60 }
 0x576   :  { %v1445_v16 = vpop.permute.xlu1 %1444 }
 0x577   :  { %v3536_v6 = vsub.f32 %v1445_v16, %v11262_v52 }
 0x578   :  { %9247 = vmatpush.bf16.msra.mxu3 %v8675_v57  ;;  %v4051_v57 = vmul.f32 %v3539_v51, %v3539_v51 }
 0x57b   :  { %9724 = vset.pattern.permute.xlu2 %v14151_v29 }
 0x57c   :  { %9723 = vset.pattern.permute.xlu1 %v14147_v56  ;;  %9248 = vmatpush.bf16.msra.mxu3 %v8674_v33 }
 0x57d   :  { %v1481_v53 = vpop.permute.xlu2 %1480 }
 0x57e   :  { %v3542_v50 = vsub.f32 %v1481_v53, %v11262_v52 }
 0x580   :  { %v4054_v63 = vmul.f32 %v3542_v50, %v3542_v50  ;;  %v4563_v50 = vmul.f32 -20000.0, %v4051_v57 }
 0x582   :  { %v4566_v62 = vmul.f32 -20000.0, %v4054_v63  ;;  %v3533_v63 = vsub.f32 %v1427_v3, %v11262_v52  ;;  %v5075_v16 = vpack.c.bf16 %v4563_v50, %v4563_v50 }
 0x583   :  { %1571 = vperm.xlu2 %9724, %v14171_v18  }
 0x584   :  { %1565 = vperm.xlu1 %9723, %v14171_v18   ;;  %v5078_v14 = vpack.c.bf16 %v4566_v62, %v4566_v62  ;;  %v4045_v3 = vmul.f32 %v3533_v63, %v3533_v63 }
 0x586   :  { %v1457_v32 = vpop.permute.xlu1 %1456  ;;  %v4557_v63 = vmul.f32 -20000.0, %v4045_v3 }
 0x587   :  { %v3538_v33 = vsub.f32 %v1457_v32, %v11262_v52 }
 0x58b   :  { %9726 = vset.pattern.permute.xlu2 %v14160_v43 }
 0x58c   :  { %9725 = vset.pattern.permute.xlu1 %v14072_v45 }
 0x58d   :  { %v1493_v25 = vpop.permute.xlu2 %1492 }
 0x58e   :  { %v3544_v12 = vsub.f32 %v1493_v25, %v11262_v52 }
 0x590   :  { %v4056_v61 = vmul.f32 %v3544_v12, %v3544_v12  ;;  %v4047_v12 = vmul.f32 %v3535_v36, %v3535_v36 }
 0x592   :  { %v4568_v60 = vmul.f32 -20000.0, %v4056_v61  ;;  %v4559_v32 = vmul.f32 -20000.0, %v4047_v12 }
 0x593   :  { %1583 = vperm.xlu2 %9726, %v14171_v18  }
 0x594   :  { %1577 = vperm.xlu1 %9725, %v14171_v18   ;;  %v14173_v18 = vld [vmem:[#allocation88_spill] sm:$0xff]  ;;  %v5080_v1 = vpack.c.bf16 %v4568_v60, %v4568_v60  ;;  %v5590_v60 = vunpack.c.l.bf16 %v5078_v14  ;;  %v5071_v58 = vpack.c.bf16 %v4559_v32, %v4559_v32 }
 0x595   :  { %v3540_v41 = vsub.f32 %v14173_v18, %v11262_v52 }
 0x596   :  { %v1475_v40 = vpop.permute.xlu1 %1474  ;;  %v5592_v18 = vunpack.c.l.bf16 %v5080_v1  ;;  %v5583_v8 = vunpack.c.l.bf16 %v5071_v58 }
 0x597   :  { %v3541_v20 = vsub.f32 %v1475_v40, %v11262_v52  ;;  %v4052_v26 = vmul.f32 %v3540_v41, %v3540_v41  ;;  %v3537_v40 = vsub.f32 %v1451_v31, %v11262_v52 }
 0x598   :  { %v6311_v49 = vmul.f32 1.442695, %v5592_v18 }
 0x599   :  { %v4053_v35 = vmul.f32 %v3541_v20, %v3541_v20  ;;  %v4564_v25 = vmul.f32 -20000.0, %v4052_v26  ;;  %v4050_v20 = vmul.f32 %v3538_v33, %v3538_v33  ;;  %v4049_v51 = vmul.f32 %v3537_v40, %v3537_v40 }
 0x59a   :  { %v3532_v33 = vsub.f32 %v12570_v38, %v11262_v52  ;;  %v5587_v40 = vunpack.c.l.bf16 %v5075_v16  ;;  %10349 = vpow2.f32 %v6311_v49  ;;  %v14175_v38 = vld [vmem:[#allocation79_spill] sm:$0xff] }
 0x59b   :  { %9728 = vset.pattern.permute.xlu2 %v14094_v11  ;;  %v4565_v53 = vmul.f32 -20000.0, %v4053_v35  ;;  %v5076_v41 = vpack.c.bf16 %v4564_v25, %v4564_v25  ;;  %v4048_v35 = vmul.f32 %v3536_v6, %v3536_v6  ;;  %v4562_v26 = vmul.f32 -20000.0, %v4050_v20 }
 0x59c   :  { %9727 = vset.pattern.permute.xlu1 %v14136_v23  ;;  %v4561_v1 = vmul.f32 -20000.0, %v4049_v51  ;;  %v6307_v6 = vmul.f32 1.442695, %v5590_v60  ;;  %v4044_v32 = vmul.f32 %v3532_v33, %v3532_v33 }
 0x59d   :  { %v5077_v61 = vpack.c.bf16 %v4565_v53, %v4565_v53  ;;  %v5588_v62 = vunpack.c.l.bf16 %v5076_v41  ;;  %v4046_v53 = vmul.f32 %v3534_v44, %v3534_v44  ;;  %v4560_v12 = vmul.f32 -20000.0, %v4048_v35 }
 0x59e   :  { %v5074_v50 = vpack.c.bf16 %v4562_v26, %v4562_v26  ;;  %v3529_v41 = vsub.f32 %v12566_v7, %v11262_v52  ;;  %v5073_v44 = vpack.c.bf16 %v4561_v1, %v4561_v1  ;;  %v6301_v35 = vmul.f32 1.442695, %v5587_v40 }
 0x59f   :  { %v5589_v36 = vunpack.c.l.bf16 %v5077_v61  ;;  %v3530_v61 = vsub.f32 %v14175_v38, %v11262_v52  ;;  %v6303_v18 = vmul.f32 1.442695, %v5588_v62  ;;  %10351 = vpow2.f32 %v6307_v6 }
 0x5a0   :  { %v5072_v16 = vpack.c.bf16 %v4560_v12, %v4560_v12  ;;  %v5586_v60 = vunpack.c.l.bf16 %v5074_v50  ;;  %v5585_v62 = vunpack.c.l.bf16 %v5073_v44  ;;  %v4041_v7 = vmul.f32 %v3529_v41, %v3529_v41 }
 0x5a1   :  { %v6305_v14 = vmul.f32 1.442695, %v5589_v36  ;;  %v10350_v36 = vpop.eup %10349  ;;  %v4042_v49 = vmul.f32 %v3530_v61, %v3530_v61  ;;  %v4556_v58 = vmul.f32 -20000.0, %v4044_v32 }
 0x5a2   :  { %v5584_v1 = vunpack.c.l.bf16 %v5072_v16  ;;  %v7128_v12 = vpack.c.bf16 %v10350_v36, %v10350_v36  ;;  %v6297_v50 = vmul.f32 1.442695, %v5585_v62 }
 0x5a3   :  { %1602 = vperm.xlu2 %9728, %v14174_v0   ;;  %10353 = vpow2.f32 %v6305_v14  ;;  %v4554_v6 = vmul.f32 -20000.0, %v4042_v49  ;;  %v5068_v38 = vpack.c.bf16 %v4556_v58, %v4556_v58 }
 0x5a4   :  { %1596 = vperm.xlu1 %9727, %v14174_v0   ;;  %10355 = vpow2.f32 %v6303_v18  ;;  %v6295_v32 = vmul.f32 1.442695, %v5584_v1  ;;  %v8281_v44 = vunpack.c.l.b16 %v7128_v12 }
 0x5a5   :  { %v10352_v3 = vpop.eup %10351 }
 0x5a6   :  { %v1487_v46 = vpop.permute.xlu1 %1486 }
 0x5a7   :  { %v3543_v31 = vsub.f32 %v1487_v46, %v11262_v52  ;;  %v4558_v46 = vmul.f32 -20000.0, %v4046_v53  ;;  %v5069_v53 = vpack.c.bf16 %v4557_v63, %v4557_v63  ;;  %v7126_v63 = vpack.c.bf16 %v10352_v3, %v10352_v3 }
 0x5a9   :  { %v4055_v57 = vmul.f32 %v3543_v31, %v3543_v31  ;;  %v4043_v31 = vmul.f32 %v3531_v42, %v3531_v42  ;;  %v5070_v33 = vpack.c.bf16 %v4558_v46, %v4558_v46  ;;  %v10354_v40 = vpop.eup %10353  ;;  %v5581_v41 = vunpack.c.l.bf16 %v5069_v53 }
 0x5aa   :  { %v10356_v14 = vpop.eup %10355 }
 0x5ab   :  { %v4567_v25 = vmul.f32 -20000.0, %v4055_v57  ;;  %9730 = vset.pattern.permute.xlu2 %v11095_v10  ;;  %v6293_v57 = vmul.f32 1.442695, %v5583_v8  ;;  %v4555_v42 = vmul.f32 -20000.0, %v4043_v31  ;;  %v5582_v61 = vunpack.c.l.bf16 %v5070_v33 }
 0x5ac   :  { %9729 = vset.pattern.permute.xlu1 %v11073_v4  ;;  %v7125_v31 = vpack.c.bf16 %v10354_v40, %v10354_v40  ;;  %v7124_v53 = vpack.c.bf16 %v10356_v14, %v10356_v14 }
 0x5ad   :  { %v5079_v20 = vpack.c.bf16 %v4567_v25, %v4567_v25  ;;  %v6299_v25 = vmul.f32 1.442695, %v5586_v60  ;;  %v5067_v8 = vpack.c.bf16 %v4555_v42, %v4555_v42  ;;  %v5580_v60 = vunpack.c.l.bf16 %v5068_v38 }
 0x5ae   :  { %v8278_v33 = vunpack.c.l.b16 %v7125_v31  ;;  %v8279_v42 = vunpack.c.l.b16 %v7126_v63 }
 0x5af   :  { %v5591_v51 = vunpack.c.l.bf16 %v5079_v20  ;;  %v4553_v20 = vmul.f32 -20000.0, %v4041_v7  ;;  %v5579_v49 = vunpack.c.l.bf16 %v5067_v8  ;;  %v6287_v3 = vmul.f32 1.442695, %v5580_v60 }
 0x5b1   :  { %v6309_v26 = vmul.f32 1.442695, %v5591_v51  ;;  %v5065_v16 = vpack.c.bf16 %v4553_v20, %v4553_v20  ;;  %v8688_v20 = vpack.c.b16 %v8279_v42, %v8278_v33 }
 0x5b3   :  { %10357 = vpow2.f32 %v6309_v26  ;;  %1614 = vperm.xlu2 %9730, %v14174_v0   ;;  %v6291_v26 = vmul.f32 1.442695, %v5582_v61  ;;  %v8277_v61 = vunpack.c.l.b16 %v7124_v53 }
 0x5b4   :  { %10359 = vpow2.f32 %v6301_v35  ;;  %1608 = vperm.xlu1 %9729, %v14174_v0   ;;  %v5066_v35 = vpack.c.bf16 %v4554_v6, %v4554_v6  ;;  %v6285_v6 = vmul.f32 1.442695, %v5579_v49 }
 0x5b5   :  { %10361 = vpow2.f32 %v6293_v57  ;;  %v6289_v57 = vmul.f32 1.442695, %v5581_v41 }
 0x5b6   :  { %10363 = vpow2.f32 %v6299_v25  ;;  %v5577_v25 = vunpack.c.l.bf16 %v5065_v16  ;;  %v5578_v40 = vunpack.c.l.bf16 %v5066_v35 }
 0x5b7   :  { %10365 = vpow2.f32 %v6297_v50  ;;  %v12632_v50 = vpop.permute.xlu2 %1511 }
 0x5b8   :  { %10367 = vpow2.f32 %v6295_v32  ;;  %v6281_v41 = vmul.f32 1.442695, %v5577_v25  ;;  %v6283_v32 = vmul.f32 1.442695, %v5578_v40 }
 0x5b9   :  { %v10358_v18 = vpop.eup %10357  ;;  %10369 = vpow2.f32 %v6291_v26 }
 0x5ba   :  { %v10360_v46 = vpop.eup %10359  ;;  %v7127_v51 = vpack.c.bf16 %v10358_v18, %v10358_v18  ;;  %10371 = vpow2.f32 %v6289_v57 }
 0x5bb   :  { %9733 = vset.pattern.permute.xlu2 %v14083_v5  ;;  %v7123_v62 = vpack.c.bf16 %v10360_v46, %v10360_v46  ;;  %v10362_v7 = vpop.eup %10361  ;;  %10373 = vpow2.f32 %v6287_v3 }
 0x5bc   :  { %v8280_v36 = vunpack.c.l.b16 %v7127_v51  ;;  %9732 = vset.pattern.permute.xlu1 %v11092_v9  ;;  %v10364_v1 = vpop.eup %10363  ;;  %v7119_v46 = vpack.c.bf16 %v10362_v7, %v10362_v7  ;;  %10375 = vpow2.f32 %v6285_v6 }
 0x5bd   :  { %v10366_v12 = vpop.eup %10365  ;;  %v8276_v38 = vunpack.c.l.b16 %v7123_v62  ;;  %v7122_v18 = vpack.c.bf16 %v10364_v1, %v10364_v1  ;;  %10377 = vpow2.f32 %v6281_v41 }
 0x5be   :  { %v8689_v58 = vpack.c.b16 %v8281_v44, %v8280_v36  ;;  %v10368_v8 = vpop.eup %10367  ;;  %v7121_v14 = vpack.c.bf16 %v10366_v12, %v10366_v12  ;;  %10379 = vpow2.f32 %v6283_v32  ;;  %v8272_v60 = vunpack.c.l.b16 %v7119_v46 }
 0x5bf   :  { %v10370_v44 = vpop.eup %10369  ;;  %v8687_v51 = vpack.c.b16 %v8277_v61, %v8276_v38  ;;  %v8275_v31 = vunpack.c.l.b16 %v7122_v18  ;;  %v7120_v63 = vpack.c.bf16 %v10368_v8, %v10368_v8  ;;  %v12636_v26 = vpop.permute.xlu2 %1523 }
 0x5c0   :  { %9254 = vmatpush.bf16.msrb.mxu0 %v8689_v58  ;;  %v10372_v35 = vpop.eup %10371  ;;  %v8274_v16 = vunpack.c.l.b16 %v7121_v14  ;;  %v7118_v58 = vpack.c.bf16 %v10370_v44, %v10370_v44  ;;  %v12642_v8 = vpop.permute.xlu1 %1505  ;;  %v14176_v44 = vld [vmem:[#allocation123_spill] sm:$0xff] }
 0x5c1   :  { %v10374_v36 = vpop.eup %10373  ;;  %v8273_v57 = vunpack.c.l.b16 %v7120_v63  ;;  %v7117_v62 = vpack.c.bf16 %v10372_v35, %v10372_v35 }
 0x5c2   :  { %v8686_v49 = vpack.c.b16 %v8275_v31, %v8274_v16  ;;  %v10376_v33 = vpop.eup %10375  ;;  %v7116_v7 = vpack.c.bf16 %v10374_v36, %v10374_v36  ;;  %v8271_v25 = vunpack.c.l.b16 %v7118_v58 }
 0x5c3   :  { %1632 = vperm.xlu2 %9733, %v14174_v0   ;;  %v10378_v42 = vpop.eup %10377  ;;  %v8685_v53 = vpack.c.b16 %v8273_v57, %v8272_v60  ;;  %v8270_v1 = vunpack.c.l.b16 %v7117_v62  ;;  %v7115_v3 = vpack.c.bf16 %v10376_v33, %v10376_v33 }
 0x5c4   :  { %1626 = vperm.xlu1 %9732, %v14174_v0   ;;  %9255 = vmatpush.bf16.msrb.mxu0 %v8688_v20  ;;  %v10380_v12 = vpop.eup %10379  ;;  %v7113_v40 = vpack.c.bf16 %v10378_v42, %v10378_v42  ;;  %v8269_v38 = vunpack.c.l.b16 %v7116_v7 }
 0x5c5   :  { %v8684_v6 = vpack.c.b16 %v8271_v25, %v8270_v1  ;;  %v8268_v20 = vunpack.c.l.b16 %v7115_v3  ;;  %v7114_v61 = vpack.c.bf16 %v10380_v12, %v10380_v12  ;;  %v14177_v25 = vld [vmem:[#allocation114_spill] sm:$0xff] }
 0x5c6   :  { %v8266_v14 = vunpack.c.l.b16 %v7113_v40  ;;  %v3555_v3 = vsub.f32 %v14177_v25, %v11262_v52 }
 0x5c7   :  { %v1542_v18 = vpop.permute.xlu2 %1541  ;;  %v8683_v41 = vpack.c.b16 %v8269_v38, %v8268_v20  ;;  %v8267_v32 = vunpack.c.l.b16 %v7114_v61 }
 0x5c8   :  { %9256 = vmatpush.bf16.msrb.mxu0 %v8687_v51  ;;  %v3560_v51 = vsub.f32 %v14176_v44, %v11262_v52  ;;  %v12648_v63 = vpop.permute.xlu1 %1517 }
 0x5c9   :  { %v8682_v46 = vpack.c.b16 %v8267_v32, %v8266_v14  ;;  %v4067_v14 = vmul.f32 %v3555_v3, %v3555_v3 }
 0x5ca   :  { %v4072_v35 = vmul.f32 %v3560_v51, %v3560_v51 }
 0x5cb   :  { %9735 = vset.pattern.permute.xlu2 %v11171_v27 }
 0x5cc   :  { %9734 = vset.pattern.permute.xlu1 %v11067_v2  ;;  %9257 = vmatpush.bf16.msrb.mxu0 %v8686_v49  ;;  %v4584_v16 = vmul.f32 -20000.0, %v4072_v35 }
 0x5ce   :  { %v5096_v49 = vpack.c.bf16 %v4584_v16, %v4584_v16 }
 0x5cf   :  { %v1554_v31 = vpop.permute.xlu2 %1553 }
 0x5d0   :  { %9258 = vmatpush.bf16.msrb.mxu0 %v8685_v53  ;;  %v5608_v57 = vunpack.c.l.bf16 %v5096_v49  ;;  %v3554_v51 = vsub.f32 %v1554_v31, %v11262_v52  ;;  %v14178_v31 = vld [vmem:[#allocation107_spill] sm:$0xff] }
 0x5d1   :  { %v3550_v25 = vsub.f32 %v14178_v31, %v11262_v52 }
 0x5d2   :  { %v6343_v7 = vmul.f32 1.442695, %v5608_v57 }
 0x5d3   :  { %1644 = vperm.xlu2 %9735, %v14174_v0  }
 0x5d4   :  { %1638 = vperm.xlu1 %9734, %v14174_v0   ;;  %9259 = vmatpush.bf16.msrb.mxu0 %v8684_v6  ;;  %10381 = vpow2.f32 %v6343_v7 }
 0x5d6   :  { %v1536_v36 = vpop.permute.xlu1 %1535 }
 0x5d7   :  { %v3551_v7 = vsub.f32 %v1536_v36, %v11262_v52 }
 0x5d8   :  { %9260 = vmatpush.bf16.msrb.mxu0 %v8683_v41  ;;  %v7471_v41 = vunpack.c.h.b16 %v12604_v24  ;;  %v3552_v24 = vsub.f32 %v1542_v18, %v11262_v52 }
 0x5d9   :  { %v4063_v18 = vmul.f32 %v3551_v7, %v3551_v7 }
 0x5da   :  { %v10382_v38 = vpop.eup %10381 }
 0x5db   :  { %9737 = vset.pattern.permute.xlu2 %v14147_v56  ;;  %v7144_v44 = vpack.c.bf16 %v10382_v38, %v10382_v38 }
 0x5dc   :  { %9736 = vset.pattern.permute.xlu1 %v14148_v54  ;;  %9261 = vmatpush.bf16.msrb.mxu0 %v8682_v46  ;;  %v7503_v46 = vpack.c.b16 %v7471_v41, %v7471_v41 }
 0x5dd   :  { %v1572_v60 = vpop.permute.xlu2 %1571 }
 0x5de   :  { %v3557_v6 = vsub.f32 %v1572_v60, %v11262_v52  ;;  %9171 = vmatmul.bf16.vlgmr.msrb.gmra.mxu1 %v7503_v46  ;;  %v4579_v60 = vmul.f32 -20000.0, %v4067_v14  ;;  %v4062_v14 = vmul.f32 %v3550_v25, %v3550_v25 }
 0x5e0   :  { %v4069_v32 = vmul.f32 %v3557_v6, %v3557_v6  ;;  %v5091_v3 = vpack.c.bf16 %v4579_v60, %v4579_v60  ;;  %v14179_v6 = vld [vmem:[#allocation19_spill] sm:$0xff]  ;;  %v4574_v7 = vmul.f32 -20000.0, %v4062_v14 }
 0x5e2   :  { %v4581_v49 = vmul.f32 -20000.0, %v4069_v32  ;;  %v5603_v32 = vunpack.c.l.bf16 %v5091_v3 }
 0x5e3   :  { %1662 = vperm.xlu2 %9737, %v14174_v0  }
 0x5e4   :  { %1656 = vperm.xlu1 %9736, %v14174_v0  }
 0x5e6   :  { %v1548_v58 = vpop.permute.xlu1 %1547 }
 0x5e7   :  { %v3553_v35 = vsub.f32 %v1548_v58, %v11262_v52  ;;  %v3549_v58 = vsub.f32 %v12636_v26, %v11262_v52  ;;  %v3548_v26 = vsub.f32 %v12648_v63, %v11262_v52  ;;  %v3546_v63 = vsub.f32 %v12642_v8, %v11262_v52 }
 0x5e9   :  { %v4060_v3 = vmul.f32 %v3548_v26, %v3548_v26 }
 0x5eb   :  { %9739 = vset.pattern.permute.xlu2 %v14072_v45 }
 0x5ec   :  { %9738 = vset.pattern.permute.xlu1 %v14151_v29 }
 0x5ed   :  { %v1584_v62 = vpop.permute.xlu2 %1583 }
 0x5ee   :  { %v3559_v33 = vsub.f32 %v1584_v62, %v11262_v52  ;;  %v8297_v62 = vunpack.c.l.b16 %v7144_v44  ;;  %v4061_v44 = vmul.f32 %v3549_v58, %v3549_v58 }
 0x5f0   :  { %v4071_v42 = vmul.f32 %v3559_v33, %v3559_v33  ;;  %v4066_v33 = vmul.f32 %v3554_v51, %v3554_v51 }
 0x5f2   :  { %v4583_v53 = vmul.f32 -20000.0, %v4071_v42  ;;  %v4065_v42 = vmul.f32 %v3553_v35, %v3553_v35  ;;  %v4578_v38 = vmul.f32 -20000.0, %v4066_v33  ;;  %v14180_v33 = vld [vmem:[#allocation94_spill] sm:$0xff] }
 0x5f3   :  { %1674 = vperm.xlu2 %9739, %v14174_v0  }
 0x5f4   :  { %1668 = vperm.xlu1 %9738, %v14174_v0   ;;  %v5095_v1 = vpack.c.bf16 %v4583_v53, %v4583_v53  ;;  %v4577_v36 = vmul.f32 -20000.0, %v4065_v42  ;;  %v5090_v60 = vpack.c.bf16 %v4578_v38, %v4578_v38  ;;  %v6333_v42 = vmul.f32 1.442695, %v5603_v32 }
 0x5f5   :  { %v4058_v32 = vmul.f32 %v3546_v63, %v3546_v63 }
 0x5f6   :  { %v1566_v12 = vpop.permute.xlu1 %1565  ;;  %v5607_v40 = vunpack.c.l.bf16 %v5095_v1 }
 0x5f7   :  { %v3556_v61 = vsub.f32 %v1566_v12, %v11262_v52  ;;  %v5093_v12 = vpack.c.bf16 %v4581_v49, %v4581_v49  ;;  %v4575_v49 = vmul.f32 -20000.0, %v4063_v18 }
 0x5f8   :  { %v6341_v20 = vmul.f32 1.442695, %v5607_v40 }
 0x5f9   :  { %v4068_v16 = vmul.f32 %v3556_v61, %v3556_v61  ;;  %v5605_v51 = vunpack.c.l.bf16 %v5093_v12  ;;  %v5602_v12 = vunpack.c.l.bf16 %v5090_v60 }
 0x5fa   :  { %10383 = vpow2.f32 %v6341_v20  ;;  %v4064_v20 = vmul.f32 %v3552_v24, %v3552_v24 }
 0x5fb   :  { %9741 = vset.pattern.permute.xlu2 %v14136_v23  ;;  %v4580_v53 = vmul.f32 -20000.0, %v4068_v16  ;;  %v6337_v31 = vmul.f32 1.442695, %v5605_v51  ;;  %10385 = vpow2.f32 %v6333_v42  ;;  %v6331_v8 = vmul.f32 1.442695, %v5602_v12 }
 0x5fc   :  { %9740 = vset.pattern.permute.xlu1 %v14152_v34  ;;  %v4576_v16 = vmul.f32 -20000.0, %v4064_v20 }
 0x5fd   :  { %v5092_v61 = vpack.c.bf16 %v4580_v53, %v4580_v53  ;;  %v3547_v53 = vsub.f32 %v12632_v50, %v11262_v52  ;;  %10387 = vpow2.f32 %v6337_v31 }
 0x5fe   :  { %v5088_v58 = vpack.c.bf16 %v4576_v16, %v4576_v16 }
 0x5ff   :  { %v4059_v50 = vmul.f32 %v3547_v53, %v3547_v53 }
 0x600   :  { %v10384_v57 = vpop.eup %10383 }
 0x601   :  { %v7143_v1 = vpack.c.bf16 %v10384_v57, %v10384_v57  ;;  %v5089_v57 = vpack.c.bf16 %v4577_v36, %v4577_v36  ;;  %v4571_v60 = vmul.f32 -20000.0, %v4059_v50 }
 0x603   :  { %v8296_v40 = vunpack.c.l.b16 %v7143_v1  ;;  %1693 = vperm.xlu2 %9741, %v14179_v6   ;;  %v4573_v1 = vmul.f32 -20000.0, %v4061_v44  ;;  %v5601_v20 = vunpack.c.l.bf16 %v5089_v57  ;;  %v5600_v44 = vunpack.c.l.bf16 %v5088_v58 }
 0x604   :  { %1686 = vperm.xlu1 %9740, %v14174_v0   ;;  %v5604_v0 = vunpack.c.l.bf16 %v5092_v61  ;;  %v5086_v61 = vpack.c.bf16 %v4574_v7, %v4574_v7  ;;  %v5083_v31 = vpack.c.bf16 %v4571_v60, %v4571_v60 }
 0x605   :  { %v8697_v41 = vpack.c.b16 %v8297_v62, %v8296_v40  ;;  %v3545_v62 = vsub.f32 %v14180_v33, %v11262_v52  ;;  %v5087_v40 = vpack.c.bf16 %v4575_v49, %v4575_v49  ;;  %v10386_v49 = vpop.eup %10385 }
 0x606   :  { %v1578_v46 = vpop.permute.xlu1 %1577  ;;  %v6335_v38 = vmul.f32 1.442695, %v5604_v0  ;;  %v5598_v57 = vunpack.c.l.bf16 %v5086_v61  ;;  %v10388_v33 = vpop.eup %10387  ;;  %v7139_v12 = vpack.c.bf16 %v10386_v49, %v10386_v49  ;;  %v5595_v50 = vunpack.c.l.bf16 %v5083_v31 }
 0x607   :  { %v3558_v35 = vsub.f32 %v1578_v46, %v11262_v52  ;;  %9267 = vmatpush.bf16.msrb.mxu1 %v8697_v41  ;;  %v4057_v36 = vmul.f32 %v3545_v62, %v3545_v62  ;;  %v5085_v41 = vpack.c.bf16 %v4573_v1, %v4573_v1  ;;  %v4572_v46 = vmul.f32 -20000.0, %v4060_v3 }
 0x608   :  { %v5599_v51 = vunpack.c.l.bf16 %v5087_v40  ;;  %10389 = vpow2.f32 %v6335_v38  ;;  %v4570_v62 = vmul.f32 -20000.0, %v4058_v32  ;;  %v7141_v3 = vpack.c.bf16 %v10388_v33, %v10388_v33 }
 0x609   :  { %v4070_v24 = vmul.f32 %v3558_v35, %v3558_v35  ;;  %v6329_v35 = vmul.f32 1.442695, %v5601_v20  ;;  %v4569_v16 = vmul.f32 -20000.0, %v4057_v36  ;;  %v5597_v0 = vunpack.c.l.bf16 %v5085_v41 }
 0x60a   :  { %v5084_v7 = vpack.c.bf16 %v4572_v46, %v4572_v46  ;;  %v6325_v42 = vmul.f32 1.442695, %v5599_v51  ;;  %v5082_v40 = vpack.c.bf16 %v4570_v62, %v4570_v62  ;;  %v8292_v46 = vunpack.c.l.b16 %v7139_v12 }
 0x60b   :  { %v4582_v25 = vmul.f32 -20000.0, %v4070_v24  ;;  %9743 = vset.pattern.permute.xlu2 %v11073_v4  ;;  %v6327_v24 = vmul.f32 1.442695, %v5600_v44  ;;  %v5081_v1 = vpack.c.bf16 %v4569_v16, %v4569_v16  ;;  %v6321_v63 = vmul.f32 1.442695, %v5597_v0 }
 0x60c   :  { %9742 = vset.pattern.permute.xlu1 %v14094_v11  ;;  %v5596_v20 = vunpack.c.l.bf16 %v5084_v7  ;;  %v5594_v44 = vunpack.c.l.bf16 %v5082_v40 }
 0x60d   :  { %v5094_v18 = vpack.c.bf16 %v4582_v25, %v4582_v25  ;;  %v6323_v25 = vmul.f32 1.442695, %v5598_v57  ;;  %v5593_v41 = vunpack.c.l.bf16 %v5081_v1  ;;  %v6317_v57 = vmul.f32 1.442695, %v5595_v50 }
 0x60e   :  { %v10390_v53 = vpop.eup %10389 }
 0x60f   :  { %v5606_v14 = vunpack.c.l.bf16 %v5094_v18  ;;  %v7140_v36 = vpack.c.bf16 %v10390_v53, %v10390_v53  ;;  %v6313_v0 = vmul.f32 1.442695, %v5593_v41 }
 0x611   :  { %v6339_v26 = vmul.f32 1.442695, %v5606_v14  ;;  %v8294_v14 = vunpack.c.l.b16 %v7141_v3 }
 0x613   :  { %10391 = vpow2.f32 %v6339_v26  ;;  %1705 = vperm.xlu2 %9743, %v14179_v6   ;;  %v8293_v26 = vunpack.c.l.b16 %v7140_v36 }
 0x614   :  { %10393 = vpow2.f32 %v6331_v8  ;;  %1699 = vperm.xlu1 %9742, %v14179_v6   ;;  %v6319_v8 = vmul.f32 1.442695, %v5596_v20 }
 0x615   :  { %10395 = vpow2.f32 %v6329_v35  ;;  %v8695_v7 = vpack.c.b16 %v8293_v26, %v8292_v46 }
 0x616   :  { %10397 = vpow2.f32 %v6327_v24  ;;  %v6315_v24 = vmul.f32 1.442695, %v5594_v44 }
 0x617   :  { %10399 = vpow2.f32 %v6325_v42 }
 0x618   :  { %10401 = vpow2.f32 %v6321_v63 }
 0x619   :  { %v10392_v58 = vpop.eup %10391  ;;  %10403 = vpow2.f32 %v6323_v25 }
 0x61a   :  { %v10394_v38 = vpop.eup %10393  ;;  %v7142_v18 = vpack.c.bf16 %v10392_v58, %v10392_v58  ;;  %10405 = vpow2.f32 %v6319_v8 }
 0x61b   :  { %v10396_v61 = vpop.eup %10395  ;;  %9745 = vset.pattern.permute.xlu2 %v11092_v9  ;;  %v7138_v60 = vpack.c.bf16 %v10394_v38, %v10394_v38  ;;  %10407 = vpow2.f32 %v6317_v57  ;;  %v12699_v57 = vpop.permute.xlu1 %1596 }
 0x61c   :  { %9744 = vset.pattern.permute.xlu1 %v14158_v21  ;;  %v8295_v32 = vunpack.c.l.b16 %v7142_v18  ;;  %v10398_v51 = vpop.eup %10397  ;;  %v7137_v16 = vpack.c.bf16 %v10396_v61, %v10396_v61  ;;  %10409 = vpow2.f32 %v6313_v0 }
 0x61d   :  { %v10400_v49 = vpop.eup %10399  ;;  %v7136_v33 = vpack.c.bf16 %v10398_v51, %v10398_v51  ;;  %v8291_v53 = vunpack.c.l.b16 %v7138_v60  ;;  %10411 = vpow2.f32 %v6315_v24 }
 0x61e   :  { %v8696_v35 = vpack.c.b16 %v8295_v32, %v8294_v14  ;;  %v10402_v62 = vpop.eup %10401  ;;  %v8290_v42 = vunpack.c.l.b16 %v7137_v16  ;;  %v7135_v1 = vpack.c.bf16 %v10400_v49, %v10400_v49  ;;  %v12695_v49 = vpop.permute.xlu2 %1602 }
 0x61f   :  { %v10404_v31 = vpop.eup %10403  ;;  %v7133_v25 = vpack.c.bf16 %v10402_v62, %v10402_v62  ;;  %v8289_v58 = vunpack.c.l.b16 %v7136_v33 }
 0x620   :  { %9268 = vmatpush.bf16.msrb.mxu1 %v8696_v35  ;;  %v8694_v63 = vpack.c.b16 %v8291_v53, %v8290_v42  ;;  %v8288_v3 = vunpack.c.l.b16 %v7135_v1  ;;  %v7134_v12 = vpack.c.bf16 %v10404_v31, %v10404_v31  ;;  %v10406_v40 = vpop.eup %10405  ;;  %v14181_v31 = vld [vmem:[#allocation30_spill] sm:$0xff] }
 0x621   :  { %v10408_v20 = vpop.eup %10407  ;;  %v8286_v36 = vunpack.c.l.b16 %v7133_v25  ;;  %v7132_v50 = vpack.c.bf16 %v10406_v40, %v10406_v40  ;;  %v3575_v25 = vsub.f32 %v14181_v31, %v11262_v52 }
 0x622   :  { %v10410_v38 = vpop.eup %10409  ;;  %v8693_v18 = vpack.c.b16 %v8289_v58, %v8288_v3  ;;  %v8287_v61 = vunpack.c.l.b16 %v7134_v12  ;;  %v7131_v14 = vpack.c.bf16 %v10408_v20, %v10408_v20  ;;  %v37_v58 = vadd.s32 768, %v14153_v17 }
 0x623   :  { %1723 = vperm.xlu2 %9745, %v14179_v6   ;;  %v10412_v41 = vpop.eup %10411  ;;  %v8285_v46 = vunpack.c.l.b16 %v7132_v50  ;;  %v7129_v44 = vpack.c.bf16 %v10410_v38, %v10410_v38  ;;  %v38_v12 = vadd.s32 896, %v14153_v17  ;;  %v4087_v40 = vmul.f32 %v3575_v25, %v3575_v25 }
 0x624   :  { %1717 = vperm.xlu1 %9744, %v14179_v6   ;;  %9269 = vmatpush.bf16.msrb.mxu1 %v8695_v7  ;;  %v8692_v32 = vpack.c.b16 %v8287_v61, %v8286_v36  ;;  %v7130_v8 = vpack.c.bf16 %v10412_v41, %v10412_v41  ;;  %v8284_v51 = vunpack.c.l.b16 %v7131_v14  ;;  %vm70_vm2 = vcmp.ge.s32.totalorder %v37_v58, %v12326_v48 }
 0x625   :  { %v8282_v26 = vunpack.c.l.b16 %v7129_v44  ;;  %vm71_vm3 = vcmp.ge.s32.totalorder %v38_v12, %v12326_v48  ;;  %vm103_vm4 = vcmp.lt.s32.totalorder %v37_v58, %v12330_v30  ;;  %vm104_vm5 = vcmp.lt.s32.totalorder %v38_v12, %v12330_v30 }
 0x626   :  { %v8691_v35 = vpack.c.b16 %v8285_v46, %v8284_v51  ;;  %v8283_v16 = vunpack.c.l.b16 %v7130_v8  ;;  %v12701_v0 = vpop.permute.xlu2 %1614  ;;  %v12705_v24 = vpop.permute.xlu1 %1608  ;;  %vm135_vm6 = vmand %vm70_vm2, %vm103_vm4  ;;  %v14182_v46 = vld [vmem:[#allocation99_spill] sm:$0xff] }
 0x627   :  { %vm136_vm7 = vmand %vm71_vm3, %vm104_vm5  ;;  %v3570_v44 = vsub.f32 %v14182_v46, %v11262_v52 }
 0x628   :  { %9270 = vmatpush.bf16.msrb.mxu1 %v8694_v63  ;;  %v8690_v60 = vpack.c.b16 %v8283_v16, %v8282_v26  ;;  %v168_v36 = vsel %vm136_vm7, 1.0, %v14166_v59 }
 0x629   :  { %v4082_v25 = vmul.f32 %v3570_v44, %v3570_v44 }
 0x62b   :  { %9747 = vset.pattern.permute.xlu2 %v11067_v2 }
 0x62c   :  { %9746 = vset.pattern.permute.xlu1 %v14083_v5  ;;  %9271 = vmatpush.bf16.msrb.mxu1 %v8693_v18  ;;  %v4599_v18 = vmul.f32 -20000.0, %v4087_v40 }
 0x62e   :  { %v1633_v33 = vpop.permute.xlu2 %1632  ;;  %v5111_v51 = vpack.c.bf16 %v4599_v18, %v4599_v18  ;;  %v4594_v18 = vmul.f32 -20000.0, %v4082_v25 }
 0x630   :  { %9272 = vmatpush.bf16.msrb.mxu1 %v8692_v32 }
 0x633   :  { %1735 = vperm.xlu2 %9747, %v14179_v6  }
 0x634   :  { %1729 = vperm.xlu1 %9746, %v14179_v6   ;;  %9273 = vmatpush.bf16.msrb.mxu1 %v8691_v35 }
 0x636   :  { %v1627_v62 = vpop.permute.xlu1 %1626  ;;  %v1645_v7 = vpop.permute.xlu2 %1644 }
 0x637   :  { %v3569_v35 = vsub.f32 %v1645_v7, %v11262_v52  ;;  %v14184_v7 = vld [vmem:[#allocation31_spill] sm:$0xff] }
 0x638   :  { %9274 = vmatpush.bf16.msrb.mxu1 %v8690_v60 }
 0x63b   :  { %9749 = vset.pattern.permute.xlu2 %v14148_v54 }
 0x63c   :  { %9748 = vset.pattern.permute.xlu1 %v14159_v37 }
 0x63e   :  { %v1663_v53 = vpop.permute.xlu2 %1662 }
 0x63f   :  { %v3572_v61 = vsub.f32 %v1663_v53, %v11262_v52 }
 0x641   :  { %v4084_v26 = vmul.f32 %v3572_v61, %v3572_v61 }
 0x643   :  { %1753 = vperm.xlu2 %9749, %v14179_v6   ;;  %v4596_v58 = vmul.f32 -20000.0, %v4084_v26 }
 0x644   :  { %1747 = vperm.xlu1 %9748, %v14179_v6  }
 0x645   :  { %v5108_v44 = vpack.c.bf16 %v4596_v58, %v4596_v58 }
 0x646   :  { %v1639_v42 = vpop.permute.xlu1 %1638 }
 0x647   :  { %v3568_v40 = vsub.f32 %v1639_v42, %v11262_v52 }
 0x64b   :  { %9751 = vset.pattern.permute.xlu2 %v14151_v29 }
 0x64c   :  { %9750 = vset.pattern.permute.xlu1 %v14147_v56 }
 0x64d   :  { %v1675_v63 = vpop.permute.xlu2 %1674 }
 0x64e   :  { %v3574_v20 = vsub.f32 %v1675_v63, %v11262_v52  ;;  %v5623_v63 = vunpack.c.l.bf16 %v5111_v51  ;;  %v4080_v51 = vmul.f32 %v3568_v40, %v3568_v40 }
 0x650   :  { %v4086_v50 = vmul.f32 %v3574_v20, %v3574_v20  ;;  %v6373_v61 = vmul.f32 1.442695, %v5623_v63 }
 0x652   :  { %v4598_v16 = vmul.f32 -20000.0, %v4086_v50  ;;  %v3567_v50 = vsub.f32 %v1633_v33, %v11262_v52  ;;  %10413 = vpow2.f32 %v6373_v61  ;;  %v3563_v33 = vsub.f32 %v12705_v24, %v11262_v52 }
 0x653   :  { %1765 = vperm.xlu2 %9751, %v14179_v6  }
 0x654   :  { %1759 = vperm.xlu1 %9750, %v14179_v6   ;;  %v5110_v12 = vpack.c.bf16 %v4598_v16, %v4598_v16 }
 0x656   :  { %v1657_v1 = vpop.permute.xlu1 %1656 }
 0x657   :  { %v3571_v14 = vsub.f32 %v1657_v1, %v11262_v52  ;;  %v4081_v1 = vmul.f32 %v3569_v35, %v3569_v35 }
 0x659   :  { %v4083_v53 = vmul.f32 %v3571_v14, %v3571_v14  ;;  %v4593_v46 = vmul.f32 -20000.0, %v4081_v1  ;;  %v5620_v1 = vunpack.c.l.bf16 %v5108_v44  ;;  %v10414_v44 = vpop.eup %10413 }
 0x65b   :  { %9753 = vset.pattern.permute.xlu2 %v14152_v34  ;;  %v4595_v20 = vmul.f32 -20000.0, %v4083_v53  ;;  %v3564_v53 = vsub.f32 %v12701_v0, %v11262_v52  ;;  %v5105_v63 = vpack.c.bf16 %v4593_v46, %v4593_v46  ;;  %v6367_v46 = vmul.f32 1.442695, %v5620_v1 }
 0x65c   :  { %9752 = vset.pattern.permute.xlu1 %v14160_v43 }
 0x65d   :  { %v5107_v35 = vpack.c.bf16 %v4595_v20, %v4595_v20  ;;  %v4076_v24 = vmul.f32 %v3564_v53, %v3564_v53 }
 0x65f   :  { %v5619_v40 = vunpack.c.l.bf16 %v5107_v35 }
 0x663   :  { %1783 = vperm.xlu2 %9753, %v14179_v6  }
 0x664   :  { %1777 = vperm.xlu1 %9752, %v14179_v6   ;;  %v167_v6 = vsel %vm135_vm6, 1.0, %v14166_v59 }
 0x665   :  { %v12730_v41 = vpack.c.bf16 %v168_v36, %v167_v6  ;;  %v3565_v6 = vsub.f32 %v14184_v7, %v11262_v52 }
 0x666   :  { %v1669_v3 = vpop.permute.xlu1 %1668 }
 0x667   :  { %v3573_v38 = vsub.f32 %v1669_v3, %v11262_v52  ;;  %v7472_v8 = vunpack.c.l.b16 %v12730_v41  ;;  %v14183_v3 = vld [vmem:[#allocation37_spill] sm:$0xff]  ;;  %v4077_v16 = vmul.f32 %v3565_v6, %v3565_v6  ;;  %v3562_v6 = vsub.f32 %v12695_v49, %v11262_v52 }
 0x669   :  { %v4085_v32 = vmul.f32 %v3573_v38, %v3573_v38  ;;  %v7504_v60 = vpack.c.b16 %v7472_v8, %v7472_v8  ;;  %v5622_v8 = vunpack.c.l.bf16 %v5110_v12  ;;  %v4592_v12 = vmul.f32 -20000.0, %v4080_v51 }
 0x66a   :  { %v4589_v7 = vmul.f32 -20000.0, %v4077_v16  ;;  %v6365_v51 = vmul.f32 1.442695, %v5619_v40  ;;  %v4074_v16 = vmul.f32 %v3562_v6, %v3562_v6 }
 0x66b   :  { %9755 = vset.pattern.permute.xlu2 %v14094_v11  ;;  %v4597_v31 = vmul.f32 -20000.0, %v4085_v32  ;;  %9184 = vmatmul.bf16.vlgmr.msrb.gmra.mxu2 %v7504_v60  ;;  %v3566_v32 = vsub.f32 %v1627_v62, %v11262_v52  ;;  %v5106_v60 = vpack.c.bf16 %v4594_v18, %v4594_v18  ;;  %v6371_v58 = vmul.f32 1.442695, %v5622_v8 }
 0x66c   :  { %9754 = vset.pattern.permute.xlu1 %v14136_v23  ;;  %v3561_v18 = vsub.f32 %v12699_v57, %v11262_v52  ;;  %v5104_v8 = vpack.c.bf16 %v4592_v12, %v4592_v12  ;;  %v4586_v40 = vmul.f32 -20000.0, %v4074_v16 }
 0x66d   :  { %v5109_v38 = vpack.c.bf16 %v4597_v31, %v4597_v31  ;;  %v4079_v31 = vmul.f32 %v3567_v50, %v3567_v50  ;;  %v4078_v62 = vmul.f32 %v3566_v32, %v3566_v32  ;;  %v5618_v0 = vunpack.c.l.bf16 %v5106_v60 }
 0x66e   :  { %v5617_v32 = vunpack.c.l.bf16 %v5105_v63  ;;  %10415 = vpow2.f32 %v6371_v58  ;;  %v4073_v57 = vmul.f32 %v3561_v18, %v3561_v18  ;;  %v4588_v60 = vmul.f32 -20000.0, %v4076_v24 }
 0x66f   :  { %v5621_v42 = vunpack.c.l.bf16 %v5109_v38  ;;  %v4591_v61 = vmul.f32 -20000.0, %v4079_v31  ;;  %v5616_v31 = vunpack.c.l.bf16 %v5104_v8  ;;  %v7159_v63 = vpack.c.bf16 %v10414_v44, %v10414_v44 }
 0x670   :  { %v5098_v8 = vpack.c.bf16 %v4586_v40, %v4586_v40 }
 0x671   :  { %v6369_v20 = vmul.f32 1.442695, %v5621_v42  ;;  %v5101_v42 = vpack.c.bf16 %v4589_v7, %v4589_v7  ;;  %v5103_v49 = vpack.c.bf16 %v4591_v61, %v4591_v61  ;;  %v6359_v24 = vmul.f32 1.442695, %v5616_v31 }
 0x673   :  { %1796 = vperm.xlu2 %9755, %v14183_v3   ;;  %10417 = vpow2.f32 %v6369_v20  ;;  %v5613_v58 = vunpack.c.l.bf16 %v5101_v42  ;;  %v5615_v12 = vunpack.c.l.bf16 %v5103_v49  ;;  %v4585_v20 = vmul.f32 -20000.0, %v4073_v57 }
 0x674   :  { %1790 = vperm.xlu1 %9754, %v14183_v3  }
 0x675   :  { %v6357_v44 = vmul.f32 1.442695, %v5615_v12 }
 0x676   :  { %v1687_v36 = vpop.permute.xlu1 %1686 }
 0x677   :  { %v3576_v14 = vsub.f32 %v1687_v36, %v11262_v52  ;;  %v4075_v36 = vmul.f32 %v3563_v33, %v3563_v33 }
 0x679   :  { %v4088_v26 = vmul.f32 %v3576_v14, %v3576_v14  ;;  %v4590_v14 = vmul.f32 -20000.0, %v4078_v62  ;;  %v4587_v53 = vmul.f32 -20000.0, %v4075_v36  ;;  %v10416_v62 = vpop.eup %10415  ;;  %v8312_v36 = vunpack.c.l.b16 %v7159_v63 }
 0x67a   :  { %v10418_v1 = vpop.eup %10417  ;;  %v5610_v63 = vunpack.c.l.bf16 %v5098_v8 }
 0x67b   :  { %v4600_v25 = vmul.f32 -20000.0, %v4088_v26  ;;  %9757 = vset.pattern.permute.xlu2 %v14158_v21  ;;  %v6363_v26 = vmul.f32 1.442695, %v5618_v0  ;;  %v5102_v33 = vpack.c.bf16 %v4590_v14, %v4590_v14  ;;  %v5099_v0 = vpack.c.bf16 %v4587_v53, %v4587_v53 }
 0x67c   :  { %9756 = vset.pattern.permute.xlu1 %v11095_v10  ;;  %v7158_v14 = vpack.c.bf16 %v10416_v62, %v10416_v62 }
 0x67d   :  { %v5112_v38 = vpack.c.bf16 %v4600_v25, %v4600_v25  ;;  %v6361_v25 = vmul.f32 1.442695, %v5617_v32  ;;  %v5614_v6 = vunpack.c.l.bf16 %v5102_v33 }
 0x67e   :  { %v8311_v31 = vunpack.c.l.b16 %v7158_v14 }
 0x67f   :  { %v5624_v50 = vunpack.c.l.bf16 %v5112_v38  ;;  %v5100_v38 = vpack.c.bf16 %v4588_v60, %v4588_v60  ;;  %v6355_v16 = vmul.f32 1.442695, %v5614_v6  ;;  %v12759_v60 = vpop.permute.xlu2 %1693 }
 0x681   :  { %v6375_v35 = vmul.f32 1.442695, %v5624_v50  ;;  %v7157_v50 = vpack.c.bf16 %v10418_v1, %v10418_v1 }
 0x683   :  { %10419 = vpow2.f32 %v6375_v35  ;;  %1814 = vperm.xlu2 %9757, %v14183_v3   ;;  %v5612_v35 = vunpack.c.l.bf16 %v5100_v38  ;;  %v8310_v33 = vunpack.c.l.b16 %v7157_v50 }
 0x684   :  { %10421 = vpow2.f32 %v6367_v46  ;;  %1808 = vperm.xlu1 %9756, %v14183_v3   ;;  %v6353_v46 = vmul.f32 1.442695, %v5613_v58 }
 0x685   :  { %10423 = vpow2.f32 %v6365_v51  ;;  %v5097_v51 = vpack.c.bf16 %v4585_v20, %v4585_v20  ;;  %v6351_v1 = vmul.f32 1.442695, %v5612_v35  ;;  %v8704_v20 = vpack.c.b16 %v8311_v31, %v8310_v33 }
 0x686   :  { %10425 = vpow2.f32 %v6363_v26  ;;  %v5611_v26 = vunpack.c.l.bf16 %v5099_v0 }
 0x687   :  { %10427 = vpow2.f32 %v6361_v25  ;;  %v5609_v12 = vunpack.c.l.bf16 %v5097_v51  ;;  %v12763_v14 = vpop.permute.xlu2 %1705 }
 0x688   :  { %10429 = vpow2.f32 %v6359_v24  ;;  %v6349_v40 = vmul.f32 1.442695, %v5611_v26  ;;  %v6347_v24 = vmul.f32 1.442695, %v5610_v63 }
 0x689   :  { %v10420_v7 = vpop.eup %10419  ;;  %10431 = vpow2.f32 %v6357_v44 }
 0x68a   :  { %v10422_v18 = vpop.eup %10421  ;;  %v7160_v61 = vpack.c.bf16 %v10420_v7, %v10420_v7  ;;  %10433 = vpow2.f32 %v6353_v46 }
 0x68b   :  { %v10424_v32 = vpop.eup %10423  ;;  %9759 = vset.pattern.permute.xlu2 %v14083_v5  ;;  %v7156_v49 = vpack.c.bf16 %v10422_v18, %v10422_v18  ;;  %10435 = vpow2.f32 %v6355_v16 }
 0x68c   :  { %v8313_v42 = vunpack.c.l.b16 %v7160_v61  ;;  %9758 = vset.pattern.permute.xlu1 %v11092_v9  ;;  %v10426_v57 = vpop.eup %10425  ;;  %v7155_v25 = vpack.c.bf16 %v10424_v32, %v10424_v32  ;;  %10437 = vpow2.f32 %v6351_v1 }
 0x68d   :  { %v10428_v62 = vpop.eup %10427  ;;  %v7154_v58 = vpack.c.bf16 %v10426_v57, %v10426_v57  ;;  %v8309_v7 = vunpack.c.l.b16 %v7156_v49  ;;  %10439 = vpow2.f32 %v6349_v40 }
 0x68e   :  { %v8705_v53 = vpack.c.b16 %v8313_v42, %v8312_v36  ;;  %v8308_v38 = vunpack.c.l.b16 %v7155_v25  ;;  %v7153_v0 = vpack.c.bf16 %v10428_v62, %v10428_v62  ;;  %v10430_v6 = vpop.eup %10429  ;;  %v6345_v36 = vmul.f32 1.442695, %v5609_v12 }
 0x68f   :  { %v10432_v18 = vpop.eup %10431  ;;  %v8307_v50 = vunpack.c.l.b16 %v7154_v58  ;;  %v7152_v44 = vpack.c.bf16 %v10430_v6, %v10430_v6  ;;  %10441 = vpow2.f32 %v6347_v24  ;;  %v12767_v12 = vpop.permute.xlu2 %1723 }
 0x690   :  { %9280 = vmatpush.bf16.msrb.mxu2 %v8705_v53  ;;  %v10434_v61 = vpop.eup %10433  ;;  %v8703_v32 = vpack.c.b16 %v8309_v7, %v8308_v38  ;;  %v8306_v46 = vunpack.c.l.b16 %v7153_v0  ;;  %v7151_v51 = vpack.c.bf16 %v10432_v18, %v10432_v18  ;;  %10443 = vpow2.f32 %v6345_v36 }
 0x691   :  { %v10436_v8 = vpop.eup %10435  ;;  %v8305_v26 = vunpack.c.l.b16 %v7152_v44  ;;  %v7149_v16 = vpack.c.bf16 %v10434_v61, %v10434_v61  ;;  %v12771_v61 = vpop.permute.xlu1 %1699 }
 0x692   :  { %v10438_v35 = vpop.eup %10437  ;;  %v8702_v42 = vpack.c.b16 %v8307_v50, %v8306_v46  ;;  %v7150_v49 = vpack.c.bf16 %v10436_v8, %v10436_v8  ;;  %v8304_v53 = vunpack.c.l.b16 %v7151_v51 }
 0x693   :  { %1826 = vperm.xlu2 %9759, %v14183_v3   ;;  %v10440_v57 = vpop.eup %10439  ;;  %v7148_v33 = vpack.c.bf16 %v10438_v35, %v10438_v35  ;;  %v8302_v62 = vunpack.c.l.b16 %v7149_v16 }
 0x694   :  { %1820 = vperm.xlu1 %9758, %v14183_v3   ;;  %9281 = vmatpush.bf16.msrb.mxu2 %v8704_v20  ;;  %v8701_v25 = vpack.c.b16 %v8305_v26, %v8304_v53  ;;  %v8303_v63 = vunpack.c.l.b16 %v7150_v49  ;;  %v7147_v1 = vpack.c.bf16 %v10440_v57, %v10440_v57  ;;  %v14185_v26 = vld [vmem:[#allocation41_spill] sm:$0xff] }
 0x695   :  { %v10442_v31 = vpop.eup %10441  ;;  %v8301_v7 = vunpack.c.l.b16 %v7148_v33  ;;  %v3590_v16 = vsub.f32 %v14185_v26, %v11262_v52 }
 0x696   :  { %v10444_v58 = vpop.eup %10443  ;;  %v7146_v40 = vpack.c.bf16 %v10442_v31, %v10442_v31  ;;  %v8700_v20 = vpack.c.b16 %v8303_v63, %v8302_v62  ;;  %v8300_v38 = vunpack.c.l.b16 %v7147_v1  ;;  %v7473_v63 = vunpack.c.h.b16 %v12730_v41  ;;  %v14186_v1 = vld [vmem:[#allocation53_spill] sm:$0xff] }
 0x697   :  { %v7145_v0 = vpack.c.bf16 %v10444_v58, %v10444_v58  ;;  %v1736_v36 = vpop.permute.xlu2 %1735  ;;  %v4102_v53 = vmul.f32 %v3590_v16, %v3590_v16  ;;  %v3585_v58 = vsub.f32 %v14186_v1, %v11262_v52 }
 0x698   :  { %9282 = vmatpush.bf16.msrb.mxu2 %v8703_v32  ;;  %v8699_v6 = vpack.c.b16 %v8301_v7, %v8300_v38  ;;  %v8299_v18 = vunpack.c.l.b16 %v7146_v40  ;;  %v7505_v38 = vpack.c.b16 %v7473_v63, %v7473_v63  ;;  %v3584_v41 = vsub.f32 %v1736_v36, %v11262_v52 }
 0x699   :  { %v8298_v24 = vunpack.c.l.b16 %v7145_v0  ;;  %v1718_v46 = vpop.permute.xlu1 %1717  ;;  %v4614_v40 = vmul.f32 -20000.0, %v4102_v53 }
 0x69a   :  { %9197 = vmatmul.bf16.vlgmr.msrb.gmra.mxu3 %v7505_v38  ;;  %v4096_v36 = vmul.f32 %v3584_v41, %v3584_v41 }
 0x69b   :  { %9761 = vset.pattern.permute.xlu2 %v14159_v37  ;;  %v8698_v50 = vpack.c.b16 %v8299_v18, %v8298_v24  ;;  %v4097_v18 = vmul.f32 %v3585_v58, %v3585_v58 }
 0x69c   :  { %9760 = vset.pattern.permute.xlu1 %v11171_v27  ;;  %9283 = vmatpush.bf16.msrb.mxu2 %v8702_v42 }
 0x69f   :  { %v1754_v32 = vpop.permute.xlu2 %1753 }
 0x6a0   :  { %9284 = vmatpush.bf16.msrb.mxu2 %v8701_v25 }
 0x6a3   :  { %1844 = vperm.xlu2 %9761, %v14183_v3  }
 0x6a4   :  { %1838 = vperm.xlu1 %9760, %v14183_v3   ;;  %9285 = vmatpush.bf16.msrb.mxu2 %v8700_v20  ;;  %v3587_v20 = vsub.f32 %v1754_v32, %v11262_v52 }
 0x6a6   :  { %v1730_v8 = vpop.permute.xlu1 %1729 }
 0x6a8   :  { %9286 = vmatpush.bf16.msrb.mxu2 %v8699_v6 }
 0x6ab   :  { %9763 = vset.pattern.permute.xlu2 %v14147_v56 }
 0x6ac   :  { %9762 = vset.pattern.permute.xlu1 %v14148_v54  ;;  %9287 = vmatpush.bf16.msrb.mxu2 %v8698_v50  ;;  %v5126_v50 = vpack.c.bf16 %v4614_v40, %v4614_v40 }
 0x6ad   :  { %v1766_v44 = vpop.permute.xlu2 %1765 }
 0x6ae   :  { %v3589_v49 = vsub.f32 %v1766_v44, %v11262_v52  ;;  %v4099_v44 = vmul.f32 %v3587_v20, %v3587_v20  ;;  %v14188_v20 = vld [vmem:[#allocation46_spill] sm:$0xff] }
 0x6af   :  { %v3580_v38 = vsub.f32 %v14188_v20, %v11262_v52 }
 0x6b0   :  { %v4101_v31 = vmul.f32 %v3589_v49, %v3589_v49 }
 0x6b2   :  { %v4613_v7 = vmul.f32 -20000.0, %v4101_v31  ;;  %v4611_v31 = vmul.f32 -20000.0, %v4099_v44 }
 0x6b3   :  { %1856 = vperm.xlu2 %9763, %v14183_v3  }
 0x6b4   :  { %1850 = vperm.xlu1 %9762, %v14183_v3   ;;  %v5125_v26 = vpack.c.bf16 %v4613_v7, %v4613_v7 }
 0x6b6   :  { %v1748_v51 = vpop.permute.xlu1 %1747 }
 0x6b7   :  { %v3586_v0 = vsub.f32 %v1748_v51, %v11262_v52  ;;  %v5638_v51 = vunpack.c.l.bf16 %v5126_v50  ;;  %v4608_v50 = vmul.f32 -20000.0, %v4096_v36 }
 0x6b9   :  { %v4098_v32 = vmul.f32 %v3586_v0, %v3586_v0  ;;  %v6403_v0 = vmul.f32 1.442695, %v5638_v51 }
 0x6bb   :  { %9765 = vset.pattern.permute.xlu2 %v14160_v43  ;;  %v4610_v1 = vmul.f32 -20000.0, %v4098_v32 }
 0x6bc   :  { %9764 = vset.pattern.permute.xlu1 %v14072_v45 }
 0x6bd   :  { %v1784_v35 = vpop.permute.xlu2 %1783 }
 0x6be   :  { %v3592_v42 = vsub.f32 %v1784_v35, %v11262_v52  ;;  %v14187_v35 = vld [vmem:[#allocation59_spill] sm:$0xff] }
 0x6c0   :  { %v4104_v57 = vmul.f32 %v3592_v42, %v3592_v42  ;;  %v3583_v42 = vsub.f32 %v1730_v8, %v11262_v52  ;;  %v5637_v8 = vunpack.c.l.bf16 %v5125_v26 }
 0x6c2   :  { %v4616_v62 = vmul.f32 -20000.0, %v4104_v57  ;;  %v4609_v57 = vmul.f32 -20000.0, %v4097_v18  ;;  %v4095_v63 = vmul.f32 %v3583_v42, %v3583_v42  ;;  %v6401_v41 = vmul.f32 1.442695, %v5637_v8 }
 0x6c3   :  { %1874 = vperm.xlu2 %9765, %v14183_v3   ;;  %v5122_v42 = vpack.c.bf16 %v4610_v1, %v4610_v1 }
 0x6c4   :  { %1868 = vperm.xlu1 %9764, %v14183_v3   ;;  %v5128_v24 = vpack.c.bf16 %v4616_v62, %v4616_v62  ;;  %v3581_v62 = vsub.f32 %v1718_v46, %v11262_v52  ;;  %v5121_v7 = vpack.c.bf16 %v4609_v57, %v4609_v57  ;;  %v4607_v44 = vmul.f32 -20000.0, %v4095_v63 }
 0x6c5   :  { %v5634_v36 = vunpack.c.l.bf16 %v5122_v42 }
 0x6c6   :  { %v1760_v33 = vpop.permute.xlu1 %1759  ;;  %v5640_v49 = vunpack.c.l.bf16 %v5128_v24  ;;  %v5123_v24 = vpack.c.bf16 %v4611_v31, %v4611_v31  ;;  %v4093_v46 = vmul.f32 %v3581_v62, %v3581_v62  ;;  %v5119_v62 = vpack.c.bf16 %v4607_v44, %v4607_v44 }
 0x6c7   :  { %v3588_v25 = vsub.f32 %v1760_v33, %v11262_v52  ;;  %v3582_v33 = vsub.f32 %v12767_v12, %v11262_v52  ;;  %v3579_v12 = vsub.f32 %v12763_v14, %v11262_v52 }
 0x6c8   :  { %v5635_v51 = vunpack.c.l.bf16 %v5123_v24  ;;  %v4605_v31 = vmul.f32 -20000.0, %v4093_v46  ;;  %v5631_v24 = vunpack.c.l.bf16 %v5119_v62 }
 0x6c9   :  { %v4100_v6 = vmul.f32 %v3588_v25, %v3588_v25  ;;  %v4091_v57 = vmul.f32 %v3579_v12, %v3579_v12 }
 0x6ca   :  { %v6397_v20 = vmul.f32 1.442695, %v5635_v51 }
 0x6cb   :  { %9767 = vset.pattern.permute.xlu2 %v14136_v23  ;;  %v4612_v16 = vmul.f32 -20000.0, %v4100_v6  ;;  %v4094_v6 = vmul.f32 %v3582_v33, %v3582_v33  ;;  %v3578_v33 = vsub.f32 %v12771_v61, %v11262_v52  ;;  %v4603_v61 = vmul.f32 -20000.0, %v4091_v57 }
 0x6cc   :  { %9766 = vset.pattern.permute.xlu1 %v14152_v34  ;;  %v6389_v57 = vmul.f32 1.442695, %v5631_v24 }
 0x6cd   :  { %v5124_v58 = vpack.c.bf16 %v4612_v16, %v4612_v16  ;;  %v4092_v16 = vmul.f32 %v3580_v38, %v3580_v38  ;;  %v4606_v14 = vmul.f32 -20000.0, %v4094_v6  ;;  %v5117_v6 = vpack.c.bf16 %v4605_v31, %v4605_v31 }
 0x6cf   :  { %v5636_v26 = vunpack.c.l.bf16 %v5124_v58  ;;  %v4604_v1 = vmul.f32 -20000.0, %v4092_v16 }
 0x6d1   :  { %v6399_v63 = vmul.f32 1.442695, %v5636_v26  ;;  %v5116_v44 = vpack.c.bf16 %v4604_v1, %v4604_v1 }
 0x6d3   :  { %1887 = vperm.xlu2 %9767, %v14187_v35   ;;  %v5628_v1 = vunpack.c.l.bf16 %v5116_v44 }
 0x6d4   :  { %1880 = vperm.xlu1 %9766, %v14183_v3   ;;  %v6407_v3 = vmul.f32 1.442695, %v5640_v49  ;;  %v5633_v49 = vunpack.c.l.bf16 %v5121_v7  ;;  %v4090_v7 = vmul.f32 %v3578_v33, %v3578_v33 }
 0x6d6   :  { %v1778_v53 = vpop.permute.xlu1 %1777  ;;  %10445 = vpow2.f32 %v6407_v3  ;;  %v6393_v3 = vmul.f32 1.442695, %v5633_v49  ;;  %v4602_v16 = vmul.f32 -20000.0, %v4090_v7  ;;  %v5629_v49 = vunpack.c.l.bf16 %v5117_v6 }
 0x6d7   :  { %v3591_v25 = vsub.f32 %v1778_v53, %v11262_v52  ;;  %10447 = vpow2.f32 %v6403_v0  ;;  %v5118_v0 = vpack.c.bf16 %v4606_v14, %v4606_v14 }
 0x6d8   :  { %10449 = vpow2.f32 %v6401_v41 }
 0x6d9   :  { %v4103_v40 = vmul.f32 %v3591_v25, %v3591_v25  ;;  %v5120_v25 = vpack.c.bf16 %v4608_v50, %v4608_v50  ;;  %v5630_v42 = vunpack.c.l.bf16 %v5118_v0 }
 0x6db   :  { %v4615_v18 = vmul.f32 -20000.0, %v4103_v40  ;;  %9769 = vset.pattern.permute.xlu2 %v11095_v10  ;;  %v3577_v40 = vsub.f32 %v12759_v60, %v11262_v52  ;;  %v5632_v12 = vunpack.c.l.bf16 %v5120_v25  ;;  %v5115_v60 = vpack.c.bf16 %v4603_v61, %v4603_v61 }
 0x6dc   :  { %9768 = vset.pattern.permute.xlu1 %v11073_v4  ;;  %v10446_v58 = vpop.eup %10445 }
 0x6dd   :  { %v5127_v32 = vpack.c.bf16 %v4615_v18, %v4615_v18  ;;  %v10448_v38 = vpop.eup %10447  ;;  %v6395_v18 = vmul.f32 1.442695, %v5634_v36  ;;  %v7176_v46 = vpack.c.bf16 %v10446_v58, %v10446_v58  ;;  %v4089_v41 = vmul.f32 %v3577_v40, %v3577_v40 }
 0x6de   :  { %v10450_v50 = vpop.eup %10449  ;;  %v6391_v26 = vmul.f32 1.442695, %v5632_v12  ;;  %v7174_v14 = vpack.c.bf16 %v10448_v38, %v10448_v38  ;;  %v5627_v62 = vunpack.c.l.bf16 %v5115_v60  ;;  %v6387_v36 = vmul.f32 1.442695, %v5630_v42 }
 0x6df   :  { %v5639_v53 = vunpack.c.l.bf16 %v5127_v32  ;;  %v8329_v51 = vunpack.c.l.b16 %v7176_v46  ;;  %v7173_v33 = vpack.c.bf16 %v10450_v50, %v10450_v50  ;;  %v4601_v25 = vmul.f32 -20000.0, %v4089_v41 }
 0x6e0   :  { %v5114_v58 = vpack.c.bf16 %v4602_v16, %v4602_v16  ;;  %v6381_v6 = vmul.f32 1.442695, %v5627_v62 }
 0x6e1   :  { %v6405_v8 = vmul.f32 1.442695, %v5639_v53  ;;  %v8326_v7 = vunpack.c.l.b16 %v7173_v33  ;;  %v5113_v12 = vpack.c.bf16 %v4601_v25, %v4601_v25 }
 0x6e2   :  { %v5626_v46 = vunpack.c.l.bf16 %v5114_v58 }
 0x6e3   :  { %10451 = vpow2.f32 %v6405_v8  ;;  %1905 = vperm.xlu2 %9769, %v14187_v35  }
 0x6e4   :  { %1899 = vperm.xlu1 %9768, %v14187_v35   ;;  %10453 = vpow2.f32 %v6399_v63 }
 0x6e5   :  { %10455 = vpow2.f32 %v6397_v20  ;;  %v8327_v20 = vunpack.c.l.b16 %v7174_v14 }
 0x6e6   :  { %10457 = vpow2.f32 %v6393_v3  ;;  %v6385_v3 = vmul.f32 1.442695, %v5629_v49  ;;  %v6379_v49 = vmul.f32 1.442695, %v5626_v46 }
 0x6e7   :  { %10459 = vpow2.f32 %v6395_v18  ;;  %v6383_v18 = vmul.f32 1.442695, %v5628_v1  ;;  %v8712_v41 = vpack.c.b16 %v8327_v20, %v8326_v7 }
 0x6e8   :  { %10461 = vpow2.f32 %v6391_v26 }
 0x6e9   :  { %v10452_v32 = vpop.eup %10451  ;;  %10463 = vpow2.f32 %v6389_v57 }
 0x6ea   :  { %v7175_v53 = vpack.c.bf16 %v10452_v32, %v10452_v32  ;;  %v10454_v31 = vpop.eup %10453  ;;  %10465 = vpow2.f32 %v6387_v36  ;;  %v5625_v32 = vunpack.c.l.bf16 %v5113_v12 }
 0x6eb   :  { %9771 = vset.pattern.permute.xlu2 %v11092_v9  ;;  %v10456_v8 = vpop.eup %10455  ;;  %v7172_v61 = vpack.c.bf16 %v10454_v31, %v10454_v31  ;;  %10467 = vpow2.f32 %v6385_v3 }
 0x6ec   :  { %v8328_v63 = vunpack.c.l.b16 %v7175_v53  ;;  %9770 = vset.pattern.permute.xlu1 %v14158_v21  ;;  %v10458_v40 = vpop.eup %10457  ;;  %v7171_v24 = vpack.c.bf16 %v10456_v8, %v10456_v8  ;;  %10469 = vpow2.f32 %v6381_v6  ;;  %v6377_v62 = vmul.f32 1.442695, %v5625_v32 }
 0x6ed   :  { %v10460_v0 = vpop.eup %10459  ;;  %v8325_v44 = vunpack.c.l.b16 %v7172_v61  ;;  %v7169_v60 = vpack.c.bf16 %v10458_v40, %v10458_v40  ;;  %10471 = vpow2.f32 %v6383_v18 }
 0x6ee   :  { %v8713_v38 = vpack.c.b16 %v8329_v51, %v8328_v63  ;;  %v10462_v50 = vpop.eup %10461  ;;  %v7170_v42 = vpack.c.bf16 %v10460_v0, %v10460_v0  ;;  %v8324_v16 = vunpack.c.l.b16 %v7171_v24  ;;  %10473 = vpow2.f32 %v6379_v49 }
 0x6ef   :  { %v10464_v26 = vpop.eup %10463  ;;  %v7168_v57 = vpack.c.bf16 %v10462_v50, %v10462_v50  ;;  %v8322_v53 = vunpack.c.l.b16 %v7169_v60  ;;  %10475 = vpow2.f32 %v6377_v62 }
 0x6f0   :  { %9293 = vmatpush.bf16.msrb.mxu3 %v8713_v38  ;;  %v10466_v14 = vpop.eup %10465  ;;  %v8711_v51 = vpack.c.b16 %v8325_v44, %v8324_v16  ;;  %v8323_v33 = vunpack.c.l.b16 %v7170_v42  ;;  %v7167_v31 = vpack.c.bf16 %v10464_v26, %v10464_v26  ;;  %v12821_v26 = vpop.permute.xlu2 %1796 }
 0x6f1   :  { %v10468_v25 = vpop.eup %10467  ;;  %v7166_v36 = vpack.c.bf16 %v10466_v14, %v10466_v14  ;;  %v8321_v58 = vunpack.c.l.b16 %v7168_v57  ;;  %v12825_v16 = vpop.permute.xlu1 %1790 }
 0x6f2   :  { %v10470_v63 = vpop.eup %10469  ;;  %v8710_v8 = vpack.c.b16 %v8323_v33, %v8322_v53  ;;  %v8320_v1 = vunpack.c.l.b16 %v7167_v31  ;;  %v7165_v3 = vpack.c.bf16 %v10468_v25, %v10468_v25 }
 0x6f3   :  { %1917 = vperm.xlu2 %9771, %v14187_v35   ;;  %v10472_v40 = vpop.eup %10471  ;;  %v7163_v20 = vpack.c.bf16 %v10470_v63, %v10470_v63  ;;  %v8319_v61 = vunpack.c.l.b16 %v7166_v36  ;;  %v14189_v36 = vld [vmem:[#allocation68_spill] sm:$0xff] }
 0x6f4   :  { %1911 = vperm.xlu1 %9770, %v14187_v35   ;;  %9294 = vmatpush.bf16.msrb.mxu3 %v8712_v41  ;;  %v8709_v38 = vpack.c.b16 %v8321_v58, %v8320_v1  ;;  %v8318_v7 = vunpack.c.l.b16 %v7165_v3  ;;  %v7164_v0 = vpack.c.bf16 %v10472_v40, %v10472_v40  ;;  %v10474_v12 = vpop.eup %10473  ;;  %v3605_v63 = vsub.f32 %v14189_v36, %v11262_v52 }
 0x6f5   :  { %v10476_v6 = vpop.eup %10475  ;;  %v8316_v18 = vunpack.c.l.b16 %v7163_v20  ;;  %v7162_v50 = vpack.c.bf16 %v10474_v12, %v10474_v12  ;;  %v39_v1 = vadd.s32 1024, %v14153_v17  ;;  %v40_v58 = vadd.s32 1152, %v14153_v17 }
 0x6f6   :  { %v8708_v24 = vpack.c.b16 %v8319_v61, %v8318_v7  ;;  %v8317_v46 = vunpack.c.l.b16 %v7164_v0  ;;  %v7161_v41 = vpack.c.bf16 %v10476_v6, %v10476_v6 }
 0x6f7   :  { %v8315_v60 = vunpack.c.l.b16 %v7162_v50  ;;  %vm72_vm8 = vcmp.ge.s32.totalorder %v39_v1, %v12326_v48  ;;  %vm73_vm9 = vcmp.ge.s32.totalorder %v40_v58, %v12326_v48  ;;  %vm105_vm10 = vcmp.lt.s32.totalorder %v39_v1, %v12330_v30  ;;  %v1833_v50 = vpop.permute.xlu0 %1832 }
 0x6f8   :  { %9295 = vmatpush.bf16.msrb.mxu3 %v8711_v51  ;;  %v8707_v44 = vpack.c.b16 %v8317_v46, %v8316_v18  ;;  %v8314_v42 = vunpack.c.l.b16 %v7161_v41  ;;  %v12827_v49 = vpop.permute.xlu2 %1814  ;;  %vm106_vm11 = vcmp.lt.s32.totalorder %v40_v58, %v12330_v30  ;;  %vm137_vm12 = vmand %vm72_vm8, %vm105_vm10 }
 0x6f9   :  { %v12831_v57 = vpop.permute.xlu1 %1808  ;;  %vm138_vm13 = vmand %vm73_vm9, %vm106_vm11  ;;  %v169_v20 = vsel %vm137_vm12, 1.0, %v14166_v59 }
 0x6fa   :  { %v8706_v32 = vpack.c.b16 %v8315_v60, %v8314_v42  ;;  %v170_v7 = vsel %vm138_vm13, 1.0, %v14166_v59 }
 0x6fb   :  { %9773 = vset.pattern.permute.xlu2 %v11171_v27  ;;  %v12858_v0 = vpack.c.bf16 %v170_v7, %v169_v20 }
 0x6fc   :  { %9772 = vset.pattern.permute.xlu1 %v11067_v2  ;;  %9296 = vmatpush.bf16.msrb.mxu3 %v8710_v8 }
 0x6fd   :  { %v7474_v18 = vunpack.c.l.b16 %v12858_v0 }
 0x6ff   :  { %v7506_v60 = vpack.c.b16 %v7474_v18, %v7474_v18 }
 0x700   :  { %9297 = vmatpush.bf16.msrb.mxu3 %v8709_v38  ;;  %v1827_v14 = vpop.permute.xlu2 %1826 }
 0x701   :  { %9210 = vmatmul.bf16.vlgmr.msra.gmra.mxu0 %v7506_v60  ;;  %v3599_v36 = vsub.f32 %v1827_v14, %v11262_v52 }
 0x703   :  { %1935 = vperm.xlu2 %9773, %v14187_v35   ;;  %v4111_v7 = vmul.f32 %v3599_v36, %v3599_v36 }
 0x704   :  { %1929 = vperm.xlu1 %9772, %v14187_v35   ;;  %9298 = vmatpush.bf16.msrb.mxu3 %v8708_v24 }
 0x706   :  { %v12835_v51 = vpop.permute.xlu1 %1820 }
 0x708   :  { %9299 = vmatpush.bf16.msrb.mxu3 %v8707_v44  ;;  %v1845_v53 = vpop.permute.xlu2 %1844 }
 0x709   :  { %v3602_v41 = vsub.f32 %v1845_v53, %v11262_v52 }
 0x70b   :  { %9775 = vset.pattern.permute.xlu2 %v14148_v54  ;;  %v4114_v1 = vmul.f32 %v3602_v41, %v3602_v41 }
 0x70c   :  { %9774 = vset.pattern.permute.xlu1 %v14159_v37  ;;  %9300 = vmatpush.bf16.msrb.mxu3 %v8706_v32 }
 0x710   :  { %v1857_v31 = vpop.permute.xlu2 %1856 }
 0x711   :  { %v3604_v61 = vsub.f32 %v1857_v31, %v11262_v52 }
 0x713   :  { %1947 = vperm.xlu2 %9775, %v14187_v35   ;;  %v4116_v44 = vmul.f32 %v3604_v61, %v3604_v61 }
 0x714   :  { %1941 = vperm.xlu1 %9774, %v14187_v35  }
 0x715   :  { %v4628_v58 = vmul.f32 -20000.0, %v4116_v44 }
 0x716   :  { %v1839_v33 = vpop.permute.xlu1 %1838 }
 0x717   :  { %v3601_v42 = vsub.f32 %v1839_v33, %v11262_v52  ;;  %v14191_v33 = vld [vmem:[#allocation60_spill] sm:$0xff]  ;;  %v5140_v18 = vpack.c.bf16 %v4628_v58, %v4628_v58 }
 0x719   :  { %v4113_v53 = vmul.f32 %v3601_v42, %v3601_v42  ;;  %v5652_v58 = vunpack.c.l.bf16 %v5140_v18 }
 0x71b   :  { %9777 = vset.pattern.permute.xlu2 %v14072_v45 }
 0x71c   :  { %9776 = vset.pattern.permute.xlu1 %v14151_v29 }
 0x71d   :  { %v1875_v62 = vpop.permute.xlu2 %1874 }
 0x71e   :  { %v3607_v3 = vsub.f32 %v1875_v62, %v11262_v52 }
 0x720   :  { %v4119_v38 = vmul.f32 %v3607_v3, %v3607_v3 }
 0x722   :  { %v4631_v46 = vmul.f32 -20000.0, %v4119_v38 }
 0x723   :  { %1965 = vperm.xlu2 %9777, %v14187_v35  }
 0x724   :  { %1959 = vperm.xlu1 %9776, %v14187_v35  }
 0x726   :  { %v1851_v25 = vpop.permute.xlu1 %1850 }
 0x727   :  { %v3603_v12 = vsub.f32 %v1851_v25, %v11262_v52  ;;  %v3600_v25 = vsub.f32 %v1833_v50, %v11262_v52 }
 0x729   :  { %v4115_v32 = vmul.f32 %v3603_v12, %v3603_v12  ;;  %v4112_v61 = vmul.f32 %v3600_v25, %v3600_v25 }
 0x72b   :  { %9779 = vset.pattern.permute.xlu2 %v14152_v34  ;;  %v4627_v3 = vmul.f32 -20000.0, %v4115_v32  ;;  %v3597_v32 = vsub.f32 %v12827_v49, %v11262_v52  ;;  %v3594_v49 = vsub.f32 %v12821_v26, %v11262_v52 }
 0x72c   :  { %9778 = vset.pattern.permute.xlu1 %v14160_v43 }
 0x72d   :  { %v5139_v50 = vpack.c.bf16 %v4627_v3, %v4627_v3 }
 0x72f   :  { %v5651_v3 = vunpack.c.l.bf16 %v5139_v50 }
 0x731   :  { %v6429_v18 = vmul.f32 1.442695, %v5651_v3 }
 0x733   :  { %1977 = vperm.xlu2 %9779, %v14187_v35  }
 0x734   :  { %1971 = vperm.xlu1 %9778, %v14187_v35   ;;  %v4117_v35 = vmul.f32 %v3605_v63, %v3605_v63  ;;  %v5143_v63 = vpack.c.bf16 %v4631_v46, %v4631_v46  ;;  %v4625_v46 = vmul.f32 -20000.0, %v4113_v53 }
 0x736   :  { %v1869_v8 = vpop.permute.xlu1 %1868  ;;  %v4629_v24 = vmul.f32 -20000.0, %v4117_v35  ;;  %v3595_v35 = vsub.f32 %v14191_v33, %v11262_v52  ;;  %v5655_v14 = vunpack.c.l.bf16 %v5143_v63  ;;  %v5137_v53 = vpack.c.bf16 %v4625_v46, %v4625_v46 }
 0x737   :  { %v3606_v40 = vsub.f32 %v1869_v8, %v11262_v52  ;;  %v14190_v8 = vld [vmem:[#allocation81_spill] sm:$0xff] }
 0x738   :  { %v5141_v62 = vpack.c.bf16 %v4629_v24, %v4629_v24  ;;  %v4626_v24 = vmul.f32 -20000.0, %v4114_v1  ;;  %v4107_v60 = vmul.f32 %v3595_v35, %v3595_v35  ;;  %v6437_v36 = vmul.f32 1.442695, %v5655_v14 }
 0x739   :  { %v4118_v6 = vmul.f32 %v3606_v40, %v3606_v40  ;;  %v3593_v35 = vsub.f32 %v12825_v16, %v11262_v52 }
 0x73a   :  { %v5653_v20 = vunpack.c.l.bf16 %v5141_v62  ;;  %v4624_v62 = vmul.f32 -20000.0, %v4112_v61  ;;  %v5138_v1 = vpack.c.bf16 %v4626_v24, %v4626_v24  ;;  %v5649_v24 = vunpack.c.l.bf16 %v5137_v53 }
 0x73b   :  { %9781 = vset.pattern.permute.xlu2 %v11073_v4  ;;  %v4630_v31 = vmul.f32 -20000.0, %v4118_v6  ;;  %v3598_v6 = vsub.f32 %v12835_v51, %v11262_v52  ;;  %v3596_v51 = vsub.f32 %v12831_v57, %v11262_v52  ;;  %v4619_v50 = vmul.f32 -20000.0, %v4107_v60 }
 0x73c   :  { %9780 = vset.pattern.permute.xlu1 %v14094_v11  ;;  %v6433_v42 = vmul.f32 1.442695, %v5653_v20  ;;  %v4109_v20 = vmul.f32 %v3597_v32, %v3597_v32 }
 0x73d   :  { %v5142_v40 = vpack.c.bf16 %v4630_v31, %v4630_v31  ;;  %v4623_v31 = vmul.f32 -20000.0, %v4111_v7  ;;  %v4110_v63 = vmul.f32 %v3598_v6, %v3598_v6  ;;  %v5136_v7 = vpack.c.bf16 %v4624_v62, %v4624_v62 }
 0x73e   :  { %10477 = vpow2.f32 %v6433_v42  ;;  %v4108_v61 = vmul.f32 %v3596_v51, %v3596_v51  ;;  %v6431_v6 = vmul.f32 1.442695, %v5652_v58  ;;  %v4621_v26 = vmul.f32 -20000.0, %v4109_v20 }
 0x73f   :  { %v5654_v41 = vunpack.c.l.bf16 %v5142_v40  ;;  %10479 = vpow2.f32 %v6437_v36  ;;  %v4622_v14 = vmul.f32 -20000.0, %v4110_v63  ;;  %v5648_v32 = vunpack.c.l.bf16 %v5136_v7 }
 0x740   :  { %v4620_v36 = vmul.f32 -20000.0, %v4108_v61  ;;  %v6425_v51 = vmul.f32 1.442695, %v5649_v24  ;;  %v5131_v60 = vpack.c.bf16 %v4619_v50, %v4619_v50  ;;  %v5133_v58 = vpack.c.bf16 %v4621_v26, %v4621_v26 }
 0x741   :  { %v6435_v40 = vmul.f32 1.442695, %v5654_v41  ;;  %v4106_v41 = vmul.f32 %v3594_v49, %v3594_v49  ;;  %v6423_v20 = vmul.f32 1.442695, %v5648_v32  ;;  %v12887_v32 = vpop.permute.xlu2 %1887 }
 0x742   :  { %v5132_v49 = vpack.c.bf16 %v4620_v36, %v4620_v36  ;;  %v5645_v24 = vunpack.c.l.bf16 %v5133_v58 }
 0x743   :  { %1996 = vperm.xlu2 %9781, %v14190_v8   ;;  %10481 = vpow2.f32 %v6435_v40 }
 0x744   :  { %1990 = vperm.xlu1 %9780, %v14190_v8   ;;  %v10478_v16 = vpop.eup %10477 }
 0x745   :  { %v10480_v62 = vpop.eup %10479 }
 0x746   :  { %v1881_v38 = vpop.permute.xlu1 %1880  ;;  %v7191_v40 = vpack.c.bf16 %v10480_v62, %v10480_v62 }
 0x747   :  { %v3608_v12 = vsub.f32 %v1881_v38, %v11262_v52  ;;  %v5135_v38 = vpack.c.bf16 %v4623_v31, %v4623_v31 }
 0x749   :  { %v4120_v44 = vmul.f32 %v3608_v12, %v3608_v12  ;;  %v5650_v12 = vunpack.c.l.bf16 %v5138_v1  ;;  %v5647_v42 = vunpack.c.l.bf16 %v5135_v38  ;;  %v10482_v63 = vpop.eup %10481  ;;  %v4618_v1 = vmul.f32 -20000.0, %v4106_v41 }
 0x74a   :  { %v7190_v61 = vpack.c.bf16 %v10482_v63, %v10482_v63  ;;  %v5644_v41 = vunpack.c.l.bf16 %v5132_v49 }
 0x74b   :  { %v4632_v25 = vmul.f32 -20000.0, %v4120_v44  ;;  %9783 = vset.pattern.permute.xlu2 %v14158_v21  ;;  %v4105_v44 = vmul.f32 %v3593_v35, %v3593_v35  ;;  %v6427_v31 = vmul.f32 1.442695, %v5650_v12  ;;  %v6421_v3 = vmul.f32 1.442695, %v5647_v42 }
 0x74c   :  { %9782 = vset.pattern.permute.xlu1 %v11095_v10  ;;  %v5643_v12 = vunpack.c.l.bf16 %v5131_v60  ;;  %v8343_v62 = vunpack.c.l.b16 %v7190_v61  ;;  %v6415_v58 = vmul.f32 1.442695, %v5644_v41 }
 0x74d   :  { %v5144_v33 = vpack.c.bf16 %v4632_v25, %v4632_v25  ;;  %v5134_v25 = vpack.c.bf16 %v4622_v14, %v4622_v14  ;;  %v4617_v53 = vmul.f32 -20000.0, %v4105_v44 }
 0x74e   :  { %v6413_v63 = vmul.f32 1.442695, %v5643_v12 }
 0x74f   :  { %v5656_v57 = vunpack.c.l.bf16 %v5144_v33  ;;  %v5646_v35 = vunpack.c.l.bf16 %v5134_v25 }
 0x751   :  { %v6439_v46 = vmul.f32 1.442695, %v5656_v57  ;;  %v7189_v57 = vpack.c.bf16 %v10478_v16, %v10478_v16  ;;  %v6419_v44 = vmul.f32 1.442695, %v5646_v35 }
 0x753   :  { %10483 = vpow2.f32 %v6439_v46  ;;  %2008 = vperm.xlu2 %9783, %v14190_v8   ;;  %v8344_v46 = vunpack.c.l.b16 %v7191_v40 }
 0x754   :  { %10485 = vpow2.f32 %v6431_v6  ;;  %2002 = vperm.xlu1 %9782, %v14190_v8   ;;  %v5130_v6 = vpack.c.bf16 %v4618_v1, %v4618_v1 }
 0x755   :  { %10487 = vpow2.f32 %v6429_v18  ;;  %v5129_v18 = vpack.c.bf16 %v4617_v53, %v4617_v53 }
 0x756   :  { %10489 = vpow2.f32 %v6427_v31  ;;  %v8342_v31 = vunpack.c.l.b16 %v7189_v57  ;;  %v5642_v60 = vunpack.c.l.bf16 %v5130_v6 }
 0x757   :  { %10491 = vpow2.f32 %v6425_v51  ;;  %v6417_v51 = vmul.f32 1.442695, %v5645_v24  ;;  %v5641_v1 = vunpack.c.l.bf16 %v5129_v18  ;;  %v12891_v18 = vpop.permute.xlu2 %1905 }
 0x758   :  { %10493 = vpow2.f32 %v6421_v3  ;;  %v8720_v40 = vpack.c.b16 %v8343_v62, %v8342_v31 }
 0x759   :  { %v10484_v33 = vpop.eup %10483  ;;  %10495 = vpow2.f32 %v6423_v20 }
 0x75a   :  { %v10486_v38 = vpop.eup %10485  ;;  %v7192_v7 = vpack.c.bf16 %v10484_v33, %v10484_v33  ;;  %10497 = vpow2.f32 %v6419_v44 }
 0x75b   :  { %v10488_v14 = vpop.eup %10487  ;;  %9785 = vset.pattern.permute.xlu2 %v11067_v2  ;;  %v7188_v26 = vpack.c.bf16 %v10486_v38, %v10486_v38  ;;  %10499 = vpow2.f32 %v6417_v51  ;;  %v6411_v38 = vmul.f32 1.442695, %v5642_v60 }
 0x75c   :  { %v8345_v50 = vunpack.c.l.b16 %v7192_v7  ;;  %9784 = vset.pattern.permute.xlu1 %v14083_v5  ;;  %v10490_v42 = vpop.eup %10489  ;;  %v7187_v36 = vpack.c.bf16 %v10488_v14, %v10488_v14  ;;  %10501 = vpow2.f32 %v6413_v63  ;;  %v6409_v7 = vmul.f32 1.442695, %v5641_v1 }
 0x75d   :  { %v10492_v25 = vpop.eup %10491  ;;  %v7186_v53 = vpack.c.bf16 %v10490_v42, %v10490_v42  ;;  %v8341_v49 = vunpack.c.l.b16 %v7188_v26  ;;  %10503 = vpow2.f32 %v6415_v58 }
 0x75e   :  { %v8721_v16 = vpack.c.b16 %v8345_v50, %v8344_v46  ;;  %v10494_v3 = vpop.eup %10493  ;;  %v8340_v33 = vunpack.c.l.b16 %v7187_v36  ;;  %v7185_v35 = vpack.c.bf16 %v10492_v25, %v10492_v25  ;;  %10505 = vpow2.f32 %v6411_v38 }
 0x75f   :  { %v10496_v20 = vpop.eup %10495  ;;  %v7183_v57 = vpack.c.bf16 %v10494_v3, %v10494_v3  ;;  %v8339_v6 = vunpack.c.l.b16 %v7186_v53  ;;  %10507 = vpow2.f32 %v6409_v7  ;;  %v12895_v1 = vpop.permute.xlu2 %1917 }
 0x760   :  { %9306 = vmatpush.bf16.msra.mxu0 %v8721_v16  ;;  %v7184_v61 = vpack.c.bf16 %v10496_v20, %v10496_v20  ;;  %v8719_v14 = vpack.c.b16 %v8341_v49, %v8340_v33  ;;  %v8338_v12 = vunpack.c.l.b16 %v7185_v35  ;;  %v10498_v24 = vpop.eup %10497  ;;  %v12899_v35 = vpop.permute.xlu1 %1899 }
 0x761   :  { %v10500_v46 = vpop.eup %10499  ;;  %v8336_v26 = vunpack.c.l.b16 %v7183_v57  ;;  %v7182_v42 = vpack.c.bf16 %v10498_v24, %v10498_v24 }
 0x762   :  { %v10502_v50 = vpop.eup %10501  ;;  %v8337_v41 = vunpack.c.l.b16 %v7184_v61  ;;  %v8718_v44 = vpack.c.b16 %v8339_v6, %v8338_v12  ;;  %v7181_v31 = vpack.c.bf16 %v10500_v46, %v10500_v46 }
 0x763   :  { %2026 = vperm.xlu2 %9785, %v14190_v8   ;;  %v10504_v16 = vpop.eup %10503  ;;  %v8335_v25 = vunpack.c.l.b16 %v7182_v42  ;;  %v7179_v51 = vpack.c.bf16 %v10502_v50, %v10502_v50 }
 0x764   :  { %2020 = vperm.xlu1 %9784, %v14190_v8   ;;  %9307 = vmatpush.bf16.msra.mxu0 %v8720_v40  ;;  %v10506_v62 = vpop.eup %10505  ;;  %v8717_v36 = vpack.c.b16 %v8337_v41, %v8336_v26  ;;  %v7180_v63 = vpack.c.bf16 %v10504_v16, %v10504_v16  ;;  %v8334_v58 = vunpack.c.l.b16 %v7181_v31  ;;  %v14192_v31 = vld [vmem:[#allocation89_spill] sm:$0xff] }
 0x765   :  { %v10508_v60 = vpop.eup %10507  ;;  %v7178_v53 = vpack.c.bf16 %v10506_v62, %v10506_v62  ;;  %v8332_v40 = vunpack.c.l.b16 %v7179_v51  ;;  %v3620_v62 = vsub.f32 %v14192_v31, %v11262_v52 }
 0x766   :  { %v8716_v3 = vpack.c.b16 %v8335_v25, %v8334_v58  ;;  %v8333_v33 = vunpack.c.l.b16 %v7180_v63  ;;  %v7177_v49 = vpack.c.bf16 %v10508_v60, %v10508_v60  ;;  %v7475_v63 = vunpack.c.h.b16 %v12858_v0 }
 0x767   :  { %v8331_v7 = vunpack.c.l.b16 %v7178_v53  ;;  %v1936_v57 = vpop.permute.xlu2 %1935  ;;  %v4132_v60 = vmul.f32 %v3620_v62, %v3620_v62  ;;  %v3615_v58 = vsub.f32 %v12238_v28, %v11262_v52 }
 0x768   :  { %9308 = vmatpush.bf16.msra.mxu0 %v8719_v14  ;;  %v8715_v20 = vpack.c.b16 %v8333_v33, %v8332_v40  ;;  %v8330_v38 = vunpack.c.l.b16 %v7177_v49  ;;  %v1912_v14 = vpop.permute.xlu1 %1911  ;;  %v7507_v53 = vpack.c.b16 %v7475_v63, %v7475_v63 }
 0x769   :  { %v3613_v62 = vsub.f32 %v1912_v14, %v11262_v52 }
 0x76a   :  { %v8714_v61 = vpack.c.b16 %v8331_v7, %v8330_v38  ;;  %9223 = vmatmul.bf16.vlgmr.msra.gmra.mxu1 %v7507_v53  ;;  %v4644_v38 = vmul.f32 -20000.0, %v4132_v60  ;;  %v4127_v7 = vmul.f32 %v3615_v58, %v3615_v58 }
 0x76b   :  { %9787 = vset.pattern.permute.xlu2 %v14159_v37  ;;  %v4125_v14 = vmul.f32 %v3613_v62, %v3613_v62 }
 0x76c   :  { %9786 = vset.pattern.permute.xlu1 %v11171_v27  ;;  %9309 = vmatpush.bf16.msra.mxu0 %v8718_v44 }
 0x76f   :  { %v1948_v12 = vpop.permute.xlu2 %1947 }
 0x770   :  { %9310 = vmatpush.bf16.msra.mxu0 %v8717_v36  ;;  %v3619_v36 = vsub.f32 %v1948_v12, %v11262_v52  ;;  %v14193_v12 = vld [vmem:[#allocation110_spill] sm:$0xff] }
 0x773   :  { %2038 = vperm.xlu2 %9787, %v14190_v8  }
 0x774   :  { %2032 = vperm.xlu1 %9786, %v14190_v8   ;;  %9311 = vmatpush.bf16.msra.mxu0 %v8716_v3  ;;  %v4131_v3 = vmul.f32 %v3619_v36, %v3619_v36 }
 0x776   :  { %v1930_v6 = vpop.permute.xlu1 %1929 }
 0x777   :  { %v3616_v0 = vsub.f32 %v1930_v6, %v11262_v52 }
 0x778   :  { %9312 = vmatpush.bf16.msra.mxu0 %v8715_v20 }
 0x779   :  { %v4128_v36 = vmul.f32 %v3616_v0, %v3616_v0 }
 0x77b   :  { %9789 = vset.pattern.permute.xlu2 %v14151_v29 }
 0x77c   :  { %9788 = vset.pattern.permute.xlu1 %v14147_v56  ;;  %9313 = vmatpush.bf16.msra.mxu0 %v8714_v61  ;;  %v3617_v61 = vsub.f32 %v1936_v57, %v11262_v52 }
 0x77d   :  { %v1966_v24 = vpop.permute.xlu2 %1965 }
 0x77e   :  { %v3622_v26 = vsub.f32 %v1966_v24, %v11262_v52  ;;  %v4643_v24 = vmul.f32 -20000.0, %v4131_v3  ;;  %v4129_v31 = vmul.f32 %v3617_v61, %v3617_v61  ;;  %v3612_v3 = vsub.f32 %v12891_v18, %v11262_v52  ;;  %v14194_v18 = vld [vmem:[#allocation82_spill] sm:$0xff] }
 0x780   :  { %v4134_v25 = vmul.f32 %v3622_v26, %v3622_v26  ;;  %v5156_v26 = vpack.c.bf16 %v4644_v38, %v4644_v38  ;;  %v5155_v6 = vpack.c.bf16 %v4643_v24, %v4643_v24 }
 0x782   :  { %v4646_v40 = vmul.f32 -20000.0, %v4134_v25  ;;  %v5668_v58 = vunpack.c.l.bf16 %v5156_v26  ;;  %v5667_v38 = vunpack.c.l.bf16 %v5155_v6 }
 0x783   :  { %2056 = vperm.xlu2 %9789, %v14190_v8  }
 0x784   :  { %2050 = vperm.xlu1 %9788, %v14190_v8  }
 0x786   :  { %v1942_v46 = vpop.permute.xlu1 %1941 }
 0x787   :  { %v3618_v33 = vsub.f32 %v1942_v46, %v11262_v52  ;;  %v4639_v46 = vmul.f32 -20000.0, %v4127_v7 }
 0x789   :  { %v4130_v28 = vmul.f32 %v3618_v33, %v3618_v33  ;;  %v5151_v53 = vpack.c.bf16 %v4639_v46, %v4639_v46  ;;  %v4641_v33 = vmul.f32 -20000.0, %v4129_v31  ;;  %v4637_v31 = vmul.f32 -20000.0, %v4125_v14 }
 0x78b   :  { %9791 = vset.pattern.permute.xlu2 %v14160_v43  ;;  %v5153_v46 = vpack.c.bf16 %v4641_v33, %v4641_v33 }
 0x78c   :  { %9790 = vset.pattern.permute.xlu1 %v14072_v45 }
 0x78d   :  { %v1978_v50 = vpop.permute.xlu2 %1977 }
 0x78e   :  { %v3624_v41 = vsub.f32 %v1978_v50, %v11262_v52  ;;  %v5158_v50 = vpack.c.bf16 %v4646_v40, %v4646_v40 }
 0x790   :  { %v4136_v16 = vmul.f32 %v3624_v41, %v3624_v41  ;;  %v5670_v25 = vunpack.c.l.bf16 %v5158_v50  ;;  %v3610_v50 = vsub.f32 %v14194_v18, %v11262_v52 }
 0x792   :  { %v6467_v7 = vmul.f32 1.442695, %v5670_v25 }
 0x793   :  { %2068 = vperm.xlu2 %9791, %v14190_v8  }
 0x794   :  { %2062 = vperm.xlu1 %9790, %v14190_v8   ;;  %v4648_v8 = vmul.f32 -20000.0, %v4136_v16  ;;  %v3614_v16 = vsub.f32 %v12895_v1, %v11262_v52  ;;  %v3611_v1 = vsub.f32 %v12899_v35, %v11262_v52  ;;  %v5663_v35 = vunpack.c.l.bf16 %v5151_v53 }
 0x796   :  { %v1960_v44 = vpop.permute.xlu1 %1959  ;;  %v5160_v20 = vpack.c.bf16 %v4648_v8, %v4648_v8  ;;  %v4126_v40 = vmul.f32 %v3614_v16, %v3614_v16  ;;  %v4123_v16 = vmul.f32 %v3611_v1, %v3611_v1 }
 0x797   :  { %v3621_v42 = vsub.f32 %v1960_v44, %v11262_v52 }
 0x798   :  { %v5672_v44 = vunpack.c.l.bf16 %v5160_v20  ;;  %v4640_v20 = vmul.f32 -20000.0, %v4128_v36  ;;  %v4638_v26 = vmul.f32 -20000.0, %v4126_v40  ;;  %v4635_v53 = vmul.f32 -20000.0, %v4123_v16 }
 0x799   :  { %v4133_v51 = vmul.f32 %v3621_v42, %v3621_v42 }
 0x79a   :  { %v6471_v63 = vmul.f32 1.442695, %v5672_v44  ;;  %v4124_v44 = vmul.f32 %v3612_v3, %v3612_v3  ;;  %v5152_v62 = vpack.c.bf16 %v4640_v20, %v4640_v20  ;;  %v5149_v3 = vpack.c.bf16 %v4637_v31, %v4637_v31 }
 0x79b   :  { %9793 = vset.pattern.permute.xlu2 %v14094_v11  ;;  %v4645_v49 = vmul.f32 -20000.0, %v4133_v51  ;;  %v4642_v51 = vmul.f32 -20000.0, %v4130_v28  ;;  %v6463_v28 = vmul.f32 1.442695, %v5668_v58  ;;  %v5150_v58 = vpack.c.bf16 %v4638_v26, %v4638_v26 }
 0x79c   :  { %9792 = vset.pattern.permute.xlu1 %v14136_v23  ;;  %10509 = vpow2.f32 %v6471_v63  ;;  %v5665_v63 = vunpack.c.l.bf16 %v5153_v46  ;;  %v5664_v1 = vunpack.c.l.bf16 %v5152_v62 }
 0x79d   :  { %v5157_v41 = vpack.c.bf16 %v4645_v49, %v4645_v49  ;;  %v5154_v61 = vpack.c.bf16 %v4642_v51, %v4642_v51  ;;  %10511 = vpow2.f32 %v6467_v7  ;;  %v4122_v51 = vmul.f32 %v3610_v50, %v3610_v50 }
 0x79e   :  { %v5147_v50 = vpack.c.bf16 %v4635_v53, %v4635_v53 }
 0x79f   :  { %v5669_v8 = vunpack.c.l.bf16 %v5157_v41  ;;  %v3609_v41 = vsub.f32 %v12887_v32, %v11262_v52  ;;  %v5666_v36 = vunpack.c.l.bf16 %v5154_v61  ;;  %v4634_v20 = vmul.f32 -20000.0, %v4122_v51 }
 0x7a1   :  { %v6465_v0 = vmul.f32 1.442695, %v5669_v8  ;;  %v6453_v8 = vmul.f32 1.442695, %v5663_v35  ;;  %v4121_v32 = vmul.f32 %v3609_v41, %v3609_v41  ;;  %v6459_v40 = vmul.f32 1.442695, %v5666_v36 }
 0x7a2   :  { %v10510_v25 = vpop.eup %10509  ;;  %v6455_v35 = vmul.f32 1.442695, %v5664_v1  ;;  %v5146_v16 = vpack.c.bf16 %v4634_v20, %v4634_v20 }
 0x7a3   :  { %2087 = vperm.xlu2 %9793, %v14193_v12   ;;  %10513 = vpow2.f32 %v6465_v0  ;;  %v10512_v33 = vpop.eup %10511  ;;  %v4633_v61 = vmul.f32 -20000.0, %v4121_v32 }
 0x7a4   :  { %2081 = vperm.xlu1 %9792, %v14193_v12   ;;  %10515 = vpow2.f32 %v6463_v28  ;;  %v5661_v28 = vunpack.c.l.bf16 %v5149_v3 }
 0x7a5   :  { %v5145_v31 = vpack.c.bf16 %v4633_v61, %v4633_v61 }
 0x7a6   :  { %v1972_v42 = vpop.permute.xlu1 %1971 }
 0x7a7   :  { %v3623_v57 = vsub.f32 %v1972_v42, %v11262_v52  ;;  %v5657_v3 = vunpack.c.l.bf16 %v5145_v31 }
 0x7a9   :  { %v4135_v60 = vmul.f32 %v3623_v57, %v3623_v57  ;;  %v6461_v57 = vmul.f32 1.442695, %v5667_v38  ;;  %v10514_v14 = vpop.eup %10513  ;;  %v6457_v38 = vmul.f32 1.442695, %v5665_v63 }
 0x7aa   :  { %v10516_v7 = vpop.eup %10515  ;;  %v7205_v46 = vpack.c.bf16 %v10514_v14, %v10514_v14  ;;  %v12943_v14 = vpop.permute.xlu2 %1996 }
 0x7ab   :  { %v4647_v49 = vmul.f32 -20000.0, %v4135_v60  ;;  %9795 = vset.pattern.permute.xlu2 %v11095_v10  ;;  %v4636_v60 = vmul.f32 -20000.0, %v4124_v44 }
 0x7ac   :  { %9794 = vset.pattern.permute.xlu1 %v11073_v4  ;;  %v8358_v32 = vunpack.c.l.b16 %v7205_v46 }
 0x7ad   :  { %v5159_v24 = vpack.c.bf16 %v4647_v49, %v4647_v49  ;;  %v7208_v49 = vpack.c.bf16 %v10510_v25, %v10510_v25  ;;  %v5148_v0 = vpack.c.bf16 %v4636_v60, %v4636_v60  ;;  %v6449_v25 = vmul.f32 1.442695, %v5661_v28 }
 0x7af   :  { %v5671_v42 = vunpack.c.l.bf16 %v5159_v24  ;;  %v5662_v24 = vunpack.c.l.bf16 %v5150_v58  ;;  %v8361_v44 = vunpack.c.l.b16 %v7208_v49  ;;  %v7204_v58 = vpack.c.bf16 %v10516_v7, %v10516_v7 }
 0x7b1   :  { %v6469_v6 = vmul.f32 1.442695, %v5671_v42  ;;  %v7206_v42 = vpack.c.bf16 %v10512_v33, %v10512_v33  ;;  %v6451_v62 = vmul.f32 1.442695, %v5662_v24  ;;  %v5658_v33 = vunpack.c.l.bf16 %v5146_v16 }
 0x7b2   :  { %v8357_v61 = vunpack.c.l.b16 %v7204_v58  ;;  %v12947_v31 = vpop.permute.xlu2 %2008 }
 0x7b3   :  { %10517 = vpow2.f32 %v6469_v6  ;;  %2099 = vperm.xlu2 %9795, %v14193_v12   ;;  %v5659_v6 = vunpack.c.l.bf16 %v5147_v50  ;;  %v8359_v60 = vunpack.c.l.b16 %v7206_v42  ;;  %v6443_v50 = vmul.f32 1.442695, %v5658_v33 }
 0x7b4   :  { %10519 = vpow2.f32 %v6461_v57  ;;  %2093 = vperm.xlu1 %9794, %v14193_v12   ;;  %v5660_v57 = vunpack.c.l.bf16 %v5148_v0 }
 0x7b5   :  { %10521 = vpow2.f32 %v6453_v8  ;;  %v6445_v49 = vmul.f32 1.442695, %v5659_v6  ;;  %v8728_v20 = vpack.c.b16 %v8359_v60, %v8358_v32 }
 0x7b6   :  { %10523 = vpow2.f32 %v6459_v40  ;;  %v6447_v1 = vmul.f32 1.442695, %v5660_v57 }
 0x7b7   :  { %10525 = vpow2.f32 %v6457_v38 }
 0x7b8   :  { %10527 = vpow2.f32 %v6455_v35 }
 0x7b9   :  { %v10518_v18 = vpop.eup %10517  ;;  %10529 = vpow2.f32 %v6451_v62 }
 0x7ba   :  { %v10520_v41 = vpop.eup %10519  ;;  %v7207_v26 = vpack.c.bf16 %v10518_v18, %v10518_v18  ;;  %10531 = vpow2.f32 %v6449_v25  ;;  %v6441_v18 = vmul.f32 1.442695, %v5657_v3 }
 0x7bb   :  { %9797 = vset.pattern.permute.xlu2 %v14083_v5  ;;  %v7203_v51 = vpack.c.bf16 %v10520_v41, %v10520_v41  ;;  %v10522_v8 = vpop.eup %10521  ;;  %10533 = vpow2.f32 %v6447_v1 }
 0x7bc   :  { %v8360_v36 = vunpack.c.l.b16 %v7207_v26  ;;  %9796 = vset.pattern.permute.xlu1 %v11092_v9  ;;  %v10524_v53 = vpop.eup %10523  ;;  %v7199_v28 = vpack.c.bf16 %v10522_v8, %v10522_v8  ;;  %10535 = vpow2.f32 %v6445_v49 }
 0x7bd   :  { %v10526_v40 = vpop.eup %10525  ;;  %v8356_v38 = vunpack.c.l.b16 %v7203_v51  ;;  %v7202_v0 = vpack.c.bf16 %v10524_v53, %v10524_v53  ;;  %10537 = vpow2.f32 %v6441_v18 }
 0x7be   :  { %v8729_v63 = vpack.c.b16 %v8361_v44, %v8360_v36  ;;  %v10528_v24 = vpop.eup %10527  ;;  %v7201_v7 = vpack.c.bf16 %v10526_v40, %v10526_v40  ;;  %10539 = vpow2.f32 %v6443_v50  ;;  %v8352_v16 = vunpack.c.l.b16 %v7199_v28  ;;  %v14195_v50 = vld [vmem:[#allocation125_spill] sm:$0xff] }
 0x7bf   :  { %v10530_v35 = vpop.eup %10529  ;;  %v8727_v41 = vpack.c.b16 %v8357_v61, %v8356_v38  ;;  %v8355_v44 = vunpack.c.l.b16 %v7202_v0  ;;  %v7200_v26 = vpack.c.bf16 %v10528_v24, %v10528_v24  ;;  %v12952_v38 = vpop.permute.xlu2 %2026  ;;  %v3640_v28 = vsub.f32 %v14195_v50, %v11262_v52 }
 0x7c0   :  { %9319 = vmatpush.bf16.msra.mxu1 %v8729_v63  ;;  %v10532_v46 = vpop.eup %10531  ;;  %v8354_v42 = vunpack.c.l.b16 %v7201_v7  ;;  %v7198_v25 = vpack.c.bf16 %v10530_v35, %v10530_v35  ;;  %v12955_v61 = vpop.permute.xlu1 %1990 }
 0x7c1   :  { %v10534_v57 = vpop.eup %10533  ;;  %v8353_v36 = vunpack.c.l.b16 %v7200_v26  ;;  %v7197_v6 = vpack.c.bf16 %v10532_v46, %v10532_v46 }
 0x7c2   :  { %v8726_v62 = vpack.c.b16 %v8355_v44, %v8354_v42  ;;  %v10536_v51 = vpop.eup %10535  ;;  %v7196_v8 = vpack.c.bf16 %v10534_v57, %v10534_v57  ;;  %v8351_v58 = vunpack.c.l.b16 %v7198_v25  ;;  %v4152_v44 = vmul.f32 %v3640_v28, %v3640_v28 }
 0x7c3   :  { %2117 = vperm.xlu2 %9797, %v14193_v12   ;;  %v10538_v63 = vpop.eup %10537  ;;  %v8725_v32 = vpack.c.b16 %v8353_v36, %v8352_v16  ;;  %v8350_v60 = vunpack.c.l.b16 %v7197_v6  ;;  %v7195_v53 = vpack.c.bf16 %v10536_v51, %v10536_v51 }
 0x7c4   :  { %2111 = vperm.xlu1 %9796, %v14193_v12   ;;  %9320 = vmatpush.bf16.msra.mxu1 %v8728_v20  ;;  %v10540_v3 = vpop.eup %10539  ;;  %v7193_v1 = vpack.c.bf16 %v10538_v63, %v10538_v63  ;;  %v8349_v49 = vunpack.c.l.b16 %v7196_v8  ;;  %v4664_v26 = vmul.f32 -20000.0, %v4152_v44  ;;  %v41_v63 = vadd.s32 1280, %v14153_v17 }
 0x7c5   :  { %v8724_v40 = vpack.c.b16 %v8351_v58, %v8350_v60  ;;  %v8348_v33 = vunpack.c.l.b16 %v7195_v53  ;;  %v7194_v20 = vpack.c.bf16 %v10540_v3, %v10540_v3  ;;  %v14196_v58 = vld [vmem:[#allocation113_spill] sm:$0xff] }
 0x7c6   :  { %v8346_v24 = vunpack.c.l.b16 %v7193_v1  ;;  %v5176_v16 = vpack.c.bf16 %v4664_v26, %v4664_v26  ;;  %vm74_vm14 = vcmp.ge.s32.totalorder %v41_v63, %v12326_v48  ;;  %vm107_vm0 = vcmp.lt.s32.totalorder %v41_v63, %v12330_v30 }
 0x7c7   :  { %v8723_v0 = vpack.c.b16 %v8349_v49, %v8348_v33  ;;  %v8347_v18 = vunpack.c.l.b16 %v7194_v20  ;;  %vm139_vm2 = vmand %vm74_vm14, %vm107_vm0  ;;  %v3635_v53 = vsub.f32 %v14196_v58, %v11262_v52 }
 0x7c8   :  { %9321 = vmatpush.bf16.msra.mxu1 %v8727_v41  ;;  %v12961_v41 = vpop.permute.xlu1 %2002  ;;  %v5688_v57 = vunpack.c.l.bf16 %v5176_v16 }
 0x7c9   :  { %v8722_v7 = vpack.c.b16 %v8347_v18, %v8346_v24 }
 0x7ca   :  { %v6503_v25 = vmul.f32 1.442695, %v5688_v57 }
 0x7cb   :  { %9799 = vset.pattern.permute.xlu2 %v11171_v27 }
 0x7cc   :  { %9798 = vset.pattern.permute.xlu1 %v11067_v2  ;;  %9322 = vmatpush.bf16.msra.mxu1 %v8726_v62  ;;  %10541 = vpow2.f32 %v6503_v25 }
 0x7cd   :  { %v2039_v35 = vpop.permute.xlu2 %2038 }
 0x7ce   :  { %v3634_v26 = vsub.f32 %v2039_v35, %v11262_v52 }
 0x7d0   :  { %9323 = vmatpush.bf16.msra.mxu1 %v8725_v32  ;;  %v42_v32 = vadd.s32 1408, %v14153_v17  ;;  %v4146_v63 = vmul.f32 %v3634_v26, %v3634_v26 }
 0x7d2   :  { %vm75_vm15 = vcmp.ge.s32.totalorder %v42_v32, %v12326_v48  ;;  %vm108_vm1 = vcmp.lt.s32.totalorder %v42_v32, %v12330_v30  ;;  %v10542_v24 = vpop.eup %10541 }
 0x7d3   :  { %2129 = vperm.xlu2 %9799, %v14193_v12   ;;  %vm140_vm3 = vmand %vm75_vm15, %vm108_vm1  ;;  %v7224_v44 = vpack.c.bf16 %v10542_v24, %v10542_v24  ;;  %v4658_v24 = vmul.f32 -20000.0, %v4146_v63  ;;  %v14199_v63 = vld [vmem:[#allocation95_spill] sm:$0xff] }
 0x7d4   :  { %2123 = vperm.xlu1 %9798, %v14193_v12   ;;  %9324 = vmatpush.bf16.msra.mxu1 %v8724_v40  ;;  %v171_v40 = vsel %vm139_vm2, 1.0, %v14166_v59  ;;  %v172_v49 = vsel %vm140_vm3, 1.0, %v14166_v59 }
 0x7d6   :  { %v2021_v42 = vpop.permute.xlu1 %2020 }
 0x7d7   :  { %v3631_v32 = vsub.f32 %v2021_v42, %v11262_v52 }
 0x7d8   :  { %9325 = vmatpush.bf16.msra.mxu1 %v8723_v0  ;;  %v12981_v0 = vpack.c.bf16 %v172_v49, %v171_v40  ;;  %v14198_v49 = vld [vmem:[#allocation20_spill] sm:$0xff] }
 0x7da   :  { %v7476_v50 = vunpack.c.l.b16 %v12981_v0 }
 0x7db   :  { %9801 = vset.pattern.permute.xlu2 %v14147_v56 }
 0x7dc   :  { %9800 = vset.pattern.permute.xlu1 %v14148_v54  ;;  %9326 = vmatpush.bf16.msra.mxu1 %v8722_v7  ;;  %v4147_v7 = vmul.f32 %v3635_v53, %v3635_v53  ;;  %v14197_v53 = vld [vmem:[#allocation111_spill] sm:$0xff] }
 0x7dd   :  { %v2057_v46 = vpop.permute.xlu2 %2056 }
 0x7de   :  { %v3637_v33 = vsub.f32 %v2057_v46, %v11262_v52  ;;  %v7508_v46 = vpack.c.b16 %v7476_v50, %v7476_v50 }
 0x7e0   :  { %v4149_v28 = vmul.f32 %v3637_v33, %v3637_v33  ;;  %9236 = vmatmul.bf16.vlgmr.msra.gmra.mxu2 %v7508_v46 }
 0x7e3   :  { %2147 = vperm.xlu2 %9801, %v14193_v12  }
 0x7e4   :  { %2141 = vperm.xlu1 %9800, %v14193_v12  }
 0x7e6   :  { %v2033_v36 = vpop.permute.xlu1 %2032 }
 0x7e7   :  { %v3633_v16 = vsub.f32 %v2033_v36, %v11262_v52  ;;  %v3629_v36 = vsub.f32 %v12947_v31, %v11262_v52  ;;  %v3628_v31 = vsub.f32 %v12961_v41, %v11262_v52  ;;  %v3626_v41 = vsub.f32 %v12955_v61, %v11262_v52 }
 0x7e9   :  { %v4141_v26 = vmul.f32 %v3629_v36, %v3629_v36 }
 0x7eb   :  { %9803 = vset.pattern.permute.xlu2 %v14072_v45 }
 0x7ec   :  { %9802 = vset.pattern.permute.xlu1 %v14151_v29 }
 0x7ed   :  { %v2069_v62 = vpop.permute.xlu2 %2068 }
 0x7ee   :  { %v3639_v6 = vsub.f32 %v2069_v62, %v11262_v52  ;;  %v4659_v62 = vmul.f32 -20000.0, %v4147_v7 }
 0x7f0   :  { %v4151_v51 = vmul.f32 %v3639_v6, %v3639_v6  ;;  %v4661_v6 = vmul.f32 -20000.0, %v4149_v28 }
 0x7f2   :  { %v4663_v8 = vmul.f32 -20000.0, %v4151_v51  ;;  %v8377_v51 = vunpack.c.l.b16 %v7224_v44  ;;  %v5173_v40 = vpack.c.bf16 %v4661_v6, %v4661_v6 }
 0x7f3   :  { %2159 = vperm.xlu2 %9803, %v14193_v12  }
 0x7f4   :  { %2153 = vperm.xlu1 %9802, %v14193_v12   ;;  %v5175_v60 = vpack.c.bf16 %v4663_v8, %v4663_v8  ;;  %v3632_v8 = vsub.f32 %v12952_v38, %v11262_v52  ;;  %v4143_v38 = vmul.f32 %v3631_v32, %v3631_v32  ;;  %v5685_v46 = vunpack.c.l.bf16 %v5173_v40 }
 0x7f6   :  { %v2051_v3 = vpop.permute.xlu1 %2050  ;;  %v5687_v1 = vunpack.c.l.bf16 %v5175_v60  ;;  %v4145_v60 = vmul.f32 %v3633_v16, %v3633_v16  ;;  %v4655_v6 = vmul.f32 -20000.0, %v4143_v38 }
 0x7f7   :  { %v3636_v18 = vsub.f32 %v2051_v3, %v11262_v52  ;;  %v3630_v3 = vsub.f32 %v14197_v53, %v11262_v52  ;;  %v6497_v53 = vmul.f32 1.442695, %v5685_v46 }
 0x7f8   :  { %v6501_v20 = vmul.f32 1.442695, %v5687_v1  ;;  %v5171_v1 = vpack.c.bf16 %v4659_v62, %v4659_v62  ;;  %v4657_v42 = vmul.f32 -20000.0, %v4145_v60  ;;  %v5170_v62 = vpack.c.bf16 %v4658_v24, %v4658_v24 }
 0x7f9   :  { %v4148_v57 = vmul.f32 %v3636_v18, %v3636_v18  ;;  %v4142_v50 = vmul.f32 %v3630_v3, %v3630_v3 }
 0x7fa   :  { %10543 = vpow2.f32 %v6501_v20  ;;  %v4144_v20 = vmul.f32 %v3632_v8, %v3632_v8  ;;  %v5683_v28 = vunpack.c.l.bf16 %v5171_v1  ;;  %v4140_v1 = vmul.f32 %v3628_v31, %v3628_v31 }
 0x7fb   :  { %9805 = vset.pattern.permute.xlu2 %v14136_v23  ;;  %v4660_v58 = vmul.f32 -20000.0, %v4148_v57  ;;  %v4654_v32 = vmul.f32 -20000.0, %v4142_v50  ;;  %v5682_v40 = vunpack.c.l.bf16 %v5170_v62 }
 0x7fc   :  { %9804 = vset.pattern.permute.xlu1 %v14152_v34  ;;  %v4656_v57 = vmul.f32 -20000.0, %v4144_v20  ;;  %v6493_v60 = vmul.f32 1.442695, %v5683_v28  ;;  %v4138_v28 = vmul.f32 %v3626_v41, %v3626_v41 }
 0x7fd   :  { %v5172_v18 = vpack.c.bf16 %v4660_v58, %v4660_v58  ;;  %v3627_v58 = vsub.f32 %v12943_v14, %v11262_v52  ;;  %v6491_v61 = vmul.f32 1.442695, %v5682_v40 }
 0x7fe   :  { %v5168_v36 = vpack.c.bf16 %v4656_v57, %v4656_v57  ;;  %10545 = vpow2.f32 %v6493_v60 }
 0x7ff   :  { %v4139_v14 = vmul.f32 %v3627_v58, %v3627_v58  ;;  %10547 = vpow2.f32 %v6497_v53 }
 0x800   :  { %v10544_v25 = vpop.eup %10543 }
 0x801   :  { %v7223_v35 = vpack.c.bf16 %v10544_v25, %v10544_v25  ;;  %v5169_v25 = vpack.c.bf16 %v4657_v42, %v4657_v42  ;;  %v4651_v62 = vmul.f32 -20000.0, %v4139_v14 }
 0x803   :  { %v8376_v33 = vunpack.c.l.b16 %v7223_v35  ;;  %2178 = vperm.xlu2 %9805, %v14198_v49   ;;  %v4653_v35 = vmul.f32 -20000.0, %v4141_v26  ;;  %v5681_v20 = vunpack.c.l.bf16 %v5169_v25  ;;  %v5680_v26 = vunpack.c.l.bf16 %v5168_v36 }
 0x804   :  { %2171 = vperm.xlu1 %9804, %v14193_v12   ;;  %v5684_v12 = vunpack.c.l.bf16 %v5172_v18  ;;  %v5166_v18 = vpack.c.bf16 %v4654_v32, %v4654_v32  ;;  %v5163_v53 = vpack.c.bf16 %v4651_v62, %v4651_v62 }
 0x805   :  { %v8737_v7 = vpack.c.b16 %v8377_v51, %v8376_v33  ;;  %v3625_v51 = vsub.f32 %v14199_v63, %v11262_v52  ;;  %v5167_v33 = vpack.c.bf16 %v4655_v6, %v4655_v6  ;;  %v10546_v6 = vpop.eup %10545 }
 0x806   :  { %v2063_v44 = vpop.permute.xlu1 %2062  ;;  %v6495_v24 = vmul.f32 1.442695, %v5684_v12  ;;  %v5678_v25 = vunpack.c.l.bf16 %v5166_v18  ;;  %v10548_v63 = vpop.eup %10547  ;;  %v7219_v40 = vpack.c.bf16 %v10546_v6, %v10546_v6  ;;  %v5675_v14 = vunpack.c.l.bf16 %v5163_v53 }
 0x807   :  { %v3638_v16 = vsub.f32 %v2063_v44, %v11262_v52  ;;  %9332 = vmatpush.bf16.msra.mxu2 %v8737_v7  ;;  %v4137_v42 = vmul.f32 %v3625_v51, %v3625_v51  ;;  %v5165_v7 = vpack.c.bf16 %v4653_v35, %v4653_v35  ;;  %v4652_v44 = vmul.f32 -20000.0, %v4140_v1 }
 0x808   :  { %v5679_v46 = vunpack.c.l.bf16 %v5167_v33  ;;  %10549 = vpow2.f32 %v6495_v24  ;;  %v4650_v51 = vmul.f32 -20000.0, %v4138_v28  ;;  %v7221_v1 = vpack.c.bf16 %v10548_v63, %v10548_v63 }
 0x809   :  { %v4150_v8 = vmul.f32 %v3638_v16, %v3638_v16  ;;  %v6489_v16 = vmul.f32 1.442695, %v5681_v20  ;;  %v4649_v57 = vmul.f32 -20000.0, %v4137_v42  ;;  %v5677_v12 = vunpack.c.l.bf16 %v5165_v7 }
 0x80a   :  { %v5164_v32 = vpack.c.bf16 %v4652_v44, %v4652_v44  ;;  %v6485_v60 = vmul.f32 1.442695, %v5679_v46  ;;  %v5162_v33 = vpack.c.bf16 %v4650_v51, %v4650_v51  ;;  %v8372_v44 = vunpack.c.l.b16 %v7219_v40 }
 0x80b   :  { %v4662_v3 = vmul.f32 -20000.0, %v4150_v8  ;;  %9807 = vset.pattern.permute.xlu2 %v11073_v4  ;;  %v6487_v8 = vmul.f32 1.442695, %v5680_v26  ;;  %v5161_v35 = vpack.c.bf16 %v4649_v57, %v4649_v57  ;;  %v6481_v41 = vmul.f32 1.442695, %v5677_v12 }
 0x80c   :  { %9806 = vset.pattern.permute.xlu1 %v14094_v11  ;;  %v5676_v20 = vunpack.c.l.bf16 %v5164_v32  ;;  %v5674_v26 = vunpack.c.l.bf16 %v5162_v33 }
 0x80d   :  { %v5174_v38 = vpack.c.bf16 %v4662_v3, %v4662_v3  ;;  %v6483_v3 = vmul.f32 1.442695, %v5678_v25  ;;  %v5673_v7 = vunpack.c.l.bf16 %v5161_v35  ;;  %v6477_v25 = vmul.f32 1.442695, %v5675_v14 }
 0x80e   :  { %v10550_v58 = vpop.eup %10549 }
 0x80f   :  { %v5686_v50 = vunpack.c.l.bf16 %v5174_v38  ;;  %v7220_v42 = vpack.c.bf16 %v10550_v58, %v10550_v58  ;;  %v6473_v12 = vmul.f32 1.442695, %v5673_v7 }
 0x811   :  { %v6499_v31 = vmul.f32 1.442695, %v5686_v50  ;;  %v8374_v50 = vunpack.c.l.b16 %v7221_v1 }
 0x813   :  { %10551 = vpow2.f32 %v6499_v31  ;;  %2190 = vperm.xlu2 %9807, %v14198_v49   ;;  %v8373_v31 = vunpack.c.l.b16 %v7220_v42 }
 0x814   :  { %10553 = vpow2.f32 %v6491_v61  ;;  %2184 = vperm.xlu1 %9806, %v14198_v49   ;;  %v6479_v61 = vmul.f32 1.442695, %v5676_v20 }
 0x815   :  { %10555 = vpow2.f32 %v6489_v16  ;;  %v8735_v32 = vpack.c.b16 %v8373_v31, %v8372_v44 }
 0x816   :  { %10557 = vpow2.f32 %v6487_v8  ;;  %v6475_v8 = vmul.f32 1.442695, %v5674_v26 }
 0x817   :  { %10559 = vpow2.f32 %v6485_v60 }
 0x818   :  { %10561 = vpow2.f32 %v6481_v41 }
 0x819   :  { %v10552_v36 = vpop.eup %10551  ;;  %10563 = vpow2.f32 %v6483_v3 }
 0x81a   :  { %v10554_v24 = vpop.eup %10553  ;;  %v7222_v38 = vpack.c.bf16 %v10552_v36, %v10552_v36  ;;  %10565 = vpow2.f32 %v6479_v61 }
 0x81b   :  { %v10556_v18 = vpop.eup %10555  ;;  %9810 = vset.pattern.permute.xlu2 %v11092_v9  ;;  %v7218_v62 = vpack.c.bf16 %v10554_v24, %v10554_v24  ;;  %10567 = vpow2.f32 %v6477_v25  ;;  %v13023_v25 = vpop.permute.xlu1 %2081 }
 0x81c   :  { %9809 = vset.pattern.permute.xlu1 %v14158_v21  ;;  %v8375_v28 = vunpack.c.l.b16 %v7222_v38  ;;  %v10558_v46 = vpop.eup %10557  ;;  %v7217_v57 = vpack.c.bf16 %v10556_v18, %v10556_v18  ;;  %10569 = vpow2.f32 %v6473_v12 }
 0x81d   :  { %v10560_v6 = vpop.eup %10559  ;;  %v7216_v63 = vpack.c.bf16 %v10558_v46, %v10558_v46  ;;  %v8371_v58 = vunpack.c.l.b16 %v7218_v62  ;;  %10571 = vpow2.f32 %v6475_v8 }
 0x81e   :  { %v8736_v16 = vpack.c.b16 %v8375_v28, %v8374_v50  ;;  %v10562_v51 = vpop.eup %10561  ;;  %v8370_v60 = vunpack.c.l.b16 %v7217_v57  ;;  %v7215_v35 = vpack.c.bf16 %v10560_v6, %v10560_v6  ;;  %v13019_v6 = vpop.permute.xlu2 %2087 }
 0x81f   :  { %v10564_v53 = vpop.eup %10563  ;;  %v7213_v3 = vpack.c.bf16 %v10562_v51, %v10562_v51  ;;  %v8369_v36 = vunpack.c.l.b16 %v7216_v63 }
 0x820   :  { %9333 = vmatpush.bf16.msra.mxu2 %v8736_v16  ;;  %v8734_v41 = vpack.c.b16 %v8371_v58, %v8370_v60  ;;  %v8368_v1 = vunpack.c.l.b16 %v7215_v35  ;;  %v7214_v40 = vpack.c.bf16 %v10564_v53, %v10564_v53  ;;  %v10566_v33 = vpop.eup %10565  ;;  %v13035_v60 = vpop.permute.xlu0 %2317 }
 0x821   :  { %v10568_v20 = vpop.eup %10567  ;;  %v8366_v42 = vunpack.c.l.b16 %v7213_v3  ;;  %v7212_v14 = vpack.c.bf16 %v10566_v33, %v10566_v33 }
 0x822   :  { %v10570_v24 = vpop.eup %10569  ;;  %v8733_v38 = vpack.c.b16 %v8369_v36, %v8368_v1  ;;  %v8367_v18 = vunpack.c.l.b16 %v7214_v40  ;;  %v7211_v50 = vpack.c.bf16 %v10568_v20, %v10568_v20 }
 0x823   :  { %2208 = vperm.xlu2 %9810, %v14198_v49   ;;  %v10572_v7 = vpop.eup %10571  ;;  %v8365_v44 = vunpack.c.l.b16 %v7212_v14  ;;  %v7209_v26 = vpack.c.bf16 %v10570_v24, %v10570_v24 }
 0x824   :  { %2202 = vperm.xlu1 %9809, %v14198_v49   ;;  %9334 = vmatpush.bf16.msra.mxu2 %v8735_v32  ;;  %v8732_v28 = vpack.c.b16 %v8367_v18, %v8366_v42  ;;  %v7210_v61 = vpack.c.bf16 %v10572_v7, %v10572_v7  ;;  %v8364_v46 = vunpack.c.l.b16 %v7211_v50  ;;  %v7477_v50 = vunpack.c.h.b16 %v12981_v0 }
 0x825   :  { %v8362_v31 = vunpack.c.l.b16 %v7209_v26 }
 0x826   :  { %v8731_v16 = vpack.c.b16 %v8365_v44, %v8364_v46  ;;  %v8363_v57 = vunpack.c.l.b16 %v7210_v61  ;;  %v13025_v12 = vpop.permute.xlu2 %2099  ;;  %v13029_v8 = vpop.permute.xlu1 %2093  ;;  %v14201_v44 = vld [vmem:[#allocation12_spill] sm:$0xff]  ;;  %v7509_v61 = vpack.c.b16 %v7477_v50, %v7477_v50 }
 0x827   :  { %v3650_v26 = vsub.f32 %v14201_v44, %v11262_v52 }
 0x828   :  { %9335 = vmatpush.bf16.msra.mxu2 %v8734_v41  ;;  %v8730_v62 = vpack.c.b16 %v8363_v57, %v8362_v31  ;;  %v13039_v3 = vpop.permute.xlu0 %2802  ;;  %v14200_v41 = vld [vmem:[#allocation27_spill] sm:$0xff]  ;;  %9249 = vmatmul.bf16.vlgmr.msra.gmra.mxu3 %v7509_v61 }
 0x829   :  { %v3655_v1 = vsub.f32 %v14200_v41, %v11262_v52  ;;  %v4162_v41 = vmul.f32 %v3650_v26, %v3650_v26 }
 0x82b   :  { %9812 = vset.pattern.permute.xlu2 %v11067_v2  ;;  %v4167_v40 = vmul.f32 %v3655_v1, %v3655_v1  ;;  %v14202_v1 = vld [vmem:[#allocation42_spill] sm:$0xff] }
 0x82c   :  { %9811 = vset.pattern.permute.xlu1 %v14083_v5  ;;  %9336 = vmatpush.bf16.msra.mxu2 %v8733_v38 }
 0x82d   :  { %v4679_v38 = vmul.f32 -20000.0, %v4167_v40 }
 0x82e   :  { %v2118_v63 = vpop.permute.xlu2 %2117 }
 0x830   :  { %9337 = vmatpush.bf16.msra.mxu2 %v8732_v28  ;;  %v13047_v42 = vpop.permute.xlu0 %3093  ;;  %v5191_v28 = vpack.c.bf16 %v4679_v38, %v4679_v38  ;;  %v4674_v38 = vmul.f32 -20000.0, %v4162_v41 }
 0x833   :  { %2220 = vperm.xlu2 %9812, %v14198_v49  }
 0x834   :  { %2214 = vperm.xlu1 %9811, %v14198_v49   ;;  %9338 = vmatpush.bf16.msra.mxu2 %v8731_v16 }
 0x836   :  { %v2112_v51 = vpop.permute.xlu1 %2111  ;;  %v2130_v32 = vpop.permute.xlu2 %2129 }
 0x837   :  { %v3649_v46 = vsub.f32 %v2130_v32, %v11262_v52  ;;  %v3646_v50 = vsub.f32 %v2112_v51, %v11262_v52 }
 0x838   :  { %9339 = vmatpush.bf16.msra.mxu2 %v8730_v62 }
 0x839   :  { %v4158_v51 = vmul.f32 %v3646_v50, %v3646_v50 }
 0x83b   :  { %9814 = vset.pattern.permute.xlu2 %v14148_v54 }
 0x83c   :  { %9813 = vset.pattern.permute.xlu1 %v14159_v37 }
 0x83e   :  { %v2148_v35 = vpop.permute.xlu2 %2147 }
 0x83f   :  { %v3652_v18 = vsub.f32 %v2148_v35, %v11262_v52  ;;  %v5703_v35 = vunpack.c.l.bf16 %v5191_v28 }
 0x841   :  { %v4164_v16 = vmul.f32 %v3652_v18, %v3652_v18  ;;  %v6533_v32 = vmul.f32 1.442695, %v5703_v35 }
 0x843   :  { %2238 = vperm.xlu2 %9814, %v14198_v49   ;;  %v4676_v40 = vmul.f32 -20000.0, %v4164_v16  ;;  %10573 = vpow2.f32 %v6533_v32 }
 0x844   :  { %2232 = vperm.xlu1 %9813, %v14198_v49  }
 0x845   :  { %v5188_v44 = vpack.c.bf16 %v4676_v40, %v4676_v40 }
 0x846   :  { %v2124_v58 = vpop.permute.xlu1 %2123 }
 0x849   :  { %v10574_v50 = vpop.eup %10573 }
 0x84b   :  { %9816 = vset.pattern.permute.xlu2 %v14151_v29 }
 0x84c   :  { %9815 = vset.pattern.permute.xlu1 %v14147_v56 }
 0x84d   :  { %v2160_v36 = vpop.permute.xlu2 %2159 }
 0x84e   :  { %v3654_v20 = vsub.f32 %v2160_v36, %v11262_v52  ;;  %v4161_v36 = vmul.f32 %v3649_v46, %v3649_v46 }
 0x850   :  { %v4166_v14 = vmul.f32 %v3654_v20, %v3654_v20  ;;  %v4673_v28 = vmul.f32 -20000.0, %v4161_v36  ;;  %v5700_v36 = vunpack.c.l.bf16 %v5188_v44 }
 0x852   :  { %v4678_v31 = vmul.f32 -20000.0, %v4166_v14 }
 0x853   :  { %2250 = vperm.xlu2 %9816, %v14198_v49  }
 0x854   :  { %2244 = vperm.xlu1 %9815, %v14198_v49   ;;  %v5190_v0 = vpack.c.bf16 %v4678_v31, %v4678_v31  ;;  %v5186_v31 = vpack.c.bf16 %v4674_v38, %v4674_v38 }
 0x856   :  { %v2142_v53 = vpop.permute.xlu1 %2141  ;;  %v5702_v26 = vunpack.c.l.bf16 %v5190_v0  ;;  %v5698_v32 = vunpack.c.l.bf16 %v5186_v31 }
 0x857   :  { %v3651_v7 = vsub.f32 %v2142_v53, %v11262_v52  ;;  %v2106_v53 = vpop.permute.xlu0 %2105 }
 0x858   :  { %v3645_v14 = vsub.f32 %v2106_v53, %v11262_v52  ;;  %v5185_v53 = vpack.c.bf16 %v4673_v28, %v4673_v28  ;;  %v6531_v40 = vmul.f32 1.442695, %v5702_v26  ;;  %v4670_v28 = vmul.f32 -20000.0, %v4158_v51 }
 0x859   :  { %v4163_v57 = vmul.f32 %v3651_v7, %v3651_v7  ;;  %v3647_v7 = vsub.f32 %v2118_v63, %v11262_v52  ;;  %v6527_v26 = vmul.f32 1.442695, %v5700_v36  ;;  %v7239_v36 = vpack.c.bf16 %v10574_v50, %v10574_v50 }
 0x85a   :  { %v4157_v63 = vmul.f32 %v3645_v14, %v3645_v14  ;;  %v5697_v44 = vunpack.c.l.bf16 %v5185_v53  ;;  %10575 = vpow2.f32 %v6531_v40 }
 0x85b   :  { %9818 = vset.pattern.permute.xlu2 %v14152_v34  ;;  %v4675_v20 = vmul.f32 -20000.0, %v4163_v57  ;;  %v3644_v57 = vsub.f32 %v13025_v12, %v11262_v52  ;;  %v4159_v35 = vmul.f32 %v3647_v7, %v3647_v7  ;;  %v3642_v12 = vsub.f32 %v13019_v6, %v11262_v52 }
 0x85c   :  { %9817 = vset.pattern.permute.xlu1 %v14160_v43  ;;  %v4669_v14 = vmul.f32 -20000.0, %v4157_v63  ;;  %v5182_v63 = vpack.c.bf16 %v4670_v28, %v4670_v28  ;;  %v6521_v51 = vmul.f32 1.442695, %v5697_v44 }
 0x85d   :  { %v5187_v46 = vpack.c.bf16 %v4675_v20, %v4675_v20  ;;  %v4156_v38 = vmul.f32 %v3644_v57, %v3644_v57  ;;  %v4671_v7 = vmul.f32 -20000.0, %v4159_v35  ;;  %v4154_v31 = vmul.f32 %v3642_v12, %v3642_v12 }
 0x85f   :  { %v4668_v6 = vmul.f32 -20000.0, %v4156_v38  ;;  %v5694_v38 = vunpack.c.l.bf16 %v5182_v63 }
 0x860   :  { %v10576_v53 = vpop.eup %10575 }
 0x861   :  { %v7238_v44 = vpack.c.bf16 %v10576_v53, %v10576_v53 }
 0x863   :  { %2268 = vperm.xlu2 %9818, %v14198_v49  }
 0x864   :  { %2262 = vperm.xlu1 %9817, %v14198_v49  }
 0x866   :  { %v2154_v33 = vpop.permute.xlu1 %2153 }
 0x867   :  { %v3653_v24 = vsub.f32 %v2154_v33, %v11262_v52  ;;  %v3648_v33 = vsub.f32 %v2124_v58, %v11262_v52 }
 0x869   :  { %v4165_v49 = vmul.f32 %v3653_v24, %v3653_v24  ;;  %v4160_v61 = vmul.f32 %v3648_v33, %v3648_v33  ;;  %v5699_v33 = vunpack.c.l.bf16 %v5187_v46 }
 0x86b   :  { %9820 = vset.pattern.permute.xlu2 %v14094_v11  ;;  %v4677_v62 = vmul.f32 -20000.0, %v4165_v49  ;;  %v4672_v0 = vmul.f32 -20000.0, %v4160_v61  ;;  %v6525_v46 = vmul.f32 1.442695, %v5699_v33 }
 0x86c   :  { %9819 = vset.pattern.permute.xlu1 %v14136_v23 }
 0x86d   :  { %v5189_v24 = vpack.c.bf16 %v4677_v62, %v4677_v62  ;;  %v3643_v62 = vsub.f32 %v13029_v8, %v11262_v52  ;;  %v3641_v8 = vsub.f32 %v13023_v25, %v11262_v52  ;;  %v5184_v61 = vpack.c.bf16 %v4672_v0, %v4672_v0 }
 0x86e   :  { %v4666_v0 = vmul.f32 -20000.0, %v4154_v31 }
 0x86f   :  { %v5701_v16 = vunpack.c.l.bf16 %v5189_v24  ;;  %v4153_v25 = vmul.f32 %v3641_v8, %v3641_v8  ;;  %v5696_v35 = vunpack.c.l.bf16 %v5184_v61 }
 0x870   :  { %v5178_v61 = vpack.c.bf16 %v4666_v0, %v4666_v0 }
 0x871   :  { %v6529_v20 = vmul.f32 1.442695, %v5701_v16 }
 0x873   :  { %2281 = vperm.xlu2 %9820, %v14202_v1   ;;  %10577 = vpow2.f32 %v6529_v20  ;;  %v4665_v20 = vmul.f32 -20000.0, %v4153_v25 }
 0x874   :  { %2275 = vperm.xlu1 %9819, %v14202_v1  }
 0x876   :  { %v2172_v18 = vpop.permute.xlu1 %2171 }
 0x877   :  { %v3656_v49 = vsub.f32 %v2172_v18, %v11262_v52  ;;  %v4155_v18 = vmul.f32 %v3643_v62, %v3643_v62  ;;  %v5181_v62 = vpack.c.bf16 %v4669_v14, %v4669_v14 }
 0x879   :  { %v4168_v58 = vmul.f32 %v3656_v49, %v3656_v49  ;;  %v4667_v57 = vmul.f32 -20000.0, %v4155_v18  ;;  %v10578_v40 = vpop.eup %10577  ;;  %v6519_v18 = vmul.f32 1.442695, %v5696_v35 }
 0x87a   :  { %v7237_v28 = vpack.c.bf16 %v10578_v40, %v10578_v40  ;;  %v5690_v40 = vunpack.c.l.bf16 %v5178_v61 }
 0x87b   :  { %v4680_v41 = vmul.f32 -20000.0, %v4168_v58  ;;  %9822 = vset.pattern.permute.xlu2 %v14158_v21  ;;  %v6523_v58 = vmul.f32 1.442695, %v5698_v32  ;;  %v5693_v32 = vunpack.c.l.bf16 %v5181_v62  ;;  %v5179_v8 = vpack.c.bf16 %v4667_v57, %v4667_v57  ;;  %v13078_v62 = vpop.permute.xlu2 %2178 }
 0x87c   :  { %9821 = vset.pattern.permute.xlu1 %v11095_v10  ;;  %v8390_v35 = vunpack.c.l.b16 %v7237_v28 }
 0x87d   :  { %v5192_v24 = vpack.c.bf16 %v4680_v41, %v4680_v41  ;;  %v5183_v41 = vpack.c.bf16 %v4671_v7, %v4671_v7  ;;  %v8392_v7 = vunpack.c.l.b16 %v7239_v36 }
 0x87f   :  { %v5704_v49 = vunpack.c.l.bf16 %v5192_v24  ;;  %v5695_v33 = vunpack.c.l.bf16 %v5183_v41  ;;  %v5180_v24 = vpack.c.bf16 %v4668_v6, %v4668_v6  ;;  %v5691_v6 = vunpack.c.l.bf16 %v5179_v8 }
 0x880   :  { %v6515_v41 = vmul.f32 1.442695, %v5694_v38 }
 0x881   :  { %v6535_v16 = vmul.f32 1.442695, %v5704_v49  ;;  %v6517_v50 = vmul.f32 1.442695, %v5695_v33 }
 0x883   :  { %10579 = vpow2.f32 %v6535_v16  ;;  %2299 = vperm.xlu2 %9822, %v14202_v1   ;;  %v5692_v16 = vunpack.c.l.bf16 %v5180_v24  ;;  %v6509_v24 = vmul.f32 1.442695, %v5691_v6 }
 0x884   :  { %10581 = vpow2.f32 %v6527_v26  ;;  %2293 = vperm.xlu1 %9821, %v14202_v1  }
 0x885   :  { %10583 = vpow2.f32 %v6525_v46  ;;  %v5177_v46 = vpack.c.bf16 %v4665_v20, %v4665_v20  ;;  %v6511_v0 = vmul.f32 1.442695, %v5692_v16 }
 0x886   :  { %10585 = vpow2.f32 %v6523_v58  ;;  %v6513_v58 = vmul.f32 1.442695, %v5693_v32 }
 0x887   :  { %10587 = vpow2.f32 %v6521_v51  ;;  %v8391_v51 = vunpack.c.l.b16 %v7238_v44  ;;  %v5689_v20 = vunpack.c.l.bf16 %v5177_v46 }
 0x888   :  { %10589 = vpow2.f32 %v6519_v18 }
 0x889   :  { %v10580_v12 = vpop.eup %10579  ;;  %10591 = vpow2.f32 %v6517_v50  ;;  %v8744_v32 = vpack.c.b16 %v8391_v51, %v8390_v35 }
 0x88a   :  { %v10582_v14 = vpop.eup %10581  ;;  %v7240_v49 = vpack.c.bf16 %v10580_v12, %v10580_v12  ;;  %10593 = vpow2.f32 %v6513_v58 }
 0x88b   :  { %v10584_v26 = vpop.eup %10583  ;;  %9824 = vset.pattern.permute.xlu2 %v14083_v5  ;;  %v7236_v25 = vpack.c.bf16 %v10582_v14, %v10582_v14  ;;  %10595 = vpow2.f32 %v6515_v41  ;;  %v6507_v14 = vmul.f32 1.442695, %v5690_v40 }
 0x88c   :  { %v8393_v31 = vunpack.c.l.b16 %v7240_v49  ;;  %9823 = vset.pattern.permute.xlu1 %v11092_v9  ;;  %v10586_v57 = vpop.eup %10585  ;;  %v7235_v53 = vpack.c.bf16 %v10584_v26, %v10584_v26  ;;  %10597 = vpow2.f32 %v6511_v0  ;;  %v6505_v49 = vmul.f32 1.442695, %v5689_v20  ;;  %v13082_v26 = vpop.permute.xlu2 %2190 }
 0x88d   :  { %v10588_v36 = vpop.eup %10587  ;;  %v7234_v33 = vpack.c.bf16 %v10586_v57, %v10586_v57  ;;  %v8389_v8 = vunpack.c.l.b16 %v7236_v25  ;;  %10599 = vpow2.f32 %v6509_v24 }
 0x88e   :  { %v8745_v63 = vpack.c.b16 %v8393_v31, %v8392_v7  ;;  %v8388_v12 = vunpack.c.l.b16 %v7235_v53  ;;  %v7233_v38 = vpack.c.bf16 %v10588_v36, %v10588_v36  ;;  %v10590_v18 = vpop.eup %10589  ;;  %10601 = vpow2.f32 %v6507_v14 }
 0x88f   :  { %v10592_v7 = vpop.eup %10591  ;;  %v8387_v44 = vunpack.c.l.b16 %v7234_v33  ;;  %v7232_v46 = vpack.c.bf16 %v10590_v18, %v10590_v18  ;;  %10603 = vpow2.f32 %v6505_v49 }
 0x890   :  { %9345 = vmatpush.bf16.msra.mxu3 %v8745_v63  ;;  %v10594_v28 = vpop.eup %10593  ;;  %v8743_v61 = vpack.c.b16 %v8389_v8, %v8388_v12  ;;  %v8386_v50 = vunpack.c.l.b16 %v7233_v38  ;;  %v7231_v58 = vpack.c.bf16 %v10592_v7, %v10592_v7 }
 0x891   :  { %v10596_v16 = vpop.eup %10595  ;;  %v7229_v6 = vpack.c.bf16 %v10594_v28, %v10594_v28  ;;  %v8385_v25 = vunpack.c.l.b16 %v7232_v46 }
 0x892   :  { %v10598_v31 = vpop.eup %10597  ;;  %v8742_v41 = vpack.c.b16 %v8387_v44, %v8386_v50  ;;  %v7230_v57 = vpack.c.bf16 %v10596_v16, %v10596_v16  ;;  %v8384_v35 = vunpack.c.l.b16 %v7231_v58  ;;  %v13090_v44 = vpop.permute.xlu1 %2184 }
 0x893   :  { %2311 = vperm.xlu2 %9824, %v14202_v1   ;;  %v10600_v63 = vpop.eup %10599  ;;  %v7228_v51 = vpack.c.bf16 %v10598_v31, %v10598_v31  ;;  %v8382_v36 = vunpack.c.l.b16 %v7229_v6 }
 0x894   :  { %2305 = vperm.xlu1 %9823, %v14202_v1   ;;  %9346 = vmatpush.bf16.msra.mxu3 %v8744_v32  ;;  %v10602_v53 = vpop.eup %10601  ;;  %v8741_v40 = vpack.c.b16 %v8385_v25, %v8384_v35  ;;  %v8383_v0 = vunpack.c.l.b16 %v7230_v57  ;;  %v7227_v33 = vpack.c.bf16 %v10600_v63, %v10600_v63  ;;  %v13086_v24 = vpop.permute.xlu2 %2208  ;;  %v14203_v25 = vld [vmem:[#allocation44_spill] sm:$0xff]  ;;  %v43_v63 = vadd.s32 1536, %v14153_v17 }
 0x895   :  { %v10604_v20 = vpop.eup %10603  ;;  %v7226_v32 = vpack.c.bf16 %v10602_v53, %v10602_v53  ;;  %v8381_v38 = vunpack.c.l.b16 %v7228_v51  ;;  %v3670_v57 = vsub.f32 %v14203_v25, %v11262_v52  ;;  %v44_v35 = vadd.s32 1664, %v14153_v17 }
 0x896   :  { %v8740_v12 = vpack.c.b16 %v8383_v0, %v8382_v36  ;;  %v8380_v8 = vunpack.c.l.b16 %v7227_v33  ;;  %v7225_v18 = vpack.c.bf16 %v10604_v20, %v10604_v20  ;;  %vm76_vm4 = vcmp.ge.s32.totalorder %v43_v63, %v12326_v48 }
 0x897   :  { %v8379_v49 = vunpack.c.l.b16 %v7226_v32  ;;  %vm77_vm5 = vcmp.ge.s32.totalorder %v44_v35, %v12326_v48  ;;  %vm109_vm6 = vcmp.lt.s32.totalorder %v43_v63, %v12330_v30  ;;  %vm110_vm7 = vcmp.lt.s32.totalorder %v44_v35, %v12330_v30 }
 0x898   :  { %9347 = vmatpush.bf16.msra.mxu3 %v8743_v61  ;;  %v8739_v14 = vpack.c.b16 %v8381_v38, %v8380_v8  ;;  %v8378_v7 = vunpack.c.l.b16 %v7225_v18  ;;  %vm141_vm8 = vmand %vm76_vm4, %vm109_vm6  ;;  %v4182_v36 = vmul.f32 %v3670_v57, %v3670_v57  ;;  %v14204_v38 = vld [vmem:[#allocation54_spill] sm:$0xff] }
 0x899   :  { %vm142_vm9 = vmand %vm77_vm5, %vm110_vm7  ;;  %v173_v0 = vsel %vm141_vm8, 1.0, %v14166_v59  ;;  %v3665_v18 = vsub.f32 %v14204_v38, %v11262_v52 }
 0x89a   :  { %v8738_v61 = vpack.c.b16 %v8379_v49, %v8378_v7  ;;  %v2203_v46 = vpop.permute.xlu1 %2202  ;;  %v174_v33 = vsel %vm142_vm9, 1.0, %v14166_v59 }
 0x89b   :  { %9826 = vset.pattern.permute.xlu2 %v14159_v37  ;;  %v13114_v32 = vpack.c.bf16 %v174_v33, %v173_v0  ;;  %v4177_v57 = vmul.f32 %v3665_v18, %v3665_v18 }
 0x89c   :  { %9825 = vset.pattern.permute.xlu1 %v11171_v27  ;;  %9348 = vmatpush.bf16.msra.mxu3 %v8742_v41  ;;  %v2221_v28 = vpop.permute.xlu2 %2220 }
 0x89d   :  { %v7478_v7 = vunpack.c.l.b16 %v13114_v32 }
 0x8a0   :  { %9349 = vmatpush.bf16.msra.mxu3 %v8741_v40 }
 0x8a3   :  { %2329 = vperm.xlu2 %9826, %v14202_v1  }
 0x8a4   :  { %2323 = vperm.xlu1 %9825, %v14202_v1   ;;  %9350 = vmatpush.bf16.msra.mxu3 %v8740_v12  ;;  %v2239_v50 = vpop.permute.xlu2 %2238 }
 0x8a5   :  { %v3667_v49 = vsub.f32 %v2239_v50, %v11262_v52 }
 0x8a6   :  { %v2215_v58 = vpop.permute.xlu1 %2214 }
 0x8a7   :  { %v4179_v35 = vmul.f32 %v3667_v49, %v3667_v49 }
 0x8a8   :  { %9351 = vmatpush.bf16.msra.mxu3 %v8739_v14  ;;  %v4694_v14 = vmul.f32 -20000.0, %v4182_v36  ;;  %v3663_v36 = vsub.f32 %v2215_v58, %v11262_v52 }
 0x8a9   :  { %v4691_v38 = vmul.f32 -20000.0, %v4179_v35 }
 0x8aa   :  { %v5206_v63 = vpack.c.bf16 %v4694_v14, %v4694_v14  ;;  %v3661_v14 = vsub.f32 %v2203_v46, %v11262_v52 }
 0x8ab   :  { %9828 = vset.pattern.permute.xlu2 %v14147_v56  ;;  %v5203_v35 = vpack.c.bf16 %v4691_v38, %v4691_v38 }
 0x8ac   :  { %9827 = vset.pattern.permute.xlu1 %v14148_v54  ;;  %9352 = vmatpush.bf16.msra.mxu3 %v8738_v61  ;;  %v4173_v46 = vmul.f32 %v3661_v14, %v3661_v14 }
 0x8ad   :  { %v2251_v16 = vpop.permute.xlu2 %2250 }
 0x8ae   :  { %v3669_v51 = vsub.f32 %v2251_v16, %v11262_v52  ;;  %v7510_v16 = vpack.c.b16 %v7478_v7, %v7478_v7  ;;  %v4175_v7 = vmul.f32 %v3663_v36, %v3663_v36  ;;  %v4685_v14 = vmul.f32 -20000.0, %v4173_v46 }
 0x8b0   :  { %v4181_v20 = vmul.f32 %v3669_v51, %v3669_v51  ;;  %9262 = vmatmul.bf16.vlgmr.msrb.gmra.mxu0 %v7510_v16  ;;  %v14205_v51 = vld [vmem:[#allocation61_spill] sm:$0xff]  ;;  %v4687_v36 = vmul.f32 -20000.0, %v4175_v7  ;;  %v5197_v46 = vpack.c.bf16 %v4685_v14, %v4685_v14 }
 0x8b2   :  { %v4693_v61 = vmul.f32 -20000.0, %v4181_v20  ;;  %v4689_v20 = vmul.f32 -20000.0, %v4177_v57  ;;  %v5199_v7 = vpack.c.bf16 %v4687_v36, %v4687_v36 }
 0x8b3   :  { %2341 = vperm.xlu2 %9828, %v14202_v1  }
 0x8b4   :  { %2335 = vperm.xlu1 %9827, %v14202_v1  }
 0x8b6   :  { %v2233_v31 = vpop.permute.xlu1 %2232 }
 0x8bb   :  { %9830 = vset.pattern.permute.xlu2 %v14160_v43 }
 0x8bc   :  { %9829 = vset.pattern.permute.xlu1 %v14072_v45 }
 0x8bd   :  { %v2269_v6 = vpop.permute.xlu2 %2268 }
 0x8be   :  { %v3672_v41 = vsub.f32 %v2269_v6, %v11262_v52  ;;  %v3666_v6 = vsub.f32 %v2233_v31, %v11262_v52  ;;  %v5718_v31 = vunpack.c.l.bf16 %v5206_v63 }
 0x8c0   :  { %v4184_v53 = vmul.f32 %v3672_v41, %v3672_v41  ;;  %v4178_v50 = vmul.f32 %v3666_v6, %v3666_v6  ;;  %v14206_v6 = vld [vmem:[#allocation49_spill] sm:$0xff]  ;;  %v6563_v57 = vmul.f32 1.442695, %v5718_v31 }
 0x8c2   :  { %v4696_v8 = vmul.f32 -20000.0, %v4184_v53  ;;  %v3664_v53 = vsub.f32 %v2221_v28, %v11262_v52  ;;  %v4690_v49 = vmul.f32 -20000.0, %v4178_v50 }
 0x8c3   :  { %2359 = vperm.xlu2 %9830, %v14202_v1  }
 0x8c4   :  { %2353 = vperm.xlu1 %9829, %v14202_v1   ;;  %v5208_v25 = vpack.c.bf16 %v4696_v8, %v4696_v8  ;;  %v3662_v8 = vsub.f32 %v13086_v24, %v11262_v52  ;;  %v4176_v28 = vmul.f32 %v3664_v53, %v3664_v53  ;;  %v3659_v24 = vsub.f32 %v13082_v26, %v11262_v52 }
 0x8c5   :  { %v5202_v50 = vpack.c.bf16 %v4690_v49, %v4690_v49 }
 0x8c6   :  { %v2245_v40 = vpop.permute.xlu1 %2244  ;;  %v5720_v33 = vunpack.c.l.bf16 %v5208_v25  ;;  %v5201_v25 = vpack.c.bf16 %v4689_v20, %v4689_v20  ;;  %v4174_v63 = vmul.f32 %v3662_v8, %v3662_v8  ;;  %v4688_v53 = vmul.f32 -20000.0, %v4176_v28 }
 0x8c7   :  { %v3668_v12 = vsub.f32 %v2245_v40, %v11262_v52  ;;  %v5205_v40 = vpack.c.bf16 %v4693_v61, %v4693_v61  ;;  %v5715_v8 = vunpack.c.l.bf16 %v5203_v35 }
 0x8c8   :  { %v5713_v31 = vunpack.c.l.bf16 %v5201_v25  ;;  %v4686_v26 = vmul.f32 -20000.0, %v4174_v63  ;;  %v5200_v28 = vpack.c.bf16 %v4688_v53, %v4688_v53  ;;  %v5711_v53 = vunpack.c.l.bf16 %v5199_v7 }
 0x8c9   :  { %v4180_v41 = vmul.f32 %v3668_v12, %v3668_v12  ;;  %v5717_v58 = vunpack.c.l.bf16 %v5205_v40  ;;  %v6557_v25 = vmul.f32 1.442695, %v5715_v8 }
 0x8ca   :  { %v5198_v63 = vpack.c.bf16 %v4686_v26, %v4686_v26  ;;  %v5712_v35 = vunpack.c.l.bf16 %v5200_v28  ;;  %v6549_v26 = vmul.f32 1.442695, %v5711_v53 }
 0x8cb   :  { %9832 = vset.pattern.permute.xlu2 %v14136_v23  ;;  %v4692_v0 = vmul.f32 -20000.0, %v4180_v41  ;;  %v3660_v41 = vsub.f32 %v14206_v6, %v11262_v52  ;;  %v6561_v40 = vmul.f32 1.442695, %v5717_v58  ;;  %v5714_v58 = vunpack.c.l.bf16 %v5202_v50 }
 0x8cc   :  { %9831 = vset.pattern.permute.xlu1 %v14152_v34 }
 0x8cd   :  { %v5204_v61 = vpack.c.bf16 %v4692_v0, %v4692_v0  ;;  %v4172_v20 = vmul.f32 %v3660_v41, %v3660_v41  ;;  %v3657_v41 = vsub.f32 %v13078_v62, %v11262_v52  ;;  %v6555_v36 = vmul.f32 1.442695, %v5714_v58 }
 0x8cf   :  { %v5716_v0 = vunpack.c.l.bf16 %v5204_v61  ;;  %v4684_v61 = vmul.f32 -20000.0, %v4172_v20  ;;  %v5710_v20 = vunpack.c.l.bf16 %v5198_v63 }
 0x8d1   :  { %v6559_v6 = vmul.f32 1.442695, %v5716_v0  ;;  %v5196_v0 = vpack.c.bf16 %v4684_v61, %v4684_v61  ;;  %v6547_v61 = vmul.f32 1.442695, %v5710_v20 }
 0x8d3   :  { %2372 = vperm.xlu2 %9832, %v14205_v51  }
 0x8d4   :  { %2365 = vperm.xlu1 %9831, %v14202_v1   ;;  %v6567_v1 = vmul.f32 1.442695, %v5720_v33 }
 0x8d6   :  { %v2263_v12 = vpop.permute.xlu1 %2262  ;;  %10605 = vpow2.f32 %v6567_v1 }
 0x8d7   :  { %v3671_v18 = vsub.f32 %v2263_v12, %v11262_v52  ;;  %10607 = vpow2.f32 %v6563_v57 }
 0x8d8   :  { %10609 = vpow2.f32 %v6561_v40 }
 0x8d9   :  { %v4183_v16 = vmul.f32 %v3671_v18, %v3671_v18  ;;  %v4171_v18 = vmul.f32 %v3659_v24, %v3659_v24 }
 0x8db   :  { %v4695_v12 = vmul.f32 -20000.0, %v4183_v16  ;;  %9834 = vset.pattern.permute.xlu2 %v11095_v10  ;;  %v3658_v16 = vsub.f32 %v13090_v44, %v11262_v52  ;;  %v4683_v44 = vmul.f32 -20000.0, %v4171_v18  ;;  %v5709_v18 = vunpack.c.l.bf16 %v5197_v46 }
 0x8dc   :  { %9833 = vset.pattern.permute.xlu1 %v11073_v4  ;;  %v10606_v1 = vpop.eup %10605 }
 0x8dd   :  { %v5207_v33 = vpack.c.bf16 %v4695_v12, %v4695_v12  ;;  %v6553_v12 = vmul.f32 1.442695, %v5713_v31  ;;  %v10608_v57 = vpop.eup %10607  ;;  %v4170_v24 = vmul.f32 %v3658_v16, %v3658_v16  ;;  %v7256_v40 = vpack.c.bf16 %v10606_v1, %v10606_v1 }
 0x8de   :  { %v10610_v50 = vpop.eup %10609  ;;  %v5195_v62 = vpack.c.bf16 %v4683_v44, %v4683_v44  ;;  %v6551_v31 = vmul.f32 1.442695, %v5712_v35  ;;  %v7254_v16 = vpack.c.bf16 %v10608_v57, %v10608_v57 }
 0x8df   :  { %v5719_v38 = vunpack.c.l.bf16 %v5207_v33  ;;  %v4169_v33 = vmul.f32 %v3657_v41, %v3657_v41  ;;  %v8409_v28 = vunpack.c.l.b16 %v7256_v40  ;;  %v7253_v7 = vpack.c.bf16 %v10610_v50, %v10610_v50 }
 0x8e0   :  { %v5708_v41 = vunpack.c.l.bf16 %v5196_v0  ;;  %v8407_v57 = vunpack.c.l.b16 %v7254_v16 }
 0x8e1   :  { %v6565_v49 = vmul.f32 1.442695, %v5719_v38  ;;  %v4682_v38 = vmul.f32 -20000.0, %v4170_v24  ;;  %v6545_v24 = vmul.f32 1.442695, %v5709_v18  ;;  %v8406_v35 = vunpack.c.l.b16 %v7253_v7 }
 0x8e3   :  { %10611 = vpow2.f32 %v6565_v49  ;;  %2390 = vperm.xlu2 %9834, %v14205_v51   ;;  %v5707_v49 = vunpack.c.l.bf16 %v5195_v62 }
 0x8e4   :  { %2384 = vperm.xlu1 %9833, %v14205_v51   ;;  %10613 = vpow2.f32 %v6559_v6  ;;  %v4681_v6 = vmul.f32 -20000.0, %v4169_v33  ;;  %v6543_v33 = vmul.f32 1.442695, %v5708_v41 }
 0x8e5   :  { %10615 = vpow2.f32 %v6557_v25  ;;  %v5194_v25 = vpack.c.bf16 %v4682_v38, %v4682_v38  ;;  %v6541_v40 = vmul.f32 1.442695, %v5707_v49 }
 0x8e6   :  { %10617 = vpow2.f32 %v6553_v12 }
 0x8e7   :  { %10619 = vpow2.f32 %v6555_v36  ;;  %v5193_v36 = vpack.c.bf16 %v4681_v6, %v4681_v6  ;;  %v5706_v62 = vunpack.c.l.bf16 %v5194_v25 }
 0x8e8   :  { %10621 = vpow2.f32 %v6551_v31  ;;  %v8752_v31 = vpack.c.b16 %v8407_v57, %v8406_v35 }
 0x8e9   :  { %v10612_v8 = vpop.eup %10611  ;;  %10623 = vpow2.f32 %v6549_v26  ;;  %v5705_v26 = vunpack.c.l.bf16 %v5193_v36 }
 0x8ea   :  { %v7255_v14 = vpack.c.bf16 %v10612_v8, %v10612_v8  ;;  %v10614_v58 = vpop.eup %10613  ;;  %10625 = vpow2.f32 %v6547_v61 }
 0x8eb   :  { %9836 = vset.pattern.permute.xlu2 %v11092_v9  ;;  %v10616_v12 = vpop.eup %10615  ;;  %v7252_v46 = vpack.c.bf16 %v10614_v58, %v10614_v58  ;;  %10627 = vpow2.f32 %v6545_v24 }
 0x8ec   :  { %v8408_v1 = vunpack.c.l.b16 %v7255_v14  ;;  %9835 = vset.pattern.permute.xlu1 %v14158_v21  ;;  %v10618_v44 = vpop.eup %10617  ;;  %v7251_v50 = vpack.c.bf16 %v10616_v12, %v10616_v12  ;;  %10629 = vpow2.f32 %v6541_v40  ;;  %v6537_v12 = vmul.f32 1.442695, %v5705_v26 }
 0x8ed   :  { %v10620_v53 = vpop.eup %10619  ;;  %v8405_v0 = vunpack.c.l.b16 %v7252_v46  ;;  %v7249_v8 = vpack.c.bf16 %v10618_v44, %v10618_v44  ;;  %10631 = vpow2.f32 %v6543_v33 }
 0x8ee   :  { %v8753_v63 = vpack.c.b16 %v8409_v28, %v8408_v1  ;;  %v10622_v20 = vpop.eup %10621  ;;  %v7250_v38 = vpack.c.bf16 %v10620_v53, %v10620_v53  ;;  %v8404_v16 = vunpack.c.l.b16 %v7251_v50  ;;  %v6539_v28 = vmul.f32 1.442695, %v5706_v62 }
 0x8ef   :  { %v10624_v18 = vpop.eup %10623  ;;  %v7248_v14 = vpack.c.bf16 %v10622_v20, %v10622_v20  ;;  %v8402_v6 = vunpack.c.l.b16 %v7249_v8 }
 0x8f0   :  { %9358 = vmatpush.bf16.msrb.mxu0 %v8753_v63  ;;  %v10626_v7 = vpop.eup %10625  ;;  %v8751_v58 = vpack.c.b16 %v8405_v0, %v8404_v16  ;;  %v8403_v49 = vunpack.c.l.b16 %v7250_v38  ;;  %v7247_v61 = vpack.c.bf16 %v10624_v18, %v10624_v18  ;;  %10633 = vpow2.f32 %v6539_v28  ;;  %v13150_v28 = vpop.permute.xlu2 %2281 }
 0x8f1   :  { %v10628_v1 = vpop.eup %10627  ;;  %v7246_v41 = vpack.c.bf16 %v10626_v7, %v10626_v7  ;;  %v8401_v57 = vunpack.c.l.b16 %v7248_v14  ;;  %10635 = vpow2.f32 %v6537_v12  ;;  %v13154_v7 = vpop.permute.xlu1 %2275 }
 0x8f2   :  { %v10630_v25 = vpop.eup %10629  ;;  %v8750_v24 = vpack.c.b16 %v8403_v49, %v8402_v6  ;;  %v8400_v44 = vunpack.c.l.b16 %v7247_v61  ;;  %v7245_v63 = vpack.c.bf16 %v10628_v1, %v10628_v1 }
 0x8f3   :  { %2402 = vperm.xlu2 %9836, %v14205_v51   ;;  %v10632_v35 = vpop.eup %10631  ;;  %v7243_v46 = vpack.c.bf16 %v10630_v25, %v10630_v25  ;;  %v8399_v40 = vunpack.c.l.b16 %v7246_v41 }
 0x8f4   :  { %2396 = vperm.xlu1 %9835, %v14205_v51   ;;  %9359 = vmatpush.bf16.msrb.mxu0 %v8752_v31  ;;  %v8749_v53 = vpack.c.b16 %v8401_v57, %v8400_v44  ;;  %v8398_v36 = vunpack.c.l.b16 %v7245_v63  ;;  %v7244_v50 = vpack.c.bf16 %v10632_v35, %v10632_v35  ;;  %v14207_v44 = vld [vmem:[#allocation71_spill] sm:$0xff] }
 0x8f5   :  { %v8396_v31 = vunpack.c.l.b16 %v7243_v46  ;;  %v3685_v57 = vsub.f32 %v14207_v44, %v11262_v52 }
 0x8f6   :  { %v10634_v33 = vpop.eup %10633  ;;  %v8748_v20 = vpack.c.b16 %v8399_v40, %v8398_v36  ;;  %v8397_v0 = vunpack.c.l.b16 %v7244_v50 }
 0x8f7   :  { %v10636_v62 = vpop.eup %10635  ;;  %v7242_v8 = vpack.c.bf16 %v10634_v33, %v10634_v33  ;;  %v7479_v33 = vunpack.c.h.b16 %v13114_v32 }
 0x8f8   :  { %9360 = vmatpush.bf16.msrb.mxu0 %v8751_v58  ;;  %v7241_v38 = vpack.c.bf16 %v10636_v62, %v10636_v62  ;;  %v8747_v18 = vpack.c.b16 %v8397_v0, %v8396_v31  ;;  %v13156_v58 = vpop.permute.xlu2 %2299 }
 0x8f9   :  { %v8395_v26 = vunpack.c.l.b16 %v7242_v8  ;;  %v13160_v6 = vpop.permute.xlu1 %2293  ;;  %v7511_v31 = vpack.c.b16 %v7479_v33, %v7479_v33 }
 0x8fa   :  { %v8394_v16 = vunpack.c.l.b16 %v7241_v38 }
 0x8fb   :  { %9838 = vset.pattern.permute.xlu2 %v11171_v27  ;;  %9275 = vmatmul.bf16.vlgmr.msrb.gmra.mxu1 %v7511_v31 }
 0x8fc   :  { %9837 = vset.pattern.permute.xlu1 %v11067_v2  ;;  %9361 = vmatpush.bf16.msrb.mxu0 %v8750_v24  ;;  %v8746_v14 = vpack.c.b16 %v8395_v26, %v8394_v16 }
 0x900   :  { %9362 = vmatpush.bf16.msrb.mxu0 %v8749_v53  ;;  %v2312_v49 = vpop.permute.xlu2 %2311  ;;  %v4197_v53 = vmul.f32 %v3685_v57, %v3685_v57 }
 0x902   :  { %v4709_v62 = vmul.f32 -20000.0, %v4197_v53  ;;  %v14209_v53 = vld [vmem:[#allocation62_spill] sm:$0xff] }
 0x903   :  { %2420 = vperm.xlu2 %9838, %v14205_v51  }
 0x904   :  { %2414 = vperm.xlu1 %9837, %v14205_v51   ;;  %9363 = vmatpush.bf16.msrb.mxu0 %v8748_v20  ;;  %v5221_v16 = vpack.c.bf16 %v4709_v62, %v4709_v62 }
 0x906   :  { %v2306_v61 = vpop.permute.xlu1 %2305 }
 0x908   :  { %9364 = vmatpush.bf16.msrb.mxu0 %v8747_v18  ;;  %v2330_v1 = vpop.permute.xlu2 %2329 }
 0x909   :  { %v3682_v0 = vsub.f32 %v2330_v1, %v11262_v52 }
 0x90b   :  { %9840 = vset.pattern.permute.xlu2 %v14148_v54  ;;  %v4194_v32 = vmul.f32 %v3682_v0, %v3682_v0 }
 0x90c   :  { %9839 = vset.pattern.permute.xlu1 %v14159_v37  ;;  %9365 = vmatpush.bf16.msrb.mxu0 %v8746_v14  ;;  %v3680_v14 = vsub.f32 %v13035_v60, %v11262_v52 }
 0x910   :  { %v2342_v41 = vpop.permute.xlu2 %2341 }
 0x911   :  { %v3684_v40 = vsub.f32 %v2342_v41, %v11262_v52  ;;  %v3679_v41 = vsub.f32 %v2312_v49, %v11262_v52 }
 0x913   :  { %2432 = vperm.xlu2 %9840, %v14205_v51   ;;  %v4196_v8 = vmul.f32 %v3684_v40, %v3684_v40  ;;  %v4191_v40 = vmul.f32 %v3679_v41, %v3679_v41 }
 0x914   :  { %2426 = vperm.xlu1 %9839, %v14205_v51  }
 0x915   :  { %v4708_v44 = vmul.f32 -20000.0, %v4196_v8 }
 0x916   :  { %v2324_v12 = vpop.permute.xlu1 %2323 }
 0x917   :  { %v3681_v38 = vsub.f32 %v2324_v12, %v11262_v52  ;;  %v5733_v12 = vunpack.c.l.bf16 %v5221_v16  ;;  %v5220_v33 = vpack.c.bf16 %v4708_v44, %v4708_v44  ;;  %v4703_v16 = vmul.f32 -20000.0, %v4191_v40 }
 0x919   :  { %v4193_v1 = vmul.f32 %v3681_v38, %v3681_v38  ;;  %v6593_v8 = vmul.f32 1.442695, %v5733_v12  ;;  %v5732_v44 = vunpack.c.l.bf16 %v5220_v33 }
 0x91b   :  { %9842 = vset.pattern.permute.xlu2 %v14072_v45  ;;  %v4705_v62 = vmul.f32 -20000.0, %v4193_v1  ;;  %10637 = vpow2.f32 %v6593_v8 }
 0x91c   :  { %9841 = vset.pattern.permute.xlu1 %v14151_v29 }
 0x91d   :  { %v2360_v24 = vpop.permute.xlu2 %2359  ;;  %v5217_v1 = vpack.c.bf16 %v4705_v62, %v4705_v62 }
 0x91e   :  { %v3687_v35 = vsub.f32 %v2360_v24, %v11262_v52  ;;  %v14208_v24 = vld [vmem:[#allocation83_spill] sm:$0xff] }
 0x920   :  { %v4199_v36 = vmul.f32 %v3687_v35, %v3687_v35  ;;  %v4192_v35 = vmul.f32 %v3680_v14, %v3680_v14 }
 0x922   :  { %v4711_v20 = vmul.f32 -20000.0, %v4199_v36  ;;  %v3675_v36 = vsub.f32 %v14209_v53, %v11262_v52  ;;  %v4704_v38 = vmul.f32 -20000.0, %v4192_v35  ;;  %v3674_v35 = vsub.f32 %v13150_v28, %v11262_v52  ;;  %v10638_v28 = vpop.eup %10637 }
 0x923   :  { %2450 = vperm.xlu2 %9842, %v14205_v51   ;;  %v3673_v53 = vsub.f32 %v13154_v7, %v11262_v52 }
 0x924   :  { %2444 = vperm.xlu1 %9841, %v14205_v51  }
 0x925   :  { %v4185_v7 = vmul.f32 %v3673_v53, %v3673_v53 }
 0x926   :  { %v2336_v25 = vpop.permute.xlu1 %2335 }
 0x927   :  { %v3683_v50 = vsub.f32 %v2336_v25, %v11262_v52  ;;  %v5223_v25 = vpack.c.bf16 %v4711_v20, %v4711_v20 }
 0x929   :  { %v4195_v18 = vmul.f32 %v3683_v50, %v3683_v50  ;;  %v5735_v60 = vunpack.c.l.bf16 %v5223_v25  ;;  %v3678_v50 = vsub.f32 %v2306_v61, %v11262_v52  ;;  %v3676_v61 = vsub.f32 %v13160_v6, %v11262_v52 }
 0x92b   :  { %9844 = vset.pattern.permute.xlu2 %v14152_v34  ;;  %v4707_v57 = vmul.f32 -20000.0, %v4195_v18  ;;  %v3677_v18 = vsub.f32 %v13156_v58, %v11262_v52  ;;  %v6597_v14 = vmul.f32 1.442695, %v5735_v60  ;;  %v4190_v25 = vmul.f32 %v3678_v50, %v3678_v50 }
 0x92c   :  { %9843 = vset.pattern.permute.xlu1 %v14160_v43  ;;  %v5216_v58 = vpack.c.bf16 %v4704_v38, %v4704_v38  ;;  %v4188_v40 = vmul.f32 %v3676_v61, %v3676_v61  ;;  %v6591_v50 = vmul.f32 1.442695, %v5732_v44 }
 0x92d   :  { %v5219_v20 = vpack.c.bf16 %v4707_v57, %v4707_v57  ;;  %10639 = vpow2.f32 %v6597_v14  ;;  %v4702_v60 = vmul.f32 -20000.0, %v4190_v25 }
 0x92e   :  { %v4700_v14 = vmul.f32 -20000.0, %v4188_v40 }
 0x92f   :  { %v5731_v57 = vunpack.c.l.bf16 %v5219_v20 }
 0x931   :  { %v6589_v33 = vmul.f32 1.442695, %v5731_v57  ;;  %v4697_v57 = vmul.f32 -20000.0, %v4185_v7 }
 0x933   :  { %2462 = vperm.xlu2 %9844, %v14205_v51  }
 0x934   :  { %2456 = vperm.xlu1 %9843, %v14205_v51  }
 0x936   :  { %v2354_v63 = vpop.permute.xlu1 %2353 }
 0x937   :  { %v3686_v46 = vsub.f32 %v2354_v63, %v11262_v52 }
 0x939   :  { %v4198_v51 = vmul.f32 %v3686_v46, %v3686_v46 }
 0x93b   :  { %9846 = vset.pattern.permute.xlu2 %v11073_v4  ;;  %v4710_v26 = vmul.f32 -20000.0, %v4198_v51  ;;  %v4706_v51 = vmul.f32 -20000.0, %v4194_v32 }
 0x93c   :  { %9845 = vset.pattern.permute.xlu1 %v14094_v11 }
 0x93d   :  { %v5222_v63 = vpack.c.bf16 %v4710_v26, %v4710_v26  ;;  %v4187_v26 = vmul.f32 %v3675_v36, %v3675_v36  ;;  %v5218_v32 = vpack.c.bf16 %v4706_v51, %v4706_v51  ;;  %v5215_v36 = vpack.c.bf16 %v4703_v16, %v4703_v16  ;;  %v10640_v16 = vpop.eup %10639 }
 0x93e   :  { %v5729_v51 = vunpack.c.l.bf16 %v5217_v1 }
 0x93f   :  { %v5734_v31 = vunpack.c.l.bf16 %v5222_v63  ;;  %v4699_v20 = vmul.f32 -20000.0, %v4187_v26  ;;  %v5727_v38 = vunpack.c.l.bf16 %v5215_v36 }
 0x940   :  { %v6585_v61 = vmul.f32 1.442695, %v5729_v51 }
 0x941   :  { %v6595_v63 = vmul.f32 1.442695, %v5734_v31  ;;  %v5728_v31 = vunpack.c.l.bf16 %v5216_v58  ;;  %v5211_v26 = vpack.c.bf16 %v4699_v20, %v4699_v20  ;;  %v5212_v58 = vpack.c.bf16 %v4700_v14, %v4700_v14 }
 0x943   :  { %2481 = vperm.xlu2 %9846, %v14208_v24   ;;  %10641 = vpow2.f32 %v6595_v63  ;;  %v7271_v63 = vpack.c.bf16 %v10640_v16, %v10640_v16 }
 0x944   :  { %2475 = vperm.xlu1 %9845, %v14208_v24  }
 0x946   :  { %v2366_v46 = vpop.permute.xlu1 %2365 }
 0x947   :  { %v3688_v49 = vsub.f32 %v2366_v46, %v11262_v52  ;;  %v4189_v46 = vmul.f32 %v3677_v18, %v3677_v18 }
 0x949   :  { %v4200_v0 = vmul.f32 %v3688_v49, %v3688_v49  ;;  %v5730_v49 = vunpack.c.l.bf16 %v5218_v32  ;;  %v4701_v8 = vmul.f32 -20000.0, %v4189_v46  ;;  %v10642_v25 = vpop.eup %10641  ;;  %v6583_v32 = vmul.f32 1.442695, %v5728_v31 }
 0x94a   :  { %v6581_v46 = vmul.f32 1.442695, %v5727_v38  ;;  %v7270_v40 = vpack.c.bf16 %v10642_v25, %v10642_v25  ;;  %v5724_v31 = vunpack.c.l.bf16 %v5212_v58  ;;  %v13204_v38 = vpop.permute.xlu2 %2372 }
 0x94b   :  { %v4712_v41 = vmul.f32 -20000.0, %v4200_v0  ;;  %9848 = vset.pattern.permute.xlu2 %v14158_v21  ;;  %v4186_v0 = vmul.f32 %v3674_v35, %v3674_v35  ;;  %v6587_v18 = vmul.f32 1.442695, %v5730_v49  ;;  %v5213_v44 = vpack.c.bf16 %v4701_v8, %v4701_v8 }
 0x94c   :  { %9847 = vset.pattern.permute.xlu1 %v11095_v10  ;;  %v5723_v49 = vunpack.c.l.bf16 %v5211_v26  ;;  %v8423_v16 = vunpack.c.l.b16 %v7270_v40 }
 0x94d   :  { %v5224_v12 = vpack.c.bf16 %v4712_v41, %v4712_v41  ;;  %v5214_v41 = vpack.c.bf16 %v4702_v60, %v4702_v60  ;;  %v4698_v1 = vmul.f32 -20000.0, %v4186_v0 }
 0x94e   :  { %v6573_v25 = vmul.f32 1.442695, %v5723_v49 }
 0x94f   :  { %v5736_v6 = vunpack.c.l.bf16 %v5224_v12  ;;  %v5726_v35 = vunpack.c.l.bf16 %v5214_v41  ;;  %v5210_v51 = vpack.c.bf16 %v4698_v1, %v4698_v1  ;;  %v6575_v1 = vmul.f32 1.442695, %v5724_v31 }
 0x951   :  { %v6599_v62 = vmul.f32 1.442695, %v5736_v6  ;;  %v7269_v6 = vpack.c.bf16 %v10638_v28, %v10638_v28  ;;  %v6579_v0 = vmul.f32 1.442695, %v5726_v35  ;;  %v5722_v26 = vunpack.c.l.bf16 %v5210_v51 }
 0x953   :  { %10643 = vpow2.f32 %v6599_v62  ;;  %2493 = vperm.xlu2 %9848, %v14208_v24   ;;  %v8424_v62 = vunpack.c.l.b16 %v7271_v63 }
 0x954   :  { %10645 = vpow2.f32 %v6591_v50  ;;  %2487 = vperm.xlu1 %9847, %v14208_v24   ;;  %v5725_v50 = vunpack.c.l.bf16 %v5213_v44 }
 0x955   :  { %10647 = vpow2.f32 %v6589_v33  ;;  %v5209_v33 = vpack.c.bf16 %v4697_v57, %v4697_v57 }
 0x956   :  { %10649 = vpow2.f32 %v6587_v18  ;;  %v8422_v18 = vunpack.c.l.b16 %v7269_v6 }
 0x957   :  { %10651 = vpow2.f32 %v6585_v61  ;;  %v6577_v61 = vmul.f32 1.442695, %v5725_v50  ;;  %v5721_v44 = vunpack.c.l.bf16 %v5209_v33  ;;  %v13208_v33 = vpop.permute.xlu2 %2390 }
 0x958   :  { %10653 = vpow2.f32 %v6583_v32  ;;  %v8760_v63 = vpack.c.b16 %v8423_v16, %v8422_v18 }
 0x959   :  { %v10644_v12 = vpop.eup %10643  ;;  %10655 = vpow2.f32 %v6581_v46  ;;  %v6569_v6 = vmul.f32 1.442695, %v5721_v44 }
 0x95a   :  { %v10646_v53 = vpop.eup %10645  ;;  %v7272_v36 = vpack.c.bf16 %v10644_v12, %v10644_v12  ;;  %10657 = vpow2.f32 %v6579_v0 }
 0x95b   :  { %v10648_v60 = vpop.eup %10647  ;;  %9850 = vset.pattern.permute.xlu2 %v11067_v2  ;;  %v7268_v8 = vpack.c.bf16 %v10646_v53, %v10646_v53  ;;  %10659 = vpow2.f32 %v6577_v61  ;;  %v6571_v53 = vmul.f32 1.442695, %v5722_v26 }
 0x95c   :  { %v8425_v20 = vunpack.c.l.b16 %v7272_v36  ;;  %9849 = vset.pattern.permute.xlu1 %v14083_v5  ;;  %v10650_v7 = vpop.eup %10649  ;;  %v7267_v14 = vpack.c.bf16 %v10648_v60, %v10648_v60  ;;  %10661 = vpow2.f32 %v6573_v25 }
 0x95d   :  { %v10652_v41 = vpop.eup %10651  ;;  %v7266_v57 = vpack.c.bf16 %v10650_v7, %v10650_v7  ;;  %v8421_v58 = vunpack.c.l.b16 %v7268_v8  ;;  %10663 = vpow2.f32 %v6575_v1 }
 0x95e   :  { %v8761_v28 = vpack.c.b16 %v8425_v20, %v8424_v62  ;;  %v10654_v32 = vpop.eup %10653  ;;  %v8420_v12 = vunpack.c.l.b16 %v7267_v14  ;;  %v7265_v35 = vpack.c.bf16 %v10652_v41, %v10652_v41  ;;  %10665 = vpow2.f32 %v6571_v53 }
 0x95f   :  { %v10656_v46 = vpop.eup %10655  ;;  %v7264_v36 = vpack.c.bf16 %v10654_v32, %v10654_v32  ;;  %v8419_v49 = vunpack.c.l.b16 %v7266_v57  ;;  %10667 = vpow2.f32 %v6569_v6  ;;  %v13212_v32 = vpop.permute.xlu2 %2402 }
 0x960   :  { %9371 = vmatpush.bf16.msrb.mxu1 %v8761_v28  ;;  %v8759_v40 = vpack.c.b16 %v8421_v58, %v8420_v12  ;;  %v8418_v60 = vunpack.c.l.b16 %v7265_v35  ;;  %v7263_v50 = vpack.c.bf16 %v10656_v46, %v10656_v46  ;;  %v10658_v51 = vpop.eup %10657  ;;  %v13216_v35 = vpop.permute.xlu1 %2384 }
 0x961   :  { %v10660_v62 = vpop.eup %10659  ;;  %v8417_v31 = vunpack.c.l.b16 %v7264_v36  ;;  %v7262_v7 = vpack.c.bf16 %v10658_v51, %v10658_v51 }
 0x962   :  { %v10662_v20 = vpop.eup %10661  ;;  %v8758_v0 = vpack.c.b16 %v8419_v49, %v8418_v60  ;;  %v8416_v8 = vunpack.c.l.b16 %v7263_v50  ;;  %v7261_v18 = vpack.c.bf16 %v10660_v62, %v10660_v62 }
 0x963   :  { %2511 = vperm.xlu2 %9850, %v14208_v24   ;;  %v10664_v28 = vpop.eup %10663  ;;  %v8415_v41 = vunpack.c.l.b16 %v7262_v7  ;;  %v7259_v61 = vpack.c.bf16 %v10662_v20, %v10662_v20  ;;  %v46_v7 = vadd.s32 1920, %v14153_v17 }
 0x964   :  { %2505 = vperm.xlu1 %9849, %v14208_v24   ;;  %9372 = vmatpush.bf16.msrb.mxu1 %v8760_v63  ;;  %v10666_v16 = vpop.eup %10665  ;;  %v8757_v14 = vpack.c.b16 %v8417_v31, %v8416_v8  ;;  %v7260_v25 = vpack.c.bf16 %v10664_v28, %v10664_v28  ;;  %v8414_v44 = vunpack.c.l.b16 %v7261_v18  ;;  %v45_v8 = vadd.s32 1792, %v14153_v17 }
 0x965   :  { %v10668_v26 = vpop.eup %10667  ;;  %v7258_v1 = vpack.c.bf16 %v10666_v16, %v10666_v16  ;;  %v8412_v63 = vunpack.c.l.b16 %v7259_v61  ;;  %vm79_vm11 = vcmp.ge.s32.totalorder %v46_v7, %v12326_v48  ;;  %vm112_vm13 = vcmp.lt.s32.totalorder %v46_v7, %v12330_v30 }
 0x966   :  { %v8756_v57 = vpack.c.b16 %v8415_v41, %v8414_v44  ;;  %v8413_v12 = vunpack.c.l.b16 %v7260_v25  ;;  %v7257_v58 = vpack.c.bf16 %v10668_v26, %v10668_v26  ;;  %vm78_vm10 = vcmp.ge.s32.totalorder %v45_v8, %v12326_v48  ;;  %vm144_vm15 = vmand %vm79_vm11, %vm112_vm13 }
 0x967   :  { %v8411_v36 = vunpack.c.l.b16 %v7258_v1  ;;  %v2421_v6 = vpop.permute.xlu2 %2420  ;;  %vm111_vm12 = vcmp.lt.s32.totalorder %v45_v8, %v12330_v30  ;;  %v176_v61 = vsel %vm144_vm15, 1.0, %v14166_v59 }
 0x968   :  { %9373 = vmatpush.bf16.msrb.mxu1 %v8759_v40  ;;  %v8755_v46 = vpack.c.b16 %v8413_v12, %v8412_v63  ;;  %v8410_v53 = vunpack.c.l.b16 %v7257_v58  ;;  %v2397_v60 = vpop.permute.xlu1 %2396  ;;  %vm143_vm14 = vmand %vm78_vm10, %vm111_vm12  ;;  %v3695_v12 = vsub.f32 %v12262_v47, %v11262_v52 }
 0x969   :  { %v175_v41 = vsel %vm143_vm14, 1.0, %v14166_v59 }
 0x96a   :  { %v8754_v40 = vpack.c.b16 %v8411_v36, %v8410_v53  ;;  %v13242_v44 = vpack.c.bf16 %v176_v61, %v175_v41  ;;  %v3694_v41 = vsub.f32 %v13212_v32, %v11262_v52  ;;  %v3691_v32 = vsub.f32 %v13216_v35, %v11262_v52 }
 0x96b   :  { %9852 = vset.pattern.permute.xlu2 %v14159_v37 }
 0x96c   :  { %9851 = vset.pattern.permute.xlu1 %v11171_v27  ;;  %9374 = vmatpush.bf16.msrb.mxu1 %v8758_v0  ;;  %v7480_v58 = vunpack.c.l.b16 %v13242_v44 }
 0x96e   :  { %v7512_v36 = vpack.c.b16 %v7480_v58, %v7480_v58 }
 0x96f   :  { %v2433_v49 = vpop.permute.xlu2 %2432 }
 0x970   :  { %9375 = vmatpush.bf16.msrb.mxu1 %v8757_v14  ;;  %v3699_v25 = vsub.f32 %v2433_v49, %v11262_v52  ;;  %9288 = vmatmul.bf16.vlgmr.msrb.gmra.mxu2 %v7512_v36  ;;  %v3692_v36 = vsub.f32 %v13208_v33, %v11262_v52  ;;  %v14211_v33 = vld [vmem:[#allocation84_spill] sm:$0xff] }
 0x973   :  { %2523 = vperm.xlu2 %9852, %v14208_v24  }
 0x974   :  { %2517 = vperm.xlu1 %9851, %v14208_v24   ;;  %9376 = vmatpush.bf16.msrb.mxu1 %v8756_v57 }
 0x976   :  { %v2415_v50 = vpop.permute.xlu1 %2414 }
 0x977   :  { %v3696_v8 = vsub.f32 %v2415_v50, %v11262_v52 }
 0x978   :  { %9377 = vmatpush.bf16.msrb.mxu1 %v8755_v46  ;;  %v4211_v46 = vmul.f32 %v3699_v25, %v3699_v25  ;;  %v3693_v25 = vsub.f32 %v2397_v60, %v11262_v52 }
 0x97a   :  { %v4723_v7 = vmul.f32 -20000.0, %v4211_v46  ;;  %v4205_v60 = vmul.f32 %v3693_v25, %v3693_v25 }
 0x97b   :  { %9854 = vset.pattern.permute.xlu2 %v14151_v29 }
 0x97c   :  { %9853 = vset.pattern.permute.xlu1 %v14147_v56  ;;  %9378 = vmatpush.bf16.msrb.mxu1 %v8754_v40  ;;  %v5235_v50 = vpack.c.bf16 %v4723_v7, %v4723_v7 }
 0x97d   :  { %v2451_v51 = vpop.permute.xlu2 %2450 }
 0x97e   :  { %v3702_v28 = vsub.f32 %v2451_v51, %v11262_v52 }
 0x980   :  { %v4214_v26 = vmul.f32 %v3702_v28, %v3702_v28 }
 0x982   :  { %v4726_v53 = vmul.f32 -20000.0, %v4214_v26  ;;  %v4208_v26 = vmul.f32 %v3696_v8, %v3696_v8 }
 0x983   :  { %2541 = vperm.xlu2 %9854, %v14208_v24  }
 0x984   :  { %2535 = vperm.xlu1 %9853, %v14208_v24   ;;  %v5238_v47 = vpack.c.bf16 %v4726_v53, %v4726_v53 }
 0x986   :  { %v2427_v62 = vpop.permute.xlu1 %2426 }
 0x987   :  { %v3698_v40 = vsub.f32 %v2427_v62, %v11262_v52 }
 0x989   :  { %v4210_v28 = vmul.f32 %v3698_v40, %v3698_v40  ;;  %v4206_v40 = vmul.f32 %v3694_v41, %v3694_v41 }
 0x98b   :  { %9856 = vset.pattern.permute.xlu2 %v14160_v43 }
 0x98c   :  { %9855 = vset.pattern.permute.xlu1 %v14072_v45 }
 0x98d   :  { %v2463_v20 = vpop.permute.xlu2 %2462 }
 0x98e   :  { %v3704_v31 = vsub.f32 %v2463_v20, %v11262_v52 }
 0x990   :  { %v4216_v16 = vmul.f32 %v3704_v31, %v3704_v31  ;;  %v4207_v31 = vmul.f32 %v3695_v12, %v3695_v12 }
 0x992   :  { %v4728_v57 = vmul.f32 -20000.0, %v4216_v16  ;;  %v4719_v62 = vmul.f32 -20000.0, %v4207_v31  ;;  %v5747_v31 = vunpack.c.l.bf16 %v5235_v50 }
 0x993   :  { %2553 = vperm.xlu2 %9856, %v14208_v24  }
 0x994   :  { %2547 = vperm.xlu1 %9855, %v14208_v24   ;;  %v14210_v24 = vld [vmem:[#allocation90_spill] sm:$0xff]  ;;  %v5240_v49 = vpack.c.bf16 %v4728_v57, %v4728_v57  ;;  %v4722_v57 = vmul.f32 -20000.0, %v4210_v28  ;;  %v5231_v53 = vpack.c.bf16 %v4719_v62, %v4719_v62  ;;  %v3690_v28 = vsub.f32 %v14211_v33, %v11262_v52 }
 0x995   :  { %v3700_v14 = vsub.f32 %v14210_v24, %v11262_v52  ;;  %v4718_v62 = vmul.f32 -20000.0, %v4206_v40  ;;  %v6621_v25 = vmul.f32 1.442695, %v5747_v31 }
 0x996   :  { %v2445_v0 = vpop.permute.xlu1 %2444  ;;  %v5752_v16 = vunpack.c.l.bf16 %v5240_v49  ;;  %v5234_v8 = vpack.c.bf16 %v4722_v57, %v4722_v57  ;;  %v5743_v35 = vunpack.c.l.bf16 %v5231_v53 }
 0x997   :  { %v3701_v18 = vsub.f32 %v2445_v0, %v11262_v52  ;;  %v4212_v63 = vmul.f32 %v3700_v14, %v3700_v14  ;;  %v3697_v0 = vsub.f32 %v2421_v6, %v11262_v52  ;;  %v5230_v53 = vpack.c.bf16 %v4718_v62, %v4718_v62 }
 0x998   :  { %v6631_v12 = vmul.f32 1.442695, %v5752_v16  ;;  %v3689_v16 = vsub.f32 %v13204_v38, %v11262_v52  ;;  %v5746_v50 = vunpack.c.l.bf16 %v5234_v8 }
 0x999   :  { %v4213_v1 = vmul.f32 %v3701_v18, %v3701_v18  ;;  %v4724_v20 = vmul.f32 -20000.0, %v4212_v63  ;;  %v4209_v61 = vmul.f32 %v3697_v0, %v3697_v0  ;;  %v5742_v33 = vunpack.c.l.bf16 %v5230_v53 }
 0x99a   :  { %10669 = vpow2.f32 %v6631_v12  ;;  %v6613_v12 = vmul.f32 1.442695, %v5743_v35  ;;  %v4201_v38 = vmul.f32 %v3689_v16, %v3689_v16 }
 0x99b   :  { %9858 = vset.pattern.permute.xlu2 %v14094_v11  ;;  %v4725_v51 = vmul.f32 -20000.0, %v4213_v1  ;;  %v5236_v24 = vpack.c.bf16 %v4724_v20, %v4724_v20  ;;  %v5750_v1 = vunpack.c.l.bf16 %v5238_v47  ;;  %v4720_v20 = vmul.f32 -20000.0, %v4208_v26 }
 0x99c   :  { %9857 = vset.pattern.permute.xlu1 %v14136_v23 }
 0x99d   :  { %v5237_v18 = vpack.c.bf16 %v4725_v51, %v4725_v51  ;;  %v5748_v46 = vunpack.c.l.bf16 %v5236_v24  ;;  %v4721_v51 = vmul.f32 -20000.0, %v4209_v61  ;;  %v6627_v0 = vmul.f32 1.442695, %v5750_v1 }
 0x99e   :  { %v4204_v24 = vmul.f32 %v3692_v36, %v3692_v36  ;;  %v4203_v61 = vmul.f32 %v3691_v32, %v3691_v32  ;;  %v5232_v26 = vpack.c.bf16 %v4720_v20, %v4720_v20 }
 0x99f   :  { %v5749_v63 = vunpack.c.l.bf16 %v5237_v18  ;;  %v6623_v18 = vmul.f32 1.442695, %v5748_v46  ;;  %10671 = vpow2.f32 %v6627_v0 }
 0x9a0   :  { %v10670_v57 = vpop.eup %10669  ;;  %v4716_v46 = vmul.f32 -20000.0, %v4204_v24  ;;  %v4715_v36 = vmul.f32 -20000.0, %v4203_v61  ;;  %v5744_v40 = vunpack.c.l.bf16 %v5232_v26 }
 0x9a1   :  { %v6625_v7 = vmul.f32 1.442695, %v5749_v63  ;;  %v4202_v63 = vmul.f32 %v3690_v28, %v3690_v28 }
 0x9a2   :  { %v6615_v16 = vmul.f32 1.442695, %v5744_v40 }
 0x9a3   :  { %2572 = vperm.xlu2 %9858, %v14071_v13   ;;  %10673 = vpow2.f32 %v6625_v7  ;;  %v4714_v31 = vmul.f32 -20000.0, %v4202_v63  ;;  %v4713_v7 = vmul.f32 -20000.0, %v4201_v38 }
 0x9a4   :  { %2566 = vperm.xlu1 %9857, %v14071_v13   ;;  %10675 = vpow2.f32 %v6623_v18  ;;  %v5227_v18 = vpack.c.bf16 %v4715_v36, %v4715_v36 }
 0x9a6   :  { %v2457_v14 = vpop.permute.xlu1 %2456 }
 0x9a7   :  { %v3703_v6 = vsub.f32 %v2457_v14, %v11262_v52  ;;  %v5233_v14 = vpack.c.bf16 %v4721_v51, %v4721_v51  ;;  %v6619_v51 = vmul.f32 1.442695, %v5746_v50  ;;  %v6611_v50 = vmul.f32 1.442695, %v5742_v33 }
 0x9a9   :  { %v4215_v58 = vmul.f32 %v3703_v6, %v3703_v6  ;;  %v4717_v6 = vmul.f32 -20000.0, %v4205_v60  ;;  %v7288_v60 = vpack.c.bf16 %v10670_v57, %v10670_v57  ;;  %v5739_v57 = vunpack.c.l.bf16 %v5227_v18 }
 0x9ab   :  { %v4727_v49 = vmul.f32 -20000.0, %v4215_v58  ;;  %9860 = vset.pattern.permute.xlu2 %v11095_v10  ;;  %v5745_v58 = vunpack.c.l.bf16 %v5233_v14  ;;  %v5229_v32 = vpack.c.bf16 %v4717_v6, %v4717_v6  ;;  %v8441_v62 = vunpack.c.l.b16 %v7288_v60 }
 0x9ac   :  { %9859 = vset.pattern.permute.xlu1 %v11073_v4  ;;  %v5226_v6 = vpack.c.bf16 %v4714_v31, %v4714_v31  ;;  %v13270_v31 = vpop.permute.xlu2 %2481 }
 0x9ad   :  { %v5239_v47 = vpack.c.bf16 %v4727_v49, %v4727_v49  ;;  %v10672_v49 = vpop.eup %10671  ;;  %v6617_v0 = vmul.f32 1.442695, %v5745_v58  ;;  %v5741_v35 = vunpack.c.l.bf16 %v5229_v32 }
 0x9ae   :  { %v10674_v20 = vpop.eup %10673  ;;  %v7286_v61 = vpack.c.bf16 %v10672_v49, %v10672_v49  ;;  %v5738_v60 = vunpack.c.l.bf16 %v5226_v6 }
 0x9af   :  { %v5751_v41 = vunpack.c.l.bf16 %v5239_v47  ;;  %v10676_v8 = vpop.eup %10675  ;;  %v5228_v47 = vpack.c.bf16 %v4716_v46, %v4716_v46  ;;  %v6609_v63 = vmul.f32 1.442695, %v5741_v35 }
 0x9b0   :  { %v8439_v53 = vunpack.c.l.b16 %v7286_v61  ;;  %v7284_v36 = vpack.c.bf16 %v10676_v8, %v10676_v8  ;;  %v6603_v35 = vmul.f32 1.442695, %v5738_v60 }
 0x9b1   :  { %v6629_v1 = vmul.f32 1.442695, %v5751_v41  ;;  %v7285_v41 = vpack.c.bf16 %v10674_v20, %v10674_v20  ;;  %v5740_v26 = vunpack.c.l.bf16 %v5228_v47  ;;  %v6605_v20 = vmul.f32 1.442695, %v5739_v57 }
 0x9b2   :  { %v8437_v47 = vunpack.c.l.b16 %v7284_v36 }
 0x9b3   :  { %10677 = vpow2.f32 %v6629_v1  ;;  %2584 = vperm.xlu2 %9860, %v14071_v13   ;;  %v8438_v46 = vunpack.c.l.b16 %v7285_v41 }
 0x9b4   :  { %10679 = vpow2.f32 %v6621_v25  ;;  %2578 = vperm.xlu1 %9859, %v14071_v13   ;;  %v5225_v25 = vpack.c.bf16 %v4713_v7, %v4713_v7 }
 0x9b5   :  { %10681 = vpow2.f32 %v6613_v12 }
 0x9b6   :  { %10683 = vpow2.f32 %v6619_v51  ;;  %v5737_v40 = vunpack.c.l.bf16 %v5225_v25  ;;  %v6607_v51 = vmul.f32 1.442695, %v5740_v26  ;;  %v13274_v26 = vpop.permute.xlu2 %2493 }
 0x9b7   :  { %10685 = vpow2.f32 %v6617_v0  ;;  %v8768_v0 = vpack.c.b16 %v8439_v53, %v8438_v46 }
 0x9b8   :  { %10687 = vpow2.f32 %v6615_v16  ;;  %v6601_v18 = vmul.f32 1.442695, %v5737_v40 }
 0x9b9   :  { %v10678_v28 = vpop.eup %10677  ;;  %10689 = vpow2.f32 %v6611_v50 }
 0x9ba   :  { %v10680_v24 = vpop.eup %10679  ;;  %v7287_v14 = vpack.c.bf16 %v10678_v28, %v10678_v28  ;;  %10691 = vpow2.f32 %v6609_v63 }
 0x9bb   :  { %9862 = vset.pattern.permute.xlu2 %v14083_v5  ;;  %v7283_v12 = vpack.c.bf16 %v10680_v24, %v10680_v24  ;;  %v10682_v58 = vpop.eup %10681  ;;  %10693 = vpow2.f32 %v6607_v51 }
 0x9bc   :  { %v8440_v1 = vunpack.c.l.b16 %v7287_v14  ;;  %9861 = vset.pattern.permute.xlu1 %v11092_v9  ;;  %v10684_v32 = vpop.eup %10683  ;;  %v7279_v16 = vpack.c.bf16 %v10682_v58, %v10682_v58  ;;  %10695 = vpow2.f32 %v6605_v20 }
 0x9bd   :  { %v10686_v49 = vpop.eup %10685  ;;  %v8436_v7 = vunpack.c.l.b16 %v7283_v12  ;;  %v7282_v33 = vpack.c.bf16 %v10684_v32, %v10684_v32  ;;  %10697 = vpow2.f32 %v6601_v18 }
 0x9be   :  { %v8769_v38 = vpack.c.b16 %v8441_v62, %v8440_v1  ;;  %v10688_v28 = vpop.eup %10687  ;;  %v7281_v8 = vpack.c.bf16 %v10686_v49, %v10686_v49  ;;  %10699 = vpow2.f32 %v6603_v35  ;;  %v8432_v25 = vunpack.c.l.b16 %v7279_v16  ;;  %v14212_v16 = vld [vmem:[#allocation127_spill] sm:$0xff] }
 0x9bf   :  { %v10690_v24 = vpop.eup %10689  ;;  %v8767_v62 = vpack.c.b16 %v8437_v47, %v8436_v7  ;;  %v8435_v14 = vunpack.c.l.b16 %v7282_v33  ;;  %v7280_v41 = vpack.c.bf16 %v10688_v28, %v10688_v28  ;;  %v2512_v47 = vpop.permute.xlu2 %2511 }
 0x9c0   :  { %9384 = vmatpush.bf16.msrb.mxu2 %v8769_v38  ;;  %v10692_v61 = vpop.eup %10691  ;;  %v8434_v6 = vunpack.c.l.b16 %v7281_v8  ;;  %v7278_v12 = vpack.c.bf16 %v10690_v24, %v10690_v24  ;;  %v13280_v33 = vpop.permute.xlu1 %2475  ;;  %v3720_v24 = vsub.f32 %v14212_v16, %v11262_v52 }
 0x9c1   :  { %v10694_v50 = vpop.eup %10693  ;;  %v8433_v57 = vunpack.c.l.b16 %v7280_v41  ;;  %v7277_v63 = vpack.c.bf16 %v10692_v61, %v10692_v61 }
 0x9c2   :  { %v8766_v1 = vpack.c.b16 %v8435_v14, %v8434_v6  ;;  %v10696_v38 = vpop.eup %10695  ;;  %v7276_v58 = vpack.c.bf16 %v10694_v50, %v10694_v50  ;;  %v8431_v32 = vunpack.c.l.b16 %v7278_v12  ;;  %v4232_v41 = vmul.f32 %v3720_v24, %v3720_v24 }
 0x9c3   :  { %2602 = vperm.xlu2 %9862, %v14071_v13   ;;  %v10698_v46 = vpop.eup %10697  ;;  %v8765_v53 = vpack.c.b16 %v8433_v57, %v8432_v25  ;;  %v8430_v36 = vunpack.c.l.b16 %v7277_v63  ;;  %v7275_v40 = vpack.c.bf16 %v10696_v38, %v10696_v38 }
 0x9c4   :  { %2596 = vperm.xlu1 %9861, %v14071_v13   ;;  %9385 = vmatpush.bf16.msrb.mxu2 %v8768_v0  ;;  %v10700_v51 = vpop.eup %10699  ;;  %v7273_v49 = vpack.c.bf16 %v10698_v46, %v10698_v46  ;;  %v8429_v0 = vunpack.c.l.b16 %v7276_v58  ;;  %v4744_v61 = vmul.f32 -20000.0, %v4232_v41 }
 0x9c5   :  { %v8764_v60 = vpack.c.b16 %v8431_v32, %v8430_v36  ;;  %v8428_v20 = vunpack.c.l.b16 %v7275_v40  ;;  %v7274_v7 = vpack.c.bf16 %v10700_v51, %v10700_v51  ;;  %v14213_v36 = vld [vmem:[#allocation109_spill] sm:$0xff] }
 0x9c6   :  { %v8426_v18 = vunpack.c.l.b16 %v7273_v49  ;;  %v5256_v50 = vpack.c.bf16 %v4744_v61, %v4744_v61  ;;  %v3715_v32 = vsub.f32 %v14213_v36, %v11262_v52 }
 0x9c7   :  { %v8763_v28 = vpack.c.b16 %v8429_v0, %v8428_v20  ;;  %v8427_v8 = vunpack.c.l.b16 %v7274_v7  ;;  %v7481_v7 = vunpack.c.h.b16 %v13242_v44  ;;  %v3712_v44 = vsub.f32 %v2512_v47, %v11262_v52 }
 0x9c8   :  { %9386 = vmatpush.bf16.msrb.mxu2 %v8767_v62  ;;  %v13286_v14 = vpop.permute.xlu1 %2487 }
 0x9c9   :  { %v8762_v35 = vpack.c.b16 %v8427_v8, %v8426_v18  ;;  %v7513_v8 = vpack.c.b16 %v7481_v7, %v7481_v7 }
 0x9cb   :  { %9864 = vset.pattern.permute.xlu2 %v11171_v27  ;;  %9301 = vmatmul.bf16.vlgmr.msrb.gmra.mxu3 %v7513_v8 }
 0x9cc   :  { %9863 = vset.pattern.permute.xlu1 %v11067_v2  ;;  %9387 = vmatpush.bf16.msrb.mxu2 %v8766_v1  ;;  %v5768_v1 = vunpack.c.l.bf16 %v5256_v50 }
 0x9cd   :  { %v2524_v62 = vpop.permute.xlu2 %2523 }
 0x9ce   :  { %v6663_v38 = vmul.f32 1.442695, %v5768_v1  ;;  %v3714_v16 = vsub.f32 %v2524_v62, %v11262_v52  ;;  %v14214_v62 = vld [vmem:[#allocation115_spill] sm:$0xff] }
 0x9d0   :  { %9388 = vmatpush.bf16.msrb.mxu2 %v8765_v53  ;;  %10701 = vpow2.f32 %v6663_v38 }
 0x9d3   :  { %2614 = vperm.xlu2 %9864, %v14071_v13  }
 0x9d4   :  { %2608 = vperm.xlu1 %9863, %v14071_v13   ;;  %9389 = vmatpush.bf16.msrb.mxu2 %v8764_v60 }
 0x9d6   :  { %v2506_v25 = vpop.permute.xlu1 %2505  ;;  %v10702_v20 = vpop.eup %10701 }
 0x9d8   :  { %9390 = vmatpush.bf16.msrb.mxu2 %v8763_v28  ;;  %v4227_v28 = vmul.f32 %v3715_v32, %v3715_v32 }
 0x9da   :  { %v4739_v61 = vmul.f32 -20000.0, %v4227_v28 }
 0x9db   :  { %9866 = vset.pattern.permute.xlu2 %v14147_v56 }
 0x9dc   :  { %9865 = vset.pattern.permute.xlu1 %v14148_v54  ;;  %9391 = vmatpush.bf16.msrb.mxu2 %v8762_v35  ;;  %v7304_v35 = vpack.c.bf16 %v10702_v20, %v10702_v20  ;;  %v5251_v36 = vpack.c.bf16 %v4739_v61, %v4739_v61 }
 0x9dd   :  { %v2542_v6 = vpop.permute.xlu2 %2541 }
 0x9de   :  { %v3717_v49 = vsub.f32 %v2542_v6, %v11262_v52  ;;  %v8457_v1 = vunpack.c.l.b16 %v7304_v35  ;;  %v5763_v7 = vunpack.c.l.bf16 %v5251_v36 }
 0x9e0   :  { %v4229_v18 = vmul.f32 %v3717_v49, %v3717_v49 }
 0x9e2   :  { %v4741_v6 = vmul.f32 -20000.0, %v4229_v18 }
 0x9e3   :  { %2632 = vperm.xlu2 %9866, %v14071_v13  }
 0x9e4   :  { %2626 = vperm.xlu1 %9865, %v14071_v13   ;;  %v5253_v32 = vpack.c.bf16 %v4741_v6, %v4741_v6 }
 0x9e6   :  { %v2518_v63 = vpop.permute.xlu1 %2517  ;;  %v5765_v8 = vunpack.c.l.bf16 %v5253_v32 }
 0x9e7   :  { %v3713_v24 = vsub.f32 %v2518_v63, %v11262_v52  ;;  %v3709_v63 = vsub.f32 %v13274_v26, %v11262_v52  ;;  %v3708_v26 = vsub.f32 %v13286_v14, %v11262_v52  ;;  %v3706_v14 = vsub.f32 %v13280_v33, %v11262_v52 }
 0x9e9   :  { %v4225_v38 = vmul.f32 %v3713_v24, %v3713_v24  ;;  %v4221_v18 = vmul.f32 %v3709_v63, %v3709_v63 }
 0x9eb   :  { %9868 = vset.pattern.permute.xlu2 %v14072_v45 }
 0x9ec   :  { %9867 = vset.pattern.permute.xlu1 %v14151_v29 }
 0x9ed   :  { %v2554_v57 = vpop.permute.xlu2 %2553 }
 0x9ee   :  { %v3719_v12 = vsub.f32 %v2554_v57, %v11262_v52  ;;  %v4226_v57 = vmul.f32 %v3714_v16, %v3714_v16 }
 0x9f0   :  { %v4231_v58 = vmul.f32 %v3719_v12, %v3719_v12  ;;  %v3711_v12 = vsub.f32 %v2506_v25, %v11262_v52  ;;  %v4738_v49 = vmul.f32 -20000.0, %v4226_v57  ;;  %v4737_v25 = vmul.f32 -20000.0, %v4225_v38 }
 0x9f1   :  { %v6653_v57 = vmul.f32 1.442695, %v5763_v7  ;;  %v4733_v38 = vmul.f32 -20000.0, %v4221_v18 }
 0x9f2   :  { %v4743_v46 = vmul.f32 -20000.0, %v4231_v58  ;;  %v4223_v47 = vmul.f32 %v3711_v12, %v3711_v12  ;;  %v5250_v24 = vpack.c.bf16 %v4738_v49, %v4738_v49  ;;  %v5249_v61 = vpack.c.bf16 %v4737_v25, %v4737_v25 }
 0x9f3   :  { %2644 = vperm.xlu2 %9868, %v14071_v13   ;;  %v3707_v12 = vsub.f32 %v13270_v31, %v11262_v52  ;;  %v5245_v25 = vpack.c.bf16 %v4733_v38, %v4733_v38 }
 0x9f4   :  { %2638 = vperm.xlu1 %9867, %v14071_v13   ;;  %v5255_v53 = vpack.c.bf16 %v4743_v46, %v4743_v46  ;;  %v5762_v36 = vunpack.c.l.bf16 %v5250_v24  ;;  %v5761_v32 = vunpack.c.l.bf16 %v5249_v61 }
 0x9f5   :  { %v4219_v31 = vmul.f32 %v3707_v12, %v3707_v12 }
 0x9f6   :  { %v2536_v40 = vpop.permute.xlu1 %2535  ;;  %v5767_v51 = vunpack.c.l.bf16 %v5255_v53  ;;  %v3710_v53 = vsub.f32 %v14214_v62, %v11262_v52  ;;  %v4220_v62 = vmul.f32 %v3708_v26, %v3708_v26  ;;  %v6651_v33 = vmul.f32 1.442695, %v5762_v36 }
 0x9f7   :  { %v3716_v0 = vsub.f32 %v2536_v40, %v11262_v52  ;;  %v6649_v18 = vmul.f32 1.442695, %v5761_v32  ;;  %v4731_v26 = vmul.f32 -20000.0, %v4219_v31 }
 0x9f8   :  { %v6661_v60 = vmul.f32 1.442695, %v5767_v51  ;;  %v4224_v51 = vmul.f32 %v3712_v44, %v3712_v44 }
 0x9f9   :  { %v4228_v41 = vmul.f32 %v3716_v0, %v3716_v0  ;;  %v4222_v0 = vmul.f32 %v3710_v53, %v3710_v53  ;;  %v5243_v12 = vpack.c.bf16 %v4731_v26, %v4731_v26 }
 0x9fa   :  { %10703 = vpow2.f32 %v6661_v60  ;;  %v4736_v16 = vmul.f32 -20000.0, %v4224_v51 }
 0x9fb   :  { %9870 = vset.pattern.permute.xlu2 %v14136_v23  ;;  %v4740_v58 = vmul.f32 -20000.0, %v4228_v41  ;;  %v4735_v41 = vmul.f32 -20000.0, %v4223_v47  ;;  %v4734_v44 = vmul.f32 -20000.0, %v4222_v0  ;;  %10705 = vpow2.f32 %v6653_v57 }
 0x9fc   :  { %9869 = vset.pattern.permute.xlu1 %v14152_v34  ;;  %v5248_v53 = vpack.c.bf16 %v4736_v16, %v4736_v16  ;;  %v4732_v0 = vmul.f32 -20000.0, %v4220_v62 }
 0x9fd   :  { %v5252_v60 = vpack.c.bf16 %v4740_v58, %v4740_v58  ;;  %v6657_v58 = vmul.f32 1.442695, %v5765_v8  ;;  %v5247_v63 = vpack.c.bf16 %v4735_v41, %v4735_v41  ;;  %v5246_v47 = vpack.c.bf16 %v4734_v44, %v4734_v44 }
 0x9fe   :  { %v5760_v7 = vunpack.c.l.bf16 %v5248_v53  ;;  %v5757_v41 = vunpack.c.l.bf16 %v5245_v25 }
 0x9ff   :  { %10707 = vpow2.f32 %v6657_v58  ;;  %v5758_v24 = vunpack.c.l.bf16 %v5246_v47 }
 0xa00   :  { %v10704_v50 = vpop.eup %10703  ;;  %v6647_v61 = vmul.f32 1.442695, %v5760_v7  ;;  %v6641_v58 = vmul.f32 1.442695, %v5757_v41 }
 0xa01   :  { %v7303_v46 = vpack.c.bf16 %v10704_v50, %v10704_v50  ;;  %v14215_v50 = vld [vmem:[#allocation97_spill] sm:$0xff]  ;;  %v10706_v16 = vpop.eup %10705  ;;  %v6643_v38 = vmul.f32 1.442695, %v5758_v24 }
 0xa02   :  { %v7299_v62 = vpack.c.bf16 %v10706_v16, %v10706_v16 }
 0xa03   :  { %v8456_v40 = vunpack.c.l.b16 %v7303_v46  ;;  %2663 = vperm.xlu2 %9870, %v14142_v15  }
 0xa04   :  { %2656 = vperm.xlu1 %9869, %v14071_v13   ;;  %v5764_v13 = vunpack.c.l.bf16 %v5252_v60 }
 0xa05   :  { %v8777_v20 = vpack.c.b16 %v8457_v1, %v8456_v40  ;;  %v3705_v1 = vsub.f32 %v14215_v50, %v11262_v52  ;;  %v5244_v50 = vpack.c.bf16 %v4732_v0, %v4732_v0 }
 0xa06   :  { %v2548_v28 = vpop.permute.xlu1 %2547  ;;  %v6655_v40 = vmul.f32 1.442695, %v5764_v13  ;;  %v10708_v13 = vpop.eup %10707 }
 0xa07   :  { %v3718_v35 = vsub.f32 %v2548_v28, %v11262_v52  ;;  %9397 = vmatpush.bf16.msrb.mxu3 %v8777_v20  ;;  %v4217_v49 = vmul.f32 %v3705_v1, %v3705_v1  ;;  %v4218_v20 = vmul.f32 %v3706_v14, %v3706_v14  ;;  %v5759_v28 = vunpack.c.l.bf16 %v5247_v63 }
 0xa08   :  { %10709 = vpow2.f32 %v6655_v40  ;;  %v5756_v36 = vunpack.c.l.bf16 %v5244_v50 }
 0xa09   :  { %v4230_v6 = vmul.f32 %v3718_v35, %v3718_v35  ;;  %v4729_v35 = vmul.f32 -20000.0, %v4217_v49  ;;  %v6645_v1 = vmul.f32 1.442695, %v5759_v28  ;;  %v5755_v49 = vunpack.c.l.bf16 %v5243_v12 }
 0xa0a   :  { %v6639_v0 = vmul.f32 1.442695, %v5756_v36 }
 0xa0b   :  { %v4742_v46 = vmul.f32 -20000.0, %v4230_v6  ;;  %9872 = vset.pattern.permute.xlu2 %v11073_v4  ;;  %v4730_v6 = vmul.f32 -20000.0, %v4218_v20  ;;  %v5241_v57 = vpack.c.bf16 %v4729_v35, %v4729_v35  ;;  %v6637_v26 = vmul.f32 1.442695, %v5755_v49 }
 0xa0c   :  { %9871 = vset.pattern.permute.xlu1 %v14094_v11 }
 0xa0d   :  { %v5254_v51 = vpack.c.bf16 %v4742_v46, %v4742_v46  ;;  %v7301_v46 = vpack.c.bf16 %v10708_v13, %v10708_v13  ;;  %v5242_v53 = vpack.c.bf16 %v4730_v6, %v4730_v6  ;;  %v5753_v47 = vunpack.c.l.bf16 %v5241_v57 }
 0xa0e   :  { %v10710_v44 = vpop.eup %10709 }
 0xa0f   :  { %v5766_v60 = vunpack.c.l.bf16 %v5254_v51  ;;  %v7300_v40 = vpack.c.bf16 %v10710_v44, %v10710_v44  ;;  %v8454_v31 = vunpack.c.l.b16 %v7301_v46  ;;  %v5754_v20 = vunpack.c.l.bf16 %v5242_v53 }
 0xa10   :  { %v6633_v16 = vmul.f32 1.442695, %v5753_v47 }
 0xa11   :  { %v6659_v8 = vmul.f32 1.442695, %v5766_v60  ;;  %v8452_v60 = vunpack.c.l.b16 %v7299_v62  ;;  %v8453_v28 = vunpack.c.l.b16 %v7300_v40  ;;  %v6635_v24 = vmul.f32 1.442695, %v5754_v20 }
 0xa13   :  { %10711 = vpow2.f32 %v6659_v8  ;;  %2675 = vperm.xlu2 %9872, %v14142_v15   ;;  %v8775_v13 = vpack.c.b16 %v8453_v28, %v8452_v60 }
 0xa14   :  { %10713 = vpow2.f32 %v6651_v33  ;;  %2669 = vperm.xlu1 %9871, %v14142_v15  }
 0xa15   :  { %10715 = vpow2.f32 %v6649_v18 }
 0xa16   :  { %10717 = vpow2.f32 %v6647_v61 }
 0xa17   :  { %10719 = vpow2.f32 %v6645_v1 }
 0xa18   :  { %10721 = vpow2.f32 %v6641_v58 }
 0xa19   :  { %v10712_v14 = vpop.eup %10711  ;;  %10723 = vpow2.f32 %v6643_v38 }
 0xa1a   :  { %v10714_v63 = vpop.eup %10713  ;;  %v7302_v32 = vpack.c.bf16 %v10712_v14, %v10712_v14  ;;  %10725 = vpow2.f32 %v6639_v0 }
 0xa1b   :  { %v10716_v51 = vpop.eup %10715  ;;  %9874 = vset.pattern.permute.xlu2 %v11092_v9  ;;  %v7298_v8 = vpack.c.bf16 %v10714_v63, %v10714_v63  ;;  %10727 = vpow2.f32 %v6637_v26 }
 0xa1c   :  { %9873 = vset.pattern.permute.xlu1 %v14158_v21  ;;  %v8455_v25 = vunpack.c.l.b16 %v7302_v32  ;;  %v10718_v7 = vpop.eup %10717  ;;  %v7297_v18 = vpack.c.bf16 %v10716_v51, %v10716_v51  ;;  %10729 = vpow2.f32 %v6633_v16 }
 0xa1d   :  { %v10720_v35 = vpop.eup %10719  ;;  %v7296_v41 = vpack.c.bf16 %v10718_v7, %v10718_v7  ;;  %v8451_v50 = vunpack.c.l.b16 %v7298_v8  ;;  %10731 = vpow2.f32 %v6635_v24  ;;  %v13337_v8 = vpop.permute.xlu1 %2566 }
 0xa1e   :  { %v8776_v33 = vpack.c.b16 %v8455_v25, %v8454_v31  ;;  %v10722_v61 = vpop.eup %10721  ;;  %v8450_v6 = vunpack.c.l.b16 %v7297_v18  ;;  %v7295_v1 = vpack.c.bf16 %v10720_v35, %v10720_v35  ;;  %v13333_v18 = vpop.permute.xlu2 %2572 }
 0xa1f   :  { %v10724_v44 = vpop.eup %10723  ;;  %v7293_v57 = vpack.c.bf16 %v10722_v61, %v10722_v61  ;;  %v8449_v58 = vunpack.c.l.b16 %v7296_v41 }
 0xa20   :  { %9398 = vmatpush.bf16.msrb.mxu3 %v8776_v33  ;;  %v8774_v12 = vpack.c.b16 %v8451_v50, %v8450_v6  ;;  %v8448_v38 = vunpack.c.l.b16 %v7295_v1  ;;  %v7294_v46 = vpack.c.bf16 %v10724_v44, %v10724_v44  ;;  %v10726_v14 = vpop.eup %10725  ;;  %v14216_v50 = vld [vmem:[#allocation34_spill] sm:$0xff] }
 0xa21   :  { %v10728_v62 = vpop.eup %10727  ;;  %v8446_v63 = vunpack.c.l.b16 %v7293_v57  ;;  %v7292_v40 = vpack.c.bf16 %v10726_v14, %v10726_v14  ;;  %v3735_v1 = vsub.f32 %v14216_v50, %v11262_v52 }
 0xa22   :  { %v10730_v53 = vpop.eup %10729  ;;  %v8773_v36 = vpack.c.b16 %v8449_v58, %v8448_v38  ;;  %v8447_v32 = vunpack.c.l.b16 %v7294_v46  ;;  %v7291_v49 = vpack.c.bf16 %v10728_v62, %v10728_v62  ;;  %v47_v38 = vadd.s32 2048, %v14153_v17 }
 0xa23   :  { %2693 = vperm.xlu2 %9874, %v14142_v15   ;;  %v10732_v51 = vpop.eup %10731  ;;  %v8445_v31 = vunpack.c.l.b16 %v7292_v40  ;;  %v7289_v25 = vpack.c.bf16 %v10730_v53, %v10730_v53  ;;  %v4247_v44 = vmul.f32 %v3735_v1, %v3735_v1  ;;  %v48_v58 = vadd.s32 2176, %v14153_v17 }
 0xa24   :  { %2687 = vperm.xlu1 %9873, %v14142_v15   ;;  %9399 = vmatpush.bf16.msrb.mxu3 %v8775_v13  ;;  %v8772_v47 = vpack.c.b16 %v8447_v32, %v8446_v63  ;;  %v7290_v60 = vpack.c.bf16 %v10732_v51, %v10732_v51  ;;  %v8444_v20 = vunpack.c.l.b16 %v7291_v49  ;;  %vm80_vm0 = vcmp.ge.s32.totalorder %v47_v38, %v12326_v48 }
 0xa25   :  { %v8442_v7 = vunpack.c.l.b16 %v7289_v25  ;;  %v4759_v46 = vmul.f32 -20000.0, %v4247_v44  ;;  %vm81_vm1 = vcmp.ge.s32.totalorder %v48_v58, %v12326_v48  ;;  %vm113_vm2 = vcmp.lt.s32.totalorder %v47_v38, %v12330_v30  ;;  %v14218_v38 = vld [vmem:[#allocation45_spill] sm:$0xff] }
 0xa26   :  { %v8771_v0 = vpack.c.b16 %v8445_v31, %v8444_v20  ;;  %v8443_v33 = vunpack.c.l.b16 %v7290_v60  ;;  %v13339_v35 = vpop.permute.xlu2 %2584  ;;  %v13343_v26 = vpop.permute.xlu1 %2578  ;;  %vm114_vm3 = vcmp.lt.s32.totalorder %v48_v58, %v12330_v30  ;;  %vm145_vm4 = vmand %vm80_vm0, %vm113_vm2 }
 0xa27   :  { %vm146_vm5 = vmand %vm81_vm1, %vm114_vm3  ;;  %v5271_v63 = vpack.c.bf16 %v4759_v46, %v4759_v46 }
 0xa28   :  { %9400 = vmatpush.bf16.msrb.mxu3 %v8774_v12  ;;  %v8770_v28 = vpack.c.b16 %v8443_v33, %v8442_v7  ;;  %v178_v32 = vsel %vm146_vm5, 1.0, %v14166_v59 }
 0xa29   :  { %v5783_v20 = vunpack.c.l.bf16 %v5271_v63 }
 0xa2b   :  { %9876 = vset.pattern.permute.xlu2 %v11067_v2  ;;  %v6693_v44 = vmul.f32 1.442695, %v5783_v20 }
 0xa2c   :  { %9875 = vset.pattern.permute.xlu1 %v14083_v5  ;;  %9401 = vmatpush.bf16.msrb.mxu3 %v8773_v36  ;;  %v177_v36 = vsel %vm145_vm4, 1.0, %v14166_v59 }
 0xa2d   :  { %v13372_v49 = vpack.c.bf16 %v178_v32, %v177_v36  ;;  %10733 = vpow2.f32 %v6693_v44 }
 0xa2e   :  { %v2603_v16 = vpop.permute.xlu2 %2602 }
 0xa2f   :  { %v7482_v60 = vunpack.c.l.b16 %v13372_v49 }
 0xa30   :  { %9402 = vmatpush.bf16.msrb.mxu3 %v8772_v47 }
 0xa33   :  { %2705 = vperm.xlu2 %9876, %v14142_v15  }
 0xa34   :  { %2699 = vperm.xlu1 %9875, %v14142_v15   ;;  %9403 = vmatpush.bf16.msrb.mxu3 %v8771_v0 }
 0xa36   :  { %v13347_v24 = vpop.permute.xlu1 %2596  ;;  %v2615_v41 = vpop.permute.xlu2 %2614 }
 0xa37   :  { %v3729_v0 = vsub.f32 %v2615_v41, %v11262_v52 }
 0xa38   :  { %9404 = vmatpush.bf16.msrb.mxu3 %v8770_v28  ;;  %v7514_v28 = vpack.c.b16 %v7482_v60, %v7482_v60 }
 0xa3a   :  { %9314 = vmatmul.bf16.vlgmr.msra.gmra.mxu0 %v7514_v28 }
 0xa3b   :  { %9879 = vset.pattern.permute.xlu2 %v14148_v54 }
 0xa3c   :  { %9878 = vset.pattern.permute.xlu1 %v14159_v37 }
 0xa3e   :  { %v2633_v13 = vpop.permute.xlu2 %2632 }
 0xa3f   :  { %v3732_v40 = vsub.f32 %v2633_v13, %v11262_v52 }
 0xa41   :  { %v4244_v7 = vmul.f32 %v3732_v40, %v3732_v40 }
 0xa43   :  { %2723 = vperm.xlu2 %9879, %v14142_v15   ;;  %v4756_v58 = vmul.f32 -20000.0, %v4244_v7 }
 0xa44   :  { %2717 = vperm.xlu1 %9878, %v14142_v15  }
 0xa46   :  { %v2609_v61 = vpop.permute.xlu1 %2608 }
 0xa47   :  { %v3728_v41 = vsub.f32 %v2609_v61, %v11262_v52 }
 0xa49   :  { %v4240_v60 = vmul.f32 %v3728_v41, %v3728_v41 }
 0xa4b   :  { %9881 = vset.pattern.permute.xlu2 %v14151_v29 }
 0xa4c   :  { %9880 = vset.pattern.permute.xlu1 %v14147_v56 }
 0xa4d   :  { %v2645_v57 = vpop.permute.xlu2 %2644 }
 0xa4e   :  { %v3734_v14 = vsub.f32 %v2645_v57, %v11262_v52  ;;  %v2591_v57 = vpop.permute.xlu0 %2590 }
 0xa4f   :  { %v3725_v36 = vsub.f32 %v2591_v57, %v11262_v52 }
 0xa50   :  { %v4246_v51 = vmul.f32 %v3734_v14, %v3734_v14 }
 0xa51   :  { %v4237_v28 = vmul.f32 %v3725_v36, %v3725_v36 }
 0xa52   :  { %v4758_v33 = vmul.f32 -20000.0, %v4246_v51  ;;  %v3726_v51 = vsub.f32 %v13347_v24, %v11262_v52 }
 0xa53   :  { %2735 = vperm.xlu2 %9881, %v14142_v15  }
 0xa54   :  { %2729 = vperm.xlu1 %9880, %v14142_v15   ;;  %v5270_v46 = vpack.c.bf16 %v4758_v33, %v4758_v33  ;;  %v3724_v33 = vsub.f32 %v13339_v35, %v11262_v52  ;;  %v4238_v44 = vmul.f32 %v3726_v51, %v3726_v51 }
 0xa56   :  { %v2627_v6 = vpop.permute.xlu1 %2626 }
 0xa57   :  { %v3731_v47 = vsub.f32 %v2627_v6, %v11262_v52  ;;  %v4241_v6 = vmul.f32 %v3729_v0, %v3729_v0 }
 0xa59   :  { %v4243_v50 = vmul.f32 %v3731_v47, %v3731_v47  ;;  %v4753_v47 = vmul.f32 -20000.0, %v4241_v6 }
 0xa5b   :  { %9883 = vset.pattern.permute.xlu2 %v14152_v34  ;;  %v5265_v57 = vpack.c.bf16 %v4753_v47, %v4753_v47 }
 0xa5c   :  { %9882 = vset.pattern.permute.xlu1 %v14160_v43 }
 0xa5d   :  { %v2664_v14 = vpop.permute.xlu2 %2663  ;;  %v5777_v51 = vunpack.c.l.bf16 %v5265_v57 }
 0xa5e   :  { %v3737_v40 = vsub.f32 %v2664_v14, %v11262_v52 }
 0xa60   :  { %v4249_v24 = vmul.f32 %v3737_v40, %v3737_v40  ;;  %v4750_v40 = vmul.f32 -20000.0, %v4238_v44  ;;  %v6681_v44 = vmul.f32 1.442695, %v5777_v51 }
 0xa63   :  { %2753 = vperm.xlu2 %9883, %v14142_v15  }
 0xa64   :  { %2747 = vperm.xlu1 %9882, %v14142_v15   ;;  %v14217_v15 = vld [vmem:[#allocation106_spill] sm:$0xff] }
 0xa65   :  { %v3730_v53 = vsub.f32 %v14217_v15, %v11262_v52 }
 0xa66   :  { %v2639_v12 = vpop.permute.xlu1 %2638 }
 0xa67   :  { %v3733_v62 = vsub.f32 %v2639_v12, %v11262_v52  ;;  %v4242_v25 = vmul.f32 %v3730_v53, %v3730_v53  ;;  %v3727_v12 = vsub.f32 %v2603_v16, %v11262_v52 }
 0xa69   :  { %v4245_v31 = vmul.f32 %v3733_v62, %v3733_v62  ;;  %v4754_v13 = vmul.f32 -20000.0, %v4242_v25  ;;  %v4755_v62 = vmul.f32 -20000.0, %v4243_v50  ;;  %v4239_v32 = vmul.f32 %v3727_v12, %v3727_v12 }
 0xa6a   :  { %v5782_v25 = vunpack.c.l.bf16 %v5270_v46  ;;  %v3723_v50 = vsub.f32 %v13343_v26, %v11262_v52  ;;  %v4752_v46 = vmul.f32 -20000.0, %v4240_v60  ;;  %v3721_v26 = vsub.f32 %v13337_v8, %v11262_v52 }
 0xa6b   :  { %9885 = vset.pattern.permute.xlu2 %v14094_v11  ;;  %v4757_v1 = vmul.f32 -20000.0, %v4245_v31  ;;  %v5266_v53 = vpack.c.bf16 %v4754_v13, %v4754_v13  ;;  %v5268_v31 = vpack.c.bf16 %v4756_v58, %v4756_v58  ;;  %v5267_v61 = vpack.c.bf16 %v4755_v62, %v4755_v62  ;;  %v10734_v58 = vpop.eup %10733 }
 0xa6c   :  { %9884 = vset.pattern.permute.xlu1 %v14136_v23  ;;  %v6691_v6 = vmul.f32 1.442695, %v5782_v25  ;;  %v3722_v62 = vsub.f32 %v13333_v18, %v11262_v52  ;;  %v4235_v36 = vmul.f32 %v3723_v50, %v3723_v50 }
 0xa6d   :  { %v5269_v15 = vpack.c.bf16 %v4757_v1, %v4757_v1  ;;  %v5778_v7 = vunpack.c.l.bf16 %v5266_v53  ;;  %v4751_v1 = vmul.f32 -20000.0, %v4239_v32  ;;  %v5780_v12 = vunpack.c.l.bf16 %v5268_v31 }
 0xa6e   :  { %v5779_v14 = vunpack.c.l.bf16 %v5267_v61  ;;  %v4749_v53 = vmul.f32 -20000.0, %v4237_v28  ;;  %10735 = vpow2.f32 %v6691_v6  ;;  %v5264_v31 = vpack.c.bf16 %v4752_v46, %v4752_v46 }
 0xa6f   :  { %v5781_v20 = vunpack.c.l.bf16 %v5269_v15  ;;  %v4236_v15 = vmul.f32 %v3724_v33, %v3724_v33  ;;  %v6687_v47 = vmul.f32 1.442695, %v5780_v12  ;;  %v7319_v61 = vpack.c.bf16 %v10734_v58, %v10734_v58 }
 0xa70   :  { %v6685_v25 = vmul.f32 1.442695, %v5779_v14  ;;  %v4234_v18 = vmul.f32 %v3722_v62, %v3722_v62  ;;  %v4747_v33 = vmul.f32 -20000.0, %v4235_v36  ;;  %v5261_v28 = vpack.c.bf16 %v4749_v53, %v4749_v53 }
 0xa71   :  { %v6689_v41 = vmul.f32 1.442695, %v5781_v20  ;;  %v6683_v20 = vmul.f32 1.442695, %v5778_v7 }
 0xa72   :  { %v4746_v7 = vmul.f32 -20000.0, %v4234_v18  ;;  %v5259_v62 = vpack.c.bf16 %v4747_v33, %v4747_v33 }
 0xa73   :  { %2766 = vperm.xlu2 %9885, %v14218_v38   ;;  %10737 = vpow2.f32 %v6689_v41 }
 0xa74   :  { %2760 = vperm.xlu1 %9884, %v14218_v38   ;;  %v10736_v57 = vpop.eup %10735 }
 0xa75   :  { %v7318_v51 = vpack.c.bf16 %v10736_v57, %v10736_v57 }
 0xa76   :  { %v2657_v63 = vpop.permute.xlu1 %2656 }
 0xa77   :  { %v3736_v16 = vsub.f32 %v2657_v63, %v11262_v52  ;;  %v5263_v63 = vpack.c.bf16 %v4751_v1, %v4751_v1  ;;  %v5262_v1 = vpack.c.bf16 %v4750_v40, %v4750_v40  ;;  %v5258_v40 = vpack.c.bf16 %v4746_v7, %v4746_v7 }
 0xa79   :  { %v4248_v0 = vmul.f32 %v3736_v16, %v3736_v16  ;;  %v4761_v16 = vmul.f32 -20000.0, %v4249_v24  ;;  %v5775_v50 = vunpack.c.l.bf16 %v5263_v63  ;;  %v5776_v24 = vunpack.c.l.bf16 %v5264_v31  ;;  %v10738_v6 = vpop.eup %10737 }
 0xa7a   :  { %v5774_v36 = vunpack.c.l.bf16 %v5262_v1 }
 0xa7b   :  { %v4760_v13 = vmul.f32 -20000.0, %v4248_v0  ;;  %9888 = vset.pattern.permute.xlu2 %v14158_v21  ;;  %v4233_v0 = vmul.f32 %v3721_v26, %v3721_v26  ;;  %v5273_v8 = vpack.c.bf16 %v4761_v16, %v4761_v16  ;;  %v5773_v26 = vunpack.c.l.bf16 %v5261_v28 }
 0xa7c   :  { %9887 = vset.pattern.permute.xlu1 %v11095_v10  ;;  %v6679_v63 = vmul.f32 1.442695, %v5776_v24  ;;  %v6675_v28 = vmul.f32 1.442695, %v5774_v36 }
 0xa7d   :  { %v5272_v35 = vpack.c.bf16 %v4760_v13, %v4760_v13  ;;  %v4748_v13 = vmul.f32 -20000.0, %v4236_v15  ;;  %v4745_v58 = vmul.f32 -20000.0, %v4233_v0  ;;  %v5785_v14 = vunpack.c.l.bf16 %v5273_v8 }
 0xa7e   :  { %v6677_v15 = vmul.f32 1.442695, %v5775_v50  ;;  %v6673_v8 = vmul.f32 1.442695, %v5773_v26 }
 0xa7f   :  { %v5784_v32 = vunpack.c.l.bf16 %v5272_v35  ;;  %v5260_v46 = vpack.c.bf16 %v4748_v13, %v4748_v13  ;;  %v8472_v35 = vunpack.c.l.b16 %v7319_v61  ;;  %v6697_v18 = vmul.f32 1.442695, %v5785_v14 }
 0xa80   :  { %v5771_v13 = vunpack.c.l.bf16 %v5259_v62 }
 0xa81   :  { %v6695_v60 = vmul.f32 1.442695, %v5784_v32 }
 0xa82   :  { %v6669_v62 = vmul.f32 1.442695, %v5771_v13 }
 0xa83   :  { %10739 = vpow2.f32 %v6695_v60  ;;  %2784 = vperm.xlu2 %9888, %v14218_v38   ;;  %v5257_v60 = vpack.c.bf16 %v4745_v58, %v4745_v58 }
 0xa84   :  { %10741 = vpow2.f32 %v6687_v47  ;;  %2778 = vperm.xlu1 %9887, %v14218_v38   ;;  %v7317_v47 = vpack.c.bf16 %v10738_v6, %v10738_v6 }
 0xa85   :  { %10743 = vpow2.f32 %v6685_v25 }
 0xa86   :  { %10745 = vpow2.f32 %v6683_v20  ;;  %v2670_v12 = vpop.permute.xlu1 %2669  ;;  %v5772_v20 = vunpack.c.l.bf16 %v5260_v46  ;;  %v8470_v57 = vunpack.c.l.b16 %v7317_v47  ;;  %v5770_v46 = vunpack.c.l.bf16 %v5258_v40 }
 0xa87   :  { %v3738_v41 = vsub.f32 %v2670_v12, %v11262_v52  ;;  %10747 = vpow2.f32 %v6681_v44  ;;  %v8471_v44 = vunpack.c.l.b16 %v7318_v51 }
 0xa88   :  { %10749 = vpow2.f32 %v6677_v15  ;;  %v6671_v14 = vmul.f32 1.442695, %v5772_v20  ;;  %v13403_v20 = vpop.permute.xlu2 %2675 }
 0xa89   :  { %v10740_v53 = vpop.eup %10739  ;;  %v4250_v32 = vmul.f32 %v3738_v41, %v3738_v41  ;;  %10751 = vpow2.f32 %v6679_v63  ;;  %v5769_v41 = vunpack.c.l.bf16 %v5257_v60 }
 0xa8a   :  { %v10742_v16 = vpop.eup %10741  ;;  %v7320_v31 = vpack.c.bf16 %v10740_v53, %v10740_v53  ;;  %10753 = vpow2.f32 %v6697_v18 }
 0xa8b   :  { %v10744_v25 = vpop.eup %10743  ;;  %v4762_v0 = vmul.f32 -20000.0, %v4250_v32  ;;  %9890 = vset.pattern.permute.xlu2 %v14083_v5  ;;  %v7316_v50 = vpack.c.bf16 %v10742_v16, %v10742_v16  ;;  %10755 = vpow2.f32 %v6673_v8  ;;  %v8784_v32 = vpack.c.b16 %v8471_v44, %v8470_v57 }
 0xa8c   :  { %v10746_v61 = vpop.eup %10745  ;;  %v8473_v33 = vunpack.c.l.b16 %v7320_v31  ;;  %9889 = vset.pattern.permute.xlu1 %v11092_v9  ;;  %v7315_v24 = vpack.c.bf16 %v10744_v25, %v10744_v25  ;;  %10757 = vpow2.f32 %v6675_v28  ;;  %v6665_v51 = vmul.f32 1.442695, %v5769_v41 }
 0xa8d   :  { %v5274_v1 = vpack.c.bf16 %v4762_v0, %v4762_v0  ;;  %v10748_v12 = vpop.eup %10747  ;;  %v7314_v58 = vpack.c.bf16 %v10746_v61, %v10746_v61  ;;  %v8469_v36 = vunpack.c.l.b16 %v7316_v50 }
 0xa8e   :  { %v8785_v7 = vpack.c.b16 %v8473_v33, %v8472_v35  ;;  %v10750_v15 = vpop.eup %10749  ;;  %v7313_v53 = vpack.c.bf16 %v10748_v12, %v10748_v12  ;;  %v8468_v63 = vunpack.c.l.b16 %v7315_v24  ;;  %v6667_v35 = vmul.f32 1.442695, %v5770_v46 }
 0xa8f   :  { %v5786_v6 = vunpack.c.l.bf16 %v5274_v1  ;;  %v10752_v16 = vpop.eup %10751  ;;  %v8467_v31 = vunpack.c.l.b16 %v7314_v58  ;;  %v7311_v61 = vpack.c.bf16 %v10750_v15, %v10750_v15 }
 0xa90   :  { %9410 = vmatpush.bf16.msra.mxu0 %v8785_v7  ;;  %v10754_v40 = vpop.eup %10753  ;;  %v7312_v25 = vpack.c.bf16 %v10752_v16, %v10752_v16  ;;  %v8466_v60 = vunpack.c.l.b16 %v7313_v53  ;;  %v8783_v18 = vpack.c.b16 %v8469_v36, %v8468_v63  ;;  %v13413_v36 = vpop.permute.xlu2 %2693 }
 0xa91   :  { %v6699_v26 = vmul.f32 1.442695, %v5786_v6  ;;  %v10756_v47 = vpop.eup %10755  ;;  %v7321_v13 = vpack.c.bf16 %v10754_v40, %v10754_v40  ;;  %v8464_v7 = vunpack.c.l.b16 %v7311_v61 }
 0xa92   :  { %v10758_v0 = vpop.eup %10757  ;;  %v7309_v33 = vpack.c.bf16 %v10756_v47, %v10756_v47  ;;  %v8465_v50 = vunpack.c.l.b16 %v7312_v25  ;;  %v8782_v24 = vpack.c.b16 %v8467_v31, %v8466_v60 }
 0xa93   :  { %10759 = vpow2.f32 %v6699_v26  ;;  %2796 = vperm.xlu2 %9890, %v14218_v38   ;;  %v7310_v44 = vpack.c.bf16 %v10758_v0, %v10758_v0  ;;  %v13406_v12 = vunpack.c.l.b16 %v7321_v13 }
 0xa94   :  { %10761 = vpow2.f32 %v6671_v14  ;;  %2790 = vperm.xlu1 %9889, %v14218_v38   ;;  %9411 = vmatpush.bf16.msra.mxu0 %v8784_v32  ;;  %v8462_v58 = vunpack.c.l.b16 %v7309_v33  ;;  %v8781_v41 = vpack.c.b16 %v8465_v50, %v8464_v7  ;;  %v14219_v50 = vld [vmem:[#allocation32_spill] sm:$0xff] }
 0xa95   :  { %10763 = vpow2.f32 %v6669_v62  ;;  %v8463_v62 = vunpack.c.l.b16 %v7310_v44 }
 0xa96   :  { %10765 = vpow2.f32 %v6667_v35  ;;  %v2688_v0 = vpop.permute.xlu1 %2687 }
 0xa97   :  { %10767 = vpow2.f32 %v6665_v51  ;;  %v8780_v32 = vpack.c.b16 %v8463_v62, %v8462_v58  ;;  %v7483_v62 = vunpack.c.h.b16 %v13372_v49  ;;  %v14221_v49 = vld [vmem:[#allocation63_spill] sm:$0xff] }
 0xa98   :  { %9412 = vmatpush.bf16.msra.mxu0 %v8783_v18  ;;  %v2706_v25 = vpop.permute.xlu2 %2705 }
 0xa99   :  { %v10760_v8 = vpop.eup %10759 }
 0xa9a   :  { %v10762_v28 = vpop.eup %10761  ;;  %v7322_v1 = vpack.c.bf16 %v10760_v8, %v10760_v8 }
 0xa9b   :  { %v10764_v57 = vpop.eup %10763  ;;  %9892 = vset.pattern.permute.xlu2 %v14159_v37  ;;  %v7308_v46 = vpack.c.bf16 %v10762_v28, %v10762_v28 }
 0xa9c   :  { %v13408_v6 = vunpack.c.l.b16 %v7322_v1  ;;  %9891 = vset.pattern.permute.xlu1 %v11171_v27  ;;  %9413 = vmatpush.bf16.msra.mxu0 %v8782_v24  ;;  %v10766_v14 = vpop.eup %10765  ;;  %v7307_v26 = vpack.c.bf16 %v10764_v57, %v10764_v57  ;;  %v3750_v1 = vsub.f32 %v14219_v50, %v11262_v52 }
 0xa9d   :  { %v10768_v53 = vpop.eup %10767  ;;  %v7306_v63 = vpack.c.bf16 %v10766_v14, %v10766_v14  ;;  %v8461_v35 = vunpack.c.l.b16 %v7308_v46  ;;  %v13431_v46 = vpop.permute.xlu0 %3075 }
 0xa9e   :  { %v8786_v15 = vpack.c.b16 %v13408_v6, %v13406_v12  ;;  %v8460_v16 = vunpack.c.l.b16 %v7307_v26  ;;  %v7305_v40 = vpack.c.bf16 %v10768_v53, %v10768_v53  ;;  %v4262_v57 = vmul.f32 %v3750_v1, %v3750_v1  ;;  %v14220_v26 = vld [vmem:[#allocation55_spill] sm:$0xff] }
 0xa9f   :  { %v8459_v31 = vunpack.c.l.b16 %v7306_v63  ;;  %v3745_v53 = vsub.f32 %v14220_v26, %v11262_v52 }
 0xaa0   :  { %9414 = vmatpush.bf16.msra.mxu0 %v8781_v41  ;;  %v8779_v51 = vpack.c.b16 %v8461_v35, %v8460_v16  ;;  %v8458_v47 = vunpack.c.l.b16 %v7305_v40  ;;  %v2724_v18 = vpop.permute.xlu2 %2723  ;;  %v4774_v63 = vmul.f32 -20000.0, %v4262_v57  ;;  %v7515_v16 = vpack.c.b16 %v7483_v62, %v7483_v62 }
 0xaa2   :  { %v8778_v60 = vpack.c.b16 %v8459_v31, %v8458_v47  ;;  %9327 = vmatmul.bf16.vlgmr.msra.gmra.mxu1 %v7515_v16  ;;  %v4257_v31 = vmul.f32 %v3745_v53, %v3745_v53 }
 0xaa3   :  { %2814 = vperm.xlu2 %9892, %v14218_v38  }
 0xaa4   :  { %2808 = vperm.xlu1 %9891, %v14218_v38   ;;  %9415 = vmatpush.bf16.msra.mxu0 %v8780_v32  ;;  %v3747_v32 = vsub.f32 %v2724_v18, %v11262_v52  ;;  %v4769_v57 = vmul.f32 -20000.0, %v4257_v31  ;;  %v3739_v31 = vsub.f32 %v13403_v20, %v11262_v52 }
 0xaa6   :  { %v2700_v13 = vpop.permute.xlu1 %2699  ;;  %v4251_v20 = vmul.f32 %v3739_v31, %v3739_v31 }
 0xaa7   :  { %v3743_v50 = vsub.f32 %v2700_v13, %v11262_v52  ;;  %v3741_v13 = vsub.f32 %v2688_v0, %v11262_v52 }
 0xaa8   :  { %9416 = vmatpush.bf16.msra.mxu0 %v8779_v51 }
 0xaa9   :  { %v4255_v53 = vmul.f32 %v3743_v50, %v3743_v50  ;;  %v4253_v0 = vmul.f32 %v3741_v13, %v3741_v13 }
 0xaab   :  { %9894 = vset.pattern.permute.xlu2 %v14147_v56  ;;  %v4767_v50 = vmul.f32 -20000.0, %v4255_v53 }
 0xaac   :  { %9893 = vset.pattern.permute.xlu1 %v14148_v54  ;;  %9417 = vmatpush.bf16.msra.mxu0 %v8778_v60  ;;  %v5286_v60 = vpack.c.bf16 %v4774_v63, %v4774_v63 }
 0xaad   :  { %v2736_v61 = vpop.permute.xlu2 %2735 }
 0xaae   :  { %v3749_v24 = vsub.f32 %v2736_v61, %v11262_v52 }
 0xab0   :  { %v4261_v58 = vmul.f32 %v3749_v24, %v3749_v24 }
 0xab2   :  { %v4773_v40 = vmul.f32 -20000.0, %v4261_v58 }
 0xab3   :  { %2826 = vperm.xlu2 %9894, %v14218_v38  }
 0xab4   :  { %2820 = vperm.xlu1 %9893, %v14218_v38   ;;  %v5285_v24 = vpack.c.bf16 %v4773_v40, %v4773_v40 }
 0xab6   :  { %v2718_v8 = vpop.permute.xlu1 %2717 }
 0xab7   :  { %v3746_v35 = vsub.f32 %v2718_v8, %v11262_v52 }
 0xab9   :  { %v4258_v1 = vmul.f32 %v3746_v35, %v3746_v35 }
 0xabb   :  { %9897 = vset.pattern.permute.xlu2 %v14160_v43  ;;  %v4770_v63 = vmul.f32 -20000.0, %v4258_v1 }
 0xabc   :  { %9896 = vset.pattern.permute.xlu1 %v14072_v45 }
 0xabd   :  { %v2754_v33 = vpop.permute.xlu2 %2753  ;;  %v5282_v1 = vpack.c.bf16 %v4770_v63, %v4770_v63 }
 0xabe   :  { %v3752_v28 = vsub.f32 %v2754_v33, %v11262_v52  ;;  %v3744_v33 = vsub.f32 %v2706_v25, %v11262_v52  ;;  %v3742_v25 = vsub.f32 %v13413_v36, %v11262_v52 }
 0xabf   :  { %v5794_v13 = vunpack.c.l.bf16 %v5282_v1 }
 0xac0   :  { %v4264_v44 = vmul.f32 %v3752_v28, %v3752_v28  ;;  %v4259_v28 = vmul.f32 %v3747_v32, %v3747_v32 }
 0xac2   :  { %v4776_v41 = vmul.f32 -20000.0, %v4264_v44  ;;  %v4771_v62 = vmul.f32 -20000.0, %v4259_v28 }
 0xac3   :  { %2844 = vperm.xlu2 %9897, %v14218_v38  }
 0xac4   :  { %2838 = vperm.xlu1 %9896, %v14218_v38   ;;  %v5288_v47 = vpack.c.bf16 %v4776_v41, %v4776_v41  ;;  %v4256_v41 = vmul.f32 %v3744_v33, %v3744_v33  ;;  %v5283_v33 = vpack.c.bf16 %v4771_v62, %v4771_v62  ;;  %v4765_v62 = vmul.f32 -20000.0, %v4253_v0 }
 0xac6   :  { %v2730_v7 = vpop.permute.xlu1 %2729  ;;  %v5800_v8 = vunpack.c.l.bf16 %v5288_v47 }
 0xac7   :  { %v3748_v14 = vsub.f32 %v2730_v7, %v11262_v52  ;;  %v5798_v7 = vunpack.c.l.bf16 %v5286_v60  ;;  %v4254_v60 = vmul.f32 %v3742_v25, %v3742_v25 }
 0xac8   :  { %v6727_v16 = vmul.f32 1.442695, %v5800_v8 }
 0xac9   :  { %v4260_v51 = vmul.f32 %v3748_v14, %v3748_v14  ;;  %v2682_v14 = vpop.permute.xlu0 %2681  ;;  %v6723_v47 = vmul.f32 1.442695, %v5798_v7  ;;  %v4766_v7 = vmul.f32 -20000.0, %v4254_v60  ;;  %v5277_v60 = vpack.c.bf16 %v4765_v62, %v4765_v62 }
 0xaca   :  { %v3740_v36 = vsub.f32 %v2682_v14, %v11262_v52  ;;  %10769 = vpow2.f32 %v6727_v16  ;;  %v5795_v14 = vunpack.c.l.bf16 %v5283_v33 }
 0xacb   :  { %9899 = vset.pattern.permute.xlu2 %v14136_v23  ;;  %v4772_v18 = vmul.f32 -20000.0, %v4260_v51  ;;  %v5281_v51 = vpack.c.bf16 %v4769_v57, %v4769_v57  ;;  %10771 = vpow2.f32 %v6723_v47  ;;  %v5278_v16 = vpack.c.bf16 %v4766_v7, %v4766_v7 }
 0xacc   :  { %9898 = vset.pattern.permute.xlu1 %v14152_v34 }
 0xacd   :  { %v2767_v61 = vpop.permute.xlu2 %2766  ;;  %v5284_v32 = vpack.c.bf16 %v4772_v18, %v4772_v18  ;;  %v5793_v57 = vunpack.c.l.bf16 %v5281_v51 }
 0xace   :  { %v3754_v44 = vsub.f32 %v2767_v61, %v11262_v52  ;;  %v4768_v61 = vmul.f32 -20000.0, %v4256_v41  ;;  %v4252_v41 = vmul.f32 %v3740_v36, %v3740_v36 }
 0xacf   :  { %v5796_v18 = vunpack.c.l.bf16 %v5284_v32  ;;  %v6713_v47 = vmul.f32 1.442695, %v5793_v57  ;;  %v5789_v57 = vunpack.c.l.bf16 %v5277_v60 }
 0xad0   :  { %v4266_v40 = vmul.f32 %v3754_v44, %v3754_v44  ;;  %v10770_v32 = vpop.eup %10769  ;;  %v4764_v31 = vmul.f32 -20000.0, %v4252_v41 }
 0xad1   :  { %v6719_v53 = vmul.f32 1.442695, %v5796_v18  ;;  %v10772_v51 = vpop.eup %10771  ;;  %v7336_v1 = vpack.c.bf16 %v10770_v32, %v10770_v32  ;;  %v5790_v18 = vunpack.c.l.bf16 %v5278_v16  ;;  %v6705_v16 = vmul.f32 1.442695, %v5789_v57 }
 0xad2   :  { %v4778_v44 = vmul.f32 -20000.0, %v4266_v40  ;;  %v6717_v40 = vmul.f32 1.442695, %v5795_v14  ;;  %v7334_v14 = vpack.c.bf16 %v10772_v51, %v10772_v51 }
 0xad3   :  { %2857 = vperm.xlu2 %9899, %v14221_v49  }
 0xad4   :  { %2850 = vperm.xlu1 %9898, %v14218_v38   ;;  %v5797_v38 = vunpack.c.l.bf16 %v5285_v24  ;;  %v8487_v51 = vunpack.c.l.b16 %v7334_v14 }
 0xad6   :  { %v2748_v58 = vpop.permute.xlu1 %2747  ;;  %v6721_v24 = vmul.f32 1.442695, %v5797_v38  ;;  %v5290_v38 = vpack.c.bf16 %v4778_v44, %v4778_v44 }
 0xad7   :  { %v3751_v26 = vsub.f32 %v2748_v58, %v11262_v52  ;;  %v5280_v58 = vpack.c.bf16 %v4768_v61, %v4768_v61  ;;  %v6715_v61 = vmul.f32 1.442695, %v5794_v13  ;;  %v8489_v13 = vunpack.c.l.b16 %v7336_v1 }
 0xad8   :  { %10773 = vpow2.f32 %v6721_v24  ;;  %v5802_v33 = vunpack.c.l.bf16 %v5290_v38  ;;  %v6707_v38 = vmul.f32 1.442695, %v5790_v18 }
 0xad9   :  { %v4263_v35 = vmul.f32 %v3751_v26, %v3751_v26  ;;  %v5279_v26 = vpack.c.bf16 %v4767_v50, %v4767_v50 }
 0xadb   :  { %v4775_v28 = vmul.f32 -20000.0, %v4263_v35  ;;  %9902 = vset.pattern.permute.xlu2 %v11095_v10  ;;  %v4763_v35 = vmul.f32 -20000.0, %v4251_v20  ;;  %v5791_v36 = vunpack.c.l.bf16 %v5279_v26  ;;  %v5276_v20 = vpack.c.bf16 %v4764_v31, %v4764_v31 }
 0xadc   :  { %9901 = vset.pattern.permute.xlu1 %v11073_v4 }
 0xadd   :  { %v5287_v8 = vpack.c.bf16 %v4775_v28, %v4775_v28  ;;  %v5792_v28 = vunpack.c.l.bf16 %v5280_v58  ;;  %v5275_v50 = vpack.c.bf16 %v4763_v35, %v4763_v35  ;;  %v6709_v7 = vmul.f32 1.442695, %v5791_v36 }
 0xade   :  { %v10774_v0 = vpop.eup %10773  ;;  %v5788_v32 = vunpack.c.l.bf16 %v5276_v20 }
 0xadf   :  { %v5799_v25 = vunpack.c.l.bf16 %v5287_v8  ;;  %v6711_v8 = vmul.f32 1.442695, %v5792_v28  ;;  %v5787_v62 = vunpack.c.l.bf16 %v5275_v50  ;;  %v7333_v26 = vpack.c.bf16 %v10774_v0, %v10774_v0 }
 0xae0   :  { %v6703_v1 = vmul.f32 1.442695, %v5788_v32 }
 0xae1   :  { %v6725_v63 = vmul.f32 1.442695, %v5799_v25  ;;  %v6731_v25 = vmul.f32 1.442695, %v5802_v33  ;;  %v6701_v60 = vmul.f32 1.442695, %v5787_v62 }
 0xae3   :  { %10775 = vpow2.f32 %v6725_v63  ;;  %2875 = vperm.xlu2 %9902, %v14221_v49  }
 0xae4   :  { %2869 = vperm.xlu1 %9901, %v14221_v49   ;;  %10777 = vpow2.f32 %v6719_v53 }
 0xae5   :  { %10779 = vpow2.f32 %v6717_v40 }
 0xae6   :  { %v2761_v24 = vpop.permute.xlu1 %2760  ;;  %10781 = vpow2.f32 %v6713_v47 }
 0xae7   :  { %v3753_v44 = vsub.f32 %v2761_v24, %v11262_v52  ;;  %10783 = vpow2.f32 %v6715_v61  ;;  %v8486_v61 = vunpack.c.l.b16 %v7333_v26 }
 0xae8   :  { %10785 = vpow2.f32 %v6711_v8 }
 0xae9   :  { %v10776_v58 = vpop.eup %10775  ;;  %v4265_v41 = vmul.f32 %v3753_v44, %v3753_v44  ;;  %10787 = vpow2.f32 %v6709_v7  ;;  %v8792_v7 = vpack.c.b16 %v8487_v51, %v8486_v61 }
 0xaea   :  { %v7335_v53 = vpack.c.bf16 %v10776_v58, %v10776_v58  ;;  %v10778_v63 = vpop.eup %10777  ;;  %10789 = vpow2.f32 %v6731_v25 }
 0xaeb   :  { %v4777_v35 = vmul.f32 -20000.0, %v4265_v41  ;;  %9904 = vset.pattern.permute.xlu2 %v11092_v9  ;;  %v10780_v40 = vpop.eup %10779  ;;  %v7332_v36 = vpack.c.bf16 %v10778_v63, %v10778_v63  ;;  %10791 = vpow2.f32 %v6707_v38 }
 0xaec   :  { %v8488_v28 = vunpack.c.l.b16 %v7335_v53  ;;  %9903 = vset.pattern.permute.xlu1 %v14158_v21  ;;  %v10782_v31 = vpop.eup %10781  ;;  %10793 = vpow2.f32 %v6705_v16  ;;  %v7331_v24 = vpack.c.bf16 %v10780_v40, %v10780_v40 }
 0xaed   :  { %v5289_v47 = vpack.c.bf16 %v4777_v35, %v4777_v35  ;;  %v10784_v0 = vpop.eup %10783  ;;  %10795 = vpow2.f32 %v6701_v60  ;;  %v8485_v57 = vunpack.c.l.b16 %v7332_v36  ;;  %v7329_v25 = vpack.c.bf16 %v10782_v31, %v10782_v31 }
 0xaee   :  { %v8793_v33 = vpack.c.b16 %v8489_v13, %v8488_v28  ;;  %v10786_v18 = vpop.eup %10785  ;;  %v7330_v20 = vpack.c.bf16 %v10784_v0, %v10784_v0  ;;  %v8484_v14 = vunpack.c.l.b16 %v7331_v24 }
 0xaef   :  { %v5801_v50 = vunpack.c.l.bf16 %v5289_v47  ;;  %v10788_v44 = vpop.eup %10787  ;;  %v7328_v62 = vpack.c.bf16 %v10786_v18, %v10786_v18  ;;  %v8482_v32 = vunpack.c.l.b16 %v7329_v25 }
 0xaf0   :  { %9423 = vmatpush.bf16.msra.mxu1 %v8793_v33  ;;  %v10790_v58 = vpop.eup %10789  ;;  %v7327_v13 = vpack.c.bf16 %v10788_v44, %v10788_v44  ;;  %v8483_v53 = vunpack.c.l.b16 %v7330_v20  ;;  %v8791_v38 = vpack.c.b16 %v8485_v57, %v8484_v14 }
 0xaf1   :  { %v6729_v8 = vmul.f32 1.442695, %v5801_v50  ;;  %v10792_v41 = vpop.eup %10791  ;;  %v7338_v63 = vpack.c.bf16 %v10790_v58, %v10790_v58  ;;  %v8481_v51 = vunpack.c.l.b16 %v7328_v62  ;;  %v13470_v58 = vpop.permute.xlu2 %2784 }
 0xaf2   :  { %v10794_v26 = vpop.eup %10793  ;;  %v7326_v28 = vpack.c.bf16 %v10792_v41, %v10792_v41  ;;  %v8480_v60 = vunpack.c.l.b16 %v7327_v13  ;;  %v8790_v31 = vpack.c.b16 %v8483_v53, %v8482_v32  ;;  %v49_v53 = vadd.s32 2304, %v14153_v17 }
 0xaf3   :  { %10797 = vpow2.f32 %v6729_v8  ;;  %2887 = vperm.xlu2 %9904, %v14221_v49   ;;  %v10796_v35 = vpop.eup %10795  ;;  %v7325_v40 = vpack.c.bf16 %v10794_v26, %v10794_v26  ;;  %v13460_v36 = vunpack.c.l.b16 %v7338_v63  ;;  %v50_v63 = vadd.s32 2432, %v14153_v17 }
 0xaf4   :  { %10799 = vpow2.f32 %v6703_v1  ;;  %2881 = vperm.xlu1 %9903, %v14221_v49   ;;  %9424 = vmatpush.bf16.msra.mxu1 %v8792_v7  ;;  %v7323_v0 = vpack.c.bf16 %v10796_v35, %v10796_v35  ;;  %v8479_v1 = vunpack.c.l.b16 %v7326_v28  ;;  %v8789_v18 = vpack.c.b16 %v8481_v51, %v8480_v60 }
 0xaf5   :  { %v8478_v24 = vunpack.c.l.b16 %v7325_v40  ;;  %vm82_vm6 = vcmp.ge.s32.totalorder %v49_v53, %v12326_v48  ;;  %vm83_vm7 = vcmp.ge.s32.totalorder %v50_v63, %v12326_v48  ;;  %vm115_vm8 = vcmp.lt.s32.totalorder %v49_v53, %v12330_v30 }
 0xaf6   :  { %v8476_v44 = vunpack.c.l.b16 %v7323_v0  ;;  %v13479_v25 = vpop.permute.xlu1 %2778  ;;  %vm116_vm9 = vcmp.lt.s32.totalorder %v50_v63, %v12330_v30  ;;  %vm147_vm10 = vmand %vm82_vm6, %vm115_vm8  ;;  %v14223_v63 = vld [vmem:[#allocation85_spill] sm:$0xff] }
 0xaf7   :  { %v8788_v57 = vpack.c.b16 %v8479_v1, %v8478_v24  ;;  %vm148_vm11 = vmand %vm83_vm7, %vm116_vm9  ;;  %v179_v28 = vsel %vm147_vm10, 1.0, %v14166_v59 }
 0xaf8   :  { %9425 = vmatpush.bf16.msra.mxu1 %v8791_v38  ;;  %v180_v51 = vsel %vm148_vm11, 1.0, %v14166_v59 }
 0xaf9   :  { %v10798_v16 = vpop.eup %10797  ;;  %v2797_v14 = vpop.permute.xlu2 %2796  ;;  %v13508_v60 = vpack.c.bf16 %v180_v51, %v179_v28 }
 0xafa   :  { %v10800_v47 = vpop.eup %10799  ;;  %v7337_v61 = vpack.c.bf16 %v10798_v16, %v10798_v16 }
 0xafb   :  { %9906 = vset.pattern.permute.xlu2 %v11171_v27  ;;  %v7324_v50 = vpack.c.bf16 %v10800_v47, %v10800_v47 }
 0xafc   :  { %v13463_v33 = vunpack.c.l.b16 %v7337_v61  ;;  %9905 = vset.pattern.permute.xlu1 %v11067_v2  ;;  %9426 = vmatpush.bf16.msra.mxu1 %v8790_v31 }
 0xafd   :  { %v8477_v20 = vunpack.c.l.b16 %v7324_v50  ;;  %v7484_v50 = vunpack.c.l.b16 %v13508_v60 }
 0xaff   :  { %v8787_v7 = vpack.c.b16 %v8477_v20, %v8476_v44  ;;  %v7516_v20 = vpack.c.b16 %v7484_v50, %v7484_v50 }
 0xb00   :  { %9427 = vmatpush.bf16.msra.mxu1 %v8789_v18 }
 0xb01   :  { %v2815_v41 = vpop.permute.xlu2 %2814  ;;  %9340 = vmatmul.bf16.vlgmr.msra.gmra.mxu2 %v7516_v20 }
 0xb02   :  { %v3762_v24 = vsub.f32 %v2815_v41, %v11262_v52 }
 0xb03   :  { %2905 = vperm.xlu2 %9906, %v14221_v49  }
 0xb04   :  { %2899 = vperm.xlu1 %9905, %v14221_v49   ;;  %9428 = vmatpush.bf16.msra.mxu1 %v8788_v57 }
 0xb06   :  { %v13483_v62 = vpop.permute.xlu1 %2790 }
 0xb08   :  { %9429 = vmatpush.bf16.msra.mxu1 %v8787_v7 }
 0xb0b   :  { %9908 = vset.pattern.permute.xlu2 %v14148_v54 }
 0xb0c   :  { %9907 = vset.pattern.permute.xlu1 %v14159_v37  ;;  %9430 = vmatpush.bf16.msra.mxu1 %v8786_v15 }
 0xb0d   :  { %v2827_v6 = vpop.permute.xlu2 %2826 }
 0xb0e   :  { %v3764_v47 = vsub.f32 %v2827_v6, %v11262_v52 }
 0xb10   :  { %v4276_v44 = vmul.f32 %v3764_v47, %v3764_v47 }
 0xb12   :  { %v4788_v41 = vmul.f32 -20000.0, %v4276_v44 }
 0xb13   :  { %2917 = vperm.xlu2 %9908, %v14221_v49  }
 0xb14   :  { %2911 = vperm.xlu1 %9907, %v14221_v49  }
 0xb16   :  { %v2809_v12 = vpop.permute.xlu1 %2808 }
 0xb17   :  { %v3761_v18 = vsub.f32 %v2809_v12, %v11262_v52 }
 0xb1b   :  { %9911 = vset.pattern.permute.xlu2 %v14072_v45 }
 0xb1c   :  { %9910 = vset.pattern.permute.xlu1 %v14151_v29 }
 0xb1d   :  { %v2845_v26 = vpop.permute.xlu2 %2844 }
 0xb1e   :  { %v3767_v38 = vsub.f32 %v2845_v26, %v11262_v52  ;;  %v3760_v26 = vsub.f32 %v13039_v3, %v11262_v52  ;;  %v3757_v3 = vsub.f32 %v13470_v58, %v11262_v52  ;;  %v3756_v58 = vsub.f32 %v13479_v25, %v11262_v52 }
 0xb20   :  { %v4279_v40 = vmul.f32 %v3767_v38, %v3767_v38  ;;  %v4274_v38 = vmul.f32 %v3762_v24, %v3762_v24 }
 0xb22   :  { %v4791_v1 = vmul.f32 -20000.0, %v4279_v40  ;;  %v4272_v40 = vmul.f32 %v3760_v26, %v3760_v26 }
 0xb23   :  { %2935 = vperm.xlu2 %9911, %v14221_v49  }
 0xb24   :  { %2929 = vperm.xlu1 %9910, %v14221_v49   ;;  %v5303_v53 = vpack.c.bf16 %v4791_v1, %v4791_v1  ;;  %v5300_v1 = vpack.c.bf16 %v4788_v41, %v4788_v41 }
 0xb26   :  { %v2821_v15 = vpop.permute.xlu1 %2820 }
 0xb27   :  { %v3763_v61 = vsub.f32 %v2821_v15, %v11262_v52  ;;  %v3759_v15 = vsub.f32 %v2797_v14, %v11262_v52  ;;  %v5815_v14 = vunpack.c.l.bf16 %v5303_v53 }
 0xb29   :  { %v4275_v57 = vmul.f32 %v3763_v61, %v3763_v61  ;;  %v4271_v47 = vmul.f32 %v3759_v15, %v3759_v15 }
 0xb2b   :  { %9913 = vset.pattern.permute.xlu2 %v14152_v34  ;;  %v4787_v12 = vmul.f32 -20000.0, %v4275_v57  ;;  %v4783_v26 = vmul.f32 -20000.0, %v4271_v47  ;;  %v4268_v47 = vmul.f32 %v3756_v58, %v3756_v58 }
 0xb2c   :  { %9912 = vset.pattern.permute.xlu1 %v14160_v43 }
 0xb2d   :  { %v13501_v16 = vpop.permute.xlu2 %2857  ;;  %v5299_v24 = vpack.c.bf16 %v4787_v12, %v4787_v12 }
 0xb2f   :  { %v5811_v41 = vunpack.c.l.bf16 %v5299_v24 }
 0xb33   :  { %2947 = vperm.xlu2 %9913, %v14221_v49  }
 0xb34   :  { %2941 = vperm.xlu1 %9912, %v14221_v49   ;;  %v14222_v49 = vld [vmem:[#allocation73_spill] sm:$0xff] }
 0xb35   :  { %v3765_v32 = vsub.f32 %v14222_v49, %v11262_v52 }
 0xb36   :  { %v2839_v13 = vpop.permute.xlu1 %2838 }
 0xb37   :  { %v3766_v35 = vsub.f32 %v2839_v13, %v11262_v52  ;;  %v4277_v0 = vmul.f32 %v3765_v32, %v3765_v32 }
 0xb39   :  { %v4278_v31 = vmul.f32 %v3766_v35, %v3766_v35  ;;  %v4789_v6 = vmul.f32 -20000.0, %v4277_v0  ;;  %v4273_v35 = vmul.f32 %v3761_v18, %v3761_v18  ;;  %v4786_v0 = vmul.f32 -20000.0, %v4274_v38 }
 0xb3b   :  { %9916 = vset.pattern.permute.xlu2 %v11073_v4  ;;  %v4790_v7 = vmul.f32 -20000.0, %v4278_v31  ;;  %v5301_v28 = vpack.c.bf16 %v4789_v6, %v4789_v6  ;;  %v3758_v31 = vsub.f32 %v13483_v62, %v11262_v52  ;;  %v4785_v50 = vmul.f32 -20000.0, %v4273_v35 }
 0xb3c   :  { %9915 = vset.pattern.permute.xlu1 %v14094_v11  ;;  %v4269_v6 = vmul.f32 %v3757_v3, %v3757_v3  ;;  %v5298_v62 = vpack.c.bf16 %v4786_v0, %v4786_v0  ;;  %v5812_v35 = vunpack.c.l.bf16 %v5300_v1 }
 0xb3d   :  { %v2876_v13 = vpop.permute.xlu2 %2875  ;;  %v5302_v49 = vpack.c.bf16 %v4790_v7, %v4790_v7  ;;  %v5813_v57 = vunpack.c.l.bf16 %v5301_v28  ;;  %v4784_v7 = vmul.f32 -20000.0, %v4272_v40  ;;  %v4270_v53 = vmul.f32 %v3758_v31, %v3758_v31  ;;  %v14224_v28 = vld [vmem:[#allocation64_spill] sm:$0xff] }
 0xb3e   :  { %v3772_v32 = vsub.f32 %v2876_v13, %v11262_v52  ;;  %v6757_v13 = vmul.f32 1.442695, %v5815_v14  ;;  %v5297_v38 = vpack.c.bf16 %v4785_v50, %v4785_v50  ;;  %v3755_v40 = vsub.f32 %v14224_v28, %v11262_v52 }
 0xb3f   :  { %v5814_v18 = vunpack.c.l.bf16 %v5302_v49  ;;  %v6753_v3 = vmul.f32 1.442695, %v5813_v57  ;;  %v5296_v25 = vpack.c.bf16 %v4784_v7, %v4784_v7  ;;  %v5295_v14 = vpack.c.bf16 %v4783_v26, %v4783_v26 }
 0xb40   :  { %v4284_v20 = vmul.f32 %v3772_v32, %v3772_v32  ;;  %10801 = vpow2.f32 %v6757_v13  ;;  %v4782_v31 = vmul.f32 -20000.0, %v4270_v53  ;;  %v5810_v0 = vunpack.c.l.bf16 %v5298_v62 }
 0xb41   :  { %v6755_v12 = vmul.f32 1.442695, %v5814_v18  ;;  %v5809_v50 = vunpack.c.l.bf16 %v5297_v38  ;;  %v6751_v1 = vmul.f32 1.442695, %v5812_v35  ;;  %v4780_v57 = vmul.f32 -20000.0, %v4268_v47 }
 0xb42   :  { %v4796_v32 = vmul.f32 -20000.0, %v4284_v20  ;;  %v4267_v20 = vmul.f32 %v3755_v40, %v3755_v40  ;;  %v5807_v7 = vunpack.c.l.bf16 %v5295_v14  ;;  %v5294_v26 = vpack.c.bf16 %v4782_v31, %v4782_v31 }
 0xb43   :  { %2966 = vperm.xlu2 %9916, %v14223_v63   ;;  %10803 = vpow2.f32 %v6755_v12  ;;  %v6745_v13 = vmul.f32 1.442695, %v5809_v50  ;;  %v5292_v28 = vpack.c.bf16 %v4780_v57, %v4780_v57 }
 0xb44   :  { %2960 = vperm.xlu1 %9915, %v14223_v63   ;;  %v5308_v18 = vpack.c.bf16 %v4796_v32, %v4796_v32  ;;  %10805 = vpow2.f32 %v6753_v3  ;;  %v4779_v35 = vmul.f32 -20000.0, %v4267_v20  ;;  %v6741_v40 = vmul.f32 1.442695, %v5807_v7 }
 0xb46   :  { %v2851_v51 = vpop.permute.xlu1 %2850  ;;  %v10802_v58 = vpop.eup %10801  ;;  %v5820_v53 = vunpack.c.l.bf16 %v5308_v18 }
 0xb47   :  { %v3768_v61 = vsub.f32 %v2851_v51, %v11262_v52  ;;  %v4781_v51 = vmul.f32 -20000.0, %v4269_v6  ;;  %v6747_v6 = vmul.f32 1.442695, %v5810_v0  ;;  %v7351_v3 = vpack.c.bf16 %v10802_v58, %v10802_v58 }
 0xb48   :  { %v6767_v47 = vmul.f32 1.442695, %v5820_v53 }
 0xb49   :  { %v4280_v44 = vmul.f32 %v3768_v61, %v3768_v61  ;;  %v5293_v8 = vpack.c.bf16 %v4781_v51, %v4781_v51  ;;  %v10804_v38 = vpop.eup %10803  ;;  %v5806_v51 = vunpack.c.l.bf16 %v5294_v26  ;;  %v8504_v18 = vunpack.c.l.b16 %v7351_v3 }
 0xb4a   :  { %v10806_v32 = vpop.eup %10805  ;;  %v7350_v31 = vpack.c.bf16 %v10804_v38, %v10804_v38 }
 0xb4b   :  { %v4792_v15 = vmul.f32 -20000.0, %v4280_v44  ;;  %9918 = vset.pattern.permute.xlu2 %v14158_v21  ;;  %v6749_v44 = vmul.f32 1.442695, %v5811_v41  ;;  %v5805_v12 = vunpack.c.l.bf16 %v5293_v8  ;;  %v7349_v8 = vpack.c.bf16 %v10806_v32, %v10806_v32 }
 0xb4c   :  { %9917 = vset.pattern.permute.xlu1 %v11095_v10  ;;  %v6739_v57 = vmul.f32 1.442695, %v5806_v51 }
 0xb4d   :  { %v5304_v49 = vpack.c.bf16 %v4792_v15, %v4792_v15  ;;  %v5808_v15 = vunpack.c.l.bf16 %v5296_v25 }
 0xb4f   :  { %v5816_v61 = vunpack.c.l.bf16 %v5304_v49  ;;  %v6743_v41 = vmul.f32 1.442695, %v5808_v15  ;;  %v5804_v15 = vunpack.c.l.bf16 %v5292_v28 }
 0xb51   :  { %v6759_v24 = vmul.f32 1.442695, %v5816_v61 }
 0xb53   :  { %10807 = vpow2.f32 %v6759_v24  ;;  %2978 = vperm.xlu2 %9918, %v14223_v63   ;;  %v6737_v24 = vmul.f32 1.442695, %v5805_v12 }
 0xb54   :  { %10809 = vpow2.f32 %v6751_v1  ;;  %2972 = vperm.xlu1 %9917, %v14223_v63   ;;  %v5291_v1 = vpack.c.bf16 %v4779_v35, %v4779_v35 }
 0xb55   :  { %10811 = vpow2.f32 %v6749_v44 }
 0xb56   :  { %v2870_v62 = vpop.permute.xlu1 %2869  ;;  %10813 = vpow2.f32 %v6747_v6  ;;  %v5803_v38 = vunpack.c.l.bf16 %v5291_v1 }
 0xb57   :  { %v3771_v49 = vsub.f32 %v2870_v62, %v11262_v52  ;;  %10815 = vpow2.f32 %v6745_v13  ;;  %v8503_v13 = vunpack.c.l.b16 %v7350_v31 }
 0xb58   :  { %10817 = vpow2.f32 %v6743_v41  ;;  %v8502_v41 = vunpack.c.l.b16 %v7349_v8 }
 0xb59   :  { %v10808_v25 = vpop.eup %10807  ;;  %v4283_v14 = vmul.f32 %v3771_v49, %v3771_v49  ;;  %10819 = vpow2.f32 %v6741_v40  ;;  %v6735_v49 = vmul.f32 1.442695, %v5804_v15 }
 0xb5a   :  { %v10810_v61 = vpop.eup %10809  ;;  %v7352_v0 = vpack.c.bf16 %v10808_v25, %v10808_v25  ;;  %10821 = vpow2.f32 %v6767_v47  ;;  %v8800_v47 = vpack.c.b16 %v8503_v13, %v8502_v41 }
 0xb5b   :  { %v10812_v50 = vpop.eup %10811  ;;  %v4795_v44 = vmul.f32 -20000.0, %v4283_v14  ;;  %9921 = vset.pattern.permute.xlu2 %v11067_v2  ;;  %v7348_v58 = vpack.c.bf16 %v10810_v61, %v10810_v61  ;;  %10823 = vpow2.f32 %v6737_v24  ;;  %v6733_v61 = vmul.f32 1.442695, %v5803_v38 }
 0xb5c   :  { %v8505_v20 = vunpack.c.l.b16 %v7352_v0  ;;  %9920 = vset.pattern.permute.xlu1 %v14083_v5  ;;  %v10814_v6 = vpop.eup %10813  ;;  %v7347_v26 = vpack.c.bf16 %v10812_v50, %v10812_v50  ;;  %10825 = vpow2.f32 %v6739_v57 }
 0xb5d   :  { %v5307_v7 = vpack.c.bf16 %v4795_v44, %v4795_v44  ;;  %v10816_v62 = vpop.eup %10815  ;;  %v7346_v32 = vpack.c.bf16 %v10814_v6, %v10814_v6  ;;  %v8501_v25 = vunpack.c.l.b16 %v7348_v58 }
 0xb5e   :  { %v8801_v53 = vpack.c.b16 %v8505_v20, %v8504_v18  ;;  %v10818_v12 = vpop.eup %10817  ;;  %v7345_v3 = vpack.c.bf16 %v10816_v62, %v10816_v62  ;;  %v8500_v51 = vunpack.c.l.b16 %v7347_v26 }
 0xb5f   :  { %v5819_v35 = vunpack.c.l.bf16 %v5307_v7  ;;  %v10820_v28 = vpop.eup %10819  ;;  %v7344_v31 = vpack.c.bf16 %v10818_v12, %v10818_v12  ;;  %v8499_v1 = vunpack.c.l.b16 %v7346_v32  ;;  %v13544_v12 = vpop.permute.xlu2 %2887 }
 0xb60   :  { %9436 = vmatpush.bf16.msra.mxu2 %v8801_v53  ;;  %v10822_v14 = vpop.eup %10821  ;;  %v7343_v0 = vpack.c.bf16 %v10820_v28, %v10820_v28  ;;  %v8498_v44 = vunpack.c.l.b16 %v7345_v3  ;;  %v8799_v24 = vpack.c.b16 %v8501_v25, %v8500_v51 }
 0xb61   :  { %v6765_v40 = vmul.f32 1.442695, %v5819_v35  ;;  %v10824_v50 = vpop.eup %10823  ;;  %v7356_v8 = vpack.c.bf16 %v10822_v14, %v10822_v14  ;;  %v8497_v15 = vunpack.c.l.b16 %v7344_v31 }
 0xb62   :  { %v10826_v18 = vpop.eup %10825  ;;  %v8496_v57 = vunpack.c.l.b16 %v7343_v0  ;;  %v8798_v26 = vpack.c.b16 %v8499_v1, %v8498_v44  ;;  %v7341_v53 = vpack.c.bf16 %v10824_v50, %v10824_v50 }
 0xb63   :  { %10827 = vpow2.f32 %v6765_v40  ;;  %2996 = vperm.xlu2 %9921, %v14223_v63   ;;  %v7342_v7 = vpack.c.bf16 %v10826_v18, %v10826_v18  ;;  %v13538_v6 = vunpack.c.l.b16 %v7356_v8 }
 0xb64   :  { %2990 = vperm.xlu1 %9920, %v14223_v63   ;;  %9437 = vmatpush.bf16.msra.mxu2 %v8800_v47  ;;  %10829 = vpow2.f32 %v6735_v49  ;;  %v8797_v49 = vpack.c.b16 %v8497_v15, %v8496_v57  ;;  %v8494_v40 = vunpack.c.l.b16 %v7341_v53 }
 0xb65   :  { %10831 = vpow2.f32 %v6733_v61  ;;  %v8495_v41 = vunpack.c.l.b16 %v7342_v7  ;;  %v14225_v61 = vpack.c.b16 %v13460_v36, %v13463_v33 }
 0xb66   :  { %v2882_v31 = vpop.permute.xlu1 %2881 }
 0xb67   :  { %v8796_v25 = vpack.c.b16 %v8495_v41, %v8494_v40  ;;  %v2906_v14 = vpop.permute.xlu2 %2905 }
 0xb68   :  { %9438 = vmatpush.bf16.msra.mxu2 %v8799_v24 }
 0xb69   :  { %v10828_v20 = vpop.eup %10827 }
 0xb6a   :  { %v7355_v58 = vpack.c.bf16 %v10828_v20, %v10828_v20  ;;  %v10830_v13 = vpop.eup %10829 }
 0xb6b   :  { %9923 = vset.pattern.permute.xlu2 %v14159_v37  ;;  %v10832_v38 = vpop.eup %10831  ;;  %v7340_v35 = vpack.c.bf16 %v10830_v13, %v10830_v13 }
 0xb6c   :  { %v13541_v62 = vunpack.c.l.b16 %v7355_v58  ;;  %9922 = vset.pattern.permute.xlu1 %v11171_v27  ;;  %9439 = vmatpush.bf16.msra.mxu2 %v8798_v26  ;;  %v7339_v28 = vpack.c.bf16 %v10832_v38, %v10832_v38  ;;  %v14226_v26 = vld [vmem:[#allocation91_spill] sm:$0xff] }
 0xb6d   :  { %v8493_v3 = vunpack.c.l.b16 %v7340_v35  ;;  %v3780_v13 = vsub.f32 %v14226_v26, %v11262_v52 }
 0xb6e   :  { %v8803_v32 = vpack.c.b16 %v13538_v6, %v13541_v62  ;;  %v8492_v51 = vunpack.c.l.b16 %v7339_v28 }
 0xb6f   :  { %v2918_v0 = vpop.permute.xlu2 %2917  ;;  %v4292_v28 = vmul.f32 %v3780_v13, %v3780_v13 }
 0xb70   :  { %9440 = vmatpush.bf16.msra.mxu2 %v8797_v49  ;;  %v8795_v47 = vpack.c.b16 %v8493_v3, %v8492_v51  ;;  %v3779_v15 = vsub.f32 %v2918_v0, %v11262_v52  ;;  %v3775_v3 = vsub.f32 %v12277_v22, %v11262_v52 }
 0xb72   :  { %v4291_v38 = vmul.f32 %v3779_v15, %v3779_v15 }
 0xb73   :  { %3008 = vperm.xlu2 %9923, %v14223_v63  }
 0xb74   :  { %3002 = vperm.xlu1 %9922, %v14223_v63   ;;  %9441 = vmatpush.bf16.msra.mxu2 %v8796_v25  ;;  %v3777_v25 = vsub.f32 %v2906_v14, %v11262_v52 }
 0xb76   :  { %v2900_v50 = vpop.permute.xlu1 %2899  ;;  %v4289_v22 = vmul.f32 %v3777_v25, %v3777_v25 }
 0xb77   :  { %v3776_v51 = vsub.f32 %v2900_v50, %v11262_v52 }
 0xb78   :  { %9442 = vmatpush.bf16.msra.mxu2 %v8795_v47 }
 0xb7b   :  { %9925 = vset.pattern.permute.xlu2 %v14151_v29 }
 0xb7c   :  { %9924 = vset.pattern.permute.xlu1 %v14147_v56  ;;  %9443 = vmatpush.bf16.msra.mxu2 %v14225_v61 }
 0xb7d   :  { %v2936_v1 = vpop.permute.xlu2 %2935 }
 0xb7e   :  { %v3782_v24 = vsub.f32 %v2936_v1, %v11262_v52 }
 0xb80   :  { %v4294_v57 = vmul.f32 %v3782_v24, %v3782_v24  ;;  %v3773_v24 = vsub.f32 %v2882_v31, %v11262_v52 }
 0xb82   :  { %v4806_v35 = vmul.f32 -20000.0, %v4294_v57 }
 0xb83   :  { %3026 = vperm.xlu2 %9925, %v14223_v63  }
 0xb84   :  { %3020 = vperm.xlu1 %9924, %v14223_v63   ;;  %v5318_v47 = vpack.c.bf16 %v4806_v35, %v4806_v35 }
 0xb86   :  { %v2912_v44 = vpop.permute.xlu1 %2911  ;;  %v5830_v50 = vunpack.c.l.bf16 %v5318_v47 }
 0xb87   :  { %v3778_v41 = vsub.f32 %v2912_v44, %v11262_v52  ;;  %v4804_v44 = vmul.f32 -20000.0, %v4292_v28 }
 0xb89   :  { %v4290_v61 = vmul.f32 %v3778_v41, %v3778_v41 }
 0xb8b   :  { %9927 = vset.pattern.permute.xlu2 %v14160_v43  ;;  %v4802_v15 = vmul.f32 -20000.0, %v4290_v61 }
 0xb8c   :  { %9926 = vset.pattern.permute.xlu1 %v14072_v45 }
 0xb8d   :  { %v2948_v8 = vpop.permute.xlu2 %2947  ;;  %v5314_v31 = vpack.c.bf16 %v4802_v15, %v4802_v15 }
 0xb8e   :  { %v3784_v36 = vsub.f32 %v2948_v8, %v11262_v52 }
 0xb90   :  { %v4296_v20 = vmul.f32 %v3784_v36, %v3784_v36  ;;  %v4287_v36 = vmul.f32 %v3775_v3, %v3775_v3 }
 0xb92   :  { %v4808_v58 = vmul.f32 -20000.0, %v4296_v20  ;;  %v4288_v20 = vmul.f32 %v3776_v51, %v3776_v51  ;;  %v4799_v26 = vmul.f32 -20000.0, %v4287_v36 }
 0xb93   :  { %3038 = vperm.xlu2 %9927, %v14223_v63  }
 0xb94   :  { %3032 = vperm.xlu1 %9926, %v14223_v63   ;;  %v7485_v63 = vunpack.c.h.b16 %v13508_v60  ;;  %v5320_v40 = vpack.c.bf16 %v4808_v58, %v4808_v58  ;;  %v4803_v60 = vmul.f32 -20000.0, %v4291_v38  ;;  %v4800_v41 = vmul.f32 -20000.0, %v4288_v20  ;;  %v14228_v20 = vld [vmem:[#allocation98_spill] sm:$0xff] }
 0xb95   :  { %v5311_v25 = vpack.c.bf16 %v4799_v26, %v4799_v26 }
 0xb96   :  { %v2930_v33 = vpop.permute.xlu1 %2929  ;;  %v7517_v53 = vpack.c.b16 %v7485_v63, %v7485_v63  ;;  %v5832_v1 = vunpack.c.l.bf16 %v5320_v40  ;;  %v5316_v63 = vpack.c.bf16 %v4804_v44, %v4804_v44  ;;  %v5312_v44 = vpack.c.bf16 %v4800_v41, %v4800_v41 }
 0xb97   :  { %v3781_v18 = vsub.f32 %v2930_v33, %v11262_v52  ;;  %v3774_v33 = vsub.f32 %v13544_v12, %v11262_v52  ;;  %v4285_v12 = vmul.f32 %v3773_v24, %v3773_v24 }
 0xb98   :  { %9353 = vmatmul.bf16.vlgmr.msra.gmra.mxu3 %v7517_v53  ;;  %v4801_v53 = vmul.f32 -20000.0, %v4289_v22  ;;  %v5828_v3 = vunpack.c.l.bf16 %v5316_v63  ;;  %v14227_v22 = vld [vmem:[#allocation86_spill] sm:$0xff] }
 0xb99   :  { %v4293_v7 = vmul.f32 %v3781_v18, %v3781_v18  ;;  %v5315_v18 = vpack.c.bf16 %v4803_v60, %v4803_v60  ;;  %v4286_v13 = vmul.f32 %v3774_v33, %v3774_v33  ;;  %v3769_v60 = vsub.f32 %v13501_v16, %v11262_v52 }
 0xb9a   :  { %v5313_v51 = vpack.c.bf16 %v4801_v53, %v4801_v53  ;;  %v6783_v24 = vmul.f32 1.442695, %v5828_v3  ;;  %v5823_v16 = vunpack.c.l.bf16 %v5311_v25 }
 0xb9b   :  { %9929 = vset.pattern.permute.xlu2 %v14094_v11  ;;  %v4805_v49 = vmul.f32 -20000.0, %v4293_v7  ;;  %v6791_v7 = vmul.f32 1.442695, %v5832_v1  ;;  %v5827_v35 = vunpack.c.l.bf16 %v5315_v18  ;;  %v4798_v61 = vmul.f32 -20000.0, %v4286_v13 }
 0xb9c   :  { %9928 = vset.pattern.permute.xlu1 %v14136_v23  ;;  %v5825_v18 = vunpack.c.l.bf16 %v5313_v51 }
 0xb9d   :  { %v5317_v0 = vpack.c.bf16 %v4805_v49, %v4805_v49  ;;  %v6787_v49 = vmul.f32 1.442695, %v5830_v50  ;;  %10833 = vpow2.f32 %v6791_v7  ;;  %v6781_v1 = vmul.f32 1.442695, %v5827_v35 }
 0xb9e   :  { %v4281_v50 = vmul.f32 %v3769_v60, %v3769_v60  ;;  %v5310_v15 = vpack.c.bf16 %v4798_v61, %v4798_v61  ;;  %v5824_v7 = vunpack.c.l.bf16 %v5312_v44 }
 0xb9f   :  { %v5829_v57 = vunpack.c.l.bf16 %v5317_v0  ;;  %v4797_v0 = vmul.f32 -20000.0, %v4285_v12  ;;  %10835 = vpow2.f32 %v6787_v49  ;;  %v6773_v12 = vmul.f32 1.442695, %v5823_v16 }
 0xba0   :  { %v5822_v35 = vunpack.c.l.bf16 %v5310_v15  ;;  %v4793_v49 = vmul.f32 -20000.0, %v4281_v50 }
 0xba1   :  { %v6785_v40 = vmul.f32 1.442695, %v5829_v57  ;;  %v5309_v57 = vpack.c.bf16 %v4797_v0, %v4797_v0 }
 0xba2   :  { %v6771_v61 = vmul.f32 1.442695, %v5822_v35  ;;  %v5305_v44 = vpack.c.bf16 %v4793_v49, %v4793_v49 }
 0xba3   :  { %3057 = vperm.xlu2 %9929, %v14137_v39   ;;  %10837 = vpow2.f32 %v6785_v40  ;;  %v10834_v33 = vpop.eup %10833  ;;  %v6775_v40 = vmul.f32 1.442695, %v5824_v7 }
 0xba4   :  { %3051 = vperm.xlu1 %9928, %v14137_v39   ;;  %v7368_v26 = vpack.c.bf16 %v10834_v33, %v10834_v33 }
 0xba5   :  { %v10836_v63 = vpop.eup %10835 }
 0xba6   :  { %v2942_v8 = vpop.permute.xlu1 %2941  ;;  %v8521_v25 = vunpack.c.l.b16 %v7368_v26 }
 0xba7   :  { %v3783_v14 = vsub.f32 %v2942_v8, %v11262_v52  ;;  %v5826_v8 = vunpack.c.l.bf16 %v5314_v31  ;;  %v5821_v31 = vunpack.c.l.bf16 %v5309_v57  ;;  %v5817_v57 = vunpack.c.l.bf16 %v5305_v44 }
 0xba9   :  { %v4295_v58 = vmul.f32 %v3783_v14, %v3783_v14  ;;  %v3770_v14 = vsub.f32 %v14227_v22, %v11262_v52  ;;  %v10838_v13 = vpop.eup %10837  ;;  %v6761_v35 = vmul.f32 1.442695, %v5817_v57 }
 0xbaa   :  { %v7365_v3 = vpack.c.bf16 %v10838_v13, %v10838_v13 }
 0xbab   :  { %v4807_v38 = vmul.f32 -20000.0, %v4295_v58  ;;  %9931 = vset.pattern.permute.xlu2 %v14160_v43  ;;  %v6779_v58 = vmul.f32 1.442695, %v5826_v8  ;;  %v4282_v53 = vmul.f32 %v3770_v14, %v3770_v14  ;;  %v6769_v8 = vmul.f32 1.442695, %v5821_v31 }
 0xbac   :  { %9930 = vset.pattern.permute.xlu1 %v11073_v4  ;;  %v8518_v14 = vunpack.c.l.b16 %v7365_v3 }
 0xbad   :  { %v5319_v28 = vpack.c.bf16 %v4807_v38, %v4807_v38  ;;  %v6777_v38 = vmul.f32 1.442695, %v5825_v18 }
 0xbaf   :  { %v5831_v47 = vunpack.c.l.bf16 %v5319_v28  ;;  %v7366_v28 = vpack.c.bf16 %v10836_v63, %v10836_v63 }
 0xbb1   :  { %v6789_v36 = vmul.f32 1.442695, %v5831_v47  ;;  %v4794_v47 = vmul.f32 -20000.0, %v4282_v53  ;;  %v8519_v22 = vunpack.c.l.b16 %v7366_v28 }
 0xbb3   :  { %10839 = vpow2.f32 %v6789_v36  ;;  %3232 = vperm.xlu2 %9931, %v14228_v20   ;;  %v13591_v36 = vpop.permute.xlu2 %2966  ;;  %v5306_v16 = vpack.c.bf16 %v4794_v47, %v4794_v47  ;;  %v8808_v63 = vpack.c.b16 %v8519_v22, %v8518_v14 }
 0xbb4   :  { %3063 = vperm.xlu1 %9930, %v14137_v39   ;;  %10841 = vpow2.f32 %v6781_v1 }
 0xbb5   :  { %10843 = vpow2.f32 %v6783_v24  ;;  %v5818_v13 = vunpack.c.l.bf16 %v5306_v16 }
 0xbb6   :  { %10845 = vpow2.f32 %v6779_v58  ;;  %v13603_v57 = vpop.permute.xlu1 %2960 }
 0xbb7   :  { %10847 = vpow2.f32 %v6777_v38  ;;  %v6763_v3 = vmul.f32 1.442695, %v5818_v13  ;;  %v51_v13 = vadd.s32 2560, %v14153_v17 }
 0xbb8   :  { %10849 = vpow2.f32 %v6773_v12 }
 0xbb9   :  { %v10840_v41 = vpop.eup %10839  ;;  %10851 = vpow2.f32 %v6775_v40  ;;  %vm84_vm12 = vcmp.ge.s32.totalorder %v51_v13, %v12326_v48  ;;  %vm117_vm14 = vcmp.lt.s32.totalorder %v51_v13, %v12330_v30  ;;  %v14233_v13 = vld [vmem:[#allocation118_spill] sm:$0xff] }
 0xbba   :  { %v7367_v60 = vpack.c.bf16 %v10840_v41, %v10840_v41  ;;  %v10842_v51 = vpop.eup %10841  ;;  %10853 = vpow2.f32 %v6771_v61  ;;  %vm149_vm0 = vmand %vm84_vm12, %vm117_vm14 }
 0xbbb   :  { %9934 = vset.pattern.permute.xlu2 %v14152_v34  ;;  %v10844_v1 = vpop.eup %10843  ;;  %v7363_v33 = vpack.c.bf16 %v10842_v51, %v10842_v51  ;;  %10855 = vpow2.f32 %v6769_v8  ;;  %v181_v62 = vsel %vm149_vm0, 1.0, %v14166_v59 }
 0xbbc   :  { %v8520_v0 = vunpack.c.l.b16 %v7367_v60  ;;  %9933 = vset.pattern.permute.xlu1 %v14160_v43  ;;  %v10846_v18 = vpop.eup %10845  ;;  %v7364_v50 = vpack.c.bf16 %v10844_v1, %v10844_v1  ;;  %10857 = vpow2.f32 %v6761_v35 }
 0xbbd   :  { %v10848_v15 = vpop.eup %10847  ;;  %v8516_v43 = vunpack.c.l.b16 %v7363_v33  ;;  %v7362_v58 = vpack.c.bf16 %v10846_v18, %v10846_v18  ;;  %10859 = vpow2.f32 %v6763_v3 }
 0xbbe   :  { %v8809_v24 = vpack.c.b16 %v8521_v25, %v8520_v0  ;;  %v10850_v7 = vpop.eup %10849  ;;  %v7361_v53 = vpack.c.bf16 %v10848_v15, %v10848_v15  ;;  %v8517_v38 = vunpack.c.l.b16 %v7364_v50  ;;  %v13595_v25 = vpop.permute.xlu2 %2978 }
 0xbbf   :  { %v10852_v26 = vpop.eup %10851  ;;  %v7359_v12 = vpack.c.bf16 %v10850_v7, %v10850_v7  ;;  %v8515_v31 = vunpack.c.l.b16 %v7362_v58  ;;  %v14229_v58 = vld [vmem:[#allocation128_spill] sm:$0xff] }
 0xbc0   :  { %9449 = vmatpush.bf16.msra.mxu3 %v8809_v24  ;;  %v10854_v41 = vpop.eup %10853  ;;  %v7360_v49 = vpack.c.bf16 %v10852_v26, %v10852_v26  ;;  %v8807_v40 = vpack.c.b16 %v8517_v38, %v8516_v43  ;;  %v8514_v60 = vunpack.c.l.b16 %v7361_v53  ;;  %v52_v53 = vadd.s32 2688, %v14153_v17 }
 0xbc1   :  { %v10856_v28 = vpop.eup %10855  ;;  %v8512_v51 = vunpack.c.l.b16 %v7359_v12  ;;  %v7358_v47 = vpack.c.bf16 %v10854_v41, %v10854_v41 }
 0xbc2   :  { %v7357_v61 = vpack.c.bf16 %v10856_v28, %v10856_v28  ;;  %v8513_v0 = vunpack.c.l.b16 %v7360_v49  ;;  %v8806_v1 = vpack.c.b16 %v8515_v31, %v8514_v60  ;;  %v10858_v22 = vpop.eup %10857  ;;  %vm85_vm13 = vcmp.ge.s32.totalorder %v52_v53, %v12326_v48 }
 0xbc3   :  { %3335 = vperm.xlu2 %9934, %v11712_v55   ;;  %v8511_v44 = vunpack.c.l.b16 %v7358_v47  ;;  %v10860_v24 = vpop.eup %10859  ;;  %v7353_v18 = vpack.c.bf16 %v10858_v22, %v10858_v22  ;;  %vm118_vm15 = vcmp.lt.s32.totalorder %v52_v53, %v12330_v30  ;;  %v3790_v53 = vsub.f32 %v14233_v13, %v11262_v52 }
 0xbc4   :  { %3329 = vperm.xlu1 %9933, %v11712_v55   ;;  %9450 = vmatpush.bf16.msra.mxu3 %v8808_v63  ;;  %v8510_v8 = vunpack.c.l.b16 %v7357_v61  ;;  %v8805_v33 = vpack.c.b16 %v8513_v0, %v8512_v51  ;;  %v7354_v50 = vpack.c.bf16 %v10860_v24, %v10860_v24  ;;  %v3800_v63 = vsub.f32 %v14229_v58, %v11262_v52  ;;  %vm150_vm1 = vmand %vm85_vm13, %vm118_vm15  ;;  %v14232_v58 = vld [vmem:[#allocation100_spill] sm:$0xff] }
 0xbc5   :  { %v8506_v15 = vunpack.c.l.b16 %v7353_v18  ;;  %v182_v38 = vsel %vm150_vm1, 1.0, %v14166_v59  ;;  %v14231_v18 = vld [vmem:[#allocation101_spill] sm:$0xff] }
 0xbc6   :  { %v13599_v14 = vpop.permute.xlu2 %2996  ;;  %v8804_v16 = vpack.c.b16 %v8511_v44, %v8510_v8  ;;  %v13612_v26 = vpop.permute.xlu1 %2972  ;;  %v4312_v6 = vmul.f32 %v3800_v63, %v3800_v63  ;;  %v13624_v12 = vpack.c.bf16 %v182_v38, %v181_v62  ;;  %v14230_v8 = vld [vmem:[#allocation129_spill] sm:$0xff]  ;;  %v13643_v63 = vsub.f32 %v14232_v58, %v11262_v52 }
 0xbc7   :  { %v3787_v58 = vsub.f32 %v13591_v36, %v11262_v52 }
 0xbc8   :  { %9451 = vmatpush.bf16.msra.mxu3 %v8807_v40  ;;  %v4824_v35 = vmul.f32 -20000.0, %v4312_v6  ;;  %v7486_v49 = vunpack.c.l.b16 %v13624_v12 }
 0xbca   :  { %v7518_v31 = vpack.c.b16 %v7486_v49, %v7486_v49  ;;  %v5336_v40 = vpack.c.bf16 %v4824_v35, %v4824_v35  ;;  %v53_v35 = vadd.s32 2816, %v14153_v17 }
 0xbcb   :  { %9937 = vset.pattern.permute.xlu2 %v14151_v29 }
 0xbcc   :  { %9936 = vset.pattern.permute.xlu1 %v14152_v34  ;;  %9452 = vmatpush.bf16.msra.mxu3 %v8806_v1  ;;  %v8507_v34 = vunpack.c.l.b16 %v7354_v50  ;;  %v5848_v28 = vunpack.c.l.bf16 %v5336_v40  ;;  %vm86_vm2 = vcmp.ge.s32.totalorder %v53_v35, %v12326_v48  ;;  %vm119_vm4 = vcmp.lt.s32.totalorder %v53_v35, %v12330_v30 }
 0xbcd   :  { %9366 = vmatmul.bf16.vlgmr.msrb.gmra.mxu0 %v7518_v31  ;;  %v3792_v31 = vsub.f32 %v13599_v14, %v11262_v52  ;;  %vm151_vm6 = vmand %vm86_vm2, %vm119_vm4  ;;  %v3789_v14 = vsub.f32 %v13595_v25, %v11262_v52  ;;  %v3788_v35 = vsub.f32 %v13612_v26, %v11262_v52 }
 0xbce   :  { %v3009_v7 = vpop.permute.xlu2 %3008  ;;  %v8802_v43 = vpack.c.b16 %v8507_v34, %v8506_v15  ;;  %v6823_v47 = vmul.f32 1.442695, %v5848_v28 }
 0xbcf   :  { %v3794_v34 = vsub.f32 %v3009_v7, %v11262_v52  ;;  %v54_v7 = vadd.s32 2944, %v14153_v17 }
 0xbd0   :  { %9453 = vmatpush.bf16.msra.mxu3 %v8805_v33  ;;  %10861 = vpow2.f32 %v6823_v47  ;;  %v3832_v33 = vsub.f32 %v14230_v8, %v11262_v52 }
 0xbd1   :  { %v4306_v40 = vmul.f32 %v3794_v34, %v3794_v34  ;;  %vm87_vm3 = vcmp.ge.s32.totalorder %v54_v7, %v12326_v48  ;;  %vm120_vm5 = vcmp.lt.s32.totalorder %v54_v7, %v12330_v30 }
 0xbd2   :  { %v4344_v15 = vmul.f32 %v3832_v33, %v3832_v33  ;;  %vm152_vm7 = vmand %vm87_vm3, %vm120_vm5 }
 0xbd3   :  { %3220 = vperm.xlu2 %9937, %v14228_v20  }
 0xbd4   :  { %3141 = vperm.xlu1 %9936, %v14137_v39   ;;  %9454 = vmatpush.bf16.msra.mxu3 %v8804_v16  ;;  %v3795_v16 = vsub.f32 %v14231_v18, %v11262_v52  ;;  %v4856_v49 = vmul.f32 -20000.0, %v4344_v15  ;;  %v4818_v18 = vmul.f32 -20000.0, %v4306_v40 }
 0xbd6   :  { %v2991_v41 = vpop.permute.xlu1 %2990  ;;  %v10862_v50 = vpop.eup %10861  ;;  %v4307_v38 = vmul.f32 %v3795_v16, %v3795_v16 }
 0xbd8   :  { %9455 = vmatpush.bf16.msra.mxu3 %v8803_v32 }
 0xbdb   :  { %3317 = vperm.xlu2 %9937, %v11712_v55  }
 0xbdc   :  { %9938 = vset.pattern.permute.xlu1 %v14072_v45  ;;  %9456 = vmatpush.bf16.msra.mxu3 %v8802_v43 }
 0xbdd   :  { %v3027_v32 = vpop.permute.xlu2 %3026 }
 0xbe3   :  { %9941 = vset.pattern.permute.xlu2 %v14072_v45 }
 0xbe4   :  { %3226 = vperm.xlu1 %9938, %v14228_v20  }
 0xbe6   :  { %v3003_v3 = vpop.permute.xlu1 %3002 }
 0xbe7   :  { %v3793_v6 = vsub.f32 %v3003_v3, %v11262_v52 }
 0xbe9   :  { %v4305_v3 = vmul.f32 %v3793_v6, %v3793_v6 }
 0xbeb   :  { %3129 = vperm.xlu2 %9941, %v14137_v39  }
 0xbec   :  { %9940 = vset.pattern.permute.xlu1 %v14151_v29  ;;  %v3797_v29 = vsub.f32 %v3027_v32, %v11262_v52  ;;  %v7384_v32 = vpack.c.bf16 %v10862_v50, %v10862_v50  ;;  %v4817_v50 = vmul.f32 -20000.0, %v4305_v3 }
 0xbed   :  { %v3039_v45 = vpop.permute.xlu2 %3038 }
 0xbee   :  { %v3799_v60 = vsub.f32 %v3039_v45, %v11262_v52  ;;  %v4309_v43 = vmul.f32 %v3797_v29, %v3797_v29  ;;  %v184_v29 = vsel %vm152_vm7, 1.0, %v14166_v59 }
 0xbf0   :  { %v4311_v51 = vmul.f32 %v3799_v60, %v3799_v60  ;;  %v4821_v28 = vmul.f32 -20000.0, %v4309_v43  ;;  %v3791_v60 = vsub.f32 %v2991_v41, %v11262_v52  ;;  %v183_v41 = vsel %vm151_vm6, 1.0, %v14166_v59 }
 0xbf1   :  { %v13663_v16 = vpack.c.bf16 %v184_v29, %v183_v41 }
 0xbf2   :  { %v4823_v61 = vmul.f32 -20000.0, %v4311_v51 }
 0xbf3   :  { %9943 = vset.pattern.permute.xlu2 %v14147_v56  ;;  %v7488_v6 = vunpack.c.l.b16 %v13663_v16 }
 0xbf4   :  { %v5335_v0 = vpack.c.bf16 %v4823_v61, %v4823_v61  ;;  %3123 = vperm.xlu1 %9940, %v14137_v39   ;;  %v8537_v61 = vunpack.c.l.b16 %v7384_v32 }
 0xbf5   :  { %v7520_v40 = vpack.c.b16 %v7488_v6, %v7488_v6 }
 0xbf6   :  { %v5847_v1 = vunpack.c.l.bf16 %v5335_v0  ;;  %v3021_v44 = vpop.permute.xlu1 %3020  ;;  %v4819_v0 = vmul.f32 -20000.0, %v4307_v38 }
 0xbf7   :  { %v3796_v24 = vsub.f32 %v3021_v44, %v11262_v52  ;;  %v5333_v44 = vpack.c.bf16 %v4821_v28, %v4821_v28  ;;  %v5329_v28 = vpack.c.bf16 %v4817_v50, %v4817_v50  ;;  %9392 = vmatmul.bf16.vlgmr.msrb.gmra.mxu2 %v7520_v40 }
 0xbf8   :  { %v6821_v22 = vmul.f32 1.442695, %v5847_v1  ;;  %v4304_v1 = vmul.f32 %v3792_v31, %v3792_v31  ;;  %v5331_v43 = vpack.c.bf16 %v4819_v0, %v4819_v0  ;;  %v5330_v31 = vpack.c.bf16 %v4818_v18, %v4818_v18 }
 0xbf9   :  { %v4308_v62 = vmul.f32 %v3796_v24, %v3796_v24  ;;  %v4303_v24 = vmul.f32 %v3791_v60, %v3791_v60  ;;  %v5845_v32 = vunpack.c.l.bf16 %v5333_v44 }
 0xbfa   :  { %10863 = vpow2.f32 %v6821_v22  ;;  %v4302_v22 = vmul.f32 %v3790_v53, %v3790_v53  ;;  %v5368_v53 = vpack.c.bf16 %v4856_v49, %v4856_v49  ;;  %v3786_v49 = vsub.f32 %v13603_v57, %v11262_v52 }
 0xbfb   :  { %3214 = vperm.xlu2 %9943, %v14228_v20   ;;  %v4820_v47 = vmul.f32 -20000.0, %v4308_v62  ;;  %v4816_v62 = vmul.f32 -20000.0, %v4304_v1  ;;  %v4815_v7 = vmul.f32 -20000.0, %v4303_v24  ;;  %v4300_v1 = vmul.f32 %v3788_v35, %v3788_v35 }
 0xbfc   :  { %9942 = vset.pattern.permute.xlu1 %v14148_v54  ;;  %v4814_v3 = vmul.f32 -20000.0, %v4302_v22  ;;  %v5880_v26 = vunpack.c.l.bf16 %v5368_v53 }
 0xbfd   :  { %v3058_v33 = vpop.permute.xlu2 %3057  ;;  %v5332_v25 = vpack.c.bf16 %v4820_v47, %v4820_v47  ;;  %v4299_v47 = vmul.f32 %v3787_v58, %v3787_v58  ;;  %v5328_v0 = vpack.c.bf16 %v4816_v62, %v4816_v62  ;;  %v5327_v44 = vpack.c.bf16 %v4815_v7, %v4815_v7 }
 0xbfe   :  { %v3802_v15 = vsub.f32 %v3058_v33, %v11262_v52  ;;  %v5841_v33 = vunpack.c.l.bf16 %v5329_v28  ;;  %v6887_v35 = vmul.f32 1.442695, %v5880_v26 }
 0xc00   :  { %v10864_v45 = vpop.eup %10863  ;;  %v4314_v60 = vmul.f32 %v3802_v15, %v3802_v15  ;;  %v6809_v62 = vmul.f32 1.442695, %v5841_v33 }
 0xc01   :  { %v7383_v51 = vpack.c.bf16 %v10864_v45, %v10864_v45  ;;  %v5844_v45 = vunpack.c.l.bf16 %v5332_v25  ;;  %v4811_v25 = vmul.f32 -20000.0, %v4299_v47 }
 0xc02   :  { %v4826_v22 = vmul.f32 -20000.0, %v4314_v60 }
 0xc03   :  { %v8536_v8 = vunpack.c.l.b16 %v7383_v51  ;;  %9946 = vset.pattern.permute.xlu2 %v14148_v54  ;;  %v4301_v54 = vmul.f32 %v3789_v14, %v3789_v14  ;;  %v5843_v51 = vunpack.c.l.bf16 %v5331_v43  ;;  %v6817_v14 = vmul.f32 1.442695, %v5845_v32 }
 0xc04   :  { %3208 = vperm.xlu1 %9942, %v14228_v20   ;;  %v6815_v29 = vmul.f32 1.442695, %v5844_v45  ;;  %v5840_v43 = vunpack.c.l.bf16 %v5328_v0  ;;  %v5323_v40 = vpack.c.bf16 %v4811_v25, %v4811_v25 }
 0xc05   :  { %v8817_v34 = vpack.c.b16 %v8537_v61, %v8536_v8  ;;  %v4813_v61 = vmul.f32 -20000.0, %v4301_v54  ;;  %v5842_v8 = vunpack.c.l.bf16 %v5330_v31  ;;  %v6813_v50 = vmul.f32 1.442695, %v5843_v51 }
 0xc06   :  { %v3033_v13 = vpop.permute.xlu1 %3032  ;;  %10865 = vpow2.f32 %v6817_v14  ;;  %v4812_v54 = vmul.f32 -20000.0, %v4300_v1  ;;  %v5326_v31 = vpack.c.bf16 %v4814_v3, %v4814_v3  ;;  %v6807_v60 = vmul.f32 1.442695, %v5840_v43 }
 0xc07   :  { %v3798_v38 = vsub.f32 %v3033_v13, %v11262_v52  ;;  %9462 = vmatpush.bf16.msrb.mxu0 %v8817_v34  ;;  %v5325_v15 = vpack.c.bf16 %v4813_v61, %v4813_v61  ;;  %v4298_v34 = vmul.f32 %v3786_v49, %v3786_v49  ;;  %v5839_v13 = vunpack.c.l.bf16 %v5327_v44 }
 0xc08   :  { %v6811_v6 = vmul.f32 1.442695, %v5842_v8  ;;  %10867 = vpow2.f32 %v6815_v29  ;;  %v5324_v47 = vpack.c.bf16 %v4812_v54, %v4812_v54  ;;  %v5835_v26 = vunpack.c.l.bf16 %v5323_v40 }
 0xc09   :  { %v4310_v36 = vmul.f32 %v3798_v38, %v3798_v38  ;;  %v4297_v38 = vmul.f32 %v13643_v63, %v13643_v63  ;;  %10869 = vpow2.f32 %v6813_v50  ;;  %v5837_v28 = vunpack.c.l.bf16 %v5325_v15 }
 0xc0a   :  { %v4810_v45 = vmul.f32 -20000.0, %v4298_v34  ;;  %v6805_v61 = vmul.f32 1.442695, %v5839_v13 }
 0xc0b   :  { %v4822_v41 = vmul.f32 -20000.0, %v4310_v36  ;;  %3111 = vperm.xlu2 %9946, %v14137_v39   ;;  %v4809_v49 = vmul.f32 -20000.0, %v4297_v38  ;;  %v6801_v1 = vmul.f32 1.442695, %v5837_v28 }
 0xc0c   :  { %9945 = vset.pattern.permute.xlu1 %v14147_v56  ;;  %v5338_v56 = vpack.c.bf16 %v4826_v22, %v4826_v22  ;;  %v10866_v51 = vpop.eup %10865  ;;  %v5322_v33 = vpack.c.bf16 %v4810_v45, %v4810_v45 }
 0xc0d   :  { %v5334_v24 = vpack.c.bf16 %v4822_v41, %v4822_v41  ;;  %v3233_v18 = vpop.permute.xlu2 %3232  ;;  %v5838_v41 = vunpack.c.l.bf16 %v5326_v31  ;;  %v7381_v29 = vpack.c.bf16 %v10866_v51, %v10866_v51 }
 0xc0e   :  { %v3831_v57 = vsub.f32 %v3233_v18, %v11262_v52  ;;  %v5850_v63 = vunpack.c.l.bf16 %v5338_v56  ;;  %v10868_v14 = vpop.eup %10867  ;;  %v5836_v18 = vunpack.c.l.bf16 %v5324_v47  ;;  %v5834_v56 = vunpack.c.l.bf16 %v5322_v33 }
 0xc0f   :  { %v5846_v58 = vunpack.c.l.bf16 %v5334_v24  ;;  %v10870_v8 = vpop.eup %10869  ;;  %v7380_v34 = vpack.c.bf16 %v10868_v14, %v10868_v14  ;;  %v6803_v54 = vmul.f32 1.442695, %v5838_v41 }
 0xc10   :  { %v4343_v53 = vmul.f32 %v3831_v57, %v3831_v57  ;;  %v6827_v50 = vmul.f32 1.442695, %v5850_v63  ;;  %v5321_v57 = vpack.c.bf16 %v4809_v49, %v4809_v49  ;;  %v7379_v13 = vpack.c.bf16 %v10870_v8, %v10870_v8 }
 0xc11   :  { %v6819_v32 = vmul.f32 1.442695, %v5846_v58  ;;  %v8533_v45 = vunpack.c.l.b16 %v7380_v34 }
 0xc12   :  { %v4855_v7 = vmul.f32 -20000.0, %v4343_v53  ;;  %v5833_v51 = vunpack.c.l.bf16 %v5321_v57  ;;  %v8532_v49 = vunpack.c.l.b16 %v7379_v13 }
 0xc13   :  { %10871 = vpow2.f32 %v6819_v32  ;;  %9947 = vset.pattern.permute.xlu2 %v11171_v27  ;;  %v8534_v32 = vunpack.c.l.b16 %v7381_v29 }
 0xc14   :  { %10873 = vpow2.f32 %v6811_v6  ;;  %v5367_v36 = vpack.c.bf16 %v4855_v7, %v4855_v7  ;;  %3311 = vperm.xlu1 %9945, %v11712_v55   ;;  %v6797_v6 = vmul.f32 1.442695, %v5835_v26  ;;  %v8815_v33 = vpack.c.b16 %v8533_v45, %v8532_v49 }
 0xc15   :  { %10875 = vpow2.f32 %v6809_v62  ;;  %v7489_v49 = vunpack.c.h.b16 %v13663_v16 }
 0xc16   :  { %10877 = vpow2.f32 %v6887_v35  ;;  %v5879_v0 = vunpack.c.l.bf16 %v5367_v36  ;;  %v3052_v3 = vpop.permute.xlu1 %3051  ;;  %v6799_v35 = vmul.f32 1.442695, %v5836_v18 }
 0xc17   :  { %v3801_v44 = vsub.f32 %v3052_v3, %v11262_v52  ;;  %10879 = vpow2.f32 %v6807_v60 }
 0xc18   :  { %v6885_v22 = vmul.f32 1.442695, %v5879_v0  ;;  %10881 = vpow2.f32 %v6805_v61  ;;  %v6795_v0 = vmul.f32 1.442695, %v5834_v56 }
 0xc19   :  { %v10872_v24 = vpop.eup %10871  ;;  %v4313_v25 = vmul.f32 %v3801_v44, %v3801_v44 }
 0xc1a   :  { %v10874_v15 = vpop.eup %10873  ;;  %v7382_v43 = vpack.c.bf16 %v10872_v24, %v10872_v24  ;;  %10883 = vpow2.f32 %v6885_v22  ;;  %v6793_v22 = vmul.f32 1.442695, %v5833_v51 }
 0xc1b   :  { %v10876_v58 = vpop.eup %10875  ;;  %v4825_v53 = vmul.f32 -20000.0, %v4313_v25  ;;  %3196 = vperm.xlu2 %9947, %v14228_v20   ;;  %10885 = vpow2.f32 %v6801_v1  ;;  %v7378_v40 = vpack.c.bf16 %v10874_v15, %v10874_v15 }
 0xc1c   :  { %v10878_v62 = vpop.eup %10877  ;;  %v8535_v38 = vunpack.c.l.b16 %v7382_v43  ;;  %3117 = vperm.xlu1 %9945, %v14137_v39   ;;  %10887 = vpow2.f32 %v6827_v50  ;;  %v7377_v28 = vpack.c.bf16 %v10876_v58, %v10876_v58 }
 0xc1d   :  { %v5337_v7 = vpack.c.bf16 %v4825_v53, %v4825_v53  ;;  %v10880_v31 = vpop.eup %10879  ;;  %10889 = vpow2.f32 %v6803_v54  ;;  %v7416_v47 = vpack.c.bf16 %v10878_v62, %v10878_v62  ;;  %v8531_v44 = vunpack.c.l.b16 %v7378_v40  ;;  %v3336_v50 = vpop.permute.xlu2 %3335 }
 0xc1e   :  { %v8816_v60 = vpack.c.b16 %v8535_v38, %v8534_v32  ;;  %v10882_v36 = vpop.eup %10881  ;;  %10891 = vpow2.f32 %v6797_v6  ;;  %v7376_v3 = vpack.c.bf16 %v10880_v31, %v10880_v31  ;;  %v8530_v8 = vunpack.c.l.b16 %v7377_v28 }
 0xc1f   :  { %v5849_v61 = vunpack.c.l.bf16 %v5337_v7  ;;  %10893 = vpow2.f32 %v6799_v35  ;;  %v7375_v1 = vpack.c.bf16 %v10882_v36, %v10882_v36  ;;  %v8569_v24 = vunpack.c.l.b16 %v7416_v47 }
 0xc20   :  { %v10884_v63 = vpop.eup %10883  ;;  %9463 = vmatpush.bf16.msrb.mxu0 %v8816_v60  ;;  %v3848_v57 = vsub.f32 %v3336_v50, %v11262_v52  ;;  %v8529_v58 = vunpack.c.l.b16 %v7376_v3  ;;  %v8814_v6 = vpack.c.b16 %v8531_v44, %v8530_v8 }
 0xc21   :  { %v7415_v14 = vpack.c.bf16 %v10884_v63, %v10884_v63  ;;  %v6825_v41 = vmul.f32 1.442695, %v5849_v61  ;;  %v10886_v26 = vpop.eup %10885  ;;  %v8528_v54 = vunpack.c.l.b16 %v7375_v1  ;;  %v7521_v1 = vpack.c.b16 %v7489_v49, %v7489_v49 }
 0xc22   :  { %v10888_v29 = vpop.eup %10887  ;;  %v7373_v15 = vpack.c.bf16 %v10886_v26, %v10886_v26  ;;  %v4360_v38 = vmul.f32 %v3848_v57, %v3848_v57 }
 0xc23   :  { %v8568_v18 = vunpack.c.l.b16 %v7415_v14  ;;  %10895 = vpow2.f32 %v6825_v41  ;;  %9950 = vset.pattern.permute.xlu2 %v14159_v37  ;;  %v10890_v25 = vpop.eup %10889  ;;  %v7386_v13 = vpack.c.bf16 %v10888_v29, %v10888_v29  ;;  %v8813_v40 = vpack.c.b16 %v8529_v58, %v8528_v54  ;;  %9405 = vmatmul.bf16.vlgmr.msrb.gmra.mxu3 %v7521_v1 }
 0xc24   :  { %9949 = vset.pattern.permute.xlu1 %v11171_v27  ;;  %9464 = vmatpush.bf16.msrb.mxu0 %v8815_v33  ;;  %10897 = vpow2.f32 %v6795_v0  ;;  %v10892_v43 = vpop.eup %10891  ;;  %v7374_v37 = vpack.c.bf16 %v10890_v25, %v10890_v25  ;;  %v14234_v27 = vld [vmem:[#allocation36_spill] sm:$0xff]  ;;  %v8526_v32 = vunpack.c.l.b16 %v7373_v15  ;;  %v4872_v61 = vmul.f32 -20000.0, %v4360_v38 }
 0xc25   :  { %v8833_v34 = vpack.c.b16 %v8569_v24, %v8568_v18  ;;  %v10894_v53 = vpop.eup %10893  ;;  %10899 = vpow2.f32 %v6793_v22  ;;  %v3846_v56 = vsub.f32 %v14234_v27, %v11262_v52  ;;  %v13689_v7 = vunpack.c.l.b16 %v7386_v13 }
 0xc26   :  { %v7372_v35 = vpack.c.bf16 %v10894_v53, %v10894_v53  ;;  %v7371_v45 = vpack.c.bf16 %v10892_v43, %v10892_v43  ;;  %v8527_v36 = vunpack.c.l.b16 %v7374_v37  ;;  %v13696_v14 = vpop.permute.xlu1 %3063  ;;  %v5384_v29 = vpack.c.bf16 %v4872_v61, %v4872_v61  ;;  %v14235_v43 = vld [vmem:[#allocation47_spill] sm:$0xff] }
 0xc27   :  { %9488 = vmatpush.bf16.msrb.mxu2 %v8833_v34  ;;  %v4358_v47 = vmul.f32 %v3846_v56, %v3846_v56  ;;  %v3815_v58 = vsub.f32 %v14235_v43, %v11262_v52 }
 0xc28   :  { %9465 = vmatpush.bf16.msrb.mxu0 %v8814_v6  ;;  %v8525_v3 = vunpack.c.l.b16 %v7372_v35  ;;  %v8812_v41 = vpack.c.b16 %v8527_v36, %v8526_v32  ;;  %v8524_v44 = vunpack.c.l.b16 %v7371_v45  ;;  %v5896_v50 = vunpack.c.l.bf16 %v5384_v29 }
 0xc29   :  { %v10896_v62 = vpop.eup %10895  ;;  %v4870_v33 = vmul.f32 -20000.0, %v4358_v47  ;;  %v4327_v27 = vmul.f32 %v3815_v58, %v3815_v58 }
 0xc2a   :  { %v7385_v31 = vpack.c.bf16 %v10896_v62, %v10896_v62  ;;  %v10898_v28 = vpop.eup %10897  ;;  %v8811_v24 = vpack.c.b16 %v8525_v3, %v8524_v44  ;;  %v6919_v53 = vmul.f32 1.442695, %v5896_v50 }
 0xc2b   :  { %3299 = vperm.xlu2 %9950, %v11712_v55   ;;  %v10900_v51 = vpop.eup %10899  ;;  %v7370_v0 = vpack.c.bf16 %v10898_v28, %v10898_v28  ;;  %v5382_v18 = vpack.c.bf16 %v4870_v33, %v4870_v33  ;;  %v4839_v28 = vmul.f32 -20000.0, %v4327_v27 }
 0xc2c   :  { %v13692_v60 = vunpack.c.l.b16 %v7385_v31  ;;  %3293 = vperm.xlu1 %9949, %v11712_v55   ;;  %9466 = vmatpush.bf16.msrb.mxu0 %v8813_v40  ;;  %v7369_v8 = vpack.c.bf16 %v10900_v51, %v10900_v51  ;;  %10901 = vpow2.f32 %v6919_v53  ;;  %v7487_v31 = vunpack.c.h.b16 %v13624_v12 }
 0xc2d   :  { %v3221_v63 = vpop.permute.xlu2 %3220  ;;  %v8523_v22 = vunpack.c.l.b16 %v7370_v0  ;;  %v5894_v6 = vunpack.c.l.bf16 %v5382_v18  ;;  %v5351_v49 = vpack.c.bf16 %v4839_v28, %v4839_v28 }
 0xc2e   :  { %v8818_v26 = vpack.c.b16 %v13689_v7, %v13692_v60  ;;  %v8522_v16 = vunpack.c.l.b16 %v7369_v8  ;;  %v7519_v36 = vpack.c.b16 %v7487_v31, %v7487_v31  ;;  %v3829_v3 = vsub.f32 %v3221_v63, %v11262_v52 }
 0xc2f   :  { %v6915_v38 = vmul.f32 1.442695, %v5894_v6  ;;  %v5863_v12 = vunpack.c.l.bf16 %v5351_v49 }
 0xc30   :  { %9467 = vmatpush.bf16.msrb.mxu0 %v8812_v41  ;;  %v8810_v34 = vpack.c.b16 %v8523_v22, %v8522_v16  ;;  %9379 = vmatmul.bf16.vlgmr.msrb.gmra.mxu1 %v7519_v36  ;;  %v4341_v16 = vmul.f32 %v3829_v3, %v3829_v3 }
 0xc31   :  { %10903 = vpow2.f32 %v6915_v38 }
 0xc32   :  { %v10902_v61 = vpop.eup %10901 }
 0xc33   :  { %3105 = vperm.xlu2 %9950, %v14137_v39  }
 0xc34   :  { %3099 = vperm.xlu1 %9949, %v14137_v39   ;;  %9468 = vmatpush.bf16.msrb.mxu0 %v8811_v24  ;;  %v6853_v24 = vmul.f32 1.442695, %v5863_v12 }
 0xc35   :  { %v3318_v25 = vpop.permute.xlu2 %3317 }
 0xc36   :  { %v3845_v15 = vsub.f32 %v3318_v25, %v11262_v52  ;;  %v3330_v57 = vpop.permute.xlu1 %3329 }
 0xc37   :  { %v3847_v54 = vsub.f32 %v3330_v57, %v11262_v52  ;;  %v10904_v0 = vpop.eup %10903 }
 0xc38   :  { %v4357_v13 = vmul.f32 %v3845_v15, %v3845_v15  ;;  %9469 = vmatpush.bf16.msrb.mxu0 %v8810_v34  ;;  %v7430_v50 = vpack.c.bf16 %v10904_v0, %v10904_v0  ;;  %v4853_v34 = vmul.f32 -20000.0, %v4341_v16 }
 0xc39   :  { %v4359_v37 = vmul.f32 %v3847_v54, %v3847_v54 }
 0xc3a   :  { %v4869_v62 = vmul.f32 -20000.0, %v4357_v13  ;;  %v8583_v58 = vunpack.c.l.b16 %v7430_v50  ;;  %v5365_v6 = vpack.c.bf16 %v4853_v34, %v4853_v34 }
 0xc3b   :  { %v4871_v56 = vmul.f32 -20000.0, %v4359_v37  ;;  %9953 = vset.pattern.permute.xlu2 %v14083_v5 }
 0xc3c   :  { %v5381_v32 = vpack.c.bf16 %v4869_v62, %v4869_v62  ;;  %9952 = vset.pattern.permute.xlu1 %v11067_v2  ;;  %v7432_v2 = vpack.c.bf16 %v10902_v61, %v10902_v61 }
 0xc3d   :  { %v5383_v35 = vpack.c.bf16 %v4871_v56, %v4871_v56  ;;  %v5877_v56 = vunpack.c.l.bf16 %v5365_v6 }
 0xc3e   :  { %v5893_v40 = vunpack.c.l.bf16 %v5381_v32  ;;  %v8585_v33 = vunpack.c.l.b16 %v7432_v2 }
 0xc3f   :  { %v5895_v45 = vunpack.c.l.bf16 %v5383_v35 }
 0xc40   :  { %v6913_v51 = vmul.f32 1.442695, %v5893_v40 }
 0xc41   :  { %v6917_v47 = vmul.f32 1.442695, %v5895_v45  ;;  %v6881_v45 = vmul.f32 1.442695, %v5877_v56 }
 0xc42   :  { %10905 = vpow2.f32 %v6913_v51 }
 0xc43   :  { %10907 = vpow2.f32 %v6917_v47  ;;  %3281 = vperm.xlu2 %9953, %v11712_v55  }
 0xc44   :  { %3190 = vperm.xlu1 %9952, %v14228_v20   ;;  %10909 = vpow2.f32 %v6853_v24 }
 0xc45   :  { %v3130_v53 = vpop.permute.xlu2 %3129 }
 0xc46   :  { %v3142_v5 = vpop.permute.xlu1 %3141  ;;  %v3814_v62 = vsub.f32 %v3130_v53, %v11262_v52 }
 0xc47   :  { %v3816_v41 = vsub.f32 %v3142_v5, %v11262_v52 }
 0xc48   :  { %v10906_v1 = vpop.eup %10905  ;;  %v4326_v40 = vmul.f32 %v3814_v62, %v3814_v62  ;;  %v14237_v62 = vld [vmem:[#allocation108_spill] sm:$0xff] }
 0xc49   :  { %v10908_v44 = vpop.eup %10907  ;;  %v4328_v8 = vmul.f32 %v3816_v41, %v3816_v41  ;;  %v7429_v29 = vpack.c.bf16 %v10906_v1, %v10906_v1 }
 0xc4a   :  { %v7431_v22 = vpack.c.bf16 %v10908_v44, %v10908_v44  ;;  %v10910_v37 = vpop.eup %10909  ;;  %v4838_v61 = vmul.f32 -20000.0, %v4326_v40  ;;  %v14236_v44 = vld [vmem:[#allocation96_spill] sm:$0xff] }
 0xc4b   :  { %v4840_v18 = vmul.f32 -20000.0, %v4328_v8  ;;  %3087 = vperm.xlu2 %9953, %v14137_v39   ;;  %v8582_v57 = vunpack.c.l.b16 %v7429_v29  ;;  %v7399_v38 = vpack.c.bf16 %v10910_v37, %v10910_v37  ;;  %v3826_v8 = vsub.f32 %v14236_v44, %v11262_v52 }
 0xc4c   :  { %v8584_v25 = vunpack.c.l.b16 %v7431_v22  ;;  %3287 = vperm.xlu1 %9952, %v11712_v55   ;;  %v5350_v0 = vpack.c.bf16 %v4838_v61, %v4838_v61 }
 0xc4d   :  { %v5352_v15 = vpack.c.bf16 %v4840_v18, %v4840_v18  ;;  %v8840_v13 = vpack.c.b16 %v8583_v58, %v8582_v57  ;;  %v8552_v51 = vunpack.c.l.b16 %v7399_v38 }
 0xc4e   :  { %v8841_v63 = vpack.c.b16 %v8585_v33, %v8584_v25  ;;  %v5862_v1 = vunpack.c.l.bf16 %v5350_v0  ;;  %v4338_v25 = vmul.f32 %v3826_v8, %v3826_v8 }
 0xc4f   :  { %v5864_v43 = vunpack.c.l.bf16 %v5352_v15 }
 0xc50   :  { %9501 = vmatpush.bf16.msrb.mxu3 %v8841_v63  ;;  %v6851_v18 = vmul.f32 1.442695, %v5862_v1 }
 0xc51   :  { %v6855_v54 = vmul.f32 1.442695, %v5864_v43 }
 0xc53   :  { %10911 = vpow2.f32 %v6855_v54  ;;  %9956 = vset.pattern.permute.xlu2 %v11092_v9 }
 0xc54   :  { %9955 = vset.pattern.permute.xlu1 %v14158_v21  ;;  %9502 = vmatpush.bf16.msrb.mxu3 %v8840_v13  ;;  %10913 = vpow2.f32 %v6881_v45  ;;  %v4850_v13 = vmul.f32 -20000.0, %v4338_v25  ;;  %v57_v25 = vadd.s32 3328, %v14153_v17 }
 0xc55   :  { %v3215_v12 = vpop.permute.xlu2 %3214 }
 0xc56   :  { %v3227_v27 = vpop.permute.xlu1 %3226  ;;  %v3828_v3 = vsub.f32 %v3215_v12, %v11262_v52  ;;  %vm90_vm14 = vcmp.ge.s32.totalorder %v57_v25, %v12326_v48  ;;  %vm123_vm0 = vcmp.lt.s32.totalorder %v57_v25, %v12330_v30 }
 0xc57   :  { %v3830_v32 = vsub.f32 %v3227_v27, %v11262_v52  ;;  %v3843_v27 = vsub.f32 %v14237_v62, %v11262_v52  ;;  %vm155_vm2 = vmand %vm90_vm14, %vm123_vm0 }
 0xc58   :  { %v4340_v29 = vmul.f32 %v3828_v3, %v3828_v3 }
 0xc59   :  { %v10912_v35 = vpop.eup %10911  ;;  %v4342_v31 = vmul.f32 %v3830_v32, %v3830_v32  ;;  %v5362_v32 = vpack.c.bf16 %v4850_v13, %v4850_v13  ;;  %v187_v13 = vsel %vm155_vm2, 1.0, %v14166_v59 }
 0xc5a   :  { %v7400_v28 = vpack.c.bf16 %v10912_v35, %v10912_v35  ;;  %v10914_v41 = vpop.eup %10913  ;;  %v4852_v57 = vmul.f32 -20000.0, %v4340_v29 }
 0xc5b   :  { %v4854_v36 = vmul.f32 -20000.0, %v4342_v31  ;;  %3178 = vperm.xlu2 %9956, %v14228_v20   ;;  %v7413_v24 = vpack.c.bf16 %v10914_v41, %v10914_v41  ;;  %v5874_v31 = vunpack.c.l.bf16 %v5362_v32 }
 0xc5c   :  { %v8553_v21 = vunpack.c.l.b16 %v7400_v28  ;;  %3172 = vperm.xlu1 %9955, %v14228_v20   ;;  %v5364_v53 = vpack.c.bf16 %v4852_v57, %v4852_v57 }
 0xc5d   :  { %v5366_v47 = vpack.c.bf16 %v4854_v36, %v4854_v36  ;;  %v8566_v43 = vunpack.c.l.b16 %v7413_v24  ;;  %v6875_v0 = vmul.f32 1.442695, %v5874_v31 }
 0xc5e   :  { %v8825_v49 = vpack.c.b16 %v8553_v21, %v8552_v51  ;;  %v5876_v35 = vunpack.c.l.bf16 %v5364_v53 }
 0xc5f   :  { %v5878_v2 = vunpack.c.l.bf16 %v5366_v47 }
 0xc60   :  { %9475 = vmatpush.bf16.msrb.mxu1 %v8825_v49  ;;  %v6879_v36 = vmul.f32 1.442695, %v5876_v35 }
 0xc61   :  { %v6883_v5 = vmul.f32 1.442695, %v5878_v2  ;;  %v55_v2 = vadd.s32 3072, %v14153_v17 }
 0xc63   :  { %10915 = vpow2.f32 %v6883_v5  ;;  %3275 = vperm.xlu2 %9956, %v11712_v55   ;;  %v56_v5 = vadd.s32 3200, %v14153_v17  ;;  %vm88_vm8 = vcmp.ge.s32.totalorder %v55_v2, %v12326_v48  ;;  %vm121_vm10 = vcmp.lt.s32.totalorder %v55_v2, %v12330_v30 }
 0xc64   :  { %3269 = vperm.xlu1 %9955, %v11712_v55   ;;  %10917 = vpow2.f32 %v6851_v18  ;;  %vm153_vm12 = vmand %vm88_vm8, %vm121_vm10 }
 0xc65   :  { %v3112_v34 = vpop.permute.xlu2 %3111  ;;  %vm89_vm9 = vcmp.ge.s32.totalorder %v56_v5, %v12326_v48  ;;  %vm122_vm11 = vcmp.lt.s32.totalorder %v56_v5, %v12330_v30 }
 0xc66   :  { %v3124_v33 = vpop.permute.xlu1 %3123  ;;  %v3811_v29 = vsub.f32 %v3112_v34, %v11262_v52  ;;  %vm154_vm13 = vmand %vm89_vm9, %vm122_vm11 }
 0xc67   :  { %v3813_v22 = vsub.f32 %v3124_v33, %v11262_v52 }
 0xc69   :  { %v10916_v16 = vpop.eup %10915  ;;  %v4325_v50 = vmul.f32 %v3813_v22, %v3813_v22 }
 0xc6a   :  { %v7414_v15 = vpack.c.bf16 %v10916_v16, %v10916_v16  ;;  %v10918_v38 = vpop.eup %10917  ;;  %v185_v16 = vsel %vm153_vm12, 1.0, %v14166_v59 }
 0xc6b   :  { %v4837_v63 = vmul.f32 -20000.0, %v4325_v50  ;;  %9959 = vset.pattern.permute.xlu2 %v11073_v4  ;;  %v4355_v4 = vmul.f32 %v3843_v27, %v3843_v27  ;;  %v7398_v40 = vpack.c.bf16 %v10918_v38, %v10918_v38  ;;  %v186_v50 = vsel %vm154_vm13, 1.0, %v14166_v59 }
 0xc6c   :  { %v8567_v58 = vunpack.c.l.b16 %v7414_v15  ;;  %9958 = vset.pattern.permute.xlu1 %v11092_v9 }
 0xc6d   :  { %v5349_v54 = vpack.c.bf16 %v4837_v63, %v4837_v63  ;;  %v4867_v61 = vmul.f32 -20000.0, %v4355_v4  ;;  %v8551_v12 = vunpack.c.l.b16 %v7398_v40  ;;  %v205_v63 = vpack.c.bf16 %v186_v50, %v185_v16 }
 0xc6e   :  { %v8832_v6 = vpack.c.b16 %v8567_v58, %v8566_v43 }
 0xc6f   :  { %v5861_v37 = vunpack.c.l.bf16 %v5349_v54  ;;  %v5379_v15 = vpack.c.bf16 %v4867_v61, %v4867_v61  ;;  %v7490_v34 = vunpack.c.l.b16 %v205_v63  ;;  %v4323_v54 = vmul.f32 %v3811_v29, %v3811_v29 }
 0xc70   :  { %9489 = vmatpush.bf16.msrb.mxu2 %v8832_v6  ;;  %v7491_v2 = vunpack.c.h.b16 %v205_v63 }
 0xc71   :  { %v6849_v56 = vmul.f32 1.442695, %v5861_v37  ;;  %v5891_v6 = vunpack.c.l.bf16 %v5379_v15  ;;  %v7522_v53 = vpack.c.b16 %v7490_v34, %v7490_v34  ;;  %v4835_v38 = vmul.f32 -20000.0, %v4323_v54 }
 0xc73   :  { %10919 = vpow2.f32 %v6849_v56  ;;  %3160 = vperm.xlu2 %9959, %v14228_v20   ;;  %9418 = vmatmul.bf16.vlgmr.msra.gmra.mxu0 %v7522_v53  ;;  %v5347_v5 = vpack.c.bf16 %v4835_v38, %v4835_v38 }
 0xc74   :  { %3081 = vperm.xlu1 %9958, %v14137_v39   ;;  %10921 = vpow2.f32 %v6879_v36 }
 0xc75   :  { %v3197_v9 = vpop.permute.xlu2 %3196  ;;  %10923 = vpow2.f32 %v6875_v0 }
 0xc76   :  { %v3825_v28 = vsub.f32 %v3197_v9, %v11262_v52  ;;  %v3209_v45 = vpop.permute.xlu1 %3208 }
 0xc77   :  { %v3827_v51 = vsub.f32 %v3209_v45, %v11262_v52 }
 0xc78   :  { %v4337_v21 = vmul.f32 %v3825_v28, %v3825_v28 }
 0xc79   :  { %v10920_v47 = vpop.eup %10919  ;;  %v4339_v49 = vmul.f32 %v3827_v51, %v3827_v51 }
 0xc7a   :  { %v7397_v3 = vpack.c.bf16 %v10920_v47, %v10920_v47  ;;  %v4849_v41 = vmul.f32 -20000.0, %v4337_v21  ;;  %v10922_v43 = vpop.eup %10921  ;;  %v59_v21 = vadd.s32 3584, %v14153_v17 }
 0xc7b   :  { %v4851_v1 = vmul.f32 -20000.0, %v4339_v49  ;;  %3257 = vperm.xlu2 %9959, %v11712_v55   ;;  %v7412_v62 = vpack.c.bf16 %v10922_v43, %v10922_v43  ;;  %v10924_v56 = vpop.eup %10923 }
 0xc7c   :  { %v8550_v44 = vunpack.c.l.b16 %v7397_v3  ;;  %v5361_v8 = vpack.c.bf16 %v4849_v41, %v4849_v41  ;;  %9960 = vset.pattern.permute.xlu1 %v11095_v10  ;;  %v58_v10 = vadd.s32 3456, %v14153_v17  ;;  %vm92_vm4 = vcmp.ge.s32.totalorder %v59_v21, %v12326_v48 }
 0xc7d   :  { %v5363_v33 = vpack.c.bf16 %v4851_v1, %v4851_v1  ;;  %v8565_v28 = vunpack.c.l.b16 %v7412_v62  ;;  %v7410_v3 = vpack.c.bf16 %v10924_v56, %v10924_v56  ;;  %v7523_v1 = vpack.c.b16 %v7491_v2, %v7491_v2 }
 0xc7e   :  { %v5873_v22 = vunpack.c.l.bf16 %v5361_v8  ;;  %v8824_v24 = vpack.c.b16 %v8551_v12, %v8550_v44  ;;  %vm91_vm15 = vcmp.ge.s32.totalorder %v58_v10, %v12326_v48  ;;  %vm124_vm1 = vcmp.lt.s32.totalorder %v58_v10, %v12330_v30 }
 0xc7f   :  { %v5875_v18 = vunpack.c.l.bf16 %v5363_v33  ;;  %vm156_vm3 = vmand %vm91_vm15, %vm124_vm1  ;;  %v60_v12 = vadd.s32 3712, %v14153_v17  ;;  %vm125_vm5 = vcmp.lt.s32.totalorder %v59_v21, %v12330_v30  ;;  %9431 = vmatmul.bf16.vlgmr.msra.gmra.mxu1 %v7523_v1  ;;  %v8563_v25 = vunpack.c.l.b16 %v7410_v3  ;;  %v9107_v3 = vpop.f32.mrf.mxu0 }
 0xc80   :  { %v6873_v57 = vmul.f32 1.442695, %v5873_v22  ;;  %9476 = vmatpush.bf16.msrb.mxu1 %v8824_v24  ;;  %v188_v37 = vsel %vm156_vm3, 1.0, %v14166_v59  ;;  %vm157_vm8 = vmand %vm92_vm4, %vm125_vm5  ;;  %v5859_v24 = vunpack.c.l.bf16 %v5347_v5 }
 0xc81   :  { %v6877_v58 = vmul.f32 1.442695, %v5875_v18  ;;  %v206_v27 = vpack.c.bf16 %v188_v37, %v187_v13  ;;  %vm93_vm6 = vcmp.ge.s32.totalorder %v60_v12, %v12326_v48  ;;  %vm126_vm7 = vcmp.lt.s32.totalorder %v60_v12, %v12330_v30 }
 0xc82   :  { %10925 = vpow2.f32 %v6873_v57  ;;  %vm158_vm9 = vmand %vm93_vm6, %vm126_vm7  ;;  %v6845_v34 = vmul.f32 1.442695, %v5859_v24 }
 0xc83   :  { %10927 = vpow2.f32 %v6877_v58  ;;  %9961 = vset.pattern.permute.xlu2 %v14136_v23  ;;  %v7492_v4 = vunpack.c.l.b16 %v206_v27  ;;  %v6909_v23 = vmul.f32 1.442695, %v5891_v6  ;;  %v7493_v31 = vunpack.c.h.b16 %v206_v27 }
 0xc84   :  { %3166 = vperm.xlu1 %9960, %v14228_v20   ;;  %v190_v50 = vsel %vm158_vm9, 1.0, %v14166_v59 }
 0xc85   :  { %v3300_v36 = vpop.permute.xlu2 %3299  ;;  %v7524_v51 = vpack.c.b16 %v7492_v4, %v7492_v4  ;;  %v7525_v49 = vpack.c.b16 %v7493_v31, %v7493_v31  ;;  %10929 = vpow2.f32 %v6909_v23 }
 0xc86   :  { %v3312_v32 = vpop.permute.xlu1 %3311  ;;  %v3842_v8 = vsub.f32 %v3300_v36, %v11262_v52 }
 0xc87   :  { %v3844_v35 = vsub.f32 %v3312_v32, %v11262_v52  ;;  %9444 = vmatmul.bf16.vlgmr.msra.gmra.mxu2 %v7524_v51  ;;  %9457 = vmatmul.bf16.vlgmr.msra.gmra.mxu3 %v7525_v49 }
 0xc88   :  { %v10926_v9 = vpop.eup %10925  ;;  %v4354_v57 = vmul.f32 %v3842_v8, %v3842_v8 }
 0xc89   :  { %v10928_v40 = vpop.eup %10927  ;;  %v4356_v45 = vmul.f32 %v3844_v35, %v3844_v35  ;;  %v7409_v47 = vpack.c.bf16 %v10926_v9, %v10926_v9  ;;  %v3808_v35 = vsub.f32 %v13047_v42, %v11262_v52 }
 0xc8a   :  { %v7411_v61 = vpack.c.bf16 %v10928_v40, %v10928_v40  ;;  %v4866_v37 = vmul.f32 -20000.0, %v4354_v57 }
 0xc8b   :  { %v4868_v0 = vmul.f32 -20000.0, %v4356_v45  ;;  %3148 = vperm.xlu2 %9961, %v14228_v20   ;;  %v8562_v33 = vunpack.c.l.b16 %v7409_v47  ;;  %v10930_v6 = vpop.eup %10929 }
 0xc8c   :  { %v8564_v41 = vunpack.c.l.b16 %v7411_v61  ;;  %3069 = vperm.xlu1 %9960, %v14137_v39   ;;  %v189_v39 = vsel %vm157_vm8, 1.0, %v14166_v59  ;;  %v7427_v32 = vpack.c.bf16 %v10930_v6, %v10930_v6  ;;  %v5378_v4 = vpack.c.bf16 %v4866_v37, %v4866_v37  ;;  %v9120_v37 = vpop.f32.mrf.mxu1 }
 0xc8d   :  { %v5380_v44 = vpack.c.bf16 %v4868_v0, %v4868_v0  ;;  %v13769_v10 = vpack.c.bf16 %v190_v50, %v189_v39  ;;  %v8830_v43 = vpack.c.b16 %v8563_v25, %v8562_v33  ;;  %v3106_v13 = vpop.permute.xlu2 %3105 }
 0xc8e   :  { %v3118_v29 = vpop.permute.xlu1 %3117  ;;  %v8831_v22 = vpack.c.b16 %v8565_v28, %v8564_v41  ;;  %v3810_v27 = vsub.f32 %v3106_v13, %v11262_v52  ;;  %v4320_v28 = vmul.f32 %v3808_v35, %v3808_v35  ;;  %v5890_v45 = vunpack.c.l.bf16 %v5378_v4 }
 0xc8f   :  { %v5892_v16 = vunpack.c.l.bf16 %v5380_v44  ;;  %v3812_v18 = vsub.f32 %v3118_v29, %v11262_v52  ;;  %v7494_v58 = vunpack.c.l.b16 %v13769_v10 }
 0xc90   :  { %9490 = vmatpush.bf16.msrb.mxu2 %v8831_v22  ;;  %v4832_v2 = vmul.f32 -20000.0, %v4320_v28  ;;  %v6907_v5 = vmul.f32 1.442695, %v5890_v45 }
 0xc91   :  { %v6911_v15 = vmul.f32 1.442695, %v5892_v16  ;;  %v4324_v63 = vmul.f32 %v3812_v18, %v3812_v18  ;;  %v7526_v53 = vpack.c.b16 %v7494_v58, %v7494_v58  ;;  %v3823_v18 = vsub.f32 %v12299_v19, %v11262_v52 }
 0xc92   :  { %v5344_v8 = vpack.c.bf16 %v4832_v2, %v4832_v2 }
 0xc93   :  { %10931 = vpow2.f32 %v6911_v15  ;;  %v4836_v54 = vmul.f32 -20000.0, %v4324_v63  ;;  %3245 = vperm.xlu2 %9961, %v11712_v55   ;;  %9470 = vmatmul.bf16.vlgmr.msrb.gmra.mxu0 %v7526_v53  ;;  %v4322_v55 = vmul.f32 %v3810_v27, %v3810_v27  ;;  %v4335_v6 = vmul.f32 %v3823_v18, %v3823_v18 }
 0xc94   :  { %9962 = vset.pattern.permute.xlu1 %v14094_v11  ;;  %9491 = vmatpush.bf16.msrb.mxu2 %v8830_v43  ;;  %10933 = vpow2.f32 %v6845_v34  ;;  %v8580_v11 = vunpack.c.l.b16 %v7427_v32  ;;  %v5856_v57 = vunpack.c.l.bf16 %v5344_v8  ;;  %v9109_v34 = vpop.f32.mrf.mxu0  ;;  %v9133_v32 = vpop.f32.mrf.mxu2 }
 0xc95   :  { %v5348_v62 = vpack.c.bf16 %v4836_v54, %v4836_v54  ;;  %v4834_v36 = vmul.f32 -20000.0, %v4322_v55  ;;  %v4847_v4 = vmul.f32 -20000.0, %v4335_v6  ;;  %v9146_v55 = vpop.f32.mrf.mxu3 }
 0xc96   :  { %v6839_v27 = vmul.f32 1.442695, %v5856_v57 }
 0xc97   :  { %v5860_v56 = vunpack.c.l.bf16 %v5348_v62  ;;  %v5346_v0 = vpack.c.bf16 %v4834_v36, %v4834_v36 }
 0xc99   :  { %v10932_v38 = vpop.eup %10931  ;;  %v6847_v9 = vmul.f32 1.442695, %v5860_v56  ;;  %v5858_v33 = vunpack.c.l.bf16 %v5346_v0 }
 0xc9a   :  { %v7428_v23 = vpack.c.bf16 %v10932_v38, %v10932_v38  ;;  %v10934_v40 = vpop.eup %10933 }
 0xc9b   :  { %10935 = vpow2.f32 %v6847_v9  ;;  %v7395_v49 = vpack.c.bf16 %v10934_v40, %v10934_v40  ;;  %v6843_v63 = vmul.f32 1.442695, %v5858_v33 }
 0xc9c   :  { %v8581_v31 = vunpack.c.l.b16 %v7428_v23  ;;  %3154 = vperm.xlu1 %9962, %v14228_v20   ;;  %10937 = vpow2.f32 %v6907_v5  ;;  %v9159_v28 = vpop.f32.mrf.mxu0  ;;  %v9135_v2 = vpop.f32.mrf.mxu2 }
 0xc9d   :  { %v3282_v51 = vpop.permute.xlu2 %3281  ;;  %v8548_v20 = vunpack.c.l.b16 %v7395_v49  ;;  %v9121_v49 = vadd.f32 %v9120_v37, %v9107_v3  ;;  %v9148_v8 = vpop.f32.mrf.mxu3 }
 0xc9e   :  { %v3294_v21 = vpop.permute.xlu1 %3293  ;;  %v8839_v47 = vpack.c.b16 %v8581_v31, %v8580_v11  ;;  %v3839_v19 = vsub.f32 %v3282_v51, %v11262_v52  ;;  %v9122_v51 = vpop.f32.mrf.mxu1 }
 0xc9f   :  { %v3841_v61 = vsub.f32 %v3294_v21, %v11262_v52 }
 0xca0   :  { %9503 = vmatpush.bf16.msrb.mxu3 %v8839_v47  ;;  %v4351_v31 = vmul.f32 %v3839_v19, %v3839_v19  ;;  %v5359_v47 = vpack.c.bf16 %v4847_v4, %v4847_v4 }
 0xca1   :  { %v10936_v42 = vpop.eup %10935  ;;  %v4353_v12 = vmul.f32 %v3841_v61, %v3841_v61 }
 0xca2   :  { %v7396_v41 = vpack.c.bf16 %v10936_v42, %v10936_v42  ;;  %v10938_v13 = vpop.eup %10937  ;;  %v4863_v42 = vmul.f32 -20000.0, %v4351_v31 }
 0xca3   :  { %v4865_v1 = vmul.f32 -20000.0, %v4353_v12  ;;  %v7426_v38 = vpack.c.bf16 %v10938_v13, %v10938_v13 }
 0xca4   :  { %v8549_v44 = vunpack.c.l.b16 %v7396_v41  ;;  %v9134_v41 = vadd.f32 %v9133_v32, %v9121_v49  ;;  %v9161_v18 = vpop.f32.mrf.mxu0  ;;  %v9185_v6 = vpop.f32.mrf.mxu2 }
 0xca5   :  { %v5377_v29 = vpack.c.bf16 %v4865_v1, %v4865_v1  ;;  %v3088_v22 = vpop.permute.xlu2 %3087  ;;  %v8579_v45 = vunpack.c.l.b16 %v7426_v38 }
 0xca6   :  { %v3807_v39 = vsub.f32 %v3088_v22, %v11262_v52  ;;  %v3100_v24 = vpop.permute.xlu1 %3099  ;;  %v8823_v16 = vpack.c.b16 %v8549_v44, %v8548_v20  ;;  %v5871_v20 = vunpack.c.l.bf16 %v5359_v47  ;;  %v9147_v22 = vadd.f32 %v9146_v55, %v9134_v41 }
 0xca7   :  { %v5889_v50 = vunpack.c.l.bf16 %v5377_v29  ;;  %v3809_v25 = vsub.f32 %v3100_v24, %v11262_v52  ;;  %v5375_v24 = vpack.c.bf16 %v4863_v42, %v4863_v42 }
 0xca8   :  { %v4319_v15 = vmul.f32 %v3807_v39, %v3807_v39  ;;  %9477 = vmatpush.bf16.msrb.mxu1 %v8823_v16 }
 0xca9   :  { %v6905_v43 = vmul.f32 1.442695, %v5889_v50  ;;  %v4321_v58 = vmul.f32 %v3809_v25, %v3809_v25  ;;  %v5887_v34 = vunpack.c.l.bf16 %v5375_v24 }
 0xcaa   :  { %v4831_v54 = vmul.f32 -20000.0, %v4319_v15  ;;  %v6869_v15 = vmul.f32 1.442695, %v5871_v20 }
 0xcab   :  { %10939 = vpow2.f32 %v6905_v43  ;;  %v4833_v53 = vmul.f32 -20000.0, %v4321_v58  ;;  %v6901_v38 = vmul.f32 1.442695, %v5887_v34 }
 0xcac   :  { %v5343_v62 = vpack.c.bf16 %v4831_v54, %v4831_v54  ;;  %10941 = vpow2.f32 %v6843_v63  ;;  %v9172_v63 = vpop.f32.mrf.mxu1  ;;  %v9211_v55 = vpop.f32.mrf.mxu0 }
 0xcad   :  { %v5345_v56 = vpack.c.bf16 %v4833_v53, %v4833_v53  ;;  %10943 = vpow2.f32 %v6839_v27 }
 0xcae   :  { %v5855_v35 = vunpack.c.l.bf16 %v5343_v62 }
 0xcaf   :  { %v5857_v9 = vunpack.c.l.bf16 %v5345_v56  ;;  %v9198_v56 = vpop.f32.mrf.mxu3 }
 0xcb0   :  { %v6837_v23 = vmul.f32 1.442695, %v5855_v35 }
 0xcb1   :  { %v10940_v11 = vpop.eup %10939  ;;  %v6841_v40 = vmul.f32 1.442695, %v5857_v9 }
 0xcb2   :  { %v7425_v36 = vpack.c.bf16 %v10940_v11, %v10940_v11  ;;  %10945 = vpow2.f32 %v6837_v23  ;;  %v10942_v21 = vpop.eup %10941 }
 0xcb3   :  { %10947 = vpow2.f32 %v6841_v40  ;;  %v7394_v5 = vpack.c.bf16 %v10942_v21, %v10942_v21  ;;  %v10944_v1 = vpop.eup %10943 }
 0xcb4   :  { %v8578_v61 = vunpack.c.l.b16 %v7425_v36  ;;  %v7392_v43 = vpack.c.bf16 %v10944_v1, %v10944_v1  ;;  %10949 = vpow2.f32 %v6869_v15  ;;  %v9174_v40 = vpop.f32.mrf.mxu1  ;;  %v9213_v1 = vpop.f32.mrf.mxu0 }
 0xcb5   :  { %v3179_v29 = vpop.permute.xlu2 %3178  ;;  %v8547_v3 = vunpack.c.l.b16 %v7394_v5 }
 0xcb6   :  { %v3191_v0 = vpop.permute.xlu1 %3190  ;;  %v8838_v12 = vpack.c.b16 %v8579_v45, %v8578_v61  ;;  %v3822_v13 = vsub.f32 %v3179_v29, %v11262_v52  ;;  %v8545_v32 = vunpack.c.l.b16 %v7392_v43  ;;  %v9160_v45 = vadd.f32 %v9159_v28, %v9147_v22  ;;  %v9187_v61 = vpop.f32.mrf.mxu2 }
 0xcb7   :  { %v3824_v44 = vsub.f32 %v3191_v0, %v11262_v52  ;;  %v9200_v42 = vpop.f32.mrf.mxu3 }
 0xcb8   :  { %v10946_v33 = vpop.eup %10945  ;;  %9504 = vmatpush.bf16.msrb.mxu3 %v8838_v12  ;;  %v4334_v9 = vmul.f32 %v3822_v13, %v3822_v13  ;;  %v9173_v29 = vadd.f32 %v9172_v63, %v9160_v45 }
 0xcb9   :  { %v10948_v39 = vpop.eup %10947  ;;  %v4336_v16 = vmul.f32 %v3824_v44, %v3824_v44  ;;  %v7391_v50 = vpack.c.bf16 %v10946_v33, %v10946_v33 }
 0xcba   :  { %v7393_v25 = vpack.c.bf16 %v10948_v39, %v10948_v39  ;;  %v10950_v36 = vpop.eup %10949  ;;  %v4846_v47 = vmul.f32 -20000.0, %v4334_v9 }
 0xcbb   :  { %v4848_v57 = vmul.f32 -20000.0, %v4336_v16  ;;  %v8544_v53 = vunpack.c.l.b16 %v7391_v50  ;;  %v7407_v2 = vpack.c.bf16 %v10950_v36, %v10950_v36  ;;  %v3805_v36 = vsub.f32 %v13431_v46, %v11262_v52 }
 0xcbc   :  { %v8546_v58 = vunpack.c.l.b16 %v7393_v25  ;;  %v5358_v12 = vpack.c.bf16 %v4846_v47, %v4846_v47  ;;  %v9224_v8 = vpop.f32.mrf.mxu1  ;;  %v9186_v25 = vadd.f32 %v9185_v6, %v9173_v29  ;;  %v9263_v63 = vpop.f32.mrf.mxu0 }
 0xcbd   :  { %v5360_v54 = vpack.c.bf16 %v4848_v57, %v4848_v57  ;;  %v8821_v23 = vpack.c.b16 %v8545_v32, %v8544_v53  ;;  %v3276_v11 = vpop.permute.xlu2 %3275  ;;  %v8560_v28 = vunpack.c.l.b16 %v7407_v2  ;;  %v3264_v53 = vpop.permute.xlu0 %3263  ;;  %v4317_v1 = vmul.f32 %v3805_v36, %v3805_v36 }
 0xcbe   :  { %v3288_v37 = vpop.permute.xlu1 %3287  ;;  %v8822_v62 = vpack.c.b16 %v8547_v3, %v8546_v58  ;;  %v3838_v51 = vsub.f32 %v3276_v11, %v11262_v52  ;;  %v5870_v22 = vunpack.c.l.bf16 %v5358_v12  ;;  %v9237_v16 = vpop.f32.mrf.mxu2  ;;  %v9199_v43 = vadd.f32 %v9198_v56, %v9186_v25 }
 0xcbf   :  { %v5872_v27 = vunpack.c.l.bf16 %v5360_v54  ;;  %v3840_v19 = vsub.f32 %v3288_v37, %v11262_v52  ;;  %v9250_v57 = vpop.f32.mrf.mxu3 }
 0xcc0   :  { %9478 = vmatpush.bf16.msrb.mxu1 %v8822_v62  ;;  %v4350_v41 = vmul.f32 %v3838_v51, %v3838_v51  ;;  %v6867_v34 = vmul.f32 1.442695, %v5870_v22 }
 0xcc1   :  { %v6871_v35 = vmul.f32 1.442695, %v5872_v27  ;;  %v4352_v4 = vmul.f32 %v3840_v19, %v3840_v19  ;;  %v9212_v27 = vadd.f32 %v9211_v55, %v9199_v43  ;;  %v3836_v19 = vsub.f32 %v3264_v53, %v11262_v52 }
 0xcc2   :  { %v4862_v39 = vmul.f32 -20000.0, %v4350_v41 }
 0xcc3   :  { %10951 = vpow2.f32 %v6871_v35  ;;  %v4864_v31 = vmul.f32 -20000.0, %v4352_v4  ;;  %v4348_v6 = vmul.f32 %v3836_v19, %v3836_v19 }
 0xcc4   :  { %9479 = vmatpush.bf16.msrb.mxu1 %v8821_v23  ;;  %10953 = vpow2.f32 %v6901_v38  ;;  %v5374_v13 = vpack.c.bf16 %v4862_v39, %v4862_v39  ;;  %v9226_v38 = vpop.f32.mrf.mxu1 }
 0xcc5   :  { %v5376_v21 = vpack.c.bf16 %v4864_v31, %v4864_v31  ;;  %v4860_v40 = vmul.f32 -20000.0, %v4348_v6 }
 0xcc6   :  { %v5886_v9 = vunpack.c.l.bf16 %v5374_v13  ;;  %v9239_v56 = vpop.f32.mrf.mxu2 }
 0xcc7   :  { %v5888_v49 = vunpack.c.l.bf16 %v5376_v21  ;;  %v9252_v47 = vpop.f32.mrf.mxu3  ;;  %v5372_v51 = vpack.c.bf16 %v4860_v40, %v4860_v40 }
 0xcc8   :  { %v6899_v42 = vmul.f32 1.442695, %v5886_v9 }
 0xcc9   :  { %v10952_v5 = vpop.eup %10951  ;;  %v6903_v0 = vmul.f32 1.442695, %v5888_v49 }
 0xcca   :  { %v7408_v20 = vpack.c.bf16 %v10952_v5, %v10952_v5  ;;  %v10954_v44 = vpop.eup %10953  ;;  %v9265_v5 = vpop.f32.mrf.mxu0 }
 0xccb   :  { %10955 = vpow2.f32 %v6903_v0  ;;  %v7423_v18 = vpack.c.bf16 %v10954_v44, %v10954_v44  ;;  %v5884_v0 = vunpack.c.l.bf16 %v5372_v51 }
 0xccc   :  { %v8561_v33 = vunpack.c.l.b16 %v7408_v20  ;;  %10957 = vpow2.f32 %v6867_v34  ;;  %v9276_v44 = vpop.f32.mrf.mxu1 }
 0xccd   :  { %v13788_v24 = vpop.permute.xlu2 %3160  ;;  %v8576_v37 = vunpack.c.l.b16 %v7423_v18  ;;  %v6895_v46 = vmul.f32 1.442695, %v5884_v0 }
 0xcce   :  { %v3173_v3 = vpop.permute.xlu1 %3172  ;;  %v8829_v50 = vpack.c.b16 %v8561_v33, %v8560_v28  ;;  %v9225_v28 = vadd.f32 %v9224_v8, %v9212_v27  ;;  %v9289_v22 = vpop.f32.mrf.mxu2 }
 0xccf   :  { %v3821_v15 = vsub.f32 %v3173_v3, %v11262_v52 }
 0xcd0   :  { %9492 = vmatpush.bf16.msrb.mxu2 %v8829_v50  ;;  %v9238_v18 = vadd.f32 %v9237_v16, %v9225_v28  ;;  %v4829_v50 = vmul.f32 -20000.0, %v4317_v1 }
 0xcd1   :  { %v10956_v58 = vpop.eup %10955  ;;  %v4333_v54 = vmul.f32 %v3821_v15, %v3821_v15  ;;  %v9302_v15 = vpop.f32.mrf.mxu3 }
 0xcd2   :  { %v7424_v62 = vpack.c.bf16 %v10956_v58, %v10956_v58  ;;  %v10958_v41 = vpop.eup %10957  ;;  %v9251_v43 = vadd.f32 %v9250_v57, %v9238_v18  ;;  %v13796_v13 = vpop.f32.mrf.mxu0  ;;  %v5341_v27 = vpack.c.bf16 %v4829_v50, %v4829_v50 }
 0xcd3   :  { %v4845_v32 = vmul.f32 -20000.0, %v4333_v54  ;;  %v7406_v39 = vpack.c.bf16 %v10958_v41, %v10958_v41 }
 0xcd4   :  { %v8577_v35 = vunpack.c.l.b16 %v7424_v62  ;;  %v9278_v19 = vpop.f32.mrf.mxu1 }
 0xcd5   :  { %v5357_v4 = vpack.c.bf16 %v4845_v32, %v4845_v32  ;;  %v3258_v23 = vpop.permute.xlu2 %3257  ;;  %v8559_v53 = vunpack.c.l.b16 %v7406_v39 }
 0xcd6   :  { %v3270_v11 = vpop.permute.xlu1 %3269  ;;  %v8837_v31 = vpack.c.b16 %v8577_v35, %v8576_v37  ;;  %v3835_v45 = vsub.f32 %v3258_v23, %v11262_v52  ;;  %v9264_v37 = vadd.f32 %v9263_v63, %v9251_v43  ;;  %v9291_v35 = vpop.f32.mrf.mxu2  ;;  %v5853_v23 = vunpack.c.l.bf16 %v5341_v27 }
 0xcd7   :  { %v5869_v55 = vunpack.c.l.bf16 %v5357_v4  ;;  %v3837_v21 = vsub.f32 %v3270_v11, %v11262_v52  ;;  %v3819_v4 = vsub.f32 %v13788_v24, %v11262_v52 }
 0xcd8   :  { %9505 = vmatpush.bf16.msrb.mxu3 %v8837_v31  ;;  %v4347_v61 = vmul.f32 %v3835_v45, %v3835_v45  ;;  %v9277_v41 = vadd.f32 %v9276_v44, %v9264_v37 }
 0xcd9   :  { %v6865_v49 = vmul.f32 1.442695, %v5869_v55  ;;  %v4349_v2 = vmul.f32 %v3837_v21, %v3837_v21  ;;  %v9304_v63 = vpop.f32.mrf.mxu3  ;;  %v3252_v55 = vpop.permute.xlu0 %3251 }
 0xcda   :  { %v4859_v12 = vmul.f32 -20000.0, %v4347_v61  ;;  %v9317_v21 = vpop.f32.mrf.mxu0  ;;  %v4331_v61 = vmul.f32 %v3819_v4, %v3819_v4  ;;  %v9290_v18 = vadd.f32 %v9289_v22, %v9277_v41 }
 0xcdb   :  { %10959 = vpow2.f32 %v6865_v49  ;;  %v4861_v20 = vmul.f32 -20000.0, %v4349_v2  ;;  %v3834_v49 = vsub.f32 %v3252_v55, %v11262_v52 }
 0xcdc   :  { %v5371_v33 = vpack.c.bf16 %v4859_v12, %v4859_v12  ;;  %10961 = vpow2.f32 %v6899_v42  ;;  %v6833_v42 = vmul.f32 1.442695, %v5853_v23  ;;  %v9328_v5 = vpop.f32.mrf.mxu1 }
 0xcdd   :  { %v5373_v29 = vpack.c.bf16 %v4861_v20, %v4861_v20  ;;  %10963 = vpow2.f32 %v6895_v46  ;;  %v4346_v1 = vmul.f32 %v3834_v49, %v3834_v49  ;;  %v3803_v20 = vsub.f32 %v13696_v14, %v11262_v52 }
 0xcde   :  { %v5883_v3 = vunpack.c.l.bf16 %v5371_v33  ;;  %v9341_v33 = vpop.f32.mrf.mxu2 }
 0xcdf   :  { %v5885_v25 = vunpack.c.l.bf16 %v5373_v29  ;;  %v4843_v29 = vmul.f32 -20000.0, %v4331_v61 }
 0xce0   :  { %v6893_v58 = vmul.f32 1.442695, %v5883_v3  ;;  %v4858_v3 = vmul.f32 -20000.0, %v4346_v1 }
 0xce1   :  { %v10960_v34 = vpop.eup %10959  ;;  %v6897_v54 = vmul.f32 1.442695, %v5885_v25  ;;  %v9354_v43 = vpop.f32.mrf.mxu3  ;;  %v5355_v37 = vpack.c.bf16 %v4843_v29, %v4843_v29 }
 0xce2   :  { %v7405_v8 = vpack.c.bf16 %v10960_v34, %v10960_v34  ;;  %10965 = vpow2.f32 %v6893_v58  ;;  %v10962_v62 = vpop.eup %10961  ;;  %v9303_v58 = vadd.f32 %v9302_v15, %v9290_v18  ;;  %v5370_v34 = vpack.c.bf16 %v4858_v3, %v4858_v3  ;;  %v13807_v14 = vpop.f32.mrf.mxu0 }
 0xce3   :  { %10967 = vpow2.f32 %v6897_v54  ;;  %v10964_v32 = vpop.eup %10963  ;;  %v7422_v6 = vpack.c.bf16 %v10962_v62, %v10962_v62  ;;  %v4315_v54 = vmul.f32 %v3803_v20, %v3803_v20 }
 0xce4   :  { %v8558_v16 = vunpack.c.l.b16 %v7405_v8  ;;  %v7420_v11 = vpack.c.bf16 %v10964_v32, %v10964_v32  ;;  %10969 = vpow2.f32 %v6833_v42  ;;  %v5882_v62 = vunpack.c.l.bf16 %v5370_v34  ;;  %v9330_v22 = vpop.f32.mrf.mxu1 }
 0xce5   :  { %v13798_v38 = vpop.permute.xlu2 %3148  ;;  %v8575_v47 = vunpack.c.l.b16 %v7422_v6  ;;  %v9316_v19 = vadd.f32 %v13796_v13, %v9303_v58  ;;  %v4827_v35 = vmul.f32 -20000.0, %v4315_v54  ;;  %v61_v42 = vadd.s32 3840, %v14153_v17 }
 0xce6   :  { %v3082_v57 = vpop.permute.xlu1 %3081  ;;  %v8828_v9 = vpack.c.b16 %v8559_v53, %v8558_v16  ;;  %v8573_v2 = vunpack.c.l.b16 %v7420_v11  ;;  %v6891_v16 = vmul.f32 1.442695, %v5882_v62  ;;  %v9343_v15 = vpop.f32.mrf.mxu2 }
 0xce7   :  { %v3806_v56 = vsub.f32 %v3082_v57, %v11262_v52  ;;  %v5867_v57 = vunpack.c.l.bf16 %v5355_v37  ;;  %vm94_vm10 = vcmp.ge.s32.totalorder %v61_v42, %v12326_v48  ;;  %vm127_vm12 = vcmp.lt.s32.totalorder %v61_v42, %v12330_v30 }
 0xce8   :  { %v10966_v31 = vpop.eup %10965  ;;  %9493 = vmatpush.bf16.msrb.mxu2 %v8828_v9  ;;  %v9329_v9 = vadd.f32 %v9328_v5, %v9316_v19  ;;  %vm159_vm14 = vmand %vm94_vm10, %vm127_vm12 }
 0xce9   :  { %v10968_v40 = vpop.eup %10967  ;;  %v4318_v45 = vmul.f32 %v3806_v56, %v3806_v56  ;;  %v7419_v36 = vpack.c.bf16 %v10966_v31, %v10966_v31  ;;  %v9356_v11 = vpop.f32.mrf.mxu3 }
 0xcea   :  { %v7421_v51 = vpack.c.bf16 %v10968_v40, %v10968_v40  ;;  %v10970_v32 = vpop.eup %10969  ;;  %v9342_v31 = vadd.f32 %v9341_v33, %v9329_v9  ;;  %v9369_v55 = vpop.f32.mrf.mxu0 }
 0xceb   :  { %v4830_v24 = vmul.f32 -20000.0, %v4318_v45  ;;  %v8572_v12 = vunpack.c.l.b16 %v7419_v36  ;;  %v7389_v63 = vpack.c.bf16 %v10970_v32, %v10970_v32  ;;  %v5339_v45 = vpack.c.bf16 %v4827_v35, %v4827_v35 }
 0xcec   :  { %v8574_v0 = vunpack.c.l.b16 %v7421_v51  ;;  %v9355_v51 = vadd.f32 %v9354_v43, %v9342_v31  ;;  %v9380_v49 = vpop.f32.mrf.mxu1 }
 0xced   :  { %v5342_v28 = vpack.c.bf16 %v4830_v24, %v4830_v24  ;;  %v3246_v46 = vpop.permute.xlu2 %3245  ;;  %v8835_v44 = vpack.c.b16 %v8573_v2, %v8572_v12  ;;  %v62_v24 = vadd.s32 3968, %v14153_v17  ;;  %v8542_v2 = vunpack.c.l.b16 %v7389_v63 }
 0xcee   :  { %v8836_v39 = vpack.c.b16 %v8575_v47, %v8574_v0  ;;  %v3833_v25 = vsub.f32 %v3246_v46, %v11262_v52  ;;  %v6861_v47 = vmul.f32 1.442695, %v5867_v57  ;;  %v5851_v12 = vunpack.c.l.bf16 %v5339_v45  ;;  %v9393_v1 = vpop.f32.mrf.mxu2 }
 0xcef   :  { %v5854_v50 = vunpack.c.l.bf16 %v5342_v28  ;;  %vm95_vm11 = vcmp.ge.s32.totalorder %v62_v24, %v12326_v48  ;;  %v3817_v17 = vsub.f32 %v13798_v38, %v11262_v52  ;;  %vm128_vm13 = vcmp.lt.s32.totalorder %v62_v24, %v12330_v30 }
 0xcf0   :  { %9506 = vmatpush.bf16.msrb.mxu3 %v8836_v39  ;;  %v4345_v8 = vmul.f32 %v3833_v25, %v3833_v25  ;;  %vm160_vm15 = vmand %vm95_vm11, %vm128_vm13  ;;  %v191_v48 = vsel %vm159_vm14, 1.0, %v14166_v59  ;;  %v9368_v34 = vadd.f32 %v13807_v14, %v9355_v51  ;;  %v6829_v38 = vmul.f32 1.442695, %v5851_v12 }
 0xcf1   :  { %v6835_v53 = vmul.f32 1.442695, %v5854_v50  ;;  %v9406_v39 = vpop.f32.mrf.mxu3  ;;  %v192_v25 = vsel %vm160_vm15, 1.0, %v14166_v59  ;;  %v4329_v30 = vmul.f32 %v3817_v17, %v3817_v17 }
 0xcf2   :  { %v4857_v27 = vmul.f32 -20000.0, %v4345_v8 }
 0xcf3   :  { %10971 = vpow2.f32 %v6835_v53  ;;  %v9419_v53 = vpop.f32.mrf.mxu0  ;;  %v4841_v14 = vmul.f32 -20000.0, %v4329_v30 }
 0xcf4   :  { %9507 = vmatpush.bf16.msrb.mxu3 %v8835_v44  ;;  %v5369_v6 = vpack.c.bf16 %v4857_v27, %v4857_v27  ;;  %10973 = vpow2.f32 %v6891_v16  ;;  %v13823_v44 = vpack.c.bf16 %v192_v25, %v191_v48  ;;  %v9382_v8 = vpop.f32.mrf.mxu1  ;;  %v9381_v27 = vadd.f32 %v9380_v49, %v9368_v34 }
 0xcf5   :  { %v5353_v63 = vpack.c.bf16 %v4841_v14, %v4841_v14 }
 0xcf6   :  { %v3167_v4 = vpop.permute.xlu1 %3166  ;;  %v5881_v56 = vunpack.c.l.bf16 %v5369_v6  ;;  %v7497_v22 = vunpack.c.h.b16 %v13823_v44  ;;  %v9395_v16 = vpop.f32.mrf.mxu2  ;;  %v9394_v59 = vadd.f32 %v9393_v1, %v9381_v27 }
 0xcf7   :  { %v3820_v23 = vsub.f32 %v3167_v4, %v11262_v52 }
 0xcf8   :  { %v6889_v13 = vmul.f32 1.442695, %v5881_v56  ;;  %v7529_v6 = vpack.c.b16 %v7497_v22, %v7497_v22  ;;  %v9407_v4 = vadd.f32 %v9406_v39, %v9394_v59 }
 0xcf9   :  { %v10972_v40 = vpop.eup %10971  ;;  %v4332_v36 = vmul.f32 %v3820_v23, %v3820_v23  ;;  %v9408_v15 = vpop.f32.mrf.mxu3 }
 0xcfa   :  { %v7390_v21 = vpack.c.bf16 %v10972_v40, %v10972_v40  ;;  %10975 = vpow2.f32 %v6889_v13  ;;  %v10974_v0 = vpop.eup %10973  ;;  %v9420_v11 = vadd.f32 %v9419_v53, %v9407_v4  ;;  %v7496_v53 = vunpack.c.l.b16 %v13823_v44 }
 0xcfb   :  { %v4844_v61 = vmul.f32 -20000.0, %v4332_v36  ;;  %10977 = vpow2.f32 %v6861_v47  ;;  %v7418_v46 = vpack.c.bf16 %v10974_v0, %v10974_v0  ;;  %v9421_v31 = vpop.f32.mrf.mxu0 }
 0xcfc   :  { %v8543_v5 = vunpack.c.l.b16 %v7390_v21  ;;  %v9432_v40 = vpop.f32.mrf.mxu1 }
 0xcfd   :  { %v5356_v41 = vpack.c.bf16 %v4844_v61, %v4844_v61  ;;  %v8571_v43 = vunpack.c.l.b16 %v7418_v46  ;;  %v9433_v13 = vadd.f32 %v9432_v40, %v9420_v11  ;;  %v5865_v61 = vunpack.c.l.bf16 %v5353_v63 }
 0xcfe   :  { %v3070_v20 = vpop.permute.xlu1 %3069  ;;  %v8820_v28 = vpack.c.b16 %v8543_v5, %v8542_v2 }
 0xcff   :  { %v5868_v33 = vunpack.c.l.bf16 %v5356_v41  ;;  %v3804_v29 = vsub.f32 %v3070_v20, %v11262_v52  ;;  %v6857_v1 = vmul.f32 1.442695, %v5865_v61 }
 0xd00   :  { %9480 = vmatpush.bf16.msrb.mxu1 %v8820_v28  ;;  %v10976_v18 = vpop.eup %10975 }
 0xd01   :  { %v6863_v3 = vmul.f32 1.442695, %v5868_v33  ;;  %v4316_v50 = vmul.f32 %v3804_v29, %v3804_v29  ;;  %v7417_v58 = vpack.c.bf16 %v10976_v18, %v10976_v18  ;;  %v10978_v37 = vpop.eup %10977 }
 0xd02   :  { %v7403_v57 = vpack.c.bf16 %v10978_v37, %v10978_v37 }
 0xd03   :  { %10979 = vpow2.f32 %v6863_v3  ;;  %v4828_v54 = vmul.f32 -20000.0, %v4316_v50  ;;  %v8570_v62 = vunpack.c.l.b16 %v7417_v58  ;;  %v7495_v3 = vunpack.c.h.b16 %v13769_v10 }
 0xd04   :  { %10981 = vpow2.f32 %v6829_v38  ;;  %v8556_v45 = vunpack.c.l.b16 %v7403_v57  ;;  %v9434_v46 = vpop.f32.mrf.mxu1 }
 0xd05   :  { %v5340_v19 = vpack.c.bf16 %v4828_v54, %v4828_v54  ;;  %v8834_v32 = vpack.c.b16 %v8571_v43, %v8570_v62  ;;  %v7527_v43 = vpack.c.b16 %v7495_v3, %v7495_v3  ;;  %v7528_v62 = vpack.c.b16 %v7496_v53, %v7496_v53 }
 0xd07   :  { %v5852_v35 = vunpack.c.l.bf16 %v5340_v19  ;;  %9508 = vmatpush.bf16.msrb.mxu3 %v8834_v32 }
 0xd09   :  { %v10980_v9 = vpop.eup %10979  ;;  %v6831_v23 = vmul.f32 1.442695, %v5852_v35 }
 0xd0a   :  { %v7404_v56 = vpack.c.bf16 %v10980_v9, %v10980_v9  ;;  %9509 = vmatmul.bf16.vlgmr.msrb.gmra.mxu3 %v7529_v6  ;;  %v10982_v55 = vpop.eup %10981  ;;  %v9445_v51 = vpop.f32.mrf.mxu2 }
 0xd0b   :  { %10983 = vpow2.f32 %v6831_v23  ;;  %v9446_v42 = vadd.f32 %v9445_v51, %v9433_v13  ;;  %v9458_v24 = vpop.f32.mrf.mxu3  ;;  %v7387_v2 = vpack.c.bf16 %v10982_v55, %v10982_v55 }
 0xd0c   :  { %v8557_v36 = vunpack.c.l.b16 %v7404_v56  ;;  %10985 = vpow2.f32 %v6857_v1 }
 0xd0d   :  { %v9459_v12 = vadd.f32 %v9458_v24, %v9446_v42  ;;  %v8540_v33 = vunpack.c.l.b16 %v7387_v2 }
 0xd0e   :  { %v3155_v21 = vpop.permute.xlu1 %3154  ;;  %v8827_v47 = vpack.c.b16 %v8557_v36, %v8556_v45 }
 0xd0f   :  { %v3818_v49 = vsub.f32 %v3155_v21, %v11262_v52 }
 0xd10   :  { %9494 = vmatpush.bf16.msrb.mxu2 %v8827_v47  ;;  %v9471_v28 = vpop.f32.mrf.mxu0 }
 0xd11   :  { %v10984_v5 = vpop.eup %10983  ;;  %v4330_v0 = vmul.f32 %v3818_v49, %v3818_v49  ;;  %v9472_v17 = vadd.f32 %v9471_v28, %v9459_v12 }
 0xd12   :  { %v7388_v41 = vpack.c.bf16 %v10984_v5, %v10984_v5  ;;  %v9447_v18 = vpop.f32.mrf.mxu2  ;;  %v10986_v34 = vpop.eup %10985 }
 0xd13   :  { %v4842_v20 = vmul.f32 -20000.0, %v4330_v0  ;;  %v9460_v50 = vpop.f32.mrf.mxu3  ;;  %v7401_v38 = vpack.c.bf16 %v10986_v34, %v10986_v34 }
 0xd14   :  { %v8541_v29 = vunpack.c.l.b16 %v7388_v41 }
 0xd15   :  { %v5354_v39 = vpack.c.bf16 %v4842_v20, %v4842_v20  ;;  %v8554_v8 = vunpack.c.l.b16 %v7401_v38 }
 0xd16   :  { %v8819_v48 = vpack.c.b16 %v8541_v29, %v8540_v33 }
 0xd17   :  { %v5866_v52 = vunpack.c.l.bf16 %v5354_v39 }
 0xd18   :  { %9481 = vmatpush.bf16.msrb.mxu1 %v8819_v48  ;;  %v9473_v58 = vpop.f32.mrf.mxu0 }
 0xd19   :  { %v6859_v25 = vmul.f32 1.442695, %v5866_v52 }
 0xd1b   :  { %10987 = vpow2.f32 %v6859_v25 }
 0xd1c   :  { %9482 = vmatpush.bf16.msrb.mxu1 %v8818_v26 }
 0xd1f   :  { %9483 = vmatmul.bf16.vlgmr.msrb.gmra.mxu1 %v7527_v43 }
 0xd21   :  { %v10988_v54 = vpop.eup %10987 }
 0xd22   :  { %v7402_v30 = vpack.c.bf16 %v10988_v54, %v10988_v54 }
 0xd24   :  { %v8555_v37 = vunpack.c.l.b16 %v7402_v30 }
 0xd26   :  { %v8826_v10 = vpack.c.b16 %v8555_v37, %v8554_v8 }
 0xd28   :  { %9495 = vmatpush.bf16.msrb.mxu2 %v8826_v10 }
 0xd2b   :  { %9496 = vmatmul.bf16.vlgmr.msrb.gmra.mxu2 %v7528_v62 }
 0xd8d   :  { %v9510_v27 = vpop.f32.mrf.mxu3 }
 0xd95   :  { %v9512_v22 = vpop.f32.mrf.mxu3 }
 0xd9c   :  { %v9484_v19 = vpop.f32.mrf.mxu1 }
 0xd9d   :  { %v9485_v59 = vadd.f32 %v9484_v19, %v9472_v17 }
 0xda4   :  { %v9486_v16 = vpop.f32.mrf.mxu1 }
 0xdae   :  { %v9497_v7 = vpop.f32.mrf.mxu2 }
 0xdaf   :  { %v9498_v60 = vadd.f32 %v9497_v7, %v9485_v59 }
 0xdb1   :  { %v9511_v26 = vadd.f32 %v9510_v27, %v9498_v60 }
 0xdb3   :  { %v9520_v32 = vmul.f32 0.0025, %v9511_v26 }
 0xdb5   :  { %9521 = vadd.xlane.f32.xlu1 %v9520_v32 }
 0xdb6   :  { %v9499_v35 = vpop.f32.mrf.mxu2 }
 0xe28   :  { %v9522_v14 = vpop.xlane.xlu1 %9521 }
 0xe29   :  { %v9523_v6 = vadd.f32 1e-10, %v9522_v14 }
 0xe2b   :  { %10989 = vrcp.f32 %v9523_v6 }
 0xe31   :  { %v10990_v44 = vpop.eup %10989 }
 0xe32   :  { %v9525_v15 = vmul.f32 %v10990_v44, %v9520_v32 }
 0xe34   :  { %9526 = vst [vmem:[#allocation7] sm:$0xff] %v9525_v15 }
 0xe35   :  { %9537 = dma.vmem_to_hbm [thread:$0]  %s9533_s11, 128, %s9535_s14, [#allocation6]  }
 0xe36   :  { %11045 = dma.done.wait [#allocation6], 128  }
 0xe37   :  { %11046 = vsyncadd [#allocation6], 4294967168 }
 0xe38   :  { %9542 = vsyncpa [#allocation5], 1 }
 0xe39   :  { %9543 = vsyncpa [#allocation6], 1 }

</bundles_post_ra>
